<compile_context>
chip_gen: v7x
topology: tpu7x:2x2x1
jax: 0.10.0
libtpu: 0.0.40
codegen_flags: <defaults>
</compile_context>

<pallas_src>
import functools

import jax
import jax.numpy as jnp
from jax import lax
from jax.experimental import pallas as pl
from jax.experimental.pallas import tpu as pltpu


# ------------------------------ fused forward kernel ------------------------------
def _fused_kernel(z_ref, w1_ref, b1_ref, w2_ref, b2_ref, w3_ref, b3_ref,
                  c1_ref, d1_ref, c2_ref, d2_ref, o_ref):
    f32 = jnp.float32
    z = z_ref[...]                                                         # (Bt, 1000)
    s = jnp.dot(z, w1_ref[...], preferred_element_type=f32) + b1_ref[...]
    s = jnp.maximum(s, 0.0)                                                # lin1+relu (Bt, 100)
    h = jnp.dot(s, w2_ref[...], preferred_element_type=f32) + b2_ref[...]
    h = jnp.maximum(h, 0.0)                                                # lin2+relu (Bt, 280)
    x = jnp.dot(h, w3_ref[...], preferred_element_type=f32) + b3_ref[...]  # lin3     (Bt, 784)
    y = jnp.dot(x, c1_ref[...], preferred_element_type=f32) + d1_ref[...]
    y = jnp.maximum(y, 0.0)                                                # conv1+relu (Bt, 784)
    o = jnp.dot(y, c2_ref[...], preferred_element_type=f32) + d2_ref[...]  # conv2    (Bt, 784)
    o_ref[...] = o.astype(o_ref.dtype)


# ------------------------- weight packing (one-time, glue) ------------------------
def _conv_toeplitz(k, H, W):
    """(H*W, H*W) matrix M with  (img.flat @ M) == conv2d_same(img, k).flat  (zero pad)."""
    kh, kw = k.shape
    ph, pw = kh // 2, kw // 2
    a = jnp.arange(H)
    di = a[:, None] - a[None, :] + ph                 # (H, H): input row a, output row m
    vi = (di >= 0) & (di < kh)
    b = jnp.arange(W)
    dj = b[:, None] - b[None, :] + pw                 # (W, W): input col b, output col n
    vj = (dj >= 0) & (dj < kw)
    dic = jnp.clip(di, 0, kh - 1)
    djc = jnp.clip(dj, 0, kw - 1)
    c4 = k[dic[:, :, None, None], djc[None, None, :, :]]          # (a, m, b, n)
    c4 = jnp.where(vi[:, :, None, None] & vj[None, None, :, :], c4, 0.0)
    return c4.transpose(0, 2, 1, 3).reshape(H * W, H * W)         # rows a*W+b, cols m*W+n


def prepare_params(p, input_shape=(10, 10, 10), output_shape=(1, 28, 28)):
    """Fold the module's raw reshapes and 'same' padding into packed weight matrices."""
    i0, i1, i2 = input_shape
    o0, o1, o2 = output_shape
    assert o0 == 1, "conv stage packed for single-channel output (output_shape[0] == 1)"
    f32 = jnp.float32
    eye = lambda n: jnp.eye(n, dtype=f32)

    # lin1 over rows of i0: block-diagonal (i1*i2*i0, i1*i2*o0)
    n1 = i1 * i2
    w1blk = jnp.kron(eye(n1), p["w1_t"].astype(f32))
    b1row = jnp.tile(p["b1"].astype(f32), n1)[None, :]
    # lin2 over rows of i1 (after raw reshape): block-diagonal (o0*i2*i1, o0*i2*o1)
    n2 = o0 * i2
    w2blk = jnp.kron(eye(n2), p["w2_t"].astype(f32))
    b2row = jnp.tile(p["b2"].astype(f32), n2)[None, :]
    # lin3 over rows of i2 taken from the flattened lin2 output: banded (o0*i2*o1, o0*o1*o2)
    L2, n3 = o0 * i2 * o1, o0 * o1
    q = jnp.arange(L2)[:, None]
    m = jnp.arange(n3)[None, :]
    t = q - i2 * m
    valid = (t >= 0) & (t < i2)
    w3_t = p["w3_t"].astype(f32)
    w3blk = jnp.where(valid[:, :, None], w3_t[jnp.clip(t, 0, i2 - 1)], 0.0).reshape(L2, n3 * o2)
    b3row = jnp.tile(p["b3"].astype(f32), n3)[None, :]
    # convolutions as full Toeplitz matmuls on the flattened (o1, o2) image
    c1 = _conv_toeplitz(p["cw1"].astype(f32), o1, o2)
    d1 = jnp.full((1, o1 * o2), p["cb1"][0], f32)
    c2 = _conv_toeplitz(p["cw2"].astype(f32), o1, o2)
    d2 = jnp.full((1, o1 * o2), p["cb2"][0], f32)
    return dict(w1blk=w1blk, b1row=b1row, w2blk=w2blk, b2row=b2row,
                w3blk=w3blk, b3row=b3row, c1=c1, d1=d1, c2=c2, d2=d2)


# --------------------------------- forward pass -----------------------------------
def simple_generator_forward(z, prep, input_shape=(10, 10, 10),
                             output_shape=(1, 28, 28), b_tile=16):
    B = z.shape[0]
    i0, i1, i2 = input_shape
    o0, o1, o2 = output_shape
    n_in = i0 * i1 * i2
    n_out = o0 * o1 * o2

    zrow = z.reshape(B, n_in).astype(jnp.float32)          # pure view: row-major flatten
    bt = min(B, b_tile)
    Bp = ((B + bt - 1) // bt) * bt
    if Bp != B:
        zrow = jnp.pad(zrow, ((0, Bp - B), (0, 0)))

    weight_order = ("w1blk", "b1row", "w2blk", "b2row", "w3blk", "b3row",
                    "c1", "d1", "c2", "d2")
    const_map = lambda i: (0, 0)
    in_specs = [pl.BlockSpec((bt, n_in), lambda i: (i, 0))]
    in_specs += [pl.BlockSpec(prep[k].shape, const_map) for k in weight_order]

    mm = (prep["w1blk"], prep["w2blk"], prep["w3blk"], prep["c1"], prep["c2"])
    flops = 2 * Bp * sum(w.shape[0] * w.shape[1] for w in mm)
    bytes_accessed = 4 * (sum(int(v.size) for v in prep.values()) + Bp * (n_in + n_out))

    out = pl.pallas_call(
        _fused_kernel,
        out_shape=jax.ShapeDtypeStruct((Bp, n_out), jnp.float32),
        grid=(Bp // bt,),
        in_specs=in_specs,
        out_specs=pl.BlockSpec((bt, n_out), lambda i: (i, 0)),
        compiler_params=pltpu.CompilerParams(
            dimension_semantics=("parallel",),            # shards batch over v7x's 2 TCs
            vmem_limit_bytes=48 * 1024 * 1024),
        cost_estimate=pl.CostEstimate(flops=int(flops), transcendentals=0,
                                      bytes_accessed=int(bytes_accessed)),
    )(zrow, *[prep[k] for k in weight_order])

    return out[:B].reshape(B, o0, o1, o2)


# -------------------------------- parameter init ----------------------------------
def init_params(key, input_shape=(10, 10, 10), output_shape=(1, 28, 28)):
    """Deterministic PyTorch-style U(-1/sqrt(fan_in), 1/sqrt(fan_in)) init."""
    i0, i1, i2 = input_shape
    o0, o1, o2 = output_shape

    def uni(k, shape, fan_in):
        bound = 1.0 / float(fan_in) ** 0.5
        return jax.random.uniform(k, shape, jnp.float32, -bound, bound)

    ks = jax.random.split(key, 10)
    return {
        # Linear weights stored pre-transposed: (in_features, out_features).
        "w1_t": uni(ks[0], (i0, o0), i0), "b1": uni(ks[1], (o0,), i0),
        "w2_t": uni(ks[2], (i1, o1), i1), "b2": uni(ks[3], (o1,), i1),
        "w3_t": uni(ks[4], (i2, o2), i2), "b3": uni(ks[5], (o2,), i2),
        # Conv weights: in/out channels are 1, keep just (kh, kw).
        "cw1": uni(ks[6], (5, 5), o0 * 25), "cb1": uni(ks[7], (1,), o0 * 25),
        "cw2": uni(ks[8], (3, 3), o0 * 9),  "cb2": uni(ks[9], (1,), o0 * 9),
    }


# ------------------------------ pure-JAX reference ---------------------------------
def reference_forward(z, p, input_shape=(10, 10, 10), output_shape=(1, 28, 28)):
    B = z.shape[0]
    i0, i1, i2 = input_shape
    o0, o1, o2 = output_shape
    x = jnp.maximum(z @ p["w1_t"] + p["b1"], 0.0)
    x = x.reshape(B, o0, i2, i1)
    x = jnp.maximum(x @ p["w2_t"] + p["b2"], 0.0)
    x = x.reshape(B, o0, o1, i2)
    x = x @ p["w3_t"] + p["b3"]
    x = x.reshape(B, o0, o1, o2)
    dn = ("NCHW", "OIHW", "NCHW")
    k1, k2 = p["cw1"], p["cw2"]
    x = lax.conv_general_dilated(x, k1.reshape(1, 1, *k1.shape), (1, 1),
                                 ((k1.shape[0] // 2,) * 2, (k1.shape[1] // 2,) * 2),
                                 dimension_numbers=dn) + p["cb1"][0]
    x = jnp.maximum(x, 0.0)
    x = lax.conv_general_dilated(x, k2.reshape(1, 1, *k2.shape), (1, 1),
                                 ((k2.shape[0] // 2,) * 2, (k2.shape[1] // 2,) * 2),
                                 dimension_numbers=dn) + p["cb2"][0]
    return x


if __name__ == "__main__":
    key = jax.random.PRNGKey(0)
    k_z, k_p = jax.random.split(key)

    B = 2
    input_shape = (10, 10, 10)
    output_shape = (1, 28, 28)

    # z laid out (B, i2, i1, i0) = (2, 10, 10, 10); last dim feeds lin1.
    z = jax.random.normal(k_z, (B, input_shape[2], input_shape[1], input_shape[0]),
                          dtype=jnp.float32)
    params = init_params(k_p, input_shape, output_shape)
    prep = prepare_params(params, input_shape, output_shape)   # one-time weight packing

    fwd = jax.jit(functools.partial(simple_generator_forward,
                                    input_shape=input_shape, output_shape=output_shape))
    out = jax.block_until_ready(fwd(z, prep))

    ref = reference_forward(z, params, input_shape, output_shape)
    assert out.shape == (B,) + output_shape
    err = float(jnp.max(jnp.abs(out - ref)))
    assert err < 1e-3, f"mismatch vs JAX reference: max|diff|={err}"

    print("KERNEL_OK")
</pallas_src>

<mosaic_0001>
module attributes {stable_mosaic.version = 11 : i64} {
  func.func @_fused_kernel(%arg0: i32, %arg1: memref<2x1000xf32, #tpu.memory_space<vmem>>, %arg2: memref<1000x100xf32, #tpu.memory_space<vmem>>, %arg3: memref<1x100xf32, #tpu.memory_space<vmem>>, %arg4: memref<100x280xf32, #tpu.memory_space<vmem>>, %arg5: memref<1x280xf32, #tpu.memory_space<vmem>>, %arg6: memref<280x784xf32, #tpu.memory_space<vmem>>, %arg7: memref<1x784xf32, #tpu.memory_space<vmem>>, %arg8: memref<784x784xf32, #tpu.memory_space<vmem>>, %arg9: memref<1x784xf32, #tpu.memory_space<vmem>>, %arg10: memref<784x784xf32, #tpu.memory_space<vmem>>, %arg11: memref<1x784xf32, #tpu.memory_space<vmem>>, %arg12: memref<2x784xf32, #tpu.memory_space<vmem>>) attributes {dimension_semantics = [#tpu.dimension_semantics<parallel>], iteration_bounds = array<i64: 1>, scalar_prefetch = 0 : i64, scratch_operands = 0 : i64, tpu.core_type = #tpu.core_type<tc>, window_params = [{transform_indices = @transform_0, window_bounds = array<i64: 2, 1000>}, {pipeline_mode = #tpu.pipeline_mode<synchronous>, transform_indices = @transform_1, window_bounds = array<i64: 1000, 100>}, {pipeline_mode = #tpu.pipeline_mode<synchronous>, transform_indices = @transform_2, window_bounds = array<i64: 1, 100>}, {pipeline_mode = #tpu.pipeline_mode<synchronous>, transform_indices = @transform_3, window_bounds = array<i64: 100, 280>}, {pipeline_mode = #tpu.pipeline_mode<synchronous>, transform_indices = @transform_4, window_bounds = array<i64: 1, 280>}, {pipeline_mode = #tpu.pipeline_mode<synchronous>, transform_indices = @transform_5, window_bounds = array<i64: 280, 784>}, {pipeline_mode = #tpu.pipeline_mode<synchronous>, transform_indices = @transform_6, window_bounds = array<i64: 1, 784>}, {pipeline_mode = #tpu.pipeline_mode<synchronous>, transform_indices = @transform_7, window_bounds = array<i64: 784, 784>}, {pipeline_mode = #tpu.pipeline_mode<synchronous>, transform_indices = @transform_8, window_bounds = array<i64: 1, 784>}, {pipeline_mode = #tpu.pipeline_mode<synchronous>, transform_indices = @transform_9, window_bounds = array<i64: 784, 784>}, {pipeline_mode = #tpu.pipeline_mode<synchronous>, transform_indices = @transform_10, window_bounds = array<i64: 1, 784>}, {transform_indices = @transform_11, window_bounds = array<i64: 2, 784>}]} {
    %c0 = arith.constant 0 : index
    %c0_0 = arith.constant 0 : index
    %0 = vector.load %arg1[%c0, %c0_0] : memref<2x1000xf32, #tpu.memory_space<vmem>>, vector<2x1000xf32>
    %c0_1 = arith.constant 0 : index
    %c0_2 = arith.constant 0 : index
    %1 = vector.load %arg2[%c0_1, %c0_2] : memref<1000x100xf32, #tpu.memory_space<vmem>>, vector<1000x100xf32>
    %cst = arith.constant dense<0.000000e+00> : vector<2x100xf32>
    %2 = tpu.matmul %0, %1, %cst {dimension_numbers = #tpu.dot_dimension_numbers<[1], [0], [0], [1], [0, 0, 1, 1], [], []>} : vector<2x1000xf32>, vector<1000x100xf32>, vector<2x100xf32> -> vector<2x100xf32>
    %c0_3 = arith.constant 0 : index
    %c0_4 = arith.constant 0 : index
    %3 = vector.load %arg3[%c0_3, %c0_4] : memref<1x100xf32, #tpu.memory_space<vmem>>, vector<1x100xf32>
    %4 = vector.broadcast %3 : vector<1x100xf32> to vector<2x100xf32>
    %5 = arith.addf %2, %4 : vector<2x100xf32>
    %cst_5 = arith.constant 0.000000e+00 : f32
    %6 = vector.broadcast %cst_5 : f32 to vector<2x100xf32>
    %7 = arith.maximumf %5, %6 : vector<2x100xf32>
    %c0_6 = arith.constant 0 : index
    %c0_7 = arith.constant 0 : index
    %8 = vector.load %arg4[%c0_6, %c0_7] : memref<100x280xf32, #tpu.memory_space<vmem>>, vector<100x280xf32>
    %cst_8 = arith.constant dense<0.000000e+00> : vector<2x280xf32>
    %9 = tpu.matmul %7, %8, %cst_8 {dimension_numbers = #tpu.dot_dimension_numbers<[1], [0], [0], [1], [0, 0, 1, 1], [], []>} : vector<2x100xf32>, vector<100x280xf32>, vector<2x280xf32> -> vector<2x280xf32>
    %c0_9 = arith.constant 0 : index
    %c0_10 = arith.constant 0 : index
    %10 = vector.load %arg5[%c0_9, %c0_10] : memref<1x280xf32, #tpu.memory_space<vmem>>, vector<1x280xf32>
    %11 = vector.broadcast %10 : vector<1x280xf32> to vector<2x280xf32>
    %12 = arith.addf %9, %11 : vector<2x280xf32>
    %cst_11 = arith.constant 0.000000e+00 : f32
    %13 = vector.broadcast %cst_11 : f32 to vector<2x280xf32>
    %14 = arith.maximumf %12, %13 : vector<2x280xf32>
    %c0_12 = arith.constant 0 : index
    %c0_13 = arith.constant 0 : index
    %15 = vector.load %arg6[%c0_12, %c0_13] : memref<280x784xf32, #tpu.memory_space<vmem>>, vector<280x784xf32>
    %cst_14 = arith.constant dense<0.000000e+00> : vector<2x784xf32>
    %16 = tpu.matmul %14, %15, %cst_14 {dimension_numbers = #tpu.dot_dimension_numbers<[1], [0], [0], [1], [0, 0, 1, 1], [], []>} : vector<2x280xf32>, vector<280x784xf32>, vector<2x784xf32> -> vector<2x784xf32>
    %c0_15 = arith.constant 0 : index
    %c0_16 = arith.constant 0 : index
    %17 = vector.load %arg7[%c0_15, %c0_16] : memref<1x784xf32, #tpu.memory_space<vmem>>, vector<1x784xf32>
    %18 = vector.broadcast %17 : vector<1x784xf32> to vector<2x784xf32>
    %19 = arith.addf %16, %18 : vector<2x784xf32>
    %c0_17 = arith.constant 0 : index
    %c0_18 = arith.constant 0 : index
    %20 = vector.load %arg8[%c0_17, %c0_18] : memref<784x784xf32, #tpu.memory_space<vmem>>, vector<784x784xf32>
    %cst_19 = arith.constant dense<0.000000e+00> : vector<2x784xf32>
    %21 = tpu.matmul %19, %20, %cst_19 {dimension_numbers = #tpu.dot_dimension_numbers<[1], [0], [0], [1], [0, 0, 1, 1], [], []>} : vector<2x784xf32>, vector<784x784xf32>, vector<2x784xf32> -> vector<2x784xf32>
    %c0_20 = arith.constant 0 : index
    %c0_21 = arith.constant 0 : index
    %22 = vector.load %arg9[%c0_20, %c0_21] : memref<1x784xf32, #tpu.memory_space<vmem>>, vector<1x784xf32>
    %23 = vector.broadcast %22 : vector<1x784xf32> to vector<2x784xf32>
    %24 = arith.addf %21, %23 : vector<2x784xf32>
    %cst_22 = arith.constant 0.000000e+00 : f32
    %25 = vector.broadcast %cst_22 : f32 to vector<2x784xf32>
    %26 = arith.maximumf %24, %25 : vector<2x784xf32>
    %c0_23 = arith.constant 0 : index
    %c0_24 = arith.constant 0 : index
    %27 = vector.load %arg10[%c0_23, %c0_24] : memref<784x784xf32, #tpu.memory_space<vmem>>, vector<784x784xf32>
    %cst_25 = arith.constant dense<0.000000e+00> : vector<2x784xf32>
    %28 = tpu.matmul %26, %27, %cst_25 {dimension_numbers = #tpu.dot_dimension_numbers<[1], [0], [0], [1], [0, 0, 1, 1], [], []>} : vector<2x784xf32>, vector<784x784xf32>, vector<2x784xf32> -> vector<2x784xf32>
    %c0_26 = arith.constant 0 : index
    %c0_27 = arith.constant 0 : index
    %29 = vector.load %arg11[%c0_26, %c0_27] : memref<1x784xf32, #tpu.memory_space<vmem>>, vector<1x784xf32>
    %30 = vector.broadcast %29 : vector<1x784xf32> to vector<2x784xf32>
    %31 = arith.addf %28, %30 : vector<2x784xf32>
    %c0_28 = arith.constant 0 : index
    %c0_29 = arith.constant 0 : index
    %32 = vector.load %arg12[%c0_28, %c0_29] : memref<2x784xf32, #tpu.memory_space<vmem>>, vector<2x784xf32>
    tpu.vector_store %arg12[%c0_28, %c0_29], %31 {strides = array<i32>} : memref<2x784xf32, #tpu.memory_space<vmem>>, vector<2x784xf32>,
    return
  }
  func.func @transform_0(%arg0: i32) -> (i32, i32) {
    %c0_i32 = arith.constant 0 : i32
    %c0_i32_0 = arith.constant 0 : i32
    return %arg0, %c0_i32 : i32, i32
  }
  func.func @transform_1(%arg0: i32) -> (i32, i32) {
    %c0_i32 = arith.constant 0 : i32
    %c0_i32_0 = arith.constant 0 : i32
    %c0_i32_1 = arith.constant 0 : i32
    return %c0_i32, %c0_i32_0 : i32, i32
  }
  func.func @transform_2(%arg0: i32) -> (i32, i32) {
    %c0_i32 = arith.constant 0 : i32
    %c0_i32_0 = arith.constant 0 : i32
    %c0_i32_1 = arith.constant 0 : i32
    return %c0_i32, %c0_i32_0 : i32, i32
  }
  func.func @transform_3(%arg0: i32) -> (i32, i32) {
    %c0_i32 = arith.constant 0 : i32
    %c0_i32_0 = arith.constant 0 : i32
    %c0_i32_1 = arith.constant 0 : i32
    return %c0_i32, %c0_i32_0 : i32, i32
  }
  func.func @transform_4(%arg0: i32) -> (i32, i32) {
    %c0_i32 = arith.constant 0 : i32
    %c0_i32_0 = arith.constant 0 : i32
    %c0_i32_1 = arith.constant 0 : i32
    return %c0_i32, %c0_i32_0 : i32, i32
  }
  func.func @transform_5(%arg0: i32) -> (i32, i32) {
    %c0_i32 = arith.constant 0 : i32
    %c0_i32_0 = arith.constant 0 : i32
    %c0_i32_1 = arith.constant 0 : i32
    return %c0_i32, %c0_i32_0 : i32, i32
  }
  func.func @transform_6(%arg0: i32) -> (i32, i32) {
    %c0_i32 = arith.constant 0 : i32
    %c0_i32_0 = arith.constant 0 : i32
    %c0_i32_1 = arith.constant 0 : i32
    return %c0_i32, %c0_i32_0 : i32, i32
  }
  func.func @transform_7(%arg0: i32) -> (i32, i32) {
    %c0_i32 = arith.constant 0 : i32
    %c0_i32_0 = arith.constant 0 : i32
    %c0_i32_1 = arith.constant 0 : i32
    return %c0_i32, %c0_i32_0 : i32, i32
  }
  func.func @transform_8(%arg0: i32) -> (i32, i32) {
    %c0_i32 = arith.constant 0 : i32
    %c0_i32_0 = arith.constant 0 : i32
    %c0_i32_1 = arith.constant 0 : i32
    return %c0_i32, %c0_i32_0 : i32, i32
  }
  func.func @transform_9(%arg0: i32) -> (i32, i32) {
    %c0_i32 = arith.constant 0 : i32
    %c0_i32_0 = arith.constant 0 : i32
    %c0_i32_1 = arith.constant 0 : i32
    return %c0_i32, %c0_i32_0 : i32, i32
  }
  func.func @transform_10(%arg0: i32) -> (i32, i32) {
    %c0_i32 = arith.constant 0 : i32
    %c0_i32_0 = arith.constant 0 : i32
    %c0_i32_1 = arith.constant 0 : i32
    return %c0_i32, %c0_i32_0 : i32, i32
  }
  func.func @transform_11(%arg0: i32) -> (i32, i32) {
    %c0_i32 = arith.constant 0 : i32
    %c0_i32_0 = arith.constant 0 : i32
    return %arg0, %c0_i32 : i32, i32
  }
}

</mosaic_0001>

<bundles_post_ra>
// kernel: simple_generator_forward.1
= control target key start
LH: loop header
LB: loop body
LE: loop exit
PB: predicated region body
PF: predicated region fallthrough
CT: control target
= control target key end

     0   :  { %16 = vsyncpa [#allocation3], 0  ;;  %s8895_s0 = inlined_call_operand.vmem [shape: f32[2,1000], index: 0, kind: input, shape index: {}]   ;;  %s8896_s1 = inlined_call_operand.vmem [shape: f32[1000,100], index: 1, kind: input, shape index: {}]   ;;  %s8897_s2 = inlined_call_operand.hbm [shape: f32[1,100], index: 2, kind: input, shape index: {}]   ;;  %s8898_s3 = inlined_call_operand.vmem [shape: f32[100,280], index: 3, kind: input, shape index: {}]   ;;  %s8899_s4 = inlined_call_operand.hbm [shape: f32[1,280], index: 4, kind: input, shape index: {}]   ;;  %s8900_s5 = inlined_call_operand.hbm [shape: f32[280,784], index: 5, kind: input, shape index: {}]   ;;  %s8901_s6 = inlined_call_operand.hbm [shape: f32[1,784], index: 6, kind: input, shape index: {}]   ;;  %s8902_s7 = inlined_call_operand.hbm [shape: f32[784,784], index: 7, kind: input, shape index: {}]   ;;  %s8903_s8 = inlined_call_operand.hbm [shape: f32[1,784], index: 8, kind: input, shape index: {}]   ;;  %s8904_s9 = inlined_call_operand.hbm [shape: f32[784,784], index: 9, kind: input, shape index: {}]   ;;  %s8905_s10 = inlined_call_operand.hbm [shape: f32[1,784], index: 10, kind: input, shape index: {}]   ;;  %s8906_s11 = inlined_call_operand.vmem [shape: f32[2,784], index: 11, kind: output, shape index: {}]  }
   0x1   :  { %17 = vsyncpa [#allocation5], 0 }
   0x2   :  { %18 = vsyncpa [#allocation8], 0 }
   0x3   :  { %19 = vsyncpa [#allocation11], 0 }
   0x4   :  { %20 = vsyncpa [#allocation14], 0  ;;  %s7948_s17 = smov [#allocation4]   ;;  %s7949_s19 = smov [#allocation7]  }
   0x5   :  { %s43_s18 = sshll.u32 %s7948_s17, 4  ;;  %s65_s20 = sshll.u32 %s7949_s19, 4  ;;  %s44_s18 = int_to_ptr.vmem [resolvable:$true] %s43_s18  ;;  %s66_s20 = int_to_ptr.vmem [resolvable:$true] %s65_s20 }
   0x6   :  { %s7762_s23 = scalar_lea.hbm %s8899_s4, 48 }
   0x7   :  { %p7763_p0 = scmp.ne.s32.totalorder %s8899_s4, %s7762_s23  ;;  %p7766_p1 = scmp.lt.u32.totalorder %s7762_s23, %s8899_s4 }
   0x9   :  { %p7768_p2 = pnand %p7766_p1, %p7763_p0 }
   0xb   :  { %7771 = shalt.err (!%p7768_p2)
}
   0xc   :  { %s7772_s28 = scalar_lea.vmem %s44_s18, 48  ;;  %s7776_s29 = scalar_lea.vmem %s44_s18, 64 }
   0xd   :  { %p7773_p3 = scmp.ne.s32.totalorder %s44_s18, %s7772_s28  ;;  %p7777_p4 = scmp.lt.s32.totalorder %s44_s18, %s44_s18 }
   0xe   :  { %p7778_p5 = scmp.lt.s32.totalorder %s7776_s29, %s7772_s28 }
  0x10   :  { %p7779_p6 = por %p7778_p5, %p7777_p4 }
  0x12   :  { %p7780_p7 = pnand %p7779_p6, %p7773_p3 }
  0x14   :  { %7783 = shalt.err (!%p7780_p7)
}
  0x15   :  { %46 = dma.hbm_to_vmem [thread:$0]  %s8899_s4, 48, %s44_s18, [#allocation5]  }
  0x16   :  { %s7784_s15 = scalar_lea.hbm %s8901_s6, 112 }
  0x17   :  { %p7785_p8 = scmp.ne.s32.totalorder %s8901_s6, %s7784_s15  ;;  %p7788_p9 = scmp.lt.u32.totalorder %s7784_s15, %s8901_s6 }
  0x19   :  { %p7790_p10 = pnand %p7788_p9, %p7785_p8 }
  0x1b   :  { %7793 = shalt.err (!%p7790_p10)
}
  0x1c   :  { %s7794_s22 = scalar_lea.vmem %s66_s20, 112  ;;  %s7798_s23 = scalar_lea.vmem %s66_s20, 128 }
  0x1d   :  { %p7795_p11 = scmp.ne.s32.totalorder %s66_s20, %s7794_s22  ;;  %p7799_p12 = scmp.lt.s32.totalorder %s66_s20, %s66_s20 }
  0x1e   :  { %p7800_p13 = scmp.lt.s32.totalorder %s7798_s23, %s7794_s22 }
  0x20   :  { %p7801_p0 = por %p7800_p13, %p7799_p12 }
  0x22   :  { %p7802_p1 = pnand %p7801_p0, %p7795_p11 }
  0x24   :  { %7805 = shalt.err (!%p7802_p1)
}
  0x25   :  { %68 = dma.hbm_to_vmem [thread:$0]  %s8901_s6, 112, %s66_s20, [#allocation8]  }
  0x26   :  { %s7950_s24 = smov [#allocation10]   ;;  %s7951_s26 = smov [#allocation2]  }
  0x27   :  { %s87_s25 = sshll.u32 %s7950_s24, 4  ;;  %s31_s27 = sshll.u32 %s7951_s26, 4  ;;  %s88_s25 = int_to_ptr.vmem [resolvable:$true] %s87_s25  ;;  %s32_s27 = int_to_ptr.vmem [resolvable:$true] %s31_s27 }
  0x28   :  { %s7806_s30 = scalar_lea.hbm %s8903_s8, 112 }
  0x29   :  { %p7807_p2 = scmp.ne.s32.totalorder %s8903_s8, %s7806_s30  ;;  %p7810_p3 = scmp.lt.u32.totalorder %s7806_s30, %s8903_s8 }
  0x2b   :  { %p7812_p4 = pnand %p7810_p3, %p7807_p2 }
  0x2d   :  { %7815 = shalt.err (!%p7812_p4)
}
  0x2e   :  { %s7816_s6 = scalar_lea.vmem %s88_s25, 112  ;;  %s7820_s20 = scalar_lea.vmem %s88_s25, 128 }
  0x2f   :  { %p7817_p5 = scmp.ne.s32.totalorder %s88_s25, %s7816_s6  ;;  %p7821_p6 = scmp.lt.s32.totalorder %s88_s25, %s88_s25 }
  0x30   :  { %p7822_p7 = scmp.lt.s32.totalorder %s7820_s20, %s7816_s6 }
  0x32   :  { %p7823_p8 = por %p7822_p7, %p7821_p6 }
  0x34   :  { %p7824_p9 = pnand %p7823_p8, %p7817_p5 }
  0x36   :  { %7827 = shalt.err (!%p7824_p9)
}
  0x37   :  { %90 = dma.hbm_to_vmem [thread:$0]  %s8903_s8, 112, %s88_s25, [#allocation11]  }
  0x38   :  { %s7828_s22 = scalar_lea.hbm %s8897_s2, 16 }
  0x39   :  { %p7829_p10 = scmp.ne.s32.totalorder %s8897_s2, %s7828_s22  ;;  %p7832_p11 = scmp.lt.u32.totalorder %s7828_s22, %s8897_s2 }
  0x3b   :  { %p7834_p12 = pnand %p7832_p11, %p7829_p10 }
  0x3d   :  { %7837 = shalt.err (!%p7834_p12)
}
  0x3e   :  { %s7838_s26 = scalar_lea.vmem %s32_s27, 16  ;;  %s7842_s28 = scalar_lea.vmem %s32_s27, 32 }
  0x3f   :  { %p7839_p13 = scmp.ne.s32.totalorder %s32_s27, %s7838_s26  ;;  %p7843_p0 = scmp.lt.s32.totalorder %s32_s27, %s32_s27 }
  0x40   :  { %p7844_p1 = scmp.lt.s32.totalorder %s7842_s28, %s7838_s26 }
  0x42   :  { %p7845_p2 = por %p7844_p1, %p7843_p0 }
  0x44   :  { %p7846_p3 = pnand %p7845_p2, %p7839_p13 }
  0x46   :  { %7849 = shalt.err (!%p7846_p3)
}
  0x47   :  { %34 = dma.hbm_to_vmem [thread:$0]  %s8897_s2, 16, %s32_s27, [#allocation3]  }
  0x48   :  { %s7952_s29 = smov [#allocation6]   ;;  %s7850_s14 = scalar_lea.hbm %s8900_s5, 31360 }
  0x49   :  { %s52_s30 = sshll.u32 %s7952_s29, 4  ;;  %p7851_p4 = scmp.ne.s32.totalorder %s8900_s5, %s7850_s14  ;;  %s53_s30 = int_to_ptr.vmem [resolvable:$true] %s52_s30 }
  0x4a   :  { %p7854_p5 = scmp.lt.u32.totalorder %s7850_s14, %s8900_s5 }
  0x4c   :  { %p7856_p6 = pnand %p7854_p5, %p7851_p4 }
  0x4e   :  { %7859 = shalt.err (!%p7856_p6)
}
  0x4f   :  { %s7860_s17 = scalar_lea.vmem %s53_s30, 31360  ;;  %p7865_p8 = scmp.lt.s32.totalorder %s53_s30, %s53_s30 }
  0x50   :  { %p7861_p7 = scmp.ne.s32.totalorder %s53_s30, %s7860_s17  ;;  %p7866_p9 = scmp.lt.s32.totalorder %s7860_s17, %s7860_s17 }
  0x52   :  { %p7867_p10 = por %p7866_p9, %p7865_p8 }
  0x54   :  { %p7868_p11 = pnand %p7867_p10, %p7861_p7 }
  0x56   :  { %7871 = shalt.err (!%p7868_p11)
}
  0x57   :  { %s7953_s2 = smov 896   ;;  %s7954_s27 = smov 56  }
  0x58   :  { %58 = dma.hbm_to_vmem [thread:$0]  %s8900_s5, 31360, %s53_s30, [#allocation5], %s7953_s2, %s7953_s2, %s7954_s27  }
  0x59   :  { %s7955_s22 = smov [#allocation9]   ;;  %s7956_s4 = smov [#allocation12]  }
  0x5a   :  { %s74_s23 = sshll.u32 %s7955_s22, 4  ;;  %s96_s18 = sshll.u32 %s7956_s4, 4  ;;  %s75_s23 = int_to_ptr.vmem [resolvable:$true] %s74_s23  ;;  %s97_s18 = int_to_ptr.vmem [resolvable:$true] %s96_s18 }
  0x5b   :  { %s7872_s28 = scalar_lea.hbm %s8902_s7, 87808 }
  0x5c   :  { %p7873_p12 = scmp.ne.s32.totalorder %s8902_s7, %s7872_s28  ;;  %p7876_p13 = scmp.lt.u32.totalorder %s7872_s28, %s8902_s7 }
  0x5e   :  { %p7878_p0 = pnand %p7876_p13, %p7873_p12 }
  0x60   :  { %7881 = shalt.err (!%p7878_p0)
}
  0x61   :  { %s7882_s5 = scalar_lea.vmem %s75_s23, 87808  ;;  %p7887_p2 = scmp.lt.s32.totalorder %s75_s23, %s75_s23 }
  0x62   :  { %p7883_p1 = scmp.ne.s32.totalorder %s75_s23, %s7882_s5  ;;  %p7888_p3 = scmp.lt.s32.totalorder %s7882_s5, %s7882_s5 }
  0x64   :  { %p7889_p4 = por %p7888_p3, %p7887_p2 }
  0x66   :  { %p7890_p5 = pnand %p7889_p4, %p7883_p1 }
  0x68   :  { %7893 = shalt.err (!%p7890_p5)
}
  0x69   :  { %80 = dma.hbm_to_vmem [thread:$0]  %s8902_s7, 87808, %s75_s23, [#allocation8], %s7953_s2, %s7953_s2, %s7954_s27  }
  0x6a   :  { %s7894_s6 = scalar_lea.hbm %s8904_s9, 87808 }
  0x6b   :  { %p7895_p6 = scmp.ne.s32.totalorder %s8904_s9, %s7894_s6  ;;  %p7898_p7 = scmp.lt.u32.totalorder %s7894_s6, %s8904_s9 }
  0x6d   :  { %p7900_p8 = pnand %p7898_p7, %p7895_p6 }
  0x6f   :  { %7903 = shalt.err (!%p7900_p8)
}
  0x70   :  { %s7904_s21 = scalar_lea.vmem %s97_s18, 87808  ;;  %p7909_p10 = scmp.lt.s32.totalorder %s97_s18, %s97_s18 }
  0x71   :  { %p7905_p9 = scmp.ne.s32.totalorder %s97_s18, %s7904_s21  ;;  %p7910_p11 = scmp.lt.s32.totalorder %s7904_s21, %s7904_s21 }
  0x73   :  { %p7911_p12 = por %p7910_p11, %p7909_p10 }
  0x75   :  { %p7912_p13 = pnand %p7911_p12, %p7905_p9 }
  0x77   :  { %7915 = shalt.err (!%p7912_p13)
}
  0x78   :  { %102 = dma.hbm_to_vmem [thread:$0]  %s8904_s9, 87808, %s97_s18, [#allocation11], %s7953_s2, %s7953_s2, %s7954_s27  }
  0x79   :  { %s7957_s23 = smov [#allocation13]   ;;  %s7916_s28 = scalar_lea.hbm %s8905_s10, 112 }
  0x7a   :  { %s109_s4 = sshll.u32 %s7957_s23, 4  ;;  %p7917_p0 = scmp.ne.s32.totalorder %s8905_s10, %s7916_s28  ;;  %s110_s4 = int_to_ptr.vmem [resolvable:$true] %s109_s4 }
  0x7b   :  { %p7920_p1 = scmp.lt.u32.totalorder %s7916_s28, %s8905_s10 }
  0x7d   :  { %p7922_p2 = pnand %p7920_p1, %p7917_p0 }
  0x7f   :  { %7925 = shalt.err (!%p7922_p2)
}
  0x80   :  { %s7926_s5 = scalar_lea.vmem %s110_s4, 112  ;;  %s7930_s9 = scalar_lea.vmem %s110_s4, 128 }
  0x81   :  { %p7927_p3 = scmp.ne.s32.totalorder %s110_s4, %s7926_s5  ;;  %p7931_p4 = scmp.lt.s32.totalorder %s110_s4, %s110_s4 }
  0x82   :  { %p7932_p5 = scmp.lt.s32.totalorder %s7930_s9, %s7926_s5 }
  0x84   :  { %p7933_p6 = por %p7932_p5, %p7931_p4 }
  0x86   :  { %p7934_p7 = pnand %p7933_p6, %p7927_p3 }
  0x88   :  { %7937 = shalt.err (!%p7934_p7)
}
  0x89   :  { %112 = dma.hbm_to_vmem [thread:$0]  %s8905_s10, 112, %s110_s4, [#allocation14]  }
  0x8a   :  { %7938 = dma.done.wait [#allocation3], 16  }
  0x8b   :  { %7939 = vsyncadd [#allocation3], 4294967280 }
  0x8c   :  { %7940 = dma.done.wait [#allocation5], 31408  }
  0x8d   :  { %7941 = vsyncadd [#allocation5], 4294935888 }
  0x8e   :  { %7942 = dma.done.wait [#allocation8], 87920  }
  0x8f   :  { %7943 = vsyncadd [#allocation8], 4294879376 }
  0x90   :  { %7944 = dma.done.wait [#allocation11], 87920  }
  0x91   :  { %7945 = vsyncadd [#allocation11], 4294879376 }
  0x92   :  { %7946 = dma.done.wait [#allocation14], 112  }
  0x93   :  { %7947 = vsyncadd [#allocation14], 4294967184  ;;  %v155_v0 = vld [vmem:[%s8896_s1 + $0x80] sm:$0xff]  ;;  %v156_v1 = vld [vmem:[%s8896_s1 + $0x88] sm:$0xff]  ;;  %v7958_v47 = vmov 1983009808   ;;  %v277_v49 = vlaneseq }
  0x94   :  { %v187_v2 = vld [vmem:[%s8896_s1 + $0x180] sm:$0xff]  ;;  %v5891_v3 = vpack.c.bf16 %v156_v1, %v155_v0  ;;  %v188_v4 = vld [vmem:[%s8896_s1 + $0x188] sm:$0xff]  ;;  %v157_v11 = vld [vmem:[%s8896_s1 + $0x90] sm:$0xff]  ;;  %v275_v48 = vunpack.c.l.s4 %v7958_v47  ;;  %vm314_vm0 = vcmask 850944   ;;  %vm658_vm1 = vcmask 1043456  }
  0x95   :  { %v139_v5 = vld [vmem:[%s8896_s1] sm:$0xff]  ;;  %v140_v6 = vld [vmem:[%s8896_s1 + $0x8] sm:$0xff]  ;;  %v5923_v7 = vpack.c.bf16 %v188_v4, %v187_v2  ;;  %v158_v13 = vld [vmem:[%s8896_s1 + $0x98] sm:$0xff]  ;;  %v8253_v0 = vshrl.u32 %v277_v49, 7  ;;  %vm654_vm2 = vcmask 818176   ;;  %vm7961_vm3 = vmmov 0  }
  0x96   :  { %v5893_v8 = vpack.c.bf16 %v140_v6, %v139_v5  ;;  %v171_v9 = vld [vmem:[%s8896_s1 + $0x100] sm:$0xff]  ;;  %v172_v10 = vld [vmem:[%s8896_s1 + $0x108] sm:$0xff]  ;;  %5892 = vmatprep.subr.bf16.mxu0 %v5891_v3  ;;  %v189_v14 = vld [vmem:[%s8896_s1 + $0x190] sm:$0xff]  ;;  %v5895_v16 = vpack.c.bf16 %v158_v13, %v157_v11  ;;  %v276_v63 = vunpack.c.0.s8 %v275_v48  ;;  %vm1094_vm4 = vcmask 195584  }
  0x97   :  { %v5925_v12 = vpack.c.bf16 %v172_v10, %v171_v9  ;;  %v190_v15 = vld [vmem:[%s8896_s1 + $0x198] sm:$0xff]  ;;  %5924 = vmatprep.subr.bf16.mxu1 %v5923_v7  ;;  %v141_v18 = vld [vmem:[%s8896_s1 + $0x10] sm:$0xff]  ;;  %v159_v23 = vld [vmem:[%s8896_s1 + $0xa0] sm:$0xff]  ;;  %vm2387_vm5 = vcmask 130048   ;;  %vm5431_vm6 = vcmask 1041408   ;;  %vm5432_vm7 = vcmask 1043458  }
  0x98   :  { %5894 = vmatpush3.bf16.msra.mxu0 %v5893_v8  ;;  %v5927_v17 = vpack.c.bf16 %v190_v15, %v189_v14  ;;  %v142_v19 = vld [vmem:[%s8896_s1 + $0x18] sm:$0xff]  ;;  %v173_v20 = vld [vmem:[%s8896_s1 + $0x110] sm:$0xff]  ;;  %v160_v24 = vld [vmem:[%s8896_s1 + $0xa8] sm:$0xff]  ;;  %v8280_v13 = vsub.s32 %v276_v63, %v8253_v0  ;;  %vm5434_vm9 = vcmask 128004  }
  0x99   :  { %5926 = vmatpush3.bf16.msra.mxu1 %v5925_v12  ;;  %v5897_v21 = vpack.c.bf16 %v142_v19, %v141_v18  ;;  %v174_v22 = vld [vmem:[%s8896_s1 + $0x118] sm:$0xff]  ;;  %5896 = vmatprep.subr.bf16.mxu0 %v5895_v16  ;;  %v5899_v26 = vpack.c.bf16 %v160_v24, %v159_v23  ;;  %v191_v27 = vld [vmem:[%s8896_s1 + $0x1a0] sm:$0xff]  ;;  %v192_v28 = vld [vmem:[%s8896_s1 + $0x1a8] sm:$0xff] }
  0x9a   :  { %5928 = vmatprep.subr.bf16.mxu1 %v5927_v17  ;;  %v5929_v25 = vpack.c.bf16 %v174_v22, %v173_v20  ;;  %v143_v29 = vld [vmem:[%s8896_s1 + $0x20] sm:$0xff]  ;;  %v5931_v30 = vpack.c.bf16 %v192_v28, %v191_v27  ;;  %v144_v31 = vld [vmem:[%s8896_s1 + $0x28] sm:$0xff]  ;;  %v161_v35 = vld [vmem:[%s8896_s1 + $0xb0] sm:$0xff] }
  0x9b   :  { %v175_v32 = vld [vmem:[%s8896_s1 + $0x120] sm:$0xff]  ;;  %v176_v33 = vld [vmem:[%s8896_s1 + $0x128] sm:$0xff]  ;;  %v5901_v34 = vpack.c.bf16 %v144_v31, %v143_v29  ;;  %v162_v36 = vld [vmem:[%s8896_s1 + $0xb8] sm:$0xff] }
  0x9c   :  { %5898 = vmatpush3.bf16.msra.mxu0 %v5897_v21  ;;  %v193_v37 = vld [vmem:[%s8896_s1 + $0x1b0] sm:$0xff]  ;;  %v5933_v38 = vpack.c.bf16 %v176_v33, %v175_v32  ;;  %v5903_v39 = vpack.c.bf16 %v162_v36, %v161_v35  ;;  %v194_v40 = vld [vmem:[%s8896_s1 + $0x1b8] sm:$0xff]  ;;  %v163_v46 = vld [vmem:[%s8896_s1 + $0xc0] sm:$0xff] }
  0x9d   :  { %5930 = vmatpush3.bf16.msra.mxu1 %v5929_v25  ;;  %5900 = vmatprep.subr.bf16.mxu0 %v5899_v26  ;;  %v145_v41 = vld [vmem:[%s8896_s1 + $0x30] sm:$0xff]  ;;  %v146_v42 = vld [vmem:[%s8896_s1 + $0x38] sm:$0xff]  ;;  %v5935_v43 = vpack.c.bf16 %v194_v40, %v193_v37  ;;  %v164_v50 = vld [vmem:[%s8896_s1 + $0xc8] sm:$0xff] }
  0x9e   :  { %5932 = vmatprep.subr.bf16.mxu1 %v5931_v30  ;;  %v177_v44 = vld [vmem:[%s8896_s1 + $0x130] sm:$0xff]  ;;  %v178_v45 = vld [vmem:[%s8896_s1 + $0x138] sm:$0xff]  ;;  %v195_v51 = vld [vmem:[%s8896_s1 + $0x1c0] sm:$0xff]  ;;  %v5905_v53 = vpack.c.bf16 %v146_v42, %v145_v41  ;;  %v5907_v55 = vpack.c.bf16 %v164_v50, %v163_v46 }
  0x9f   :  { %v196_v52 = vld [vmem:[%s8896_s1 + $0x1c8] sm:$0xff]  ;;  %v5937_v54 = vpack.c.bf16 %v178_v45, %v177_v44  ;;  %v147_v56 = vld [vmem:[%s8896_s1 + $0x40] sm:$0xff]  ;;  %v165_v61 = vld [vmem:[%s8896_s1 + $0xd0] sm:$0xff] }
  0xa0   :  { %5902 = vmatpush3.bf16.msra.mxu0 %v5901_v34  ;;  %v148_v57 = vld [vmem:[%s8896_s1 + $0x48] sm:$0xff]  ;;  %v179_v58 = vld [vmem:[%s8896_s1 + $0x140] sm:$0xff]  ;;  %v5939_v59 = vpack.c.bf16 %v196_v52, %v195_v51  ;;  %v166_v62 = vld [vmem:[%s8896_s1 + $0xd8] sm:$0xff] }
  0xa1   :  { %5934 = vmatpush3.bf16.msra.mxu1 %v5933_v38  ;;  %5904 = vmatprep.subr.bf16.mxu0 %v5903_v39  ;;  %v180_v60 = vld [vmem:[%s8896_s1 + $0x148] sm:$0xff]  ;;  %v197_v1 = vld [vmem:[%s8896_s1 + $0x1d0] sm:$0xff]  ;;  %v198_v2 = vld [vmem:[%s8896_s1 + $0x1d8] sm:$0xff]  ;;  %v5909_v3 = vpack.c.bf16 %v148_v57, %v147_v56  ;;  %v5911_v5 = vpack.c.bf16 %v166_v62, %v165_v61 }
  0xa2   :  { %5936 = vmatprep.subr.bf16.mxu1 %v5935_v43  ;;  %v5941_v4 = vpack.c.bf16 %v180_v60, %v179_v58  ;;  %v149_v6 = vld [vmem:[%s8896_s1 + $0x50] sm:$0xff]  ;;  %v150_v7 = vld [vmem:[%s8896_s1 + $0x58] sm:$0xff]  ;;  %v5943_v9 = vpack.c.bf16 %v198_v2, %v197_v1  ;;  %v167_v11 = vld [vmem:[%s8896_s1 + $0xe0] sm:$0xff] }
  0xa3   :  { %v181_v8 = vld [vmem:[%s8896_s1 + $0x150] sm:$0xff]  ;;  %v182_v10 = vld [vmem:[%s8896_s1 + $0x158] sm:$0xff]  ;;  %v168_v12 = vld [vmem:[%s8896_s1 + $0xe8] sm:$0xff]  ;;  %v5913_v16 = vpack.c.bf16 %v150_v7, %v149_v6 }
  0xa4   :  { %5906 = vmatpush3.bf16.msra.mxu0 %v5905_v53  ;;  %v199_v14 = vld [vmem:[%s8896_s1 + $0x1e0] sm:$0xff]  ;;  %v200_v15 = vld [vmem:[%s8896_s1 + $0x1e8] sm:$0xff]  ;;  %v5945_v18 = vpack.c.bf16 %v182_v10, %v181_v8  ;;  %v5915_v19 = vpack.c.bf16 %v168_v12, %v167_v11  ;;  %v169_v25 = vld [vmem:[%s8896_s1 + $0xf0] sm:$0xff] }
  0xa5   :  { %5938 = vmatpush3.bf16.msra.mxu1 %v5937_v54  ;;  %5908 = vmatprep.subr.bf16.mxu0 %v5907_v55  ;;  %v151_v17 = vld [vmem:[%s8896_s1 + $0x60] sm:$0xff]  ;;  %v152_v20 = vld [vmem:[%s8896_s1 + $0x68] sm:$0xff]  ;;  %v5947_v23 = vpack.c.bf16 %v200_v15, %v199_v14  ;;  %v170_v26 = vld [vmem:[%s8896_s1 + $0xf8] sm:$0xff] }
  0xa6   :  { %5940 = vmatprep.subr.bf16.mxu1 %v5939_v59  ;;  %v183_v21 = vld [vmem:[%s8896_s1 + $0x160] sm:$0xff]  ;;  %v184_v24 = vld [vmem:[%s8896_s1 + $0x168] sm:$0xff]  ;;  %v201_v29 = vld [vmem:[%s8896_s1 + $0x1f0] sm:$0xff]  ;;  %v5917_v31 = vpack.c.bf16 %v152_v20, %v151_v17  ;;  %v5919_v35 = vpack.c.bf16 %v170_v26, %v169_v25  ;;  %v7959_v59 = vmov 0.0|0.0  }
  0xa7   :  { %v137_v22 = vld [vmem:[%s8895_s0] sm:$0xff]  ;;  %v202_v30 = vld [vmem:[%s8896_s1 + $0x1f8] sm:$0xff]  ;;  %v5949_v34 = vpack.c.bf16 %v184_v24, %v183_v21  ;;  %v153_v36 = vld [vmem:[%s8896_s1 + $0x70] sm:$0xff] }
  0xa8   :  { %5910 = vmatpush3.bf16.msra.mxu0 %v5909_v3  ;;  %v280_v27 = vrot.slane %v137_v22, %v8280_v13  ;;  %v273_v28 = vcombine.high %v137_v22, %v137_v22  ;;  %v154_v37 = vld [vmem:[%s8896_s1 + $0x78] sm:$0xff]  ;;  %v185_v38 = vld [vmem:[%s8896_s1 + $0x170] sm:$0xff]  ;;  %v5951_v39 = vpack.c.bf16 %v202_v30, %v201_v29  ;;  %v219_v42 = vld [vmem:[%s8896_s1 + $0x280] sm:$0xff] }
  0xa9   :  { %5942 = vmatpush3.bf16.msra.mxu1 %v5941_v4  ;;  %5912 = vmatprep.subr.bf16.mxu0 %v5911_v5  ;;  %v186_v40 = vld [vmem:[%s8896_s1 + $0x178] sm:$0xff]  ;;  %v220_v43 = vld [vmem:[%s8896_s1 + $0x288] sm:$0xff]  ;;  %v5921_v44 = vpack.c.bf16 %v154_v37, %v153_v36  ;;  %v203_v47 = vld [vmem:[%s8896_s1 + $0x200] sm:$0xff] }
  0xaa   :  { %5944 = vmatprep.subr.bf16.mxu1 %v5943_v9  ;;  %v288_v32 = vcombine.high %v280_v27, %v280_v27  ;;  %v287_v33 = vrot.slane %v273_v28, %v8280_v13  ;;  %v5953_v45 = vpack.c.bf16 %v186_v40, %v185_v38  ;;  %v5955_v46 = vpack.c.bf16 %v220_v43, %v219_v42  ;;  %v204_v48 = vld [vmem:[%s8896_s1 + $0x208] sm:$0xff]  ;;  %v235_v49 = vld [vmem:[%s8896_s1 + $0x300] sm:$0xff]  ;;  %v221_v51 = vld [vmem:[%s8896_s1 + $0x290] sm:$0xff] }
  0xab   :  { %v236_v50 = vld [vmem:[%s8896_s1 + $0x308] sm:$0xff]  ;;  %v222_v52 = vld [vmem:[%s8896_s1 + $0x298] sm:$0xff]  ;;  %v5957_v53 = vpack.c.bf16 %v204_v48, %v203_v47  ;;  %v205_v56 = vld [vmem:[%s8896_s1 + $0x210] sm:$0xff] }
  0xac   :  { %5914 = vmatpush3.bf16.msra.mxu0 %v5913_v16  ;;  %381 = vmatprep.mubr.f32.mxu0 %v288_v32  ;;  %v289_v41 = vcombine.high %v287_v33, %v287_v33  ;;  %v5988_v54 = vpack.c.bf16 %v236_v50, %v235_v49  ;;  %v5959_v55 = vpack.c.bf16 %v222_v52, %v221_v51  ;;  %v206_v57 = vld [vmem:[%s8896_s1 + $0x218] sm:$0xff]  ;;  %v237_v58 = vld [vmem:[%s8896_s1 + $0x310] sm:$0xff]  ;;  %v223_v61 = vld [vmem:[%s8896_s1 + $0x2a0] sm:$0xff] }
  0xad   :  { %5946 = vmatpush3.bf16.msra.mxu1 %v5945_v18  ;;  %5916 = vmatprep.subr.bf16.mxu0 %v5915_v19  ;;  %v238_v60 = vld [vmem:[%s8896_s1 + $0x318] sm:$0xff]  ;;  %v224_v62 = vld [vmem:[%s8896_s1 + $0x2a8] sm:$0xff]  ;;  %v5961_v63 = vpack.c.bf16 %v206_v57, %v205_v56  ;;  %v207_v1 = vld [vmem:[%s8896_s1 + $0x220] sm:$0xff] }
  0xae   :  { %5948 = vmatprep.subr.bf16.mxu1 %v5947_v23  ;;  %451 = vmatprep.mubr.f32.mxu1 %v289_v41  ;;  %v5991_v2 = vpack.c.bf16 %v238_v60, %v237_v58  ;;  %v5963_v3 = vpack.c.bf16 %v224_v62, %v223_v61  ;;  %v208_v4 = vld [vmem:[%s8896_s1 + $0x228] sm:$0xff]  ;;  %v239_v5 = vld [vmem:[%s8896_s1 + $0x320] sm:$0xff]  ;;  %v225_v8 = vld [vmem:[%s8896_s1 + $0x2b0] sm:$0xff] }
  0xaf   :  { %v138_v6 = vld [vmem:[%s8895_s0 + $0x8] sm:$0xff]  ;;  %v226_v9 = vld [vmem:[%s8896_s1 + $0x2b8] sm:$0xff]  ;;  %v5965_v12 = vpack.c.bf16 %v208_v4, %v207_v1  ;;  %v209_v18 = vld [vmem:[%s8896_s1 + $0x230] sm:$0xff]  ;;  %v7960_v4 = vmov 0.0  }
  0xb0   :  { %5918 = vmatpush3.bf16.msra.mxu0 %v5917_v31  ;;  %v240_v7 = vld [vmem:[%s8896_s1 + $0x328] sm:$0xff]  ;;  %v290_v10 = vcombine.high %v138_v6, %v138_v6  ;;  %v8395_v11 = vrot.slane %v138_v6, %v8280_v13  ;;  %v5967_v17 = vpack.c.bf16 %v226_v9, %v225_v8  ;;  %v210_v19 = vld [vmem:[%s8896_s1 + $0x238] sm:$0xff]  ;;  %v241_v20 = vld [vmem:[%s8896_s1 + $0x330] sm:$0xff] }
  0xb1   :  { %5950 = vmatpush3.bf16.msra.mxu1 %v5949_v34  ;;  %5920 = vmatprep.subr.bf16.mxu0 %v5919_v35  ;;  %v5994_v16 = vpack.c.bf16 %v240_v7, %v239_v5  ;;  %v242_v21 = vld [vmem:[%s8896_s1 + $0x338] sm:$0xff]  ;;  %v227_v22 = vld [vmem:[%s8896_s1 + $0x2c0] sm:$0xff]  ;;  %v228_v23 = vld [vmem:[%s8896_s1 + $0x2c8] sm:$0xff]  ;;  %v5969_v25 = vpack.c.bf16 %v210_v19, %v209_v18 }
  0xb2   :  { %5952 = vmatprep.subr.bf16.mxu1 %v5951_v39  ;;  %v305_v14 = vcombine.high %v8395_v11, %v8395_v11  ;;  %v8400_v15 = vrot.slane %v290_v10, %v8280_v13  ;;  %v5997_v26 = vpack.c.bf16 %v242_v21, %v241_v20  ;;  %v211_v28 = vld [vmem:[%s8896_s1 + $0x240] sm:$0xff]  ;;  %v212_v29 = vld [vmem:[%s8896_s1 + $0x248] sm:$0xff]  ;;  %v229_v32 = vld [vmem:[%s8896_s1 + $0x2d0] sm:$0xff] }
  0xb3   :  { %v243_v30 = vld [vmem:[%s8896_s1 + $0x340] sm:$0xff]  ;;  %v244_v31 = vld [vmem:[%s8896_s1 + $0x348] sm:$0xff]  ;;  %v5973_v34 = vpack.c.bf16 %v212_v29, %v211_v28  ;;  %v213_v37 = vld [vmem:[%s8896_s1 + $0x250] sm:$0xff] }
  0xb4   :  { %5922 = vmatpush3.bf16.msra.mxu0 %v5921_v44  ;;  %v306_v24 = vcombine.high %v8400_v15, %v8400_v15  ;;  %v6000_v35 = vpack.c.bf16 %v244_v31, %v243_v30  ;;  %v214_v38 = vld [vmem:[%s8896_s1 + $0x258] sm:$0xff]  ;;  %v245_v39 = vld [vmem:[%s8896_s1 + $0x350] sm:$0xff]  ;;  %v231_v41 = vld [vmem:[%s8896_s1 + $0x2e0] sm:$0xff] }
  0xb5   :  { %5954 = vmatpush3.bf16.msra.mxu1 %v5953_v45  ;;  %5956 = vmatprep.subr.bf16.mxu0 %v5955_v46  ;;  %v246_v40 = vld [vmem:[%s8896_s1 + $0x358] sm:$0xff]  ;;  %v232_v42 = vld [vmem:[%s8896_s1 + $0x2e8] sm:$0xff]  ;;  %v5977_v43 = vpack.c.bf16 %v214_v38, %v213_v37  ;;  %v215_v46 = vld [vmem:[%s8896_s1 + $0x260] sm:$0xff] }
  0xb6   :  { %5987 = vmatprep.subr.bf16.mxu1 %v7959_v59  ;;  %v6003_v44 = vpack.c.bf16 %v246_v40, %v245_v39  ;;  %v5979_v45 = vpack.c.bf16 %v232_v42, %v231_v41  ;;  %v216_v47 = vld [vmem:[%s8896_s1 + $0x268] sm:$0xff]  ;;  %v247_v48 = vld [vmem:[%s8896_s1 + $0x360] sm:$0xff]  ;;  %v233_v50 = vld [vmem:[%s8896_s1 + $0x2f0] sm:$0xff] }
  0xb7   :  { %382 = vmatmul.mubr.f32.vlgmr.msra.gmra.mrb[0].mxu0 %v280_v27  ;;  %v5971_v27 = vpack.c.bf16 %v228_v23, %v227_v22  ;;  %v248_v49 = vld [vmem:[%s8896_s1 + $0x368] sm:$0xff]  ;;  %v234_v51 = vld [vmem:[%s8896_s1 + $0x2f8] sm:$0xff]  ;;  %v5981_v52 = vpack.c.bf16 %v216_v47, %v215_v46  ;;  %v249_v57 = vld [vmem:[%s8896_s1 + $0x370] sm:$0xff] }
  0xb8   :  { %452 = vmatmul.mubr.f32.vlgmr.msra.gmra.mrb[0].mxu1 %v287_v33  ;;  %5958 = vmatpush3.bf16.msra.mxu0 %v5957_v53  ;;  %v230_v33 = vld [vmem:[%s8896_s1 + $0x2d8] sm:$0xff]  ;;  %v6006_v53 = vpack.c.bf16 %v248_v49, %v247_v48  ;;  %v251_v62 = vld [vmem:[%s8896_s1 + $0x380] sm:$0xff]  ;;  %v256_v7 = vld [vmem:[%s8896_s1 + $0x3a8] sm:$0xff] }
  0xb9   :  { %5989 = vmatpush1.bf16.msra.mxu1 %v5988_v54  ;;  %5960 = vmatprep.subr.bf16.mxu0 %v5959_v55  ;;  %v5975_v36 = vpack.c.bf16 %v230_v33, %v229_v32  ;;  %v5983_v54 = vpack.c.bf16 %v234_v51, %v233_v50  ;;  %v217_v55 = vld [vmem:[%s8896_s1 + $0x270] sm:$0xff]  ;;  %v218_v56 = vld [vmem:[%s8896_s1 + $0x278] sm:$0xff]  ;;  %v255_v6 = vld [vmem:[%s8896_s1 + $0x3a0] sm:$0xff] }
  0xba   :  { %5990 = vmatprep.subr.bf16.mxu1 %v7959_v59  ;;  %521 = vmatprep.mubr.f32.mxu0 %v305_v14  ;;  %v250_v58 = vld [vmem:[%s8896_s1 + $0x378] sm:$0xff]  ;;  %v5985_v60 = vpack.c.bf16 %v218_v56, %v217_v55  ;;  %v6018_v8 = vpack.c.bf16 %v256_v7, %v255_v6  ;;  %v257_v9 = vld [vmem:[%s8896_s1 + $0x3b0] sm:$0xff]  ;;  %v260_v14 = vld [vmem:[%s8896_s1 + $0x3c8] sm:$0xff] }
  0xbb   :  { %5447 = vmatprep.mubr.msk.f32.mxu1 %vm314_vm0, %v306_v24  ;;  %v6009_v61 = vpack.c.bf16 %v250_v58, %v249_v57  ;;  %v258_v10 = vld [vmem:[%s8896_s1 + $0x3b8] sm:$0xff]  ;;  %v263_v20 = vld [vmem:[%s8896_s1 + $0x3e0] sm:$0xff]  ;;  %v599_v21 = vld [vmem:[%s8898_s3 + $0x8] sm:$0xff] }
  0xbc   :  { %5962 = vmatpush3.bf16.msra.mxu0 %v5961_v63  ;;  %v252_v63 = vld [vmem:[%s8896_s1 + $0x388] sm:$0xff]  ;;  %v262_v18 = vld [vmem:[%s8896_s1 + $0x3d8] sm:$0xff]  ;;  %v602_v22 = vld [vmem:[%s8898_s3 + $0x20] sm:$0xff] }
  0xbd   :  { %5992 = vmatpush1.bf16.msra.mxu1 %v5991_v2  ;;  %5964 = vmatprep.subr.bf16.mxu0 %v5963_v3  ;;  %v6012_v1 = vpack.c.bf16 %v252_v63, %v251_v62  ;;  %v253_v2 = vld [vmem:[%s8896_s1 + $0x390] sm:$0xff]  ;;  %v254_v3 = vld [vmem:[%s8896_s1 + $0x398] sm:$0xff]  ;;  %v598_v23 = vld [vmem:[%s8898_s3] sm:$0xff]  ;;  %v6029_v24 = vpack.c.bf16 %v602_v22, %v599_v21 }
  0xbe   :  { %5993 = vmatprep.subr.bf16.mxu1 %v7959_v59  ;;  %v6015_v5 = vpack.c.bf16 %v254_v3, %v253_v2  ;;  %v604_v29 = vld [vmem:[%s8898_s3 + $0x30] sm:$0xff]  ;;  %v607_v30 = vld [vmem:[%s8898_s3 + $0x48] sm:$0xff]  ;;  %v614_v32 = vld [vmem:[%s8898_s3 + $0x80] sm:$0xff] }
  0xbf   :  { %v611_v31 = vld [vmem:[%s8898_s3 + $0x68] sm:$0xff]  ;;  %v6035_v33 = vpack.c.bf16 %v607_v30, %v604_v29  ;;  %v617_v37 = vld [vmem:[%s8898_s3 + $0x98] sm:$0xff]  ;;  %v620_v38 = vld [vmem:[%s8898_s3 + $0xb0] sm:$0xff] }
  0xc0   :  { %5966 = vmatpush3.bf16.msra.mxu0 %v5965_v12  ;;  %v259_v12 = vld [vmem:[%s8896_s1 + $0x3c0] sm:$0xff]  ;;  %v6041_v40 = vpack.c.bf16 %v620_v38, %v617_v37  ;;  %v616_v41 = vld [vmem:[%s8898_s3 + $0x90] sm:$0xff]  ;;  %v619_v42 = vld [vmem:[%s8898_s3 + $0xa8] sm:$0xff] }
  0xc1   :  { %5995 = vmatpush1.bf16.msra.mxu1 %v5994_v16  ;;  %5968 = vmatprep.subr.bf16.mxu0 %v5967_v17  ;;  %v6024_v16 = vpack.c.bf16 %v260_v14, %v259_v12  ;;  %v261_v17 = vld [vmem:[%s8896_s1 + $0x3d0] sm:$0xff]  ;;  %v622_v47 = vld [vmem:[%s8898_s3 + $0xc0] sm:$0xff]  ;;  %v625_v48 = vld [vmem:[%s8898_s3 + $0xd8] sm:$0xff] }
  0xc2   :  { %5996 = vmatprep.subr.bf16.mxu1 %v7959_v59  ;;  %v6027_v19 = vpack.c.bf16 %v262_v18, %v261_v17  ;;  %v629_v49 = vld [vmem:[%s8898_s3 + $0xf8] sm:$0xff]  ;;  %v632_v50 = vld [vmem:[%s8898_s3 + $0x110] sm:$0xff]  ;;  %v6047_v51 = vpack.c.bf16 %v625_v48, %v622_v47  ;;  %v635_v56 = vld [vmem:[%s8898_s3 + $0x128] sm:$0xf] }
  0xc3   :  { %v634_v57 = vld [vmem:[%s8898_s3 + $0x120] sm:$0xf]  ;;  %v813_v58 = vld [vmem:[#allocation6 + $0x8] sm:$0xff]  ;;  %v812_v62 = vld [vmem:[#allocation6] sm:$0xff] }
  0xc4   :  { %5970 = vmatpush3.bf16.msra.mxu0 %v5969_v25  ;;  %v601_v25 = vld [vmem:[%s8898_s3 + $0x18] sm:$0xff]  ;;  %v833_v7 = vld [vmem:[#allocation6 + $0xa8] sm:$0xff]  ;;  %v840_v12 = vld [vmem:[#allocation6 + $0xe0] sm:$0xff] }
  0xc5   :  { %5998 = vmatpush1.bf16.msra.mxu1 %v5997_v26  ;;  %5972 = vmatprep.subr.bf16.mxu0 %v5971_v27  ;;  %v608_v26 = vld [vmem:[%s8898_s3 + $0x50] sm:$0xff]  ;;  %v6031_v27 = vpack.c.bf16 %v601_v25, %v598_v23  ;;  %v819_v63 = vld [vmem:[#allocation6 + $0x38] sm:$0xff]  ;;  %v896_v37 = vld [vmem:[#allocation6 + $0x2a0] sm:$0xff] }
  0xc6   :  { %5999 = vmatprep.subr.bf16.mxu1 %v7959_v59  ;;  %v827_v2 = vld [vmem:[#allocation6 + $0x78] sm:$0xff]  ;;  %v834_v3 = vld [vmem:[#allocation6 + $0xb0] sm:$0xff]  ;;  %v861_v21 = vld [vmem:[#allocation6 + $0x188] sm:$0xff] }
  0xc7   :  { %v826_v6 = vld [vmem:[#allocation6 + $0x70] sm:$0xff]  ;;  %v847_v14 = vld [vmem:[#allocation6 + $0x118] sm:$0xff]  ;;  %v869_v23 = vld [vmem:[#allocation6 + $0x1c8] sm:$0xff] }
  0xc8   :  { %5974 = vmatpush3.bf16.msra.mxu0 %v5973_v34  ;;  %v6037_v34 = vpack.c.bf16 %v614_v32, %v611_v31  ;;  %v855_v17 = vld [vmem:[#allocation6 + $0x158] sm:$0xff]  ;;  %v862_v18 = vld [vmem:[#allocation6 + $0x190] sm:$0xff]  ;;  %v889_v32 = vld [vmem:[#allocation6 + $0x268] sm:$0xff] }
  0xc9   :  { %6001 = vmatpush1.bf16.msra.mxu1 %v6000_v35  ;;  %5976 = vmatprep.subr.bf16.mxu0 %v5975_v36  ;;  %v610_v35 = vld [vmem:[%s8898_s3 + $0x60] sm:$0xff]  ;;  %v613_v36 = vld [vmem:[%s8898_s3 + $0x78] sm:$0xff]  ;;  %vm5433_vm8 = vmor %vm5432_vm7, %vm5431_vm6 }
  0xca   :  { %6002 = vmatprep.subr.bf16.mxu1 %v7959_v59  ;;  %v6039_v39 = vpack.c.bf16 %v613_v36, %v610_v35  ;;  %v890_v29 = vld [vmem:[#allocation6 + $0x270] sm:$0xff]  ;;  %v904_v35 = vld [vmem:[#allocation6 + $0x2e0] sm:$0xff]  ;;  %v903_v38 = vld [vmem:[#allocation6 + $0x2d8] sm:$0xff] }
  0xcb   :  { %v882_v31 = vld [vmem:[#allocation6 + $0x230] sm:$0xff]  ;;  %v932_v47 = vld [vmem:[#allocation6 + $0x3c0] sm:$0xff]  ;;  %vm5435_vm10 = vmor %vm5434_vm9, %vm5433_vm8 }
  0xcc   :  { %5978 = vmatpush3.bf16.msra.mxu0 %v5977_v43  ;;  %v623_v43 = vld [vmem:[%s8898_s3 + $0xc8] sm:$0xff] }
  0xcd   :  { %6004 = vmatpush1.bf16.msra.mxu1 %v6003_v44  ;;  %5980 = vmatprep.subr.bf16.mxu0 %v5979_v45  ;;  %v626_v44 = vld [vmem:[%s8898_s3 + $0xe0] sm:$0xff]  ;;  %v6043_v45 = vpack.c.bf16 %v619_v42, %v616_v41  ;;  %v918_v41 = vld [vmem:[#allocation6 + $0x350] sm:$0xff] }
  0xce   :  { %6005 = vmatprep.subr.bf16.mxu1 %v7959_v59  ;;  %v6045_v46 = vpack.c.bf16 %v626_v44, %v623_v43  ;;  %v910_v43 = vld [vmem:[#allocation6 + $0x310] sm:$0xff]  ;;  %v917_v44 = vld [vmem:[#allocation6 + $0x348] sm:$0xff] }
  0xd0   :  { %5982 = vmatpush3.bf16.msra.mxu0 %v5981_v52  ;;  %v6049_v52 = vpack.c.bf16 %v632_v50, %v629_v49  ;;  %v924_v49 = vld [vmem:[#allocation6 + $0x380] sm:$0xff]  ;;  %v931_v50 = vld [vmem:[#allocation6 + $0x3b8] sm:$0xff] }
  0xd1   :  { %6007 = vmatpush1.bf16.msra.mxu1 %v6006_v53  ;;  %5984 = vmatprep.subr.bf16.mxu0 %v5983_v54  ;;  %v628_v53 = vld [vmem:[%s8898_s3 + $0xf0] sm:$0xff]  ;;  %v631_v54 = vld [vmem:[%s8898_s3 + $0x108] sm:$0xff] }
  0xd2   :  { %6008 = vmatprep.subr.bf16.mxu1 %v7959_v59  ;;  %v6051_v55 = vpack.c.bf16 %v631_v54, %v628_v53  ;;  %v946_v53 = vld [vmem:[#allocation6 + $0x430] sm:$0xff] }
  0xd4   :  { %5986 = vmatpush3.bf16.msra.mxu0 %v5985_v60  ;;  %v820_v60 = vld [vmem:[#allocation6 + $0x40] sm:$0xff] }
  0xd5   :  { %6010 = vmatpush1.bf16.msra.mxu1 %v6009_v61  ;;  %6030 = vmatprep.subr.bf16.mxu0 %v6029_v24  ;;  %v6071_v61 = vpack.c.bf16 %v820_v60, %v813_v58  ;;  %v876_v24 = vld [vmem:[#allocation6 + $0x200] sm:$0xff]  ;;  %v953_v58 = vld [vmem:[#allocation6 + $0x468] sm:$0xff] }
  0xd6   :  { %6011 = vmatprep.subr.bf16.mxu1 %v7959_v59  ;;  %v6087_v25 = vpack.c.bf16 %v876_v24, %v869_v23  ;;  %v960_v60 = vld [vmem:[#allocation6 + $0x4a0] sm:$0xff]  ;;  %v987_v24 = vld [vmem:[#allocation6 + $0x578] sm:$0xff] }
  0xd7   :  { %522 = vmatmul.mubr.f32.vlgmr.msra.gmra.mrb[2].mxu0 %v8395_v11  ;;  %v6021_v11 = vpack.c.bf16 %v258_v10, %v257_v9  ;;  %v841_v9 = vld [vmem:[#allocation6 + $0xe8] sm:$0xff]  ;;  %v848_v10 = vld [vmem:[#allocation6 + $0x120] sm:$0xff] }
  0xd8   :  { %732 = vmatprep.mubr.f32.mxu0 %v7960_v4  ;;  %6032 = vmatpush1.bf16.msra.mxu0 %v6031_v27  ;;  %v980_v23 = vld [vmem:[#allocation6 + $0x540] sm:$0xff] }
  0xd9   :  { %6013 = vmatpush1.bf16.msra.mxu1 %v6012_v1  ;;  %v6073_v1 = vpack.c.bf16 %v819_v63, %v812_v62  ;;  %v6111_v62 = vpack.c.bf16 %v960_v60, %v953_v58  ;;  %v952_v63 = vld [vmem:[#allocation6 + $0x460] sm:$0xff]  ;;  %v633_v58 = vld [vmem:[%s8898_s3 + $0x118] sm:$0xff] }
  0xda   :  { %6014 = vmatprep.subr.bf16.mxu1 %v7959_v59 }
  0xdd   :  { %6016 = vmatpush1.bf16.msra.mxu1 %v6015_v5  ;;  %v6075_v5 = vpack.c.bf16 %v834_v3, %v827_v2  ;;  %v5446_v3 = vld [vmem:[#allocation2] ss:$0 sm:$0xff] }
  0xde   :  { %6017 = vmatprep.subr.bf16.mxu1 %v7959_v59 }
  0xe1   :  { %6019 = vmatpush1.bf16.msra.mxu1 %v6018_v8  ;;  %v6077_v8 = vpack.c.bf16 %v833_v7, %v826_v6 }
  0xe2   :  { %6020 = vmatprep.subr.bf16.mxu1 %v7959_v59 }
  0xe5   :  { %6022 = vmatpush1.bf16.msra.mxu1 %v6021_v11  ;;  %v6079_v11 = vpack.c.bf16 %v848_v10, %v841_v9  ;;  %v967_v10 = vld [vmem:[#allocation6 + $0x4d8] sm:$0xff] }
  0xe6   :  { %6023 = vmatprep.subr.bf16.mxu1 %v7959_v59 }
  0xe9   :  { %6025 = vmatpush1.bf16.msra.mxu1 %v6024_v16  ;;  %v6081_v16 = vpack.c.bf16 %v847_v14, %v840_v12 }
  0xea   :  { %6026 = vmatprep.subr.bf16.mxu1 %v7959_v59 }
  0xed   :  { %6028 = vmatpush1.bf16.msra.mxu1 %v6027_v19  ;;  %v6083_v19 = vpack.c.bf16 %v862_v18, %v855_v17  ;;  %v973_v17 = vld [vmem:[#allocation6 + $0x508] sm:$0xff] }
  0xee   :  { %583 = vmatprep.subr.mxu1 %v7960_v4 }
  0xf1   :  { %584 = vmatpush1.msra.mxu1 %v263_v20  ;;  %v854_v20 = vld [vmem:[#allocation6 + $0x150] sm:$0xff] }
  0xf2   :  { %592 = vmatmul.mubr.f32.vlgmr.msra.gmra.mrb[2].mxu1 %v8400_v15  ;;  %v605_v15 = vld [vmem:[%s8898_s3 + $0x38] sm:$0xff]  ;;  %6072 = vmatprep.subr.bf16.mxu1 %v6071_v61  ;;  %v6085_v22 = vpack.c.bf16 %v861_v21, %v854_v20  ;;  %v981_v20 = vld [vmem:[#allocation6 + $0x548] sm:$0xff]  ;;  %v988_v21 = vld [vmem:[#allocation6 + $0x580] sm:$0xff] }
  0xf3   :  { %v6033_v28 = vpack.c.bf16 %v608_v26, %v605_v15  ;;  %6074 = vmatpush1.bf16.msra.mxu1 %v6073_v1  ;;  %v868_v15 = vld [vmem:[#allocation6 + $0x1c0] sm:$0xff]  ;;  %v875_v26 = vld [vmem:[#allocation6 + $0x1f8] sm:$0xff] }
  0xf4   :  { %6076 = vmatprep.subr.bf16.mxu1 %v6075_v5  ;;  %v6089_v27 = vpack.c.bf16 %v875_v26, %v868_v15  ;;  %v959_v1 = vld [vmem:[#allocation6 + $0x498] sm:$0xff]  ;;  %v1002_v26 = vld [vmem:[#allocation6 + $0x5f0] sm:$0xff] }
  0xf5   :  { %6034 = vmatprep.subr.bf16.mxu0 %v6033_v28  ;;  %v883_v28 = vld [vmem:[#allocation6 + $0x238] sm:$0xff] }
  0xf6   :  { %6036 = vmatpush1.bf16.msra.mxu0 %v6035_v33  ;;  %v6091_v30 = vpack.c.bf16 %v890_v29, %v883_v28  ;;  %v6093_v33 = vpack.c.bf16 %v889_v32, %v882_v31  ;;  %v995_v15 = vld [vmem:[#allocation6 + $0x5b8] sm:$0xff]  ;;  %v994_v28 = vld [vmem:[#allocation6 + $0x5b0] sm:$0xff]  ;;  %v1001_v29 = vld [vmem:[#allocation6 + $0x5e8] sm:$0xff] }
  0xf7   :  { %6038 = vmatprep.subr.bf16.mxu0 %v6037_v34  ;;  %6078 = vmatpush1.bf16.msra.mxu1 %v6077_v8  ;;  %v897_v34 = vld [vmem:[#allocation6 + $0x2a8] sm:$0xff]  ;;  %v6113_v8 = vpack.c.bf16 %v959_v1, %v952_v63  ;;  %v1016_v32 = vld [vmem:[#allocation6 + $0x660] sm:$0xff]  ;;  %v814_v63 = vld [vmem:[#allocation6 + $0x10] sm:$0xff] }
  0xf8   :  { %6080 = vmatprep.subr.bf16.mxu1 %v6079_v11  ;;  %v6095_v36 = vpack.c.bf16 %v904_v35, %v897_v34  ;;  %v974_v11 = vld [vmem:[#allocation6 + $0x510] sm:$0xff]  ;;  %v1009_v31 = vld [vmem:[#allocation6 + $0x628] sm:$0xff] }
  0xf9   :  { %v6115_v14 = vpack.c.bf16 %v974_v11, %v967_v10  ;;  %v821_v1 = vld [vmem:[#allocation6 + $0x48] sm:$0xff]  ;;  %v835_v10 = vld [vmem:[#allocation6 + $0xb8] sm:$0xff] }
  0xfa   :  { %6040 = vmatpush1.bf16.msra.mxu0 %v6039_v39  ;;  %v6097_v39 = vpack.c.bf16 %v903_v38, %v896_v37  ;;  %v600_v38 = vld [vmem:[%s8898_s3 + $0x10] sm:$0xff]  ;;  %v843_v11 = vld [vmem:[#allocation6 + $0xf8] sm:$0xff] }
  0xfb   :  { %6042 = vmatprep.subr.bf16.mxu0 %v6041_v40  ;;  %6082 = vmatpush1.bf16.msra.mxu1 %v6081_v16  ;;  %v911_v40 = vld [vmem:[#allocation6 + $0x318] sm:$0xff]  ;;  %v966_v16 = vld [vmem:[#allocation6 + $0x4d0] sm:$0xff] }
  0xfc   :  { %6084 = vmatprep.subr.bf16.mxu1 %v6083_v19  ;;  %v6099_v42 = vpack.c.bf16 %v918_v41, %v911_v40  ;;  %v6117_v19 = vpack.c.bf16 %v973_v17, %v966_v16  ;;  %v842_v17 = vld [vmem:[#allocation6 + $0xf0] sm:$0xff] }
  0xfe   :  { %6044 = vmatpush1.bf16.msra.mxu0 %v6043_v45  ;;  %v6101_v45 = vpack.c.bf16 %v917_v44, %v910_v43 }
  0xff   :  { %6046 = vmatprep.subr.bf16.mxu0 %v6045_v46  ;;  %6086 = vmatpush1.bf16.msra.mxu1 %v6085_v22  ;;  %v925_v46 = vld [vmem:[#allocation6 + $0x388] sm:$0xff]  ;;  %v6119_v22 = vpack.c.bf16 %v988_v21, %v981_v20  ;;  %v864_v20 = vld [vmem:[#allocation6 + $0x1a0] sm:$0xff] }
 0x100   :  { %6088 = vmatprep.subr.bf16.mxu1 %v6087_v25  ;;  %v6103_v48 = vpack.c.bf16 %v932_v47, %v925_v46  ;;  %v6121_v25 = vpack.c.bf16 %v987_v24, %v980_v23  ;;  %v609_v46 = vld [vmem:[%s8898_s3 + $0x58] sm:$0xff]  ;;  %v856_v23 = vld [vmem:[#allocation6 + $0x160] sm:$0xff] }
 0x101   :  { %v863_v24 = vld [vmem:[#allocation6 + $0x198] sm:$0xff] }
 0x102   :  { %6048 = vmatpush1.bf16.msra.mxu0 %v6047_v51  ;;  %v6105_v51 = vpack.c.bf16 %v931_v50, %v924_v49  ;;  %v615_v49 = vld [vmem:[%s8898_s3 + $0x88] sm:$0xff] }
 0x103   :  { %6050 = vmatprep.subr.bf16.mxu0 %v6049_v52  ;;  %6090 = vmatpush1.bf16.msra.mxu1 %v6089_v27  ;;  %v939_v52 = vld [vmem:[#allocation6 + $0x3f8] sm:$0xff]  ;;  %v6123_v27 = vpack.c.bf16 %v1002_v26, %v995_v15  ;;  %v878_v15 = vld [vmem:[#allocation6 + $0x210] sm:$0xff]  ;;  %v6153_v26 = vpack.c.bf16 %v863_v24, %v856_v23  ;;  %v996_v23 = vld [vmem:[#allocation6 + $0x5c0] sm:$0xff] }
 0x104   :  { %6092 = vmatprep.subr.bf16.mxu1 %v6091_v30  ;;  %v6107_v54 = vpack.c.bf16 %v946_v53, %v939_v52  ;;  %v6125_v30 = vpack.c.bf16 %v1001_v29, %v994_v28  ;;  %v621_v52 = vld [vmem:[%s8898_s3 + $0xb8] sm:$0xff]  ;;  %v877_v29 = vld [vmem:[#allocation6 + $0x208] sm:$0xff] }
 0x105   :  { %v870_v28 = vld [vmem:[#allocation6 + $0x1d0] sm:$0xff]  ;;  %v1003_v24 = vld [vmem:[#allocation6 + $0x5f8] sm:$0xff] }
 0x106   :  { %6052 = vmatpush1.bf16.msra.mxu0 %v6051_v55  ;;  %v938_v55 = vld [vmem:[#allocation6 + $0x3f0] sm:$0xff] }
 0x107   :  { %5448 = vmatprep.subr.msk.mxu0 %vm658_vm1, %v635_v56  ;;  %6094 = vmatpush1.bf16.msra.mxu1 %v6093_v33  ;;  %v945_v56 = vld [vmem:[#allocation6 + $0x428] sm:$0xff]  ;;  %v6127_v33 = vpack.c.bf16 %v1016_v32, %v1009_v31  ;;  %v892_v31 = vld [vmem:[#allocation6 + $0x280] sm:$0xff]  ;;  %v6157_v32 = vpack.c.bf16 %v877_v29, %v870_v28  ;;  %v1015_v29 = vld [vmem:[#allocation6 + $0x658] sm:$0xff] }
 0x108   :  { %6096 = vmatprep.subr.bf16.mxu1 %v6095_v36  ;;  %v1008_v28 = vld [vmem:[#allocation6 + $0x620] sm:$0xff] }
 0x10a   :  { %5449 = vmatpush1.msk.msra.mxu0 %vm658_vm1, %v634_v57  ;;  %v6109_v57 = vpack.c.bf16 %v945_v56, %v938_v55  ;;  %v627_v55 = vld [vmem:[%s8898_s3 + $0xe8] sm:$0xff] }
 0x10b   :  { %6053 = vmatprep.subr.bf16.mxu0 %v7959_v59  ;;  %6098 = vmatpush1.bf16.msra.mxu1 %v6097_v39  ;;  %v603_v39 = vld [vmem:[%s8898_s3 + $0x28] sm:$0xff] }
 0x10c   :  { %6100 = vmatprep.subr.bf16.mxu1 %v6099_v42  ;;  %v6054_v43 = vpack.c.bf16 %v603_v39, %v600_v38 }
 0x10f   :  { %6102 = vmatpush1.bf16.msra.mxu1 %v6101_v45  ;;  %v606_v45 = vld [vmem:[%s8898_s3 + $0x40] sm:$0xff] }
 0x110   :  { %6104 = vmatprep.subr.bf16.mxu1 %v6103_v48  ;;  %v6057_v47 = vpack.c.bf16 %v609_v46, %v606_v45  ;;  %v612_v48 = vld [vmem:[%s8898_s3 + $0x70] sm:$0xff]  ;;  %v912_v46 = vld [vmem:[#allocation6 + $0x320] sm:$0xff] }
 0x111   :  { %v6060_v50 = vpack.c.bf16 %v615_v49, %v612_v48  ;;  %v927_v48 = vld [vmem:[#allocation6 + $0x398] sm:$0xff]  ;;  %v934_v49 = vld [vmem:[#allocation6 + $0x3d0] sm:$0xff] }
 0x113   :  { %6106 = vmatpush1.bf16.msra.mxu1 %v6105_v51  ;;  %v618_v51 = vld [vmem:[%s8898_s3 + $0xa0] sm:$0xff] }
 0x114   :  { %6108 = vmatprep.subr.bf16.mxu1 %v6107_v54  ;;  %v6063_v53 = vpack.c.bf16 %v621_v52, %v618_v51  ;;  %v624_v54 = vld [vmem:[%s8898_s3 + $0xd0] sm:$0xff]  ;;  %v6171_v51 = vpack.c.bf16 %v934_v49, %v927_v48  ;;  %v1039_v49 = vld [vmem:[#allocation6 + $0x718] sm:$0xff] }
 0x115   :  { %v6066_v56 = vpack.c.bf16 %v627_v55, %v624_v54  ;;  %v926_v52 = vld [vmem:[#allocation6 + $0x390] sm:$0xff]  ;;  %v941_v54 = vld [vmem:[#allocation6 + $0x408] sm:$0xff]  ;;  %v948_v55 = vld [vmem:[#allocation6 + $0x440] sm:$0xff] }
 0x117   :  { %6110 = vmatpush1.bf16.msra.mxu1 %v6109_v57  ;;  %v630_v57 = vld [vmem:[%s8898_s3 + $0x100] sm:$0xff] }
 0x118   :  { %6112 = vmatprep.subr.bf16.mxu1 %v6111_v62  ;;  %v6069_v60 = vpack.c.bf16 %v633_v58, %v630_v57  ;;  %v822_v62 = vld [vmem:[#allocation6 + $0x50] sm:$0xff]  ;;  %v6175_v57 = vpack.c.bf16 %v948_v55, %v941_v54  ;;  %v940_v58 = vld [vmem:[#allocation6 + $0x400] sm:$0xff]  ;;  %v8678_v54 = vsub.s32 1, %v8253_v0 }
 0x11b   :  { %6114 = vmatpush1.bf16.msra.mxu1 %v6113_v8 }
 0x11c   :  { %6116 = vmatprep.subr.bf16.mxu1 %v6115_v14 }
 0x11f   :  { %6118 = vmatpush1.bf16.msra.mxu1 %v6117_v19  ;;  %v857_v19 = vld [vmem:[#allocation6 + $0x168] sm:$0xff] }
 0x120   :  { %6120 = vmatprep.subr.bf16.mxu1 %v6119_v22  ;;  %v6151_v22 = vpack.c.bf16 %v864_v20, %v857_v19  ;;  %v997_v19 = vld [vmem:[#allocation6 + $0x5c8] sm:$0xff]  ;;  %v1004_v20 = vld [vmem:[#allocation6 + $0x600] sm:$0xff] }
 0x123   :  { %6122 = vmatpush1.bf16.msra.mxu1 %v6121_v25  ;;  %v871_v25 = vld [vmem:[#allocation6 + $0x1d8] sm:$0xff] }
 0x124   :  { %6124 = vmatprep.subr.bf16.mxu1 %v6123_v27  ;;  %v6155_v27 = vpack.c.bf16 %v878_v15, %v871_v25  ;;  %v1011_v25 = vld [vmem:[#allocation6 + $0x638] sm:$0xff]  ;;  %v1018_v15 = vld [vmem:[#allocation6 + $0x670] sm:$0xff] }
 0x127   :  { %6126 = vmatpush1.bf16.msra.mxu1 %v6125_v30  ;;  %v885_v30 = vld [vmem:[#allocation6 + $0x248] sm:$0xff] }
 0x128   :  { %6128 = vmatprep.subr.bf16.mxu1 %v6127_v33  ;;  %v6159_v33 = vpack.c.bf16 %v892_v31, %v885_v30  ;;  %v1010_v30 = vld [vmem:[#allocation6 + $0x630] sm:$0xff]  ;;  %v6129_v31 = vpack.c.bf16 %v1015_v29, %v1008_v28 }
 0x129   :  { %v838_v29 = vld [vmem:[#allocation6 + $0xd0] sm:$0xff] }
 0x12b   :  { %6130 = vmatpush1.bf16.msra.mxu1 %v6129_v31  ;;  %v951_v31 = vld [vmem:[#allocation6 + $0x458] sm:$0xff] }
 0x18a   :  { %v5497_v61 = vpop.f32.mrb[0].mxu0 }
 0x18b   :  { %v5532_v2 = vpop.f32.mrb[0].mxu1  ;;  %v5498_v5 = vpop.f32.mrb[1].mxu0 }
 0x18c   :  { %v5499_v6 = vadd.f32 %v5498_v5, %v5497_v61  ;;  %v5533_v7 = vpop.f32.mrb[1].mxu1  ;;  %v815_v61 = vld [vmem:[#allocation6 + $0x18] sm:$0xff]  ;;  %v636_v5 = vld [vmem:[%s8898_s3 + $0x130] sm:$0xf] }
 0x18d   :  { %v5534_v9 = vadd.f32 %v5533_v7, %v5532_v2  ;;  %v829_v2 = vld [vmem:[#allocation6 + $0x88] sm:$0xff]  ;;  %v6141_v7 = vpack.c.bf16 %v821_v1, %v814_v63 }
 0x18e   :  { %v384_v12 = vadd.f32 %v5499_v6, %v5446_v3  ;;  %v836_v3 = vld [vmem:[#allocation6 + $0xc0] sm:$0xff]  ;;  %v6139_v6 = vpack.c.bf16 %v822_v62, %v815_v61  ;;  %v955_v61 = vld [vmem:[#allocation6 + $0x478] sm:$0xff]  ;;  %v962_v62 = vld [vmem:[#allocation6 + $0x4b0] sm:$0xff] }
 0x18f   :  { %v6143_v8 = vpack.c.bf16 %v836_v3, %v829_v2  ;;  %v6179_v1 = vpack.c.bf16 %v962_v62, %v955_v61  ;;  %v954_v2 = vld [vmem:[#allocation6 + $0x470] sm:$0xff]  ;;  %v961_v3 = vld [vmem:[#allocation6 + $0x4a8] sm:$0xff]  ;;  %v1043_v62 = vld [vmem:[#allocation6 + $0x738] sm:$0xff] }
 0x190   :  { %v454_v18 = vadd.f32 %v5534_v9, %v384_v12  ;;  %v828_v9 = vld [vmem:[#allocation6 + $0x80] sm:$0xff]  ;;  %v850_v12 = vld [vmem:[#allocation6 + $0x130] sm:$0xff] }
 0x191   :  { %v6145_v14 = vpack.c.bf16 %v835_v10, %v828_v9  ;;  %v6147_v16 = vpack.c.bf16 %v850_v12, %v843_v11  ;;  %v968_v9 = vld [vmem:[#allocation6 + $0x4e0] sm:$0xff]  ;;  %v975_v10 = vld [vmem:[#allocation6 + $0x518] sm:$0xff]  ;;  %v990_v12 = vld [vmem:[#allocation6 + $0x590] sm:$0xff] }
 0x192   :  { %v983_v11 = vld [vmem:[#allocation6 + $0x558] sm:$0xff] }
 0x1aa   :  { %v5567_v34 = vpop.f32.mrb[2].mxu0 }
 0x1ab   :  { %v5568_v35 = vpop.f32.mrb[3].mxu0 }
 0x1ac   :  { %v5569_v36 = vadd.f32 %v5568_v35, %v5567_v34  ;;  %v884_v34 = vld [vmem:[#allocation6 + $0x240] sm:$0xff]  ;;  %v891_v35 = vld [vmem:[#allocation6 + $0x278] sm:$0xff] }
 0x1ad   :  { %v6161_v38 = vpack.c.bf16 %v891_v35, %v884_v34  ;;  %v1023_v34 = vld [vmem:[#allocation6 + $0x698] sm:$0xff]  ;;  %v1030_v35 = vld [vmem:[#allocation6 + $0x6d0] sm:$0xff] }
 0x1ae   :  { %v524_v37 = vadd.f32 %v5569_v36, %v454_v18  ;;  %v849_v18 = vld [vmem:[#allocation6 + $0x128] sm:$0xff]  ;;  %v899_v36 = vld [vmem:[#allocation6 + $0x2b8] sm:$0xff] }
 0x1af   :  { %v6149_v21 = vpack.c.bf16 %v849_v18, %v842_v17  ;;  %v982_v17 = vld [vmem:[#allocation6 + $0x550] sm:$0xff]  ;;  %v989_v18 = vld [vmem:[#allocation6 + $0x588] sm:$0xff] }
 0x1c5   :  { %v593_v40 = vpop.f32.mrb[2].mxu1 }
 0x1c6   :  { %v594_v41 = vadd.f32 %v593_v40, %v524_v37  ;;  %v595_v42 = vpop.f32.mrb[3].mxu1  ;;  %v906_v37 = vld [vmem:[#allocation6 + $0x2f0] sm:$0xff] }
 0x1c7   :  { %v6163_v39 = vpack.c.bf16 %v906_v37, %v899_v36  ;;  %v898_v40 = vld [vmem:[#allocation6 + $0x2b0] sm:$0xff]  ;;  %v913_v42 = vld [vmem:[#allocation6 + $0x328] sm:$0xff]  ;;  %v6131_v37 = vpack.c.bf16 %v1030_v35, %v1023_v34 }
 0x1c8   :  { %v597_v44 = vmax.f32 %v594_v41, 0.0  ;;  %v905_v41 = vld [vmem:[#allocation6 + $0x2e8] sm:$0xff]  ;;  %v830_v34 = vld [vmem:[#allocation6 + $0x90] sm:$0xff] }
 0x1c9   :  { %v1025_v36 = vld [vmem:[#allocation6 + $0x6a8] sm:$0xff]  ;;  %6132 = vmatprep.subr.bf16.mxu1 %v6131_v37  ;;  %v832_v37 = vld [vmem:[#allocation6 + $0xa0] sm:$0xff] }
 0x1ca   :  { %5450 = vmatmul.mubr.msk.f32.vlgmr.msra.gmra.mrb[4].mxu0 %vm654_vm2, %v597_v44  ;;  %v837_v35 = vld [vmem:[#allocation6 + $0xc8] sm:$0xff] }
 0x1cb   :  { %6055 = vmatpush3.bf16.msra.mxu0 %v6054_v43  ;;  %5865 = vmatprep.mubr.msk.f32.mxu0 %vm7961_vm3, %v7960_v4  ;;  %v920_v43 = vld [vmem:[#allocation6 + $0x360] sm:$0xff] }
 0x1cc   :  { %6056 = vmatprep.subr.bf16.mxu0 %v7959_v59  ;;  %v6167_v45 = vpack.c.bf16 %v920_v43, %v913_v42  ;;  %v1024_v43 = vld [vmem:[#allocation6 + $0x6a0] sm:$0xff] }
 0x1cf   :  { %6058 = vmatpush3.bf16.msra.mxu0 %v6057_v47  ;;  %v919_v47 = vld [vmem:[#allocation6 + $0x358] sm:$0xff] }
 0x1d0   :  { %6059 = vmatprep.subr.bf16.mxu0 %v7959_v59 }
 0x1d3   :  { %6061 = vmatpush3.bf16.msra.mxu0 %v6060_v50  ;;  %v6169_v50 = vpack.c.bf16 %v919_v47, %v912_v46  ;;  %v1037_v46 = vld [vmem:[#allocation6 + $0x708] sm:$0xff]  ;;  %v1044_v47 = vld [vmem:[#allocation6 + $0x740] sm:$0xff] }
 0x1d4   :  { %6062 = vmatprep.subr.bf16.mxu0 %v7959_v59  ;;  %v6135_v48 = vpack.c.bf16 %v1044_v47, %v1037_v46  ;;  %v844_v47 = vld [vmem:[#allocation6 + $0x100] sm:$0xff] }
 0x1d7   :  { %6064 = vmatpush3.bf16.msra.mxu0 %v6063_v53  ;;  %v933_v53 = vld [vmem:[#allocation6 + $0x3c8] sm:$0xff] }
 0x1d8   :  { %6065 = vmatprep.subr.bf16.mxu0 %v7959_v59 }
 0x1db   :  { %6067 = vmatpush3.bf16.msra.mxu0 %v6066_v56  ;;  %v6173_v56 = vpack.c.bf16 %v933_v53, %v926_v52  ;;  %v8675_v52 = vsub.s32 0, %v8253_v0  ;;  %v637_v53 = vld [vmem:[#allocation4] sm:$0x7] }
 0x1dc   :  { %6068 = vmatprep.subr.bf16.mxu0 %v7959_v59 }
 0x1dd   :  { %v642_v55 = vrot.slane %v637_v53, %v8675_v52 }
 0x1df   :  { %6070 = vmatpush3.bf16.msra.mxu0 %v6069_v60  ;;  %v947_v60 = vld [vmem:[#allocation6 + $0x438] sm:$0xff] }
 0x1e0   :  { %5863 = vmatprep.subr.mxu0 %v7960_v4  ;;  %v6177_v63 = vpack.c.bf16 %v947_v60, %v940_v58  ;;  %v1036_v58 = vld [vmem:[#allocation6 + $0x700] sm:$0xff] }
 0x1e3   :  { %5864 = vmatpush3.msk.msra.mxu0 %vm658_vm1, %v636_v5  ;;  %v969_v5 = vld [vmem:[#allocation6 + $0x4e8] sm:$0xff] }
 0x1e4   :  { %5866 = vmatmul.mubr.msk.f32.vlgmr.msra.gmra.mrb[6].mxu0 %vm654_vm2, %v597_v44  ;;  %6140 = vmatprep.subr.bf16.mxu0 %v6139_v6  ;;  %v6165_v44 = vpack.c.bf16 %v905_v41, %v898_v40  ;;  %v976_v6 = vld [vmem:[#allocation6 + $0x520] sm:$0xff]  ;;  %v1029_v40 = vld [vmem:[#allocation6 + $0x6c8] sm:$0xff] }
 0x1e5   :  { %6142 = vmatpush1.bf16.msra.mxu0 %v6141_v7  ;;  %v6181_v7 = vpack.c.bf16 %v961_v3, %v954_v2 }
 0x1e6   :  { %6144 = vmatprep.subr.bf16.mxu0 %v6143_v8  ;;  %v6183_v8 = vpack.c.bf16 %v976_v6, %v969_v5  ;;  %v6137_v5 = vpack.c.bf16 %v1043_v62, %v1036_v58  ;;  %v979_v58 = vld [vmem:[#allocation6 + $0x538] sm:$0xff]  ;;  %v858_v62 = vld [vmem:[#allocation6 + $0x170] sm:$0xff] }
 0x1e9   :  { %6146 = vmatpush1.bf16.msra.mxu0 %v6145_v14  ;;  %v6185_v14 = vpack.c.bf16 %v975_v10, %v968_v9  ;;  %v1053_v9 = vld [vmem:[#allocation6 + $0x788] sm:$0xff] }
 0x1ea   :  { %6148 = vmatprep.subr.bf16.mxu0 %v6147_v16  ;;  %v6187_v16 = vpack.c.bf16 %v990_v12, %v983_v11  ;;  %v817_v10 = vld [vmem:[#allocation6 + $0x28] sm:$0xff]  ;;  %v824_v11 = vld [vmem:[#allocation6 + $0x60] sm:$0xff]  ;;  %v930_v12 = vld [vmem:[#allocation6 + $0x3b0] sm:$0xff] }
 0x1ed   :  { %6150 = vmatpush1.bf16.msra.mxu0 %v6149_v21  ;;  %v6189_v21 = vpack.c.bf16 %v989_v18, %v982_v17  ;;  %v1052_v17 = vld [vmem:[#allocation6 + $0x780] sm:$0xff]  ;;  %v6207_v18 = vpack.c.bf16 %v824_v11, %v817_v10  ;;  %v993_v10 = vld [vmem:[#allocation6 + $0x5a8] sm:$0xff] }
 0x1ee   :  { %6152 = vmatprep.subr.bf16.mxu0 %v6151_v22  ;;  %v6191_v22 = vpack.c.bf16 %v1004_v20, %v997_v19  ;;  %v8693_v20 = vsub.s32 2, %v8253_v0 }
 0x1f1   :  { %6154 = vmatpush1.bf16.msra.mxu0 %v6153_v26  ;;  %v6193_v26 = vpack.c.bf16 %v1003_v24, %v996_v23  ;;  %v823_v23 = vld [vmem:[#allocation6 + $0x58] sm:$0xff]  ;;  %v818_v24 = vld [vmem:[#allocation6 + $0x30] sm:$0xff] }
 0x1f2   :  { %6156 = vmatprep.subr.bf16.mxu0 %v6155_v27  ;;  %v6195_v27 = vpack.c.bf16 %v1018_v15, %v1011_v25  ;;  %v825_v25 = vld [vmem:[#allocation6 + $0x68] sm:$0xff] }
 0x1f5   :  { %6158 = vmatpush1.bf16.msra.mxu0 %v6157_v32  ;;  %v1017_v32 = vld [vmem:[#allocation6 + $0x668] sm:$0xff] }
 0x1f6   :  { %6160 = vmatprep.subr.bf16.mxu0 %v6159_v33  ;;  %v6197_v33 = vpack.c.bf16 %v1017_v32, %v1010_v30  ;;  %v944_v30 = vld [vmem:[#allocation6 + $0x420] sm:$0xff] }
 0x1f9   :  { %6162 = vmatpush1.bf16.msra.mxu0 %v6161_v38  ;;  %v1032_v38 = vld [vmem:[#allocation6 + $0x6e0] sm:$0xff] }
 0x1fa   :  { %6164 = vmatprep.subr.bf16.mxu0 %v6163_v39  ;;  %v1022_v39 = vld [vmem:[#allocation6 + $0x690] sm:$0xff]  ;;  %v6199_v41 = vpack.c.bf16 %v1032_v38, %v1025_v36  ;;  %v839_v38 = vld [vmem:[#allocation6 + $0xd8] sm:$0xff] }
 0x1fb   :  { %v6133_v42 = vpack.c.bf16 %v1029_v40, %v1022_v39  ;;  %v845_v39 = vld [vmem:[#allocation6 + $0x108] sm:$0xff]  ;;  %v6281_v46 = vpack.c.bf16 %v839_v38, %v832_v37 }
 0x1fc   :  { %v1021_v37 = vld [vmem:[#allocation6 + $0x688] sm:$0xff] }
 0x1fd   :  { %6166 = vmatpush1.bf16.msra.mxu0 %v6165_v44  ;;  %v1031_v44 = vld [vmem:[#allocation6 + $0x6d8] sm:$0xff]  ;;  %6134 = vmatpush1.bf16.msra.mxu1 %v6133_v42  ;;  %v852_v42 = vld [vmem:[#allocation6 + $0x140] sm:$0xff] }
 0x1fe   :  { %6168 = vmatprep.subr.bf16.mxu0 %v6167_v45  ;;  %v6201_v45 = vpack.c.bf16 %v1031_v44, %v1024_v43  ;;  %6136 = vmatprep.subr.bf16.mxu1 %v6135_v48  ;;  %v958_v43 = vld [vmem:[#allocation6 + $0x490] sm:$0xff]  ;;  %v965_v44 = vld [vmem:[#allocation6 + $0x4c8] sm:$0xff]  ;;  %v851_v48 = vld [vmem:[#allocation6 + $0x138] sm:$0xff] }
 0x201   :  { %6170 = vmatpush1.bf16.msra.mxu0 %v6169_v50  ;;  %v1046_v50 = vld [vmem:[#allocation6 + $0x750] sm:$0xff] }
 0x202   :  { %6172 = vmatprep.subr.bf16.mxu0 %v6171_v51  ;;  %v6203_v51 = vpack.c.bf16 %v1046_v50, %v1039_v49  ;;  %v6215_v49 = vpack.c.bf16 %v852_v42, %v845_v39  ;;  %v6283_v50 = vpack.c.bf16 %v965_v44, %v958_v43  ;;  %v902_v44 = vld [vmem:[#allocation6 + $0x2d0] sm:$0xff] }
 0x205   :  { %6174 = vmatpush1.bf16.msra.mxu0 %v6173_v56  ;;  %v646_v56 = vrot.slane %v637_v53, %v8678_v54 }
 0x206   :  { %6176 = vmatprep.subr.bf16.mxu0 %v6175_v57 }
 0x209   :  { %6178 = vmatpush1.bf16.msra.mxu0 %v6177_v63  ;;  %v1038_v63 = vld [vmem:[#allocation6 + $0x710] sm:$0xff] }
 0x20a   :  { %6180 = vmatprep.subr.bf16.mxu0 %v6179_v1  ;;  %v1045_v1 = vld [vmem:[#allocation6 + $0x748] sm:$0xff] }
 0x20b   :  { %v6205_v6 = vpack.c.bf16 %v1045_v1, %v1038_v63  ;;  %v865_v63 = vld [vmem:[#allocation6 + $0x1a8] sm:$0xff] }
 0x20c   :  { %v6221_v11 = vpack.c.bf16 %v865_v63, %v858_v62  ;;  %v936_v62 = vld [vmem:[#allocation6 + $0x3e0] sm:$0xff] }
 0x20d   :  { %6182 = vmatpush1.bf16.msra.mxu0 %v6181_v7 }
 0x20e   :  { %6184 = vmatprep.subr.bf16.mxu0 %v6183_v8  ;;  %v1051_v8 = vld [vmem:[#allocation6 + $0x778] sm:$0xff] }
 0x211   :  { %6186 = vmatpush1.bf16.msra.mxu0 %v6185_v14  ;;  %v937_v14 = vld [vmem:[#allocation6 + $0x3e8] sm:$0xff] }
 0x212   :  { %6188 = vmatprep.subr.bf16.mxu0 %v6187_v16  ;;  %v1050_v16 = vld [vmem:[#allocation6 + $0x770] sm:$0xff]  ;;  %v6275_v19 = vpack.c.bf16 %v937_v14, %v930_v12  ;;  %v872_v14 = vld [vmem:[#allocation6 + $0x1e0] sm:$0xff] }
 0x215   :  { %6190 = vmatpush1.bf16.msra.mxu0 %v6189_v21  ;;  %v650_v21 = vrot.slane %v637_v53, %v8693_v20  ;;  %v853_v53 = vld [vmem:[#allocation6 + $0x148] sm:$0xff] }
 0x216   :  { %6192 = vmatprep.subr.bf16.mxu0 %v6191_v22  ;;  %v816_v22 = vld [vmem:[#allocation6 + $0x20] sm:$0xff] }
 0x217   :  { %v6209_v32 = vpack.c.bf16 %v823_v23, %v816_v22  ;;  %v887_v22 = vld [vmem:[#allocation6 + $0x258] sm:$0xff]  ;;  %v894_v23 = vld [vmem:[#allocation6 + $0x290] sm:$0xff] }
 0x219   :  { %6194 = vmatpush1.bf16.msra.mxu0 %v6193_v26  ;;  %v831_v26 = vld [vmem:[#allocation6 + $0x98] sm:$0xff] }
 0x21a   :  { %6196 = vmatprep.subr.bf16.mxu0 %v6195_v27  ;;  %v6211_v40 = vpack.c.bf16 %v838_v29, %v831_v26  ;;  %v6227_v29 = vpack.c.bf16 %v894_v23, %v887_v22  ;;  %v1665_v22 = vld [vmem:[#allocation9 + $0x8] sm:$0xff]  ;;  %v1672_v23 = vld [vmem:[#allocation9 + $0x40] sm:$0xff] }
 0x21d   :  { %6198 = vmatpush1.bf16.msra.mxu0 %v6197_v33  ;;  %v6277_v33 = vpack.c.bf16 %v825_v25, %v818_v24  ;;  %v1000_v24 = vld [vmem:[#allocation6 + $0x5e0] sm:$0xff]  ;;  %v1007_v25 = vld [vmem:[#allocation6 + $0x618] sm:$0xff] }
 0x21e   :  { %6200 = vmatprep.subr.bf16.mxu0 %v6199_v41  ;;  %v6279_v41 = vpack.c.bf16 %v951_v31, %v944_v30  ;;  %v6295_v30 = vpack.c.bf16 %v1007_v25, %v1000_v24  ;;  %v888_v31 = vld [vmem:[#allocation6 + $0x260] sm:$0xff] }
 0x21f   :  { %v956_v25 = vld [vmem:[#allocation6 + $0x480] sm:$0xff] }
 0x221   :  { %6202 = vmatpush1.bf16.msra.mxu0 %v6201_v45  ;;  %v6213_v45 = vpack.c.bf16 %v837_v35, %v830_v34  ;;  %v908_v34 = vld [vmem:[#allocation6 + $0x300] sm:$0xff]  ;;  %v1014_v35 = vld [vmem:[#allocation6 + $0x650] sm:$0xff] }
 0x222   :  { %6204 = vmatprep.subr.bf16.mxu0 %v6203_v51  ;;  %v846_v51 = vld [vmem:[#allocation6 + $0x110] sm:$0xff]  ;;  %v6299_v43 = vpack.c.bf16 %v1021_v37, %v1014_v35 }
 0x223   :  { %v970_v37 = vld [vmem:[#allocation6 + $0x4f0] sm:$0xff] }
 0x29d   :  { %v734_v57 = vpop.f32.mrb[4].mxu0 }
 0x29e   :  { %v735_v60 = vadd.f32 %v734_v57, %v642_v55  ;;  %v736_v61 = vpop.f32.mrb[5].mxu0  ;;  %v859_v55 = vld [vmem:[#allocation6 + $0x178] sm:$0xff]  ;;  %v972_v57 = vld [vmem:[#allocation6 + $0x500] sm:$0xff] }
 0x29f   :  { %v737_v2 = vadd.f32 %v736_v61, %v646_v56  ;;  %v866_v56 = vld [vmem:[#allocation6 + $0x1b0] sm:$0xff]  ;;  %v6285_v61 = vpack.c.bf16 %v853_v53, %v846_v51 }
 0x2a0   :  { %v8684_v7 = vmax.f32 %v735_v60, 0.0  ;;  %v6217_v60 = vpack.c.bf16 %v851_v48, %v844_v47  ;;  %v6219_v1 = vpack.c.bf16 %v866_v56, %v859_v55  ;;  %v922_v47 = vld [vmem:[#allocation6 + $0x370] sm:$0xff]  ;;  %v1028_v48 = vld [vmem:[#allocation6 + $0x6c0] sm:$0xff] }
 0x2a1   :  { %v8682_v3 = vmax.f32 %v737_v2, 0.0  ;;  %v6287_v2 = vpack.c.bf16 %v979_v58, %v972_v57  ;;  %v914_v53 = vld [vmem:[#allocation6 + $0x330] sm:$0xff]  ;;  %v921_v57 = vld [vmem:[#allocation6 + $0x368] sm:$0xff]  ;;  %v916_v58 = vld [vmem:[#allocation6 + $0x340] sm:$0xff] }
 0x2a2   :  { %v6237_v63 = vpack.c.bf16 %v921_v57, %v914_v53  ;;  %v1699_v53 = vld [vmem:[#allocation9 + $0x118] sm:$0xff] }
 0x2a3   :  { %1162 = vmatprep.mubr.f32.mxu1 %v8682_v3  ;;  %1304 = vmatprep.mubr.f32.mxu0 %v8682_v3  ;;  %v1707_v57 = vld [vmem:[#allocation9 + $0x158] sm:$0xff] }
 0x2a4   :  { %1163 = vmatmul.mubr.f32.vlgmr.msra.gmra.mrb[4].mxu1 %v8684_v7  ;;  %1305 = vmatmul.mubr.f32.vlgmr.msra.gmra.mrb[8].mxu0 %v8684_v7 }
 0x2a5   :  { %6138 = vmatpush1.bf16.msra.mxu1 %v6137_v5  ;;  %6206 = vmatpush1.bf16.msra.mxu0 %v6205_v6  ;;  %v867_v5 = vld [vmem:[#allocation6 + $0x1b8] sm:$0xff]  ;;  %v873_v6 = vld [vmem:[#allocation6 + $0x1e8] sm:$0xff] }
 0x2a6   :  { %1173 = vmatprep.subr.mxu1 %v1051_v8  ;;  %1315 = vmatprep.subr.mxu0 %v1053_v9  ;;  %v880_v8 = vld [vmem:[#allocation6 + $0x220] sm:$0xff]  ;;  %v986_v9 = vld [vmem:[#allocation6 + $0x570] sm:$0xff] }
 0x2a7   :  { %1233 = vmatprep.mubr.f32.mxu1 %v7960_v4  ;;  %1375 = vmatprep.mubr.f32.mxu0 %v7960_v4 }
 0x2a9   :  { %1174 = vmatpush1.msra.mxu1 %v1050_v16  ;;  %1316 = vmatpush1.msra.mxu0 %v1052_v17  ;;  %v879_v16 = vld [vmem:[#allocation6 + $0x218] sm:$0xff]  ;;  %v6223_v17 = vpack.c.bf16 %v880_v8, %v873_v6  ;;  %v1042_v6 = vld [vmem:[#allocation6 + $0x730] sm:$0xff]  ;;  %v1049_v8 = vld [vmem:[#allocation6 + $0x768] sm:$0xff] }
 0x2aa   :  { %6208 = vmatprep.subr.bf16.mxu1 %v6207_v18  ;;  %6276 = vmatprep.subr.bf16.mxu0 %v6275_v19  ;;  %v6291_v18 = vpack.c.bf16 %v993_v10, %v986_v9  ;;  %v874_v19 = vld [vmem:[#allocation6 + $0x1f0] sm:$0xff]  ;;  %v943_v9 = vld [vmem:[#allocation6 + $0x418] sm:$0xff] }
 0x2ab   :  { %v950_v10 = vld [vmem:[#allocation6 + $0x450] sm:$0xff] }
 0x2b7   :  { %v805_v15 = vpop.f32.mrb[6].mxu0 }
 0x2b8   :  { %v806_v27 = vadd.f32 %v805_v15, %v650_v21  ;;  %v5867_v28 = vpop.f32.mrb[7].mxu0  ;;  %v881_v21 = vld [vmem:[#allocation6 + $0x228] sm:$0xff]  ;;  %v6225_v15 = vpack.c.bf16 %v879_v16, %v872_v14  ;;  %v6243_v14 = vpack.c.bf16 %v950_v10, %v943_v9  ;;  %v942_v16 = vld [vmem:[#allocation6 + $0x410] sm:$0xff]  ;;  %v1721_v9 = vld [vmem:[#allocation9 + $0x1c8] sm:$0xff] }
 0x2b9   :  { %v6293_v26 = vpack.c.bf16 %v881_v21, %v874_v19  ;;  %v893_v28 = vld [vmem:[#allocation6 + $0x288] sm:$0xff]  ;;  %v964_v19 = vld [vmem:[#allocation6 + $0x4c0] sm:$0xff]  ;;  %v1728_v10 = vld [vmem:[#allocation9 + $0x200] sm:$0xff] }
 0x2ba   :  { %v8696_v36 = vmax.f32 %v806_v27, 0.0  ;;  %v886_v27 = vld [vmem:[#allocation6 + $0x250] sm:$0xff]  ;;  %v1056_v21 = vld [vmem:[#allocation6 + $0x7a0] sm:$0xff] }
 0x2bb   :  { %v6229_v38 = vpack.c.bf16 %v893_v28, %v886_v27  ;;  %v963_v28 = vld [vmem:[#allocation6 + $0x4b8] sm:$0xff] }
 0x2bc   :  { %5453 = vmatmul.mubr.msk.f32.vlgmr.msra.gmra.mrb[4].mxu1 %vm1094_vm4, %v8696_v36  ;;  %5454 = vmatmul.mubr.msk.f32.vlgmr.msra.gmra.mrb[8].mxu0 %vm1094_vm4, %v8696_v36  ;;  %v6249_v35 = vpack.c.bf16 %v963_v28, %v956_v25  ;;  %v1742_v25 = vld [vmem:[#allocation9 + $0x270] sm:$0xff] }
 0x2bd   :  { %6210 = vmatpush1.bf16.msra.mxu1 %v6209_v32  ;;  %6278 = vmatpush3.bf16.msra.mxu0 %v6277_v33  ;;  %v895_v32 = vld [vmem:[#allocation6 + $0x298] sm:$0xff]  ;;  %v901_v33 = vld [vmem:[#allocation6 + $0x2c8] sm:$0xff] }
 0x2be   :  { %1446 = vmatprep.mubr.f32.mxu1 %v8682_v3  ;;  %1588 = vmatprep.mubr.f32.mxu0 %v8682_v3  ;;  %v860_v3 = vld [vmem:[#allocation6 + $0x180] sm:$0xff]  ;;  %v6297_v39 = vpack.c.bf16 %v895_v32, %v888_v31  ;;  %v6231_v42 = vpack.c.bf16 %v908_v34, %v901_v33  ;;  %v971_v31 = vld [vmem:[#allocation6 + $0x4f8] sm:$0xff]  ;;  %v978_v32 = vld [vmem:[#allocation6 + $0x530] sm:$0xff]  ;;  %v6310_v33 = vpack.c.bf16 %v1672_v23, %v1665_v22 }
 0x2bf   :  { %6212 = vmatprep.subr.bf16.mxu1 %v6211_v40  ;;  %6280 = vmatprep.subr.bf16.mxu0 %v6279_v41  ;;  %v6289_v12 = vpack.c.bf16 %v867_v5, %v860_v3  ;;  %v900_v40 = vld [vmem:[#allocation6 + $0x2c0] sm:$0xff]  ;;  %v907_v41 = vld [vmem:[#allocation6 + $0x2f8] sm:$0xff] }
 0x2c0   :  { %v935_v5 = vld [vmem:[#allocation6 + $0x3d8] sm:$0xff] }
 0x2c1   :  { %6214 = vmatpush1.bf16.msra.mxu1 %v6213_v45  ;;  %6282 = vmatpush3.bf16.msra.mxu0 %v6281_v46  ;;  %v909_v45 = vld [vmem:[#allocation6 + $0x308] sm:$0xff]  ;;  %v915_v46 = vld [vmem:[#allocation6 + $0x338] sm:$0xff] }
 0x2c2   :  { %6216 = vmatprep.subr.bf16.mxu1 %v6215_v49  ;;  %6284 = vmatprep.subr.bf16.mxu0 %v6283_v50  ;;  %v1035_v49 = vld [vmem:[#allocation6 + $0x6f8] sm:$0xff]  ;;  %v6233_v50 = vpack.c.bf16 %v907_v41, %v900_v40  ;;  %v6301_v51 = vpack.c.bf16 %v909_v45, %v902_v44  ;;  %v6235_v55 = vpack.c.bf16 %v922_v47, %v915_v46  ;;  %v1700_v44 = vld [vmem:[#allocation9 + $0x120] sm:$0xff]  ;;  %v985_v45 = vld [vmem:[#allocation6 + $0x568] sm:$0xff] }
 0x2c3   :  { %v6303_v56 = vpack.c.bf16 %v1035_v49, %v1028_v48  ;;  %v1685_v40 = vld [vmem:[#allocation9 + $0xa8] sm:$0xff]  ;;  %v6251_v41 = vpack.c.bf16 %v978_v32, %v971_v31  ;;  %v992_v46 = vld [vmem:[#allocation6 + $0x5a0] sm:$0xff] }
 0x2c4   :  { %v984_v49 = vld [vmem:[#allocation6 + $0x560] sm:$0xff]  ;;  %v1019_v23 = vld [vmem:[#allocation6 + $0x678] sm:$0xff] }
 0x2c5   :  { %6218 = vmatpush1.bf16.msra.mxu1 %v6217_v60  ;;  %6286 = vmatpush3.bf16.msra.mxu0 %v6285_v61  ;;  %v923_v60 = vld [vmem:[#allocation6 + $0x378] sm:$0xff]  ;;  %v929_v61 = vld [vmem:[#allocation6 + $0x3a8] sm:$0xff]  ;;  %v1734_v31 = vld [vmem:[#allocation9 + $0x230] sm:$0xff] }
 0x2c6   :  { %6220 = vmatprep.subr.bf16.mxu1 %v6219_v1  ;;  %6288 = vmatprep.subr.bf16.mxu0 %v6287_v2  ;;  %v6305_v1 = vpack.c.bf16 %v923_v60, %v916_v58  ;;  %v928_v2 = vld [vmem:[#allocation6 + $0x3a0] sm:$0xff]  ;;  %v6239_v3 = vpack.c.bf16 %v936_v62, %v929_v61  ;;  %v999_v60 = vld [vmem:[#allocation6 + $0x5d8] sm:$0xff]  ;;  %v1006_v61 = vld [vmem:[#allocation6 + $0x610] sm:$0xff] }
 0x2c7   :  { %v1714_v58 = vld [vmem:[#allocation9 + $0x190] sm:$0xff]  ;;  %v1741_v32 = vld [vmem:[#allocation9 + $0x268] sm:$0xff] }
 0x2c9   :  { %6222 = vmatpush1.bf16.msra.mxu1 %v6221_v11  ;;  %6290 = vmatpush3.bf16.msra.mxu0 %v6289_v12  ;;  %v6241_v11 = vpack.c.bf16 %v935_v5, %v928_v2  ;;  %v6308_v12 = vpack.c.bf16 %v1049_v8, %v1042_v6  ;;  %v6322_v2 = vpack.c.bf16 %v1714_v58, %v1707_v57  ;;  %v1713_v5 = vld [vmem:[#allocation9 + $0x188] sm:$0xff]  ;;  %v1005_v8 = vld [vmem:[#allocation6 + $0x608] sm:$0xff]  ;;  %v1784_v58 = vld [vmem:[#allocation9 + $0x3c0] sm:$0xff] }
 0x2ca   :  { %6224 = vmatprep.subr.bf16.mxu1 %v6223_v17  ;;  %6292 = vmatprep.subr.bf16.mxu0 %v6291_v18  ;;  %v949_v17 = vld [vmem:[#allocation6 + $0x448] sm:$0xff]  ;;  %v6259_v6 = vpack.c.bf16 %v1006_v61, %v999_v60  ;;  %v1777_v57 = vld [vmem:[#allocation9 + $0x388] sm:$0xff] }
 0x2cb   :  { %v957_v18 = vld [vmem:[#allocation6 + $0x488] sm:$0xff]  ;;  %v6245_v24 = vpack.c.bf16 %v949_v17, %v942_v16  ;;  %v1012_v17 = vld [vmem:[#allocation6 + $0x640] sm:$0xff]  ;;  %v1055_v60 = vld [vmem:[#allocation6 + $0x798] sm:$0xff] }
 0x2cc   :  { %v6247_v27 = vpack.c.bf16 %v964_v19, %v957_v18  ;;  %v6326_v18 = vpack.c.bf16 %v1728_v10, %v1721_v9  ;;  %v1720_v19 = vld [vmem:[#allocation9 + $0x1c0] sm:$0xff]  ;;  %v6265_v28 = vpack.c.bf16 %v1019_v23, %v1012_v17  ;;  %v1667_v61 = vld [vmem:[#allocation9 + $0x18] sm:$0xff]  ;;  %v1673_v9 = vld [vmem:[#allocation9 + $0x48] sm:$0xff] }
 0x2cd   :  { %6226 = vmatpush1.bf16.msra.mxu1 %v6225_v15  ;;  %6294 = vmatpush3.bf16.msra.mxu0 %v6293_v26  ;;  %v1664_v15 = vld [vmem:[#allocation9] sm:$0xff]  ;;  %v1671_v26 = vld [vmem:[#allocation9 + $0x38] sm:$0xff] }
 0x2ce   :  { %6228 = vmatprep.subr.bf16.mxu1 %v6227_v29  ;;  %6296 = vmatprep.subr.bf16.mxu0 %v6295_v30  ;;  %v1679_v29 = vld [vmem:[#allocation9 + $0x78] sm:$0xff]  ;;  %v1686_v30 = vld [vmem:[#allocation9 + $0xb0] sm:$0xff]  ;;  %v6312_v34 = vpack.c.bf16 %v1671_v26, %v1664_v15  ;;  %v1027_v15 = vld [vmem:[#allocation6 + $0x6b8] sm:$0xff] }
 0x2cf   :  { %v1034_v26 = vld [vmem:[#allocation6 + $0x6f0] sm:$0xff]  ;;  %v1791_v10 = vld [vmem:[#allocation9 + $0x3f8] sm:$0xff] }
 0x2d0   :  { %v1680_v17 = vld [vmem:[#allocation9 + $0x80] sm:$0xff]  ;;  %v1687_v23 = vld [vmem:[#allocation9 + $0xb8] sm:$0xff] }
 0x2d1   :  { %6230 = vmatpush1.bf16.msra.mxu1 %v6229_v38  ;;  %6298 = vmatpush3.bf16.msra.mxu0 %v6297_v39  ;;  %v6314_v38 = vpack.c.bf16 %v1686_v30, %v1679_v29  ;;  %v1678_v39 = vld [vmem:[#allocation9 + $0x70] sm:$0xff]  ;;  %v1026_v29 = vld [vmem:[#allocation6 + $0x6b0] sm:$0xff] }
 0x2d2   :  { %6232 = vmatprep.subr.bf16.mxu1 %v6231_v42  ;;  %6300 = vmatprep.subr.bf16.mxu0 %v6299_v43  ;;  %v977_v42 = vld [vmem:[#allocation6 + $0x528] sm:$0xff]  ;;  %v1693_v43 = vld [vmem:[#allocation9 + $0xe8] sm:$0xff]  ;;  %v6316_v47 = vpack.c.bf16 %v1685_v40, %v1678_v39  ;;  %v1048_v39 = vld [vmem:[#allocation6 + $0x760] sm:$0xff]  ;;  %v6332_v40 = vpack.c.bf16 %v1741_v32, %v1734_v31 }
 0x2d3   :  { %v6253_v48 = vpack.c.bf16 %v977_v42, %v970_v37  ;;  %v1756_v37 = vld [vmem:[#allocation9 + $0x2e0] sm:$0xff]  ;;  %v1811_v32 = vld [vmem:[#allocation9 + $0x498] sm:$0xff] }
 0x2d4   :  { %v1804_v31 = vld [vmem:[#allocation9 + $0x460] sm:$0xff] }
 0x2d5   :  { %6234 = vmatpush1.bf16.msra.mxu1 %v6233_v50  ;;  %6302 = vmatpush3.bf16.msra.mxu0 %v6301_v51  ;;  %v6318_v50 = vpack.c.bf16 %v1700_v44, %v1693_v43  ;;  %v1692_v51 = vld [vmem:[#allocation9 + $0xe0] sm:$0xff]  ;;  %v1755_v44 = vld [vmem:[#allocation9 + $0x2d8] sm:$0xff] }
 0x2d6   :  { %6236 = vmatprep.subr.bf16.mxu1 %v6235_v55  ;;  %6304 = vmatprep.subr.bf16.mxu0 %v6303_v56  ;;  %v6255_v55 = vpack.c.bf16 %v992_v46, %v985_v45  ;;  %v991_v56 = vld [vmem:[#allocation6 + $0x598] sm:$0xff]  ;;  %v6320_v62 = vpack.c.bf16 %v1699_v53, %v1692_v51  ;;  %v1748_v43 = vld [vmem:[#allocation9 + $0x2a0] sm:$0xff]  ;;  %v1040_v46 = vld [vmem:[#allocation6 + $0x720] sm:$0xff] }
 0x2d7   :  { %v1762_v53 = vld [vmem:[#allocation9 + $0x310] sm:$0xff] }
 0x2d9   :  { %6238 = vmatpush1.bf16.msra.mxu1 %v6237_v63  ;;  %6306 = vmatpush3.bf16.msra.mxu0 %v6305_v1  ;;  %v6257_v63 = vpack.c.bf16 %v991_v56, %v984_v49  ;;  %v998_v1 = vld [vmem:[#allocation6 + $0x5d0] sm:$0xff]  ;;  %v1770_v49 = vld [vmem:[#allocation9 + $0x350] sm:$0xff] }
 0x2da   :  { %6240 = vmatprep.subr.bf16.mxu1 %v6239_v3  ;;  %6307 = vmatprep.subr.bf16.mxu0 %v7959_v59  ;;  %v1706_v3 = vld [vmem:[#allocation9 + $0x150] sm:$0xff]  ;;  %v6261_v16 = vpack.c.bf16 %v1005_v8, %v998_v1 }
 0x2dc   :  { %1589 = vmatmul.mubr.f32.vlgmr.msra.gmra.mrb[10].mxu0 %v8684_v7 }
 0x2dd   :  { %6242 = vmatpush1.bf16.msra.mxu1 %v6241_v11  ;;  %6309 = vmatpush3.bf16.msra.mxu0 %v6308_v12  ;;  %v1013_v11 = vld [vmem:[#allocation6 + $0x648] sm:$0xff]  ;;  %v1020_v12 = vld [vmem:[#allocation6 + $0x680] sm:$0xff] }
 0x2de   :  { %6244 = vmatprep.subr.bf16.mxu1 %v6243_v14  ;;  %5872 = vmatprep.subr.mxu0 %v7960_v4  ;;  %v6324_v14 = vpack.c.bf16 %v1713_v5, %v1706_v3  ;;  %v6263_v22 = vpack.c.bf16 %v1020_v12, %v1013_v11  ;;  %v6342_v3 = vpack.c.bf16 %v1784_v58, %v1777_v57  ;;  %v1776_v5 = vld [vmem:[#allocation9 + $0x380] sm:$0xff]  ;;  %v1798_v11 = vld [vmem:[#allocation9 + $0x430] sm:$0xff]  ;;  %v1681_v12 = vld [vmem:[#allocation9 + $0x88] sm:$0xff] }
 0x2df   :  { %5874 = vmatprep.mubr.msk.f32.mxu0 %vm7961_vm3, %v7960_v4  ;;  %v1832_v57 = vld [vmem:[#allocation9 + $0x540] sm:$0xff]  ;;  %v1839_v58 = vld [vmem:[#allocation9 + $0x578] sm:$0xff] }
 0x2e1   :  { %6246 = vmatpush1.bf16.msra.mxu1 %v6245_v24  ;;  %5873 = vmatpush3.msra.mxu0 %v1056_v21  ;;  %v1727_v21 = vld [vmem:[#allocation9 + $0x1f8] sm:$0xff] }
 0x2e2   :  { %5875 = vmatmul.mubr.msk.f32.vlgmr.msra.gmra.mrb[12].mxu0 %vm1094_vm4, %v8696_v36  ;;  %6248 = vmatprep.subr.bf16.mxu1 %v6247_v27  ;;  %v1735_v24 = vld [vmem:[#allocation9 + $0x238] sm:$0xff]  ;;  %v6328_v27 = vpack.c.bf16 %v1727_v21, %v1720_v19  ;;  %v1790_v19 = vld [vmem:[#allocation9 + $0x3f0] sm:$0xff]  ;;  %v1797_v21 = vld [vmem:[#allocation9 + $0x428] sm:$0xff] }
 0x2e3   :  { %6311 = vmatprep.subr.bf16.mxu0 %v6310_v33  ;;  %v6330_v30 = vpack.c.bf16 %v1742_v25, %v1735_v24  ;;  %v6267_v33 = vpack.c.bf16 %v1034_v26, %v1027_v15  ;;  %v1805_v24 = vld [vmem:[#allocation9 + $0x468] sm:$0xff]  ;;  %v1812_v25 = vld [vmem:[#allocation9 + $0x4a0] sm:$0xff]  ;;  %v1695_v15 = vld [vmem:[#allocation9 + $0xf8] sm:$0xff] }
 0x2e4   :  { %6313 = vmatpush1.bf16.msra.mxu0 %v6312_v34  ;;  %v1033_v34 = vld [vmem:[#allocation6 + $0x6e8] sm:$0xff]  ;;  %v1702_v26 = vld [vmem:[#allocation9 + $0x130] sm:$0xff] }
 0x2e5   :  { %6250 = vmatpush1.bf16.msra.mxu1 %v6249_v35  ;;  %6315 = vmatprep.subr.bf16.mxu0 %v6314_v38  ;;  %v1749_v35 = vld [vmem:[#allocation9 + $0x2a8] sm:$0xff]  ;;  %v1041_v38 = vld [vmem:[#allocation6 + $0x728] sm:$0xff] }
 0x2e6   :  { %6252 = vmatprep.subr.bf16.mxu1 %v6251_v41  ;;  %v6269_v41 = vpack.c.bf16 %v1033_v34, %v1026_v29  ;;  %v6334_v42 = vpack.c.bf16 %v1756_v37, %v1749_v35  ;;  %v6271_v45 = vpack.c.bf16 %v1048_v39, %v1041_v38  ;;  %v1694_v29 = vld [vmem:[#allocation9 + $0xf0] sm:$0xff]  ;;  %v1701_v34 = vld [vmem:[#allocation9 + $0x128] sm:$0xff]  ;;  %v1819_v35 = vld [vmem:[#allocation9 + $0x4d8] sm:$0xff] }
 0x2e7   :  { %v1826_v37 = vld [vmem:[#allocation9 + $0x510] sm:$0xff]  ;;  %v1709_v38 = vld [vmem:[#allocation9 + $0x168] sm:$0xff]  ;;  %v1716_v39 = vld [vmem:[#allocation9 + $0x1a0] sm:$0xff] }
 0x2e8   :  { %6317 = vmatpush1.bf16.msra.mxu0 %v6316_v47  ;;  %v1047_v47 = vld [vmem:[#allocation6 + $0x758] sm:$0xff] }
 0x2e9   :  { %6254 = vmatpush1.bf16.msra.mxu1 %v6253_v48  ;;  %6319 = vmatprep.subr.bf16.mxu0 %v6318_v50  ;;  %v1763_v48 = vld [vmem:[#allocation9 + $0x318] sm:$0xff]  ;;  %v6336_v50 = vpack.c.bf16 %v1755_v44, %v1748_v43  ;;  %v6273_v51 = vpack.c.bf16 %v1047_v47, %v1040_v46  ;;  %v1818_v43 = vld [vmem:[#allocation9 + $0x4d0] sm:$0xff]  ;;  %v1825_v44 = vld [vmem:[#allocation9 + $0x508] sm:$0xff] }
 0x2ea   :  { %6256 = vmatprep.subr.bf16.mxu1 %v6255_v55  ;;  %v1769_v55 = vld [vmem:[#allocation9 + $0x348] sm:$0xff]  ;;  %v6338_v56 = vpack.c.bf16 %v1770_v49, %v1763_v48  ;;  %v1715_v46 = vld [vmem:[#allocation9 + $0x198] sm:$0xff]  ;;  %v1840_v48 = vld [vmem:[#allocation9 + $0x580] sm:$0xff] }
 0x2eb   :  { %v6340_v1 = vpack.c.bf16 %v1769_v55, %v1762_v53  ;;  %v1833_v47 = vld [vmem:[#allocation9 + $0x548] sm:$0xff]  ;;  %v1723_v49 = vld [vmem:[#allocation9 + $0x1d8] sm:$0xff]  ;;  %v1722_v55 = vld [vmem:[#allocation9 + $0x1d0] sm:$0xff] }
 0x2ec   :  { %6321 = vmatpush1.bf16.msra.mxu0 %v6320_v62  ;;  %v1674_v62 = vld [vmem:[#allocation9 + $0x50] sm:$0xff] }
 0x2ed   :  { %6258 = vmatpush1.bf16.msra.mxu1 %v6257_v63  ;;  %6323 = vmatprep.subr.bf16.mxu0 %v6322_v2  ;;  %v1054_v63 = vld [vmem:[#allocation6 + $0x790] sm:$0xff]  ;;  %v1666_v2 = vld [vmem:[#allocation9 + $0x10] sm:$0xff]  ;;  %v6506_v8 = vpack.c.bf16 %v1674_v62, %v1667_v61  ;;  %v1729_v61 = vld [vmem:[#allocation9 + $0x208] sm:$0xff] }
 0x2ee   :  { %6260 = vmatprep.subr.bf16.mxu1 %v6259_v6  ;;  %v1783_v6 = vld [vmem:[#allocation9 + $0x3b8] sm:$0xff] }
 0x2ef   :  { %v1847_v62 = vld [vmem:[#allocation9 + $0x5b8] sm:$0xff] }
 0x2f0   :  { %6325 = vmatpush1.bf16.msra.mxu0 %v6324_v14  ;;  %v1688_v14 = vld [vmem:[#allocation9 + $0xc0] sm:$0xff] }
 0x2f1   :  { %6262 = vmatpush1.bf16.msra.mxu1 %v6261_v16  ;;  %6327 = vmatprep.subr.bf16.mxu0 %v6326_v18  ;;  %v6508_v16 = vpack.c.bf16 %v1673_v9, %v1666_v2  ;;  %v6346_v18 = vpack.c.bf16 %v1798_v11, %v1791_v10  ;;  %v1744_v2 = vld [vmem:[#allocation9 + $0x280] sm:$0xff]  ;;  %v1846_v9 = vld [vmem:[#allocation9 + $0x5b0] sm:$0xff]  ;;  %v1853_v10 = vld [vmem:[#allocation9 + $0x5e8] sm:$0xff] }
 0x2f2   :  { %6264 = vmatprep.subr.bf16.mxu1 %v6263_v22  ;;  %v6510_v22 = vpack.c.bf16 %v1688_v14, %v1681_v12  ;;  %v1743_v12 = vld [vmem:[#allocation9 + $0x278] sm:$0xff]  ;;  %v1861_v14 = vld [vmem:[#allocation9 + $0x628] sm:$0xff] }
 0x2f4   :  { %6329 = vmatpush1.bf16.msra.mxu0 %v6328_v27  ;;  %v6348_v27 = vpack.c.bf16 %v1797_v21, %v1790_v19  ;;  %v1750_v21 = vld [vmem:[#allocation9 + $0x2b0] sm:$0xff] }
 0x2f5   :  { %6266 = vmatpush1.bf16.msra.mxu1 %v6265_v28  ;;  %6331 = vmatprep.subr.bf16.mxu0 %v6330_v30  ;;  %v6512_v28 = vpack.c.bf16 %v1687_v23, %v1680_v17  ;;  %v6350_v30 = vpack.c.bf16 %v1812_v25, %v1805_v24  ;;  %v1758_v17 = vld [vmem:[#allocation9 + $0x2f0] sm:$0xff]  ;;  %v1860_v23 = vld [vmem:[#allocation9 + $0x620] sm:$0xff]  ;;  %v1867_v24 = vld [vmem:[#allocation9 + $0x658] sm:$0xff] }
 0x2f6   :  { %6268 = vmatprep.subr.bf16.mxu1 %v6267_v33  ;;  %v6514_v33 = vpack.c.bf16 %v1702_v26, %v1695_v15  ;;  %v1757_v15 = vld [vmem:[#allocation9 + $0x2e8] sm:$0xff]  ;;  %v1875_v26 = vld [vmem:[#allocation9 + $0x698] sm:$0xff] }
 0x2f8   :  { %6333 = vmatpush1.bf16.msra.mxu0 %v6332_v40  ;;  %v6352_v40 = vpack.c.bf16 %v1811_v32, %v1804_v31  ;;  %v6532_v31 = vpack.c.bf16 %v1757_v15, %v1750_v21  ;;  %v1764_v32 = vld [vmem:[#allocation9 + $0x320] sm:$0xff]  ;;  %v1855_v21 = vld [vmem:[#allocation9 + $0x5f8] sm:$0xff]  ;;  %v1862_v15 = vld [vmem:[#allocation9 + $0x630] sm:$0xff] }
 0x2f9   :  { %6270 = vmatpush1.bf16.msra.mxu1 %v6269_v41  ;;  %6335 = vmatprep.subr.bf16.mxu0 %v6334_v42  ;;  %v1708_v41 = vld [vmem:[#allocation9 + $0x160] sm:$0xff]  ;;  %v6354_v42 = vpack.c.bf16 %v1826_v37, %v1819_v35  ;;  %v1881_v35 = vld [vmem:[#allocation9 + $0x6c8] sm:$0xff] }
 0x2fa   :  { %6272 = vmatprep.subr.bf16.mxu1 %v6271_v45  ;;  %v6518_v45 = vpack.c.bf16 %v1716_v39, %v1709_v38  ;;  %v6520_v53 = vpack.c.bf16 %v1715_v46, %v1708_v41  ;;  %v1771_v38 = vld [vmem:[#allocation9 + $0x358] sm:$0xff]  ;;  %v1889_v39 = vld [vmem:[#allocation9 + $0x708] sm:$0xff]  ;;  %v1786_v41 = vld [vmem:[#allocation9 + $0x3d0] sm:$0xff] }
 0x2fb   :  { %v1778_v46 = vld [vmem:[#allocation9 + $0x390] sm:$0xff] }
 0x2fc   :  { %1447 = vmatmul.mubr.f32.vlgmr.msra.gmra.mrb[6].mxu1 %v8684_v7  ;;  %6337 = vmatpush1.bf16.msra.mxu0 %v6336_v50  ;;  %v6344_v7 = vpack.c.bf16 %v1783_v6, %v1776_v5  ;;  %v1730_v50 = vld [vmem:[#allocation9 + $0x210] sm:$0xff]  ;;  %v6524_v5 = vpack.c.bf16 %v1729_v61, %v1722_v55  ;;  %v1736_v6 = vld [vmem:[#allocation9 + $0x240] sm:$0xff]  ;;  %v1799_v55 = vld [vmem:[#allocation9 + $0x438] sm:$0xff] }
 0x2fd   :  { %6274 = vmatpush1.bf16.msra.mxu1 %v6273_v51  ;;  %1517 = vmatprep.mubr.f32.mxu1 %v7960_v4  ;;  %v6356_v51 = vpack.c.bf16 %v1825_v44, %v1818_v43  ;;  %v6528_v19 = vpack.c.bf16 %v1743_v12, %v1736_v6  ;;  %v6536_v43 = vpack.c.bf16 %v1771_v38, %v1764_v32  ;;  %v1806_v61 = vld [vmem:[#allocation9 + $0x470] sm:$0xff]  ;;  %v1827_v6 = vld [vmem:[#allocation9 + $0x518] sm:$0xff] }
 0x2fe   :  { %1457 = vmatprep.subr.mxu1 %v1055_v60  ;;  %6339 = vmatprep.subr.bf16.mxu0 %v6338_v56  ;;  %v6358_v56 = vpack.c.bf16 %v1840_v48, %v1833_v47  ;;  %v6522_v60 = vpack.c.bf16 %v1730_v50, %v1723_v49  ;;  %v1785_v47 = vld [vmem:[#allocation9 + $0x3c8] sm:$0xff]  ;;  %v1800_v49 = vld [vmem:[#allocation9 + $0x440] sm:$0xff]  ;;  %v1834_v12 = vld [vmem:[#allocation9 + $0x550] sm:$0xff] }
 0x2ff   :  { %v1793_v48 = vld [vmem:[#allocation9 + $0x408] sm:$0xff]  ;;  %v6540_v50 = vpack.c.bf16 %v1785_v47, %v1778_v46  ;;  %v1883_v32 = vld [vmem:[#allocation9 + $0x6d8] sm:$0xff] }
 0x300   :  { %6341 = vmatpush1.bf16.msra.mxu0 %v6340_v1  ;;  %v1737_v1 = vld [vmem:[#allocation9 + $0x248] sm:$0xff]  ;;  %v8715_v38 = vld [vmem:[#allocation7] sm:$0x7f] }
 0x301   :  { %1458 = vmatpush1.msra.mxu1 %v1054_v63  ;;  %6343 = vmatprep.subr.bf16.mxu0 %v6342_v3  ;;  %v1854_v63 = vld [vmem:[#allocation9 + $0x5f0] sm:$0xff]  ;;  %v6360_v3 = vpack.c.bf16 %v1839_v58, %v1832_v57  ;;  %v6526_v11 = vpack.c.bf16 %v1744_v2, %v1737_v1  ;;  %v1828_v1 = vld [vmem:[#allocation9 + $0x520] sm:$0xff]  ;;  %v1903_v47 = vld [vmem:[#allocation9 + $0x778] sm:$0xff] }
 0x302   :  { %6507 = vmatprep.subr.bf16.mxu1 %v6506_v8  ;;  %v6362_v8 = vpack.c.bf16 %v1854_v63, %v1847_v62  ;;  %v1814_v57 = vld [vmem:[#allocation9 + $0x4b0] sm:$0xff]  ;;  %v1813_v62 = vld [vmem:[#allocation9 + $0x4a8] sm:$0xff] }
 0x303   :  { %v1821_v63 = vld [vmem:[#allocation9 + $0x4e8] sm:$0xff]  ;;  %v6548_v2 = vpack.c.bf16 %v1813_v62, %v1806_v61 }
 0x304   :  { %5455 = vmatmul.mubr.msk.f32.vlgmr.msra.gmra.mrb[6].mxu1 %vm1094_vm4, %v8696_v36  ;;  %6345 = vmatpush1.bf16.msra.mxu0 %v6344_v7  ;;  %v6516_v36 = vpack.c.bf16 %v1701_v34, %v1694_v29  ;;  %v1868_v7 = vld [vmem:[#allocation9 + $0x660] sm:$0xff]  ;;  %v1874_v34 = vld [vmem:[#allocation9 + $0x690] sm:$0xff]  ;;  %v1909_v61 = vld [vmem:[#allocation9 + $0x7a8] sm:$0xff] }
 0x305   :  { %6509 = vmatpush1.bf16.msra.mxu1 %v6508_v16  ;;  %6347 = vmatprep.subr.bf16.mxu0 %v6346_v18  ;;  %v1751_v16 = vld [vmem:[#allocation9 + $0x2b8] sm:$0xff]  ;;  %v6364_v18 = vpack.c.bf16 %v1853_v10, %v1846_v9  ;;  %v1772_v29 = vld [vmem:[#allocation9 + $0x360] sm:$0xff]  ;;  %v1842_v9 = vld [vmem:[#allocation9 + $0x590] sm:$0xff] }
 0x306   :  { %6511 = vmatprep.subr.bf16.mxu1 %v6510_v22  ;;  %v6366_v22 = vpack.c.bf16 %v1868_v7, %v1861_v14  ;;  %v6530_v25 = vpack.c.bf16 %v1758_v17, %v1751_v16  ;;  %v1841_v14 = vld [vmem:[#allocation9 + $0x588] sm:$0xff]  ;;  %v1856_v16 = vld [vmem:[#allocation9 + $0x600] sm:$0xff] }
 0x307   :  { %v1849_v7 = vld [vmem:[#allocation9 + $0x5c8] sm:$0xff]  ;;  %v6556_v17 = vpack.c.bf16 %v1841_v14, %v1834_v12  ;;  %v1916_v14 = vld [vmem:[#allocation9 + $0x7e0] sm:$0xff] }
 0x308   :  { %6349 = vmatpush1.bf16.msra.mxu0 %v6348_v27  ;;  %v1882_v27 = vld [vmem:[#allocation9 + $0x6d0] sm:$0xff] }
 0x309   :  { %6513 = vmatpush1.bf16.msra.mxu1 %v6512_v28  ;;  %6351 = vmatprep.subr.bf16.mxu0 %v6350_v30  ;;  %v1765_v28 = vld [vmem:[#allocation9 + $0x328] sm:$0xff]  ;;  %v6368_v30 = vpack.c.bf16 %v1867_v24, %v1860_v23  ;;  %v1870_v23 = vld [vmem:[#allocation9 + $0x670] sm:$0xff] }
 0x30a   :  { %6515 = vmatprep.subr.bf16.mxu1 %v6514_v33  ;;  %v6370_v33 = vpack.c.bf16 %v1882_v27, %v1875_v26  ;;  %v6534_v37 = vpack.c.bf16 %v1772_v29, %v1765_v28  ;;  %v1869_v26 = vld [vmem:[#allocation9 + $0x668] sm:$0xff]  ;;  %v1884_v28 = vld [vmem:[#allocation9 + $0x6e0] sm:$0xff] }
 0x30b   :  { %v1877_v27 = vld [vmem:[#allocation9 + $0x6a8] sm:$0xff]  ;;  %v6564_v29 = vpack.c.bf16 %v1869_v26, %v1862_v15  ;;  %v1930_v26 = vld [vmem:[#allocation9 + $0x850] sm:$0xff] }
 0x30c   :  { %6353 = vmatpush1.bf16.msra.mxu0 %v6352_v40  ;;  %v1896_v40 = vld [vmem:[#allocation9 + $0x740] sm:$0xff] }
 0x30d   :  { %6517 = vmatpush1.bf16.msra.mxu1 %v6516_v36  ;;  %6355 = vmatprep.subr.bf16.mxu0 %v6354_v42  ;;  %v1779_v36 = vld [vmem:[#allocation9 + $0x398] sm:$0xff]  ;;  %v6372_v42 = vpack.c.bf16 %v1881_v35, %v1874_v34  ;;  %v6374_v44 = vpack.c.bf16 %v1896_v40, %v1889_v39  ;;  %v1898_v34 = vld [vmem:[#allocation9 + $0x750] sm:$0xff]  ;;  %v8718_v39 = vsub.s32 3, %v8253_v0  ;;  %v1066_v40 = vrot.slane %v8715_v38, %v8678_v54 }
 0x30e   :  { %6519 = vmatprep.subr.bf16.mxu1 %v6518_v45  ;;  %v6538_v45 = vpack.c.bf16 %v1786_v41, %v1779_v36  ;;  %v1888_v36 = vld [vmem:[#allocation9 + $0x700] sm:$0xff]  ;;  %v1062_v41 = vrot.slane %v8715_v38, %v8675_v52 }
 0x310   :  { %6357 = vmatpush1.bf16.msra.mxu0 %v6356_v51  ;;  %v6542_v51 = vpack.c.bf16 %v1800_v49, %v1793_v48  ;;  %v1074_v49 = vrot.slane %v8715_v38, %v8718_v39 }
 0x311   :  { %6521 = vmatpush1.bf16.msra.mxu1 %v6520_v53  ;;  %6359 = vmatprep.subr.bf16.mxu0 %v6358_v56  ;;  %v1792_v53 = vld [vmem:[#allocation9 + $0x400] sm:$0xff]  ;;  %v1807_v56 = vld [vmem:[#allocation9 + $0x478] sm:$0xff] }
 0x312   :  { %6523 = vmatprep.subr.bf16.mxu1 %v6522_v60  ;;  %v6544_v58 = vpack.c.bf16 %v1799_v55, %v1792_v53  ;;  %v6546_v60 = vpack.c.bf16 %v1814_v57, %v1807_v56  ;;  %v1905_v53 = vld [vmem:[#allocation9 + $0x788] sm:$0xff]  ;;  %v1912_v55 = vld [vmem:[#allocation9 + $0x7c0] sm:$0xff] }
 0x314   :  { %6361 = vmatpush1.bf16.msra.mxu0 %v6360_v3  ;;  %v6550_v3 = vpack.c.bf16 %v1828_v1, %v1821_v63  ;;  %v1904_v63 = vld [vmem:[#allocation9 + $0x780] sm:$0xff]  ;;  %v1911_v1 = vld [vmem:[#allocation9 + $0x7b8] sm:$0xff] }
 0x315   :  { %6525 = vmatpush1.bf16.msra.mxu1 %v6524_v5  ;;  %6363 = vmatprep.subr.bf16.mxu0 %v6362_v8  ;;  %v1820_v5 = vld [vmem:[#allocation9 + $0x4e0] sm:$0xff]  ;;  %v1835_v8 = vld [vmem:[#allocation9 + $0x558] sm:$0xff]  ;;  %v6576_v12 = vpack.c.bf16 %v1911_v1, %v1904_v63  ;;  %v1973_v1 = vld [vmem:[#allocation9 + $0x9a8] sm:$0xff] }
 0x316   :  { %6527 = vmatprep.subr.bf16.mxu1 %v6526_v11  ;;  %v6552_v10 = vpack.c.bf16 %v1827_v6, %v1820_v5  ;;  %v6554_v11 = vpack.c.bf16 %v1842_v9, %v1835_v8  ;;  %v6574_v5 = vpack.c.bf16 %v1912_v55, %v1905_v53  ;;  %v1924_v6 = vld [vmem:[#allocation9 + $0x820] sm:$0xff]  ;;  %v1919_v8 = vld [vmem:[#allocation9 + $0x7f8] sm:$0xff]  ;;  %v1926_v9 = vld [vmem:[#allocation9 + $0x830] sm:$0xff] }
 0x317   :  { %v1958_v55 = vld [vmem:[#allocation9 + $0x930] sm:$0xff]  ;;  %v1967_v63 = vld [vmem:[#allocation9 + $0x978] sm:$0xff] }
 0x318   :  { %6365 = vmatpush1.bf16.msra.mxu0 %v6364_v18  ;;  %v6558_v18 = vpack.c.bf16 %v1856_v16, %v1849_v7  ;;  %v1923_v7 = vld [vmem:[#allocation9 + $0x818] sm:$0xff] }
 0x319   :  { %6529 = vmatpush1.bf16.msra.mxu1 %v6528_v19  ;;  %6367 = vmatprep.subr.bf16.mxu0 %v6366_v22  ;;  %v1848_v19 = vld [vmem:[#allocation9 + $0x5c0] sm:$0xff]  ;;  %v1863_v22 = vld [vmem:[#allocation9 + $0x638] sm:$0xff] }
 0x31a   :  { %6531 = vmatprep.subr.bf16.mxu1 %v6530_v25  ;;  %v6560_v24 = vpack.c.bf16 %v1855_v21, %v1848_v19  ;;  %v6562_v25 = vpack.c.bf16 %v1870_v23, %v1863_v22  ;;  %v1925_v19 = vld [vmem:[#allocation9 + $0x828] sm:$0xff]  ;;  %v1931_v21 = vld [vmem:[#allocation9 + $0x858] sm:$0xff]  ;;  %v1938_v22 = vld [vmem:[#allocation9 + $0x890] sm:$0xff] }
 0x31b   :  { %v1933_v23 = vld [vmem:[#allocation9 + $0x868] sm:$0xff] }
 0x31c   :  { %6369 = vmatpush1.bf16.msra.mxu0 %v6368_v30  ;;  %v6566_v30 = vpack.c.bf16 %v1884_v28, %v1877_v27  ;;  %v1937_v27 = vld [vmem:[#allocation9 + $0x888] sm:$0xff]  ;;  %v6386_v28 = vpack.c.bf16 %v1938_v22, %v1931_v21  ;;  %v1996_v21 = vld [vmem:[#allocation9 + $0xa60] sm:$0xff] }
 0x31d   :  { %6533 = vmatpush1.bf16.msra.mxu1 %v6532_v31  ;;  %6371 = vmatprep.subr.bf16.mxu0 %v6370_v33  ;;  %v1876_v31 = vld [vmem:[#allocation9 + $0x6a0] sm:$0xff]  ;;  %v1891_v33 = vld [vmem:[#allocation9 + $0x718] sm:$0xff] }
 0x31e   :  { %6535 = vmatprep.subr.bf16.mxu1 %v6534_v37  ;;  %v6568_v35 = vpack.c.bf16 %v1883_v32, %v1876_v31  ;;  %v6570_v37 = vpack.c.bf16 %v1898_v34, %v1891_v33  ;;  %v1939_v31 = vld [vmem:[#allocation9 + $0x898] sm:$0xff]  ;;  %v1945_v32 = vld [vmem:[#allocation9 + $0x8c8] sm:$0xff]  ;;  %v1952_v33 = vld [vmem:[#allocation9 + $0x900] sm:$0xff] }
 0x31f   :  { %v1947_v34 = vld [vmem:[#allocation9 + $0x8d8] sm:$0xff] }
 0x320   :  { %6373 = vmatpush1.bf16.msra.mxu0 %v6372_v42  ;;  %v1895_v42 = vld [vmem:[#allocation9 + $0x738] sm:$0xff] }
 0x321   :  { %6537 = vmatpush1.bf16.msra.mxu1 %v6536_v43  ;;  %6375 = vmatprep.subr.bf16.mxu0 %v6374_v44  ;;  %v1890_v43 = vld [vmem:[#allocation9 + $0x710] sm:$0xff]  ;;  %v1897_v44 = vld [vmem:[#allocation9 + $0x748] sm:$0xff]  ;;  %v6376_v57 = vpack.c.bf16 %v1895_v42, %v1888_v36  ;;  %v1944_v36 = vld [vmem:[#allocation9 + $0x8c0] sm:$0xff]  ;;  %v6390_v42 = vpack.c.bf16 %v1952_v33, %v1945_v32  ;;  %v8741_v33 = vsub.s32 6, %v8253_v0 }
 0x322   :  { %6539 = vmatprep.subr.bf16.mxu1 %v6538_v45  ;;  %v2010_v32 = vld [vmem:[#allocation9 + $0xad0] sm:$0xff] }
 0x325   :  { %6541 = vmatpush1.bf16.msra.mxu1 %v6540_v50 }
 0x326   :  { %6543 = vmatprep.subr.bf16.mxu1 %v6542_v51  ;;  %v1910_v51 = vld [vmem:[#allocation9 + $0x7b0] sm:$0xff] }
 0x329   :  { %6545 = vmatpush1.bf16.msra.mxu1 %v6544_v58  ;;  %v6572_v58 = vpack.c.bf16 %v1897_v44, %v1890_v43  ;;  %v1946_v44 = vld [vmem:[#allocation9 + $0x8d0] sm:$0xff] }
 0x32a   :  { %6547 = vmatprep.subr.bf16.mxu1 %v6546_v60  ;;  %v1902_v60 = vld [vmem:[#allocation9 + $0x770] sm:$0xff] }
 0x32d   :  { %6549 = vmatpush1.bf16.msra.mxu1 %v6548_v2  ;;  %v1917_v2 = vld [vmem:[#allocation9 + $0x7e8] sm:$0xff] }
 0x32e   :  { %6551 = vmatprep.subr.bf16.mxu1 %v6550_v3  ;;  %v6378_v3 = vpack.c.bf16 %v1910_v51, %v1903_v47  ;;  %v6382_v16 = vpack.c.bf16 %v1924_v6, %v1917_v2  ;;  %v1959_v47 = vld [vmem:[#allocation9 + $0x938] sm:$0xff]  ;;  %v1980_v2 = vld [vmem:[#allocation9 + $0x9e0] sm:$0xff] }
 0x331   :  { %6553 = vmatpush1.bf16.msra.mxu1 %v6552_v10 }
 0x332   :  { %6555 = vmatprep.subr.bf16.mxu1 %v6554_v11  ;;  %v6380_v11 = vpack.c.bf16 %v1909_v61, %v1902_v60  ;;  %v1960_v61 = vld [vmem:[#allocation9 + $0x940] sm:$0xff] }
 0x335   :  { %6557 = vmatpush1.bf16.msra.mxu1 %v6556_v17  ;;  %v6578_v17 = vpack.c.bf16 %v1926_v9, %v1919_v8  ;;  %v6592_v8 = vpack.c.bf16 %v1967_v63, %v1960_v61  ;;  %v1972_v9 = vld [vmem:[#allocation9 + $0x9a0] sm:$0xff] }
 0x336   :  { %6559 = vmatprep.subr.bf16.mxu1 %v6558_v18  ;;  %v1918_v18 = vld [vmem:[#allocation9 + $0x7f0] sm:$0xff] }
 0x337   :  { %v6580_v15 = vpack.c.bf16 %v1925_v19, %v1918_v18  ;;  %v1994_v18 = vld [vmem:[#allocation9 + $0xa50] sm:$0xff]  ;;  %v1989_v19 = vld [vmem:[#allocation9 + $0xa28] sm:$0xff] }
 0x339   :  { %6561 = vmatpush1.bf16.msra.mxu1 %v6560_v24  ;;  %v1940_v24 = vld [vmem:[#allocation9 + $0x8a0] sm:$0xff] }
 0x33a   :  { %6563 = vmatprep.subr.bf16.mxu1 %v6562_v25  ;;  %v6384_v25 = vpack.c.bf16 %v1923_v7, %v1916_v14  ;;  %v1974_v7 = vld [vmem:[#allocation9 + $0x9b0] sm:$0xff] }
 0x33d   :  { %6565 = vmatpush1.bf16.msra.mxu1 %v6564_v29  ;;  %v6582_v29 = vpack.c.bf16 %v1940_v24, %v1933_v23  ;;  %v1986_v24 = vld [vmem:[#allocation9 + $0xa10] sm:$0xff] }
 0x33e   :  { %6567 = vmatprep.subr.bf16.mxu1 %v6566_v30  ;;  %v1932_v30 = vld [vmem:[#allocation9 + $0x860] sm:$0xff] }
 0x341   :  { %6569 = vmatpush1.bf16.msra.mxu1 %v6568_v35  ;;  %v1954_v35 = vld [vmem:[#allocation9 + $0x910] sm:$0xff] }
 0x342   :  { %6571 = vmatprep.subr.bf16.mxu1 %v6570_v37  ;;  %v6388_v37 = vpack.c.bf16 %v1937_v27, %v1930_v26  ;;  %v6586_v43 = vpack.c.bf16 %v1954_v35, %v1947_v34  ;;  %v6598_v26 = vpack.c.bf16 %v1996_v21, %v1989_v19  ;;  %v1988_v27 = vld [vmem:[#allocation9 + $0xa20] sm:$0xff] }
 0x38f   :  { %v1235_v45 = vpop.f32.mrb[4].mxu1  ;;  %v8724_v46 = vpop.f32.mrb[8].mxu0 }
 0x390   :  { %v1237_v48 = vpop.f32.mrb[5].mxu1  ;;  %v1379_v50 = vpop.f32.mrb[9].mxu0  ;;  %v8730_v62 = vadd.f32 %v1235_v45, %v1062_v41  ;;  %v1951_v41 = vld [vmem:[#allocation9 + $0x8f8] sm:$0xff]  ;;  %v1953_v45 = vld [vmem:[#allocation9 + $0x908] sm:$0xff] }
 0x391   :  { %v8728_v56 = vadd.f32 %v1237_v48, %v1066_v40  ;;  %v8734_v10 = vadd.f32 %v1379_v50, %v1074_v49  ;;  %v6584_v40 = vpack.c.bf16 %v1939_v31, %v1932_v30  ;;  %v1966_v48 = vld [vmem:[#allocation9 + $0x970] sm:$0xff]  ;;  %v1961_v49 = vld [vmem:[#allocation9 + $0x948] sm:$0xff]  ;;  %v1968_v50 = vld [vmem:[#allocation9 + $0x980] sm:$0xff]  ;;  %v6392_v51 = vpack.c.bf16 %v1951_v41, %v1944_v36 }
 0x392   :  { %v6588_v53 = vpack.c.bf16 %v1953_v45, %v1946_v44  ;;  %v6590_v60 = vpack.c.bf16 %v1968_v50, %v1961_v49  ;;  %v2008_v30 = vld [vmem:[#allocation9 + $0xac0] sm:$0xff]  ;;  %v2003_v31 = vld [vmem:[#allocation9 + $0xa98] sm:$0xff]  ;;  %v2017_v49 = vld [vmem:[#allocation9 + $0xb08] sm:$0xff] }
 0x393   :  { %2455 = vmatprep.mubr.f32.mxu0 %v8728_v56  ;;  %2739 = vmatprep.mubr.f32.mxu1 %v8728_v56  ;;  %v6602_v41 = vpack.c.bf16 %v2010_v32, %v2003_v31  ;;  %v2015_v44 = vld [vmem:[#allocation9 + $0xaf8] sm:$0xff]  ;;  %v2024_v50 = vld [vmem:[#allocation9 + $0xb40] sm:$0xff] }
 0x394   :  { %2456 = vmatmul.mubr.f32.vlgmr.msra.gmra.mrb[14].mxu0 %v8730_v62  ;;  %2740 = vmatmul.mubr.f32.vlgmr.msra.gmra.mrb[8].mxu1 %v8730_v62  ;;  %v6606_v63 = vpack.c.bf16 %v2024_v50, %v2017_v49  ;;  %v2058_v49 = vld [vmem:[#allocation9 + $0xc50] sm:$0xff]  ;;  %v2065_v50 = vld [vmem:[#allocation9 + $0xc88] sm:$0xff] }
 0x395   :  { %6377 = vmatpush1.bf16.msra.mxu0 %v6376_v57  ;;  %6573 = vmatpush1.bf16.msra.mxu1 %v6572_v58  ;;  %v1965_v57 = vld [vmem:[#allocation9 + $0x968] sm:$0xff]  ;;  %v6394_v58 = vpack.c.bf16 %v1966_v48, %v1959_v47  ;;  %v1086_v47 = vrot.slane %v8715_v38, %v8741_v33  ;;  %v2022_v48 = vld [vmem:[#allocation9 + $0xb30] sm:$0xff] }
 0x396   :  { %2526 = vmatprep.mubr.f32.mxu0 %v8734_v10  ;;  %2810 = vmatprep.mubr.f32.mxu1 %v8734_v10  ;;  %v6396_v6 = vpack.c.bf16 %v1965_v57, %v1958_v55  ;;  %v6410_v61 = vpack.c.bf16 %v2022_v48, %v2015_v44  ;;  %v2056_v44 = vld [vmem:[#allocation9 + $0xc40] sm:$0xff] }
 0x397   :  { %6379 = vmatprep.subr.bf16.mxu0 %v6378_v3  ;;  %6575 = vmatprep.subr.bf16.mxu1 %v6574_v5  ;;  %v1975_v3 = vld [vmem:[#allocation9 + $0x9b8] sm:$0xff]  ;;  %v1982_v5 = vld [vmem:[#allocation9 + $0x9f0] sm:$0xff] }
 0x398   :  { %v6594_v14 = vpack.c.bf16 %v1982_v5, %v1975_v3  ;;  %v2029_v3 = vld [vmem:[#allocation9 + $0xb68] sm:$0xff] }
 0x399   :  { %6381 = vmatpush1.bf16.msra.mxu0 %v6380_v11  ;;  %6577 = vmatpush1.bf16.msra.mxu1 %v6576_v12  ;;  %v1979_v11 = vld [vmem:[#allocation9 + $0x9d8] sm:$0xff]  ;;  %v6398_v12 = vpack.c.bf16 %v1980_v2, %v1973_v1  ;;  %v2016_v1 = vld [vmem:[#allocation9 + $0xb00] sm:$0xff] }
 0x39a   :  { %6383 = vmatprep.subr.bf16.mxu0 %v6382_v16  ;;  %6579 = vmatprep.subr.bf16.mxu1 %v6578_v17  ;;  %v1981_v16 = vld [vmem:[#allocation9 + $0x9e8] sm:$0xff]  ;;  %v1987_v17 = vld [vmem:[#allocation9 + $0xa18] sm:$0xff]  ;;  %v6400_v22 = vpack.c.bf16 %v1979_v11, %v1972_v9  ;;  %v2038_v9 = vld [vmem:[#allocation9 + $0xbb0] sm:$0xff] }
 0x39b   :  { %v6596_v23 = vpack.c.bf16 %v1981_v16, %v1974_v7  ;;  %v2023_v2 = vld [vmem:[#allocation9 + $0xb38] sm:$0xff]  ;;  %v2028_v7 = vld [vmem:[#allocation9 + $0xb60] sm:$0xff] }
 0x39c   :  { %v2035_v16 = vld [vmem:[#allocation9 + $0xb98] sm:$0xff] }
 0x39d   :  { %6385 = vmatpush1.bf16.msra.mxu0 %v6384_v25  ;;  %6581 = vmatpush1.bf16.msra.mxu1 %v6580_v15  ;;  %v1993_v25 = vld [vmem:[#allocation9 + $0xa48] sm:$0xff]  ;;  %v6402_v15 = vpack.c.bf16 %v1994_v18, %v1987_v17 }
 0x39e   :  { %6387 = vmatprep.subr.bf16.mxu0 %v6386_v28  ;;  %6583 = vmatprep.subr.bf16.mxu1 %v6582_v29  ;;  %v1995_v28 = vld [vmem:[#allocation9 + $0xa58] sm:$0xff]  ;;  %v2001_v29 = vld [vmem:[#allocation9 + $0xa88] sm:$0xff]  ;;  %v6404_v34 = vpack.c.bf16 %v1993_v25, %v1986_v24  ;;  %v2050_v25 = vld [vmem:[#allocation9 + $0xc10] sm:$0xff] }
 0x39f   :  { %v6600_v35 = vpack.c.bf16 %v1995_v28, %v1988_v27  ;;  %v6406_v36 = vpack.c.bf16 %v2008_v30, %v2001_v29  ;;  %v2043_v24 = vld [vmem:[#allocation9 + $0xbd8] sm:$0xff]  ;;  %v6416_v27 = vpack.c.bf16 %v2035_v16, %v2028_v7  ;;  %v2042_v29 = vld [vmem:[#allocation9 + $0xbd0] sm:$0xff]  ;;  %v2049_v30 = vld [vmem:[#allocation9 + $0xc08] sm:$0xff] }
 0x3a0   :  { %v6418_v31 = vpack.c.bf16 %v2050_v25, %v2043_v24  ;;  %v2084_v7 = vld [vmem:[#allocation9 + $0xd20] sm:$0xff]  ;;  %v2091_v16 = vld [vmem:[#allocation9 + $0xd58] sm:$0xff]  ;;  %v2106_v24 = vld [vmem:[#allocation9 + $0xdd0] sm:$0xff] }
 0x3a1   :  { %6389 = vmatpush1.bf16.msra.mxu0 %v6388_v37  ;;  %6585 = vmatpush1.bf16.msra.mxu1 %v6584_v40  ;;  %v2000_v37 = vld [vmem:[#allocation9 + $0xa80] sm:$0xff]  ;;  %v2007_v40 = vld [vmem:[#allocation9 + $0xab8] sm:$0xff]  ;;  %v2101_v25 = vld [vmem:[#allocation9 + $0xda8] sm:$0xff] }
 0x3a2   :  { %6391 = vmatprep.subr.bf16.mxu0 %v6390_v42  ;;  %6587 = vmatprep.subr.bf16.mxu1 %v6586_v43  ;;  %v2002_v42 = vld [vmem:[#allocation9 + $0xa90] sm:$0xff]  ;;  %v2009_v43 = vld [vmem:[#allocation9 + $0xac8] sm:$0xff]  ;;  %v6408_v55 = vpack.c.bf16 %v2007_v40, %v2000_v37  ;;  %v2064_v40 = vld [vmem:[#allocation9 + $0xc80] sm:$0xff] }
 0x3a3   :  { %v6604_v57 = vpack.c.bf16 %v2009_v43, %v2002_v42  ;;  %v2057_v37 = vld [vmem:[#allocation9 + $0xc48] sm:$0xff]  ;;  %v6420_v42 = vpack.c.bf16 %v2049_v30, %v2042_v29 }
 0x3a4   :  { %v2105_v29 = vld [vmem:[#allocation9 + $0xdc8] sm:$0xff] }
 0x3a5   :  { %6393 = vmatpush1.bf16.msra.mxu0 %v6392_v51  ;;  %6589 = vmatpush1.bf16.msra.mxu1 %v6588_v53 }
 0x3a6   :  { %6395 = vmatprep.subr.bf16.mxu0 %v6394_v58  ;;  %6591 = vmatprep.subr.bf16.mxu1 %v6590_v60  ;;  %v2014_v58 = vld [vmem:[#allocation9 + $0xaf0] sm:$0xff]  ;;  %v2021_v60 = vld [vmem:[#allocation9 + $0xb28] sm:$0xff] }
 0x3a9   :  { %6397 = vmatpush1.bf16.msra.mxu0 %v6396_v6  ;;  %6593 = vmatpush1.bf16.msra.mxu1 %v6592_v8  ;;  %v2036_v6 = vld [vmem:[#allocation9 + $0xba0] sm:$0xff]  ;;  %v2031_v8 = vld [vmem:[#allocation9 + $0xb78] sm:$0xff] }
 0x3aa   :  { %6399 = vmatprep.subr.bf16.mxu0 %v6398_v12  ;;  %6595 = vmatprep.subr.bf16.mxu1 %v6594_v14  ;;  %v6412_v12 = vpack.c.bf16 %v2021_v60, %v2014_v58  ;;  %v6608_v14 = vpack.c.bf16 %v2023_v2, %v2016_v1  ;;  %v6414_v19 = vpack.c.bf16 %v2036_v6, %v2029_v3  ;;  %v2072_v3 = vld [vmem:[#allocation9 + $0xcc0] sm:$0xff]  ;;  %v2085_v6 = vld [vmem:[#allocation9 + $0xd28] sm:$0xff] }
 0x3ab   :  { %v6610_v21 = vpack.c.bf16 %v2038_v9, %v2031_v8  ;;  %v6620_v60 = vpack.c.bf16 %v2065_v50, %v2058_v49  ;;  %v2092_v8 = vld [vmem:[#allocation9 + $0xd60] sm:$0xff]  ;;  %v2087_v9 = vld [vmem:[#allocation9 + $0xd38] sm:$0xff]  ;;  %v2114_v49 = vld [vmem:[#allocation9 + $0xe10] sm:$0xff] }
 0x3ac   :  { %v2121_v50 = vld [vmem:[#allocation9 + $0xe48] sm:$0xff] }
 0x3ad   :  { %6401 = vmatpush1.bf16.msra.mxu0 %v6400_v22  ;;  %6597 = vmatpush1.bf16.msra.mxu1 %v6596_v23  ;;  %v2030_v22 = vld [vmem:[#allocation9 + $0xb70] sm:$0xff]  ;;  %v2037_v23 = vld [vmem:[#allocation9 + $0xba8] sm:$0xff] }
 0x3ae   :  { %6403 = vmatprep.subr.bf16.mxu0 %v6402_v15  ;;  %6599 = vmatprep.subr.bf16.mxu1 %v6598_v26  ;;  %v2045_v15 = vld [vmem:[#allocation9 + $0xbe8] sm:$0xff]  ;;  %v2052_v26 = vld [vmem:[#allocation9 + $0xc20] sm:$0xff]  ;;  %v6612_v28 = vpack.c.bf16 %v2037_v23, %v2030_v22  ;;  %v2099_v23 = vld [vmem:[#allocation9 + $0xd98] sm:$0xff] }
 0x3af   :  { %v5616_v45 = vpop.f32.mrb[10].mxu0  ;;  %v6614_v32 = vpack.c.bf16 %v2052_v26, %v2045_v15  ;;  %v2093_v22 = vld [vmem:[#allocation9 + $0xd68] sm:$0xff]  ;;  %v2108_v15 = vld [vmem:[#allocation9 + $0xde0] sm:$0xff]  ;;  %v6432_v26 = vpack.c.bf16 %v2091_v16, %v2084_v7  ;;  %v6434_v30 = vpack.c.bf16 %v2106_v24, %v2099_v23  ;;  %v2142_v23 = vld [vmem:[#allocation9 + $0xef0] sm:$0xff] }
 0x3b0   :  { %v5617_v51 = vpop.f32.mrb[11].mxu0  ;;  %v2149_v24 = vld [vmem:[#allocation9 + $0xf28] sm:$0xff] }
 0x3b1   :  { %v5618_v53 = vadd.f32 %v5617_v51, %v5616_v45  ;;  %6405 = vmatpush1.bf16.msra.mxu0 %v6404_v34  ;;  %6601 = vmatpush1.bf16.msra.mxu1 %v6600_v35  ;;  %v2044_v34 = vld [vmem:[#allocation9 + $0xbe0] sm:$0xff]  ;;  %v2051_v35 = vld [vmem:[#allocation9 + $0xc18] sm:$0xff] }
 0x3b2   :  { %6407 = vmatprep.subr.bf16.mxu0 %v6406_v36  ;;  %6603 = vmatprep.subr.bf16.mxu1 %v6602_v41  ;;  %v2059_v36 = vld [vmem:[#allocation9 + $0xc58] sm:$0xff]  ;;  %v2066_v41 = vld [vmem:[#allocation9 + $0xc90] sm:$0xff]  ;;  %v6616_v43 = vpack.c.bf16 %v2051_v35, %v2044_v34  ;;  %v2113_v35 = vld [vmem:[#allocation9 + $0xe08] sm:$0xff] }
 0x3b3   :  { %v1591_v5 = vadd.f32 %v5618_v53, %v1086_v47  ;;  %v2063_v45 = vld [vmem:[#allocation9 + $0xc78] sm:$0xff]  ;;  %v6422_v47 = vpack.c.bf16 %v2064_v40, %v2057_v37  ;;  %v6618_v48 = vpack.c.bf16 %v2066_v41, %v2059_v36  ;;  %v2078_v53 = vld [vmem:[#allocation9 + $0xcf0] sm:$0xff]  ;;  %v2120_v37 = vld [vmem:[#allocation9 + $0xe40] sm:$0xff] }
 0x3b4   :  { %v2071_v51 = vld [vmem:[#allocation9 + $0xcb8] sm:$0xff]  ;;  %v6424_v58 = vpack.c.bf16 %v2063_v45, %v2056_v44  ;;  %v2122_v36 = vld [vmem:[#allocation9 + $0xe50] sm:$0xff]  ;;  %v1070_v45 = vrot.slane %v8715_v38, %v8693_v20 }
 0x3b5   :  { %v1660_v11 = vpop.f32.mrb[12].mxu0  ;;  %6409 = vmatpush1.bf16.msra.mxu0 %v6408_v55  ;;  %6605 = vmatpush1.bf16.msra.mxu1 %v6604_v57  ;;  %v2073_v55 = vld [vmem:[#allocation9 + $0xcc8] sm:$0xff]  ;;  %v2080_v57 = vld [vmem:[#allocation9 + $0xd00] sm:$0xff]  ;;  %v6426_v1 = vpack.c.bf16 %v2078_v53, %v2071_v51  ;;  %v2107_v34 = vld [vmem:[#allocation9 + $0xdd8] sm:$0xff] }
 0x3b6   :  { %v8745_v17 = vadd.f32 %v1660_v11, %v1591_v5  ;;  %v5876_v18 = vpop.f32.mrb[13].mxu0  ;;  %6411 = vmatprep.subr.bf16.mxu0 %v6410_v61  ;;  %6607 = vmatprep.subr.bf16.mxu1 %v6606_v63  ;;  %v2070_v61 = vld [vmem:[#allocation9 + $0xcb0] sm:$0xff]  ;;  %v2077_v63 = vld [vmem:[#allocation9 + $0xce8] sm:$0xff]  ;;  %v6622_v2 = vpack.c.bf16 %v2080_v57, %v2073_v55  ;;  %v2079_v5 = vld [vmem:[#allocation9 + $0xcf8] sm:$0xff] }
 0x3b7   :  { %v2094_v11 = vld [vmem:[#allocation9 + $0xd70] sm:$0xff]  ;;  %v6430_v18 = vpack.c.bf16 %v2092_v8, %v2085_v6  ;;  %v2115_v40 = vld [vmem:[#allocation9 + $0xe18] sm:$0xff]  ;;  %v2129_v55 = vld [vmem:[#allocation9 + $0xe88] sm:$0xff] }
 0x3b8   :  { %v2119_v44 = vld [vmem:[#allocation9 + $0xe38] sm:$0xff]  ;;  %v2134_v53 = vld [vmem:[#allocation9 + $0xeb0] sm:$0xff]  ;;  %v2136_v57 = vld [vmem:[#allocation9 + $0xec0] sm:$0xff] }
 0x3b9   :  { %6413 = vmatpush1.bf16.msra.mxu0 %v6412_v12  ;;  %6609 = vmatpush1.bf16.msra.mxu1 %v6608_v14  ;;  %v6428_v12 = vpack.c.bf16 %v2077_v63, %v2070_v61  ;;  %v6624_v14 = vpack.c.bf16 %v2079_v5, %v2072_v3  ;;  %v2127_v51 = vld [vmem:[#allocation9 + $0xe78] sm:$0xff]  ;;  %v8750_v61 = vsub.s32 5, %v8253_v0  ;;  %v2126_v63 = vld [vmem:[#allocation9 + $0xe70] sm:$0xff]  ;;  %v6638_v5 = vpack.c.bf16 %v2136_v57, %v2129_v55  ;;  %v2128_v6 = vld [vmem:[#allocation9 + $0xe80] sm:$0xff] }
 0x3ba   :  { %6415 = vmatprep.subr.bf16.mxu0 %v6414_v19  ;;  %6611 = vmatprep.subr.bf16.mxu1 %v6610_v21  ;;  %v6626_v19 = vpack.c.bf16 %v2094_v11, %v2087_v9  ;;  %v2086_v21 = vld [vmem:[#allocation9 + $0xd30] sm:$0xff]  ;;  %v6442_v3 = vpack.c.bf16 %v2134_v53, %v2127_v51  ;;  %v2135_v8 = vld [vmem:[#allocation9 + $0xeb8] sm:$0xff]  ;;  %v2141_v9 = vld [vmem:[#allocation9 + $0xee8] sm:$0xff] }
 0x3bb   :  { %v2148_v11 = vld [vmem:[#allocation9 + $0xf20] sm:$0xff]  ;;  %v6640_v16 = vpack.c.bf16 %v2135_v8, %v2128_v6  ;;  %v2170_v53 = vld [vmem:[#allocation9 + $0xfd0] sm:$0xff]  ;;  %v2177_v55 = vld [vmem:[#allocation9 + $0x1008] sm:$0xff] }
 0x3bc   :  { %v2183_v57 = vld [vmem:[#allocation9 + $0x1038] sm:$0xff]  ;;  %v2189_v6 = vld [vmem:[#allocation9 + $0x1068] sm:$0xff] }
 0x3bd   :  { %6417 = vmatpush1.bf16.msra.mxu0 %v6416_v27  ;;  %6613 = vmatpush1.bf16.msra.mxu1 %v6612_v28  ;;  %v6628_v27 = vpack.c.bf16 %v2093_v22, %v2086_v21  ;;  %v2098_v28 = vld [vmem:[#allocation9 + $0xd90] sm:$0xff]  ;;  %v6446_v21 = vpack.c.bf16 %v2148_v11, %v2141_v9  ;;  %v2184_v11 = vld [vmem:[#allocation9 + $0x1040] sm:$0xff] }
 0x3be   :  { %6419 = vmatprep.subr.bf16.mxu0 %v6418_v31  ;;  %6615 = vmatprep.subr.bf16.mxu1 %v6614_v32  ;;  %v6630_v31 = vpack.c.bf16 %v2108_v15, %v2101_v25  ;;  %v2100_v32 = vld [vmem:[#allocation9 + $0xda0] sm:$0xff]  ;;  %v6436_v41 = vpack.c.bf16 %v2105_v29, %v2098_v28  ;;  %v2155_v25 = vld [vmem:[#allocation9 + $0xf58] sm:$0xff] }
 0x3bf   :  { %v2164_v28 = vld [vmem:[#allocation9 + $0xfa0] sm:$0xff] }
 0x3c1   :  { %6421 = vmatpush1.bf16.msra.mxu0 %v6420_v42  ;;  %6617 = vmatpush1.bf16.msra.mxu1 %v6616_v43  ;;  %v6632_v42 = vpack.c.bf16 %v2107_v34, %v2100_v32  ;;  %v2112_v43 = vld [vmem:[#allocation9 + $0xe00] sm:$0xff]  ;;  %v2154_v32 = vld [vmem:[#allocation9 + $0xf50] sm:$0xff]  ;;  %v2161_v34 = vld [vmem:[#allocation9 + $0xf88] sm:$0xff] }
 0x3c2   :  { %6423 = vmatprep.subr.bf16.mxu0 %v6422_v47  ;;  %6619 = vmatprep.subr.bf16.mxu1 %v6618_v48  ;;  %v6438_v47 = vpack.c.bf16 %v2120_v37, %v2113_v35  ;;  %v6634_v48 = vpack.c.bf16 %v2122_v36, %v2115_v40  ;;  %v2156_v40 = vld [vmem:[#allocation9 + $0xf60] sm:$0xff]  ;;  %v2163_v36 = vld [vmem:[#allocation9 + $0xf98] sm:$0xff] }
 0x3c5   :  { %6425 = vmatpush1.bf16.msra.mxu0 %v6424_v58  ;;  %6621 = vmatpush1.bf16.msra.mxu1 %v6620_v60  ;;  %v6440_v58 = vpack.c.bf16 %v2119_v44, %v2112_v43  ;;  %v6636_v60 = vpack.c.bf16 %v2121_v50, %v2114_v49  ;;  %v2171_v43 = vld [vmem:[#allocation9 + $0xfd8] sm:$0xff]  ;;  %v2178_v44 = vld [vmem:[#allocation9 + $0x1010] sm:$0xff] }
 0x3c6   :  { %6427 = vmatprep.subr.bf16.mxu0 %v6426_v1  ;;  %6623 = vmatprep.subr.bf16.mxu1 %v6622_v2  ;;  %v2133_v1 = vld [vmem:[#allocation9 + $0xea8] sm:$0xff]  ;;  %v8753_v2 = vadd.f32 %v8724_v46, %v1070_v45  ;;  %v1082_v46 = vrot.slane %v8715_v38, %v8750_v61  ;;  %v6452_v45 = vpack.c.bf16 %v2161_v34, %v2154_v32  ;;  %v2175_v49 = vld [vmem:[#allocation9 + $0xff8] sm:$0xff]  ;;  %v2210_v34 = vld [vmem:[#allocation9 + $0x1110] sm:$0xff] }
 0x3c7   :  { %v6444_v7 = vpack.c.bf16 %v2133_v1, %v2126_v63  ;;  %v6650_v51 = vpack.c.bf16 %v2178_v44, %v2171_v43  ;;  %v2192_v63 = vld [vmem:[#allocation9 + $0x1080] sm:$0xff]  ;;  %v2227_v44 = vld [vmem:[#allocation9 + $0x1198] sm:$0xff] }
 0x3c8   :  { %v2232_v43 = vld [vmem:[#allocation9 + $0x11c0] sm:$0xff] }
 0x3c9   :  { %6429 = vmatpush1.bf16.msra.mxu0 %v6428_v12  ;;  %6625 = vmatpush1.bf16.msra.mxu1 %v6624_v14  ;;  %v2143_v12 = vld [vmem:[#allocation9 + $0xef8] sm:$0xff]  ;;  %v2150_v14 = vld [vmem:[#allocation9 + $0xf30] sm:$0xff] }
 0x3ca   :  { %6431 = vmatprep.subr.bf16.mxu0 %v6430_v18  ;;  %6627 = vmatprep.subr.bf16.mxu1 %v6626_v19  ;;  %v2140_v18 = vld [vmem:[#allocation9 + $0xee0] sm:$0xff]  ;;  %v2147_v19 = vld [vmem:[#allocation9 + $0xf18] sm:$0xff]  ;;  %v6642_v22 = vpack.c.bf16 %v2150_v14, %v2143_v12  ;;  %v2197_v14 = vld [vmem:[#allocation9 + $0x10a8] sm:$0xff] }
 0x3cb   :  { %v6448_v38 = vpack.c.bf16 %v2147_v19, %v2140_v18  ;;  %v2191_v12 = vld [vmem:[#allocation9 + $0x1078] sm:$0xff] }
 0x3cc   :  { %v6656_v19 = vpack.c.bf16 %v2191_v12, %v2184_v11  ;;  %v2240_v12 = vld [vmem:[#allocation9 + $0x1200] sm:$0xff] }
 0x3cd   :  { %6433 = vmatpush1.bf16.msra.mxu0 %v6432_v26  ;;  %6629 = vmatpush1.bf16.msra.mxu1 %v6628_v27  ;;  %v2162_v26 = vld [vmem:[#allocation9 + $0xf90] sm:$0xff]  ;;  %v2157_v27 = vld [vmem:[#allocation9 + $0xf68] sm:$0xff] }
 0x3ce   :  { %6435 = vmatprep.subr.bf16.mxu0 %v6434_v30  ;;  %6631 = vmatprep.subr.bf16.mxu1 %v6630_v31  ;;  %v6644_v31 = vpack.c.bf16 %v2149_v24, %v2142_v23  ;;  %v6450_v35 = vpack.c.bf16 %v2162_v26, %v2155_v25  ;;  %v6646_v37 = vpack.c.bf16 %v2164_v28, %v2157_v27  ;;  %v2198_v25 = vld [vmem:[#allocation9 + $0x10b0] sm:$0xff]  ;;  %v2205_v26 = vld [vmem:[#allocation9 + $0x10e8] sm:$0xff]  ;;  %v2211_v27 = vld [vmem:[#allocation9 + $0x1118] sm:$0xff] }
 0x3cf   :  { %v2218_v28 = vld [vmem:[#allocation9 + $0x1150] sm:$0xff]  ;;  %v6660_v32 = vpack.c.bf16 %v2205_v26, %v2198_v25 }
 0x3d0   :  { %v2254_v26 = vld [vmem:[#allocation9 + $0x1270] sm:$0xff] }
 0x3d1   :  { %6437 = vmatpush1.bf16.msra.mxu0 %v6436_v41  ;;  %6633 = vmatpush1.bf16.msra.mxu1 %v6632_v42  ;;  %v2169_v41 = vld [vmem:[#allocation9 + $0xfc8] sm:$0xff]  ;;  %v2176_v42 = vld [vmem:[#allocation9 + $0x1000] sm:$0xff] }
 0x3d2   :  { %6439 = vmatprep.subr.bf16.mxu0 %v6438_v47  ;;  %6635 = vmatprep.subr.bf16.mxu1 %v6634_v48  ;;  %v6648_v47 = vpack.c.bf16 %v2163_v36, %v2156_v40  ;;  %v2168_v48 = vld [vmem:[#allocation9 + $0xfc0] sm:$0xff]  ;;  %v6454_v50 = vpack.c.bf16 %v2176_v42, %v2169_v41  ;;  %v2219_v41 = vld [vmem:[#allocation9 + $0x1158] sm:$0xff]  ;;  %v2225_v42 = vld [vmem:[#allocation9 + $0x1188] sm:$0xff] }
 0x3d3   :  { %v6456_v1 = vpack.c.bf16 %v2175_v49, %v2168_v48  ;;  %v2212_v36 = vld [vmem:[#allocation9 + $0x1120] sm:$0xff] }
 0x3d4   :  { %2527 = vmatmul.mubr.f32.vlgmr.msra.gmra.mrb[14].mxu0 %v8753_v2  ;;  %2811 = vmatmul.mubr.f32.vlgmr.msra.gmra.mrb[8].mxu1 %v8753_v2  ;;  %v6664_v48 = vpack.c.bf16 %v2219_v41, %v2212_v36  ;;  %v2224_v49 = vld [vmem:[#allocation9 + $0x1180] sm:$0xff] }
 0x3d5   :  { %6441 = vmatpush1.bf16.msra.mxu0 %v6440_v58  ;;  %6637 = vmatpush1.bf16.msra.mxu1 %v6636_v60  ;;  %v2190_v58 = vld [vmem:[#allocation9 + $0x1070] sm:$0xff]  ;;  %v2185_v60 = vld [vmem:[#allocation9 + $0x1048] sm:$0xff]  ;;  %v2268_v41 = vld [vmem:[#allocation9 + $0x12e0] sm:$0xff] }
 0x3d6   :  { %6443 = vmatprep.subr.bf16.mxu0 %v6442_v3  ;;  %6639 = vmatprep.subr.bf16.mxu1 %v6638_v5  ;;  %v6652_v3 = vpack.c.bf16 %v2177_v55, %v2170_v53  ;;  %v2182_v5 = vld [vmem:[#allocation9 + $0x1030] sm:$0xff]  ;;  %v6458_v8 = vpack.c.bf16 %v2190_v58, %v2183_v57  ;;  %v6654_v9 = vpack.c.bf16 %v2192_v63, %v2185_v60  ;;  %v2233_v57 = vld [vmem:[#allocation9 + $0x11c8] sm:$0xff]  ;;  %v2239_v58 = vld [vmem:[#allocation9 + $0x11f8] sm:$0xff] }
 0x3d7   :  { %v8759_v15 = vpop.f32.mrb[6].mxu1  ;;  %v6460_v18 = vpack.c.bf16 %v2189_v6, %v2182_v5  ;;  %v2226_v55 = vld [vmem:[#allocation9 + $0x1190] sm:$0xff]  ;;  %v2241_v63 = vld [vmem:[#allocation9 + $0x1208] sm:$0xff] }
 0x3d8   :  { %v1521_v29 = vpop.f32.mrb[7].mxu1  ;;  %v2246_v60 = vld [vmem:[#allocation9 + $0x1230] sm:$0xff]  ;;  %v6668_v5 = vpack.c.bf16 %v2233_v57, %v2226_v55 }
 0x3d9   :  { %v8761_v30 = vadd.f32 %v1521_v29, %v1082_v46  ;;  %6445 = vmatpush1.bf16.msra.mxu0 %v6444_v7  ;;  %6641 = vmatpush1.bf16.msra.mxu1 %v6640_v16  ;;  %v2204_v46 = vld [vmem:[#allocation9 + $0x10e0] sm:$0xff]  ;;  %v2199_v7 = vld [vmem:[#allocation9 + $0x10b8] sm:$0xff]  ;;  %v2206_v16 = vld [vmem:[#allocation9 + $0x10f0] sm:$0xff] }
 0x3da   :  { %6447 = vmatprep.subr.bf16.mxu0 %v6446_v21  ;;  %6643 = vmatprep.subr.bf16.mxu1 %v6642_v22  ;;  %v2196_v21 = vld [vmem:[#allocation9 + $0x10a0] sm:$0xff]  ;;  %v2203_v22 = vld [vmem:[#allocation9 + $0x10d8] sm:$0xff]  ;;  %v6462_v23 = vpack.c.bf16 %v2204_v46, %v2197_v14  ;;  %v6658_v24 = vpack.c.bf16 %v2206_v16, %v2199_v7  ;;  %v2213_v29 = vld [vmem:[#allocation9 + $0x1128] sm:$0xff] }
 0x3db   :  { %2597 = vmatprep.mubr.f32.mxu0 %v8761_v30  ;;  %2881 = vmatprep.mubr.f32.mxu1 %v8761_v30  ;;  %v2238_v6 = vld [vmem:[#allocation9 + $0x11f0] sm:$0xff]  ;;  %v2247_v14 = vld [vmem:[#allocation9 + $0x1238] sm:$0xff]  ;;  %v2253_v46 = vld [vmem:[#allocation9 + $0x1268] sm:$0xff] }
 0x3dc   :  { %v2260_v7 = vld [vmem:[#allocation9 + $0x12a0] sm:$0xff]  ;;  %v2255_v16 = vld [vmem:[#allocation9 + $0x1278] sm:$0xff]  ;;  %v2282_v57 = vld [vmem:[#allocation9 + $0x1350] sm:$0xff] }
 0x3dd   :  { %6449 = vmatpush1.bf16.msra.mxu0 %v6448_v38  ;;  %6645 = vmatpush1.bf16.msra.mxu1 %v6644_v31  ;;  %v2220_v38 = vld [vmem:[#allocation9 + $0x1160] sm:$0xff]  ;;  %v6464_v31 = vpack.c.bf16 %v2203_v22, %v2196_v21  ;;  %v6672_v21 = vpack.c.bf16 %v2247_v14, %v2240_v12 }
 0x3de   :  { %6451 = vmatprep.subr.bf16.mxu0 %v6450_v35  ;;  %6647 = vmatprep.subr.bf16.mxu1 %v6646_v37  ;;  %v2217_v35 = vld [vmem:[#allocation9 + $0x1148] sm:$0xff]  ;;  %v6466_v37 = vpack.c.bf16 %v2218_v28, %v2211_v27  ;;  %v6662_v40 = vpack.c.bf16 %v2220_v38, %v2213_v29  ;;  %v2252_v22 = vld [vmem:[#allocation9 + $0x1260] sm:$0xff]  ;;  %v2267_v28 = vld [vmem:[#allocation9 + $0x12d8] sm:$0xff] }
 0x3df   :  { %v2261_v27 = vld [vmem:[#allocation9 + $0x12a8] sm:$0xff]  ;;  %v2274_v29 = vld [vmem:[#allocation9 + $0x1310] sm:$0xff]  ;;  %v2296_v14 = vld [vmem:[#allocation9 + $0x13c0] sm:$0xff] }
 0x3e0   :  { %v2269_v38 = vld [vmem:[#allocation9 + $0x12e8] sm:$0xff] }
 0x3e1   :  { %6453 = vmatpush1.bf16.msra.mxu0 %v6452_v45  ;;  %6649 = vmatpush1.bf16.msra.mxu1 %v6648_v47  ;;  %v2234_v45 = vld [vmem:[#allocation9 + $0x11d0] sm:$0xff]  ;;  %v6468_v47 = vpack.c.bf16 %v2217_v35, %v2210_v34  ;;  %v6676_v34 = vpack.c.bf16 %v2261_v27, %v2254_v26 }
 0x3e2   :  { %6455 = vmatprep.subr.bf16.mxu0 %v6454_v50  ;;  %6651 = vmatprep.subr.bf16.mxu1 %v6650_v51  ;;  %v2231_v50 = vld [vmem:[#allocation9 + $0x11b8] sm:$0xff]  ;;  %v6470_v51 = vpack.c.bf16 %v2232_v43, %v2225_v42  ;;  %v6666_v53 = vpack.c.bf16 %v2234_v45, %v2227_v44  ;;  %v2266_v35 = vld [vmem:[#allocation9 + $0x12d0] sm:$0xff]  ;;  %v2281_v43 = vld [vmem:[#allocation9 + $0x1348] sm:$0xff] }
 0x3e3   :  { %v2275_v42 = vld [vmem:[#allocation9 + $0x1318] sm:$0xff]  ;;  %v2288_v44 = vld [vmem:[#allocation9 + $0x1380] sm:$0xff]  ;;  %v2310_v27 = vld [vmem:[#allocation9 + $0x1430] sm:$0xff] }
 0x3e4   :  { %v2283_v45 = vld [vmem:[#allocation9 + $0x1358] sm:$0xff] }
 0x3e5   :  { %6457 = vmatpush1.bf16.msra.mxu0 %v6456_v1  ;;  %6653 = vmatpush1.bf16.msra.mxu1 %v6652_v3  ;;  %v2248_v1 = vld [vmem:[#allocation9 + $0x1240] sm:$0xff]  ;;  %v6472_v3 = vpack.c.bf16 %v2231_v50, %v2224_v49  ;;  %v6680_v49 = vpack.c.bf16 %v2275_v42, %v2268_v41 }
 0x3e6   :  { %6459 = vmatprep.subr.bf16.mxu0 %v6458_v8  ;;  %6655 = vmatprep.subr.bf16.mxu1 %v6654_v9  ;;  %v2245_v8 = vld [vmem:[#allocation9 + $0x1228] sm:$0xff]  ;;  %v6474_v9 = vpack.c.bf16 %v2246_v60, %v2239_v58  ;;  %v6670_v11 = vpack.c.bf16 %v2248_v1, %v2241_v63  ;;  %v2280_v50 = vld [vmem:[#allocation9 + $0x1340] sm:$0xff]  ;;  %v2295_v60 = vld [vmem:[#allocation9 + $0x13b8] sm:$0xff] }
 0x3e7   :  { %v2289_v58 = vld [vmem:[#allocation9 + $0x1388] sm:$0xff]  ;;  %v2302_v63 = vld [vmem:[#allocation9 + $0x13f0] sm:$0xff] }
 0x3e8   :  { %v2297_v1 = vld [vmem:[#allocation9 + $0x13c8] sm:$0xff] }
 0x3e9   :  { %6461 = vmatpush1.bf16.msra.mxu0 %v6460_v18  ;;  %6657 = vmatpush1.bf16.msra.mxu1 %v6656_v19  ;;  %v2262_v18 = vld [vmem:[#allocation9 + $0x12b0] sm:$0xff]  ;;  %v6476_v19 = vpack.c.bf16 %v2245_v8, %v2238_v6  ;;  %v6684_v6 = vpack.c.bf16 %v2289_v58, %v2282_v57 }
 0x3ea   :  { %6463 = vmatprep.subr.bf16.mxu0 %v6462_v23  ;;  %6659 = vmatprep.subr.bf16.mxu1 %v6658_v24  ;;  %v2259_v23 = vld [vmem:[#allocation9 + $0x1298] sm:$0xff]  ;;  %v6478_v24 = vpack.c.bf16 %v2260_v7, %v2253_v46  ;;  %v6674_v25 = vpack.c.bf16 %v2262_v18, %v2255_v16  ;;  %v2294_v8 = vld [vmem:[#allocation9 + $0x13b0] sm:$0xff]  ;;  %v2309_v7 = vld [vmem:[#allocation9 + $0x1428] sm:$0xff] }
 0x3eb   :  { %v2303_v46 = vld [vmem:[#allocation9 + $0x13f8] sm:$0xff]  ;;  %v2316_v16 = vld [vmem:[#allocation9 + $0x1460] sm:$0xff] }
 0x3ec   :  { %v2311_v18 = vld [vmem:[#allocation9 + $0x1438] sm:$0xff] }
 0x3ed   :  { %6465 = vmatpush1.bf16.msra.mxu0 %v6464_v31  ;;  %6661 = vmatpush1.bf16.msra.mxu1 %v6660_v32  ;;  %v2276_v31 = vld [vmem:[#allocation9 + $0x1320] sm:$0xff]  ;;  %v6480_v32 = vpack.c.bf16 %v2259_v23, %v2252_v22  ;;  %v6688_v22 = vpack.c.bf16 %v2303_v46, %v2296_v14 }
 0x3ee   :  { %6467 = vmatprep.subr.bf16.mxu0 %v6466_v37  ;;  %6663 = vmatprep.subr.bf16.mxu1 %v6662_v40  ;;  %v2273_v37 = vld [vmem:[#allocation9 + $0x1308] sm:$0xff]  ;;  %v6482_v40 = vpack.c.bf16 %v2274_v29, %v2267_v28  ;;  %v6678_v36 = vpack.c.bf16 %v2276_v31, %v2269_v38  ;;  %v2308_v23 = vld [vmem:[#allocation9 + $0x1420] sm:$0xff]  ;;  %v2323_v29 = vld [vmem:[#allocation9 + $0x1498] sm:$0xff] }
 0x3ef   :  { %v2317_v28 = vld [vmem:[#allocation9 + $0x1468] sm:$0xff]  ;;  %v2330_v38 = vld [vmem:[#allocation9 + $0x14d0] sm:$0xff]  ;;  %v1684_v46 = vld [vmem:[#allocation9 + $0xa0] sm:$0xff] }
 0x3f0   :  { %v2325_v31 = vld [vmem:[#allocation9 + $0x14a8] sm:$0xff]  ;;  %v6498_v41 = vpack.c.bf16 %v2330_v38, %v2323_v29  ;;  %v1831_v29 = vld [vmem:[#allocation9 + $0x538] sm:$0xff] }
 0x3f1   :  { %6469 = vmatpush1.bf16.msra.mxu0 %v6468_v47  ;;  %6665 = vmatpush1.bf16.msra.mxu1 %v6664_v48  ;;  %v2290_v47 = vld [vmem:[#allocation9 + $0x1390] sm:$0xff]  ;;  %v6484_v48 = vpack.c.bf16 %v2273_v37, %v2266_v35  ;;  %v6692_v35 = vpack.c.bf16 %v2317_v28, %v2310_v27  ;;  %v1676_v27 = vld [vmem:[#allocation9 + $0x60] sm:$0xff] }
 0x3f2   :  { %6471 = vmatprep.subr.bf16.mxu0 %v6470_v51  ;;  %6667 = vmatprep.subr.bf16.mxu1 %v6666_v53  ;;  %v2287_v51 = vld [vmem:[#allocation9 + $0x1378] sm:$0xff]  ;;  %v6486_v53 = vpack.c.bf16 %v2288_v44, %v2281_v43  ;;  %v6682_v55 = vpack.c.bf16 %v2290_v47, %v2283_v45  ;;  %v2322_v37 = vld [vmem:[#allocation9 + $0x1490] sm:$0xff]  ;;  %v2324_v43 = vld [vmem:[#allocation9 + $0x14a0] sm:$0xff] }
 0x3f3   :  { %v2331_v44 = vld [vmem:[#allocation9 + $0x14d8] sm:$0xff]  ;;  %v1782_v45 = vld [vmem:[#allocation9 + $0x3b0] sm:$0xff]  ;;  %v2337_v47 = vld [vmem:[#allocation9 + $0x1508] sm:$0xff] }
 0x3f4   :  { %v1824_v28 = vld [vmem:[#allocation9 + $0x500] sm:$0xff] }
 0x3f5   :  { %6473 = vmatpush1.bf16.msra.mxu0 %v6472_v3  ;;  %6669 = vmatpush1.bf16.msra.mxu1 %v6668_v5  ;;  %v2304_v3 = vld [vmem:[#allocation9 + $0x1400] sm:$0xff]  ;;  %v6488_v5 = vpack.c.bf16 %v2287_v51, %v2280_v50  ;;  %v6696_v51 = vpack.c.bf16 %v2331_v44, %v2324_v43  ;;  %v1690_v43 = vld [vmem:[#allocation9 + $0xd0] sm:$0xff] }
 0x3f6   :  { %6475 = vmatprep.subr.bf16.mxu0 %v6474_v9  ;;  %6671 = vmatprep.subr.bf16.mxu1 %v6670_v11  ;;  %v2301_v9 = vld [vmem:[#allocation9 + $0x13e8] sm:$0xff]  ;;  %v6490_v11 = vpack.c.bf16 %v2302_v63, %v2295_v60  ;;  %v6686_v12 = vpack.c.bf16 %v2304_v3, %v2297_v1  ;;  %v2336_v60 = vld [vmem:[#allocation9 + $0x1500] sm:$0xff]  ;;  %v2343_v63 = vld [vmem:[#allocation9 + $0x1538] sm:$0xff] }
 0x3f7   :  { %v1677_v1 = vld [vmem:[#allocation9 + $0x68] sm:$0xff]  ;;  %v1796_v3 = vld [vmem:[#allocation9 + $0x420] sm:$0xff]  ;;  %v1838_v44 = vld [vmem:[#allocation9 + $0x570] sm:$0xff] }
 0x3f9   :  { %6477 = vmatpush1.bf16.msra.mxu0 %v6476_v19  ;;  %6673 = vmatpush1.bf16.msra.mxu1 %v6672_v21  ;;  %v2318_v19 = vld [vmem:[#allocation9 + $0x1470] sm:$0xff]  ;;  %v6492_v21 = vpack.c.bf16 %v2301_v9, %v2294_v8  ;;  %v6504_v9 = vpack.c.bf16 %v2343_v63, %v2336_v60  ;;  %v1852_v60 = vld [vmem:[#allocation9 + $0x5e0] sm:$0xff]  ;;  %v1859_v63 = vld [vmem:[#allocation9 + $0x618] sm:$0xff] }
 0x3fa   :  { %6479 = vmatprep.subr.bf16.mxu0 %v6478_v24  ;;  %6675 = vmatprep.subr.bf16.mxu1 %v6674_v25  ;;  %v2315_v24 = vld [vmem:[#allocation9 + $0x1458] sm:$0xff]  ;;  %v6494_v25 = vpack.c.bf16 %v2316_v16, %v2309_v7  ;;  %v6690_v26 = vpack.c.bf16 %v2318_v19, %v2311_v18  ;;  %v2346_v8 = vld [vmem:[#allocation9 + $0x1550] sm:$0xff]  ;;  %v1817_v19 = vld [vmem:[#allocation9 + $0x4c8] sm:$0xff] }
 0x3fb   :  { %v1691_v7 = vld [vmem:[#allocation9 + $0xd8] sm:$0xff]  ;;  %v1810_v18 = vld [vmem:[#allocation9 + $0x490] sm:$0xff] }
 0x3fd   :  { %6481 = vmatpush1.bf16.msra.mxu0 %v6480_v32  ;;  %6677 = vmatpush1.bf16.msra.mxu1 %v6676_v34  ;;  %v2332_v32 = vld [vmem:[#allocation9 + $0x14e0] sm:$0xff]  ;;  %v6496_v34 = vpack.c.bf16 %v2315_v24, %v2308_v23  ;;  %v6906_v23 = vpack.c.bf16 %v1817_v19, %v1810_v18  ;;  %v1698_v24 = vld [vmem:[#allocation9 + $0x110] sm:$0xff]  ;;  %v1873_v18 = vld [vmem:[#allocation9 + $0x688] sm:$0xff] }
 0x3fe   :  { %6483 = vmatprep.subr.bf16.mxu0 %v6482_v40  ;;  %6679 = vmatprep.subr.bf16.mxu1 %v6678_v36  ;;  %v2329_v40 = vld [vmem:[#allocation9 + $0x14c8] sm:$0xff]  ;;  %v8766_v36 = vsub.s32 4, %v8253_v0  ;;  %v6694_v42 = vpack.c.bf16 %v2332_v32, %v2325_v31 }
 0x3ff   :  { %v6500_v50 = vpack.c.bf16 %v2329_v40, %v2322_v37  ;;  %v1712_v37 = vld [vmem:[#allocation9 + $0x180] sm:$0xff]  ;;  %v6910_v40 = vpack.c.bf16 %v1831_v29, %v1824_v28  ;;  %v1887_v29 = vld [vmem:[#allocation9 + $0x6f8] sm:$0xff] }
 0x400   :  { %v1880_v28 = vld [vmem:[#allocation9 + $0x6c0] sm:$0xff] }
 0x401   :  { %6485 = vmatpush1.bf16.msra.mxu0 %v6484_v48  ;;  %6681 = vmatpush1.bf16.msra.mxu1 %v6680_v49  ;;  %v2344_v48 = vld [vmem:[#allocation9 + $0x1540] sm:$0xff]  ;;  %v1789_v49 = vld [vmem:[#allocation9 + $0x3e8] sm:$0xff] }
 0x402   :  { %6487 = vmatprep.subr.bf16.mxu0 %v6486_v53  ;;  %6683 = vmatprep.subr.bf16.mxu1 %v6682_v55  ;;  %v1670_v53 = vld [vmem:[#allocation9 + $0x30] sm:$0xff]  ;;  %v7760_v55 = vld [vmem:[#allocation7] sm:$0x7f]  ;;  %v6502_v0 = vpack.c.bf16 %v2344_v48, %v2337_v47  ;;  %v6898_v58 = vpack.c.bf16 %v1789_v49, %v1782_v45  ;;  %v1845_v45 = vld [vmem:[#allocation9 + $0x5a8] sm:$0xff] }
 0x403   :  { %v1078_v57 = vrot.slane %v7760_v55, %v8766_v36  ;;  %v6914_v55 = vpack.c.bf16 %v1845_v45, %v1838_v44  ;;  %v2006_v44 = vld [vmem:[#allocation9 + $0xab0] sm:$0xff]  ;;  %v2013_v45 = vld [vmem:[#allocation9 + $0xae8] sm:$0xff] }
 0x405   :  { %6489 = vmatpush1.bf16.msra.mxu0 %v6488_v5  ;;  %6685 = vmatpush1.bf16.msra.mxu1 %v6684_v6  ;;  %v1803_v5 = vld [vmem:[#allocation9 + $0x458] sm:$0xff] }
 0x406   :  { %6491 = vmatprep.subr.bf16.mxu0 %v6490_v11  ;;  %6687 = vmatprep.subr.bf16.mxu1 %v6686_v12  ;;  %v2339_v6 = vld [vmem:[#allocation9 + $0x1518] sm:$0xff]  ;;  %v6900_v11 = vpack.c.bf16 %v1677_v1, %v1670_v53  ;;  %v8770_v12 = vadd.f32 %v8759_v15, %v1078_v57  ;;  %v6902_v14 = vpack.c.bf16 %v1803_v5, %v1796_v3  ;;  %v2345_v15 = vld [vmem:[#allocation9 + $0x1548] sm:$0xff]  ;;  %v1726_v53 = vld [vmem:[#allocation9 + $0x1f0] sm:$0xff] }
 0x407   :  { %v6698_v16 = vpack.c.bf16 %v2346_v8, %v2339_v6  ;;  %v1733_v57 = vld [vmem:[#allocation9 + $0x228] sm:$0xff]  ;;  %v1696_v6 = vld [vmem:[#allocation9 + $0x100] sm:$0xff]  ;;  %v1703_v8 = vld [vmem:[#allocation9 + $0x138] sm:$0xff] }
 0x408   :  { %v6916_v3 = vpack.c.bf16 %v1733_v57, %v1726_v53  ;;  %v6712_v19 = vpack.c.bf16 %v1703_v8, %v1696_v6  ;;  %v6930_v53 = vpack.c.bf16 %v2013_v45, %v2006_v44  ;;  %v1901_v57 = vld [vmem:[#allocation9 + $0x768] sm:$0xff]  ;;  %v1759_v6 = vld [vmem:[#allocation9 + $0x2f8] sm:$0xff]  ;;  %v1908_v8 = vld [vmem:[#allocation9 + $0x7a0] sm:$0xff] }
 0x409   :  { %6493 = vmatpush1.bf16.msra.mxu0 %v6492_v21  ;;  %6689 = vmatpush1.bf16.msra.mxu1 %v6688_v22  ;;  %v6904_v21 = vpack.c.bf16 %v1691_v7, %v1684_v46  ;;  %v2338_v22 = vld [vmem:[#allocation9 + $0x1510] sm:$0xff]  ;;  %v1711_v46 = vld [vmem:[#allocation9 + $0x178] sm:$0xff]  ;;  %v2069_v45 = vld [vmem:[#allocation9 + $0xca8] sm:$0xff] }
 0x40a   :  { %6495 = vmatprep.subr.bf16.mxu0 %v6494_v25  ;;  %6691 = vmatprep.subr.bf16.mxu1 %v6690_v26  ;;  %v1705_v25 = vld [vmem:[#allocation9 + $0x148] sm:$0xff]  ;;  %v6700_v38 = vpack.c.bf16 %v2345_v15, %v2338_v22  ;;  %v1718_v7 = vld [vmem:[#allocation9 + $0x1b0] sm:$0xff] }
 0x40b   :  { %v1669_v26 = vld [vmem:[#allocation9 + $0x28] sm:$0xff]  ;;  %v6908_v31 = vpack.c.bf16 %v1705_v25, %v1698_v24  ;;  %v1710_v22 = vld [vmem:[#allocation9 + $0x170] sm:$0xff] }
 0x40c   :  { %v6702_v32 = vpack.c.bf16 %v1676_v27, %v1669_v26  ;;  %v1717_v15 = vld [vmem:[#allocation9 + $0x1a8] sm:$0xff]  ;;  %v1732_v27 = vld [vmem:[#allocation9 + $0x220] sm:$0xff]  ;;  %v2062_v44 = vld [vmem:[#allocation9 + $0xc70] sm:$0xff] }
 0x40d   :  { %6497 = vmatpush1.bf16.msra.mxu0 %v6496_v34  ;;  %6693 = vmatpush1.bf16.msra.mxu1 %v6692_v35  ;;  %v1668_v34 = vld [vmem:[#allocation9 + $0x20] sm:$0xff]  ;;  %v1675_v35 = vld [vmem:[#allocation9 + $0x58] sm:$0xff]  ;;  %v1761_v25 = vld [vmem:[#allocation9 + $0x308] sm:$0xff] }
 0x40e   :  { %6499 = vmatprep.subr.bf16.mxu0 %v6498_v41  ;;  %6695 = vmatprep.subr.bf16.mxu1 %v6694_v42  ;;  %v1719_v41 = vld [vmem:[#allocation9 + $0x1b8] sm:$0xff]  ;;  %v6704_v47 = vpack.c.bf16 %v1675_v35, %v1668_v34  ;;  %v1725_v26 = vld [vmem:[#allocation9 + $0x1e8] sm:$0xff]  ;;  %v1724_v34 = vld [vmem:[#allocation9 + $0x1e0] sm:$0xff] }
 0x40f   :  { %v1683_v42 = vld [vmem:[#allocation9 + $0x98] sm:$0xff]  ;;  %v6912_v48 = vpack.c.bf16 %v1719_v41, %v1712_v37  ;;  %v1768_v37 = vld [vmem:[#allocation9 + $0x340] sm:$0xff] }
 0x410   :  { %v6706_v49 = vpack.c.bf16 %v1690_v43, %v1683_v42  ;;  %v1731_v35 = vld [vmem:[#allocation9 + $0x218] sm:$0xff]  ;;  %v1746_v43 = vld [vmem:[#allocation9 + $0x290] sm:$0xff] }
 0x411   :  { %6501 = vmatpush1.bf16.msra.mxu0 %v6500_v50  ;;  %6697 = vmatpush1.bf16.msra.mxu1 %v6696_v51  ;;  %v1682_v50 = vld [vmem:[#allocation9 + $0x90] sm:$0xff]  ;;  %v1689_v51 = vld [vmem:[#allocation9 + $0xc8] sm:$0xff]  ;;  %v1775_v41 = vld [vmem:[#allocation9 + $0x378] sm:$0xff] }
 0x412   :  { %6503 = vmatprep.subr.bf16.mxu0 %v6502_v0  ;;  %6899 = vmatprep.subr.bf16.mxu1 %v6898_v58  ;;  %v1697_v0 = vld [vmem:[#allocation9 + $0x108] sm:$0xff]  ;;  %v1704_v58 = vld [vmem:[#allocation9 + $0x140] sm:$0xff]  ;;  %v6708_v1 = vpack.c.bf16 %v1689_v51, %v1682_v50  ;;  %v1739_v42 = vld [vmem:[#allocation9 + $0x258] sm:$0xff] }
 0x413   :  { %v6710_v5 = vpack.c.bf16 %v1704_v58, %v1697_v0  ;;  %v1738_v50 = vld [vmem:[#allocation9 + $0x250] sm:$0xff]  ;;  %v1745_v51 = vld [vmem:[#allocation9 + $0x288] sm:$0xff]  ;;  %v1760_v58 = vld [vmem:[#allocation9 + $0x300] sm:$0xff] }
 0x414   :  { %2598 = vmatmul.mubr.f32.vlgmr.msra.gmra.mrb[14].mxu0 %v8770_v12  ;;  %2882 = vmatmul.mubr.f32.vlgmr.msra.gmra.mrb[8].mxu1 %v8770_v12  ;;  %v1753_v0 = vld [vmem:[#allocation9 + $0x2c8] sm:$0xff] }
 0x415   :  { %6505 = vmatpush1.bf16.msra.mxu0 %v6504_v9  ;;  %6901 = vmatpush3.bf16.msra.mxu1 %v6900_v11  ;;  %v1740_v9 = vld [vmem:[#allocation9 + $0x260] sm:$0xff]  ;;  %v6918_v11 = vpack.c.bf16 %v1859_v63, %v1852_v60  ;;  %v2027_v63 = vld [vmem:[#allocation9 + $0xb58] sm:$0xff] }
 0x416   :  { %3307 = vmatprep.mubr.f32.mxu1 %v8728_v56  ;;  %6903 = vmatprep.subr.bf16.mxu1 %v6902_v14  ;;  %v1747_v14 = vld [vmem:[#allocation9 + $0x298] sm:$0xff]  ;;  %v2020_v60 = vld [vmem:[#allocation9 + $0xb20] sm:$0xff] }
 0x417   :  { %2668 = vmatprep.mubr.f32.mxu0 %v7960_v4  ;;  %6699 = vmatprep.subr.bf16.mxu0 %v6698_v16  ;;  %v1866_v16 = vld [vmem:[#allocation9 + $0x650] sm:$0xff] }
 0x418   :  { %v6922_v24 = vpack.c.bf16 %v1873_v18, %v1866_v16  ;;  %v2034_v16 = vld [vmem:[#allocation9 + $0xb90] sm:$0xff]  ;;  %v2041_v18 = vld [vmem:[#allocation9 + $0xbc8] sm:$0xff] }
 0x419   :  { %6905 = vmatpush3.bf16.msra.mxu1 %v6904_v21  ;;  %v6714_v21 = vpack.c.bf16 %v1718_v7, %v1711_v46  ;;  %v1767_v46 = vld [vmem:[#allocation9 + $0x338] sm:$0xff]  ;;  %v1774_v7 = vld [vmem:[#allocation9 + $0x370] sm:$0xff] }
 0x41a   :  { %6907 = vmatprep.subr.bf16.mxu1 %v6906_v23  ;;  %v1754_v23 = vld [vmem:[#allocation9 + $0x2d0] sm:$0xff] }
 0x41c   :  { %5457 = vmatmul.mubr.msk.f32.vlgmr.msra.gmra.mrb[14].mxu0 %vm2387_vm5, %v8745_v17 }
 0x41d   :  { %6701 = vmatpush1.bf16.msra.mxu0 %v6700_v38  ;;  %6909 = vmatpush3.bf16.msra.mxu1 %v6908_v31  ;;  %v6716_v38 = vpack.c.bf16 %v1717_v15, %v1710_v22  ;;  %v6924_v31 = vpack.c.bf16 %v1761_v25, %v1754_v23  ;;  %v1766_v22 = vld [vmem:[#allocation9 + $0x330] sm:$0xff]  ;;  %v1773_v15 = vld [vmem:[#allocation9 + $0x368] sm:$0xff] }
 0x41e   :  { %2952 = vmatprep.mubr.f32.mxu0 %v7960_v4  ;;  %6703 = vmatprep.subr.bf16.mxu0 %v6702_v32  ;;  %v6718_v32 = vpack.c.bf16 %v1732_v27, %v1725_v26  ;;  %v1922_v23 = vld [vmem:[#allocation9 + $0x810] sm:$0xff]  ;;  %v1929_v25 = vld [vmem:[#allocation9 + $0x848] sm:$0xff]  ;;  %v1788_v27 = vld [vmem:[#allocation9 + $0x3e0] sm:$0xff] }
 0x41f   :  { %6911 = vmatprep.subr.bf16.mxu1 %v6910_v40  ;;  %v6926_v40 = vpack.c.bf16 %v1887_v29, %v1880_v28  ;;  %v1781_v26 = vld [vmem:[#allocation9 + $0x3a8] sm:$0xff]  ;;  %v2048_v28 = vld [vmem:[#allocation9 + $0xc00] sm:$0xff]  ;;  %v2055_v29 = vld [vmem:[#allocation9 + $0xc38] sm:$0xff] }
 0x420   :  { %5458 = vmatmul.mubr.msk.f32.vlgmr.msra.gmra.mrb[16].mxu0 %vm2387_vm5, %v8745_v17 }
 0x421   :  { %6705 = vmatpush1.bf16.msra.mxu0 %v6704_v47  ;;  %3023 = vmatprep.mubr.f32.mxu0 %v8728_v56  ;;  %v6920_v56 = vpack.c.bf16 %v1747_v14, %v1740_v9  ;;  %v6720_v47 = vpack.c.bf16 %v1731_v35, %v1724_v34  ;;  %v6726_v9 = vpack.c.bf16 %v1760_v58, %v1753_v0  ;;  %v1915_v14 = vld [vmem:[#allocation9 + $0x7d8] sm:$0xff]  ;;  %v1780_v34 = vld [vmem:[#allocation9 + $0x3a0] sm:$0xff]  ;;  %v1809_v0 = vld [vmem:[#allocation9 + $0x488] sm:$0xff] }
 0x422   :  { %6913 = vmatpush3.bf16.msra.mxu1 %v6912_v48  ;;  %6707 = vmatprep.subr.bf16.mxu0 %v6706_v49  ;;  %v6928_v48 = vpack.c.bf16 %v1775_v41, %v1768_v37  ;;  %v6722_v49 = vpack.c.bf16 %v1746_v43, %v1739_v42  ;;  %v1787_v35 = vld [vmem:[#allocation9 + $0x3d8] sm:$0xff]  ;;  %v1936_v37 = vld [vmem:[#allocation9 + $0x880] sm:$0xff]  ;;  %v1802_v43 = vld [vmem:[#allocation9 + $0x450] sm:$0xff] }
 0x423   :  { %6915 = vmatprep.subr.bf16.mxu1 %v6914_v55  ;;  %v1894_v55 = vld [vmem:[#allocation9 + $0x730] sm:$0xff]  ;;  %v1943_v41 = vld [vmem:[#allocation9 + $0x8b8] sm:$0xff]  ;;  %v1816_v58 = vld [vmem:[#allocation9 + $0x4c0] sm:$0xff] }
 0x424   :  { %v1795_v42 = vld [vmem:[#allocation9 + $0x418] sm:$0xff] }
 0x425   :  { %6709 = vmatpush1.bf16.msra.mxu0 %v6708_v1  ;;  %v6724_v1 = vpack.c.bf16 %v1745_v51, %v1738_v50  ;;  %v1794_v50 = vld [vmem:[#allocation9 + $0x410] sm:$0xff]  ;;  %v1801_v51 = vld [vmem:[#allocation9 + $0x448] sm:$0xff] }
 0x426   :  { %6917 = vmatpush3.bf16.msra.mxu1 %v6916_v3  ;;  %6711 = vmatprep.subr.bf16.mxu0 %v6710_v5  ;;  %v6932_v3 = vpack.c.bf16 %v1901_v57, %v1894_v55  ;;  %v1752_v5 = vld [vmem:[#allocation9 + $0x2c0] sm:$0xff]  ;;  %v6946_v55 = vpack.c.bf16 %v2069_v45, %v2062_v44  ;;  %v1957_v57 = vld [vmem:[#allocation9 + $0x928] sm:$0xff]  ;;  %v2230_v44 = vld [vmem:[#allocation9 + $0x11b0] sm:$0xff] }
 0x427   :  { %6919 = vmatprep.subr.bf16.mxu1 %v6918_v11  ;;  %v6934_v11 = vpack.c.bf16 %v2027_v63, %v2020_v60  ;;  %v2076_v60 = vld [vmem:[#allocation9 + $0xce0] sm:$0xff]  ;;  %v2083_v63 = vld [vmem:[#allocation9 + $0xd18] sm:$0xff]  ;;  %v2237_v45 = vld [vmem:[#allocation9 + $0x11e8] sm:$0xff] }
 0x429   :  { %6713 = vmatpush1.bf16.msra.mxu0 %v6712_v19  ;;  %v6728_v19 = vpack.c.bf16 %v1759_v6, %v1752_v5  ;;  %v6742_v5 = vpack.c.bf16 %v1816_v58, %v1809_v0  ;;  %v1808_v6 = vld [vmem:[#allocation9 + $0x480] sm:$0xff]  ;;  %v1865_v0 = vld [vmem:[#allocation9 + $0x648] sm:$0xff] }
 0x42a   :  { %6921 = vmatpush3.bf16.msra.mxu1 %v6920_v56  ;;  %6715 = vmatprep.subr.bf16.mxu0 %v6714_v21  ;;  %v6936_v56 = vpack.c.bf16 %v1915_v14, %v1908_v8  ;;  %v6730_v21 = vpack.c.bf16 %v1774_v7, %v1767_v46  ;;  %v1815_v8 = vld [vmem:[#allocation9 + $0x4b8] sm:$0xff]  ;;  %v1830_v7 = vld [vmem:[#allocation9 + $0x530] sm:$0xff]  ;;  %v1872_v58 = vld [vmem:[#allocation9 + $0x680] sm:$0xff] }
 0x42b   :  { %6923 = vmatprep.subr.bf16.mxu1 %v6922_v24  ;;  %v6938_v24 = vpack.c.bf16 %v2041_v18, %v2034_v16  ;;  %v1971_v14 = vld [vmem:[#allocation9 + $0x998] sm:$0xff]  ;;  %v2090_v16 = vld [vmem:[#allocation9 + $0xd50] sm:$0xff]  ;;  %v2097_v18 = vld [vmem:[#allocation9 + $0xd88] sm:$0xff] }
 0x42c   :  { %v1823_v46 = vld [vmem:[#allocation9 + $0x4f8] sm:$0xff] }
 0x42d   :  { %6717 = vmatpush1.bf16.msra.mxu0 %v6716_v38  ;;  %v6732_v38 = vpack.c.bf16 %v1773_v15, %v1766_v22  ;;  %v1822_v22 = vld [vmem:[#allocation9 + $0x4f0] sm:$0xff]  ;;  %v1829_v15 = vld [vmem:[#allocation9 + $0x528] sm:$0xff] }
 0x42e   :  { %6925 = vmatpush3.bf16.msra.mxu1 %v6924_v31  ;;  %6719 = vmatprep.subr.bf16.mxu0 %v6718_v32  ;;  %v6940_v31 = vpack.c.bf16 %v1929_v25, %v1922_v23  ;;  %v6734_v32 = vpack.c.bf16 %v1788_v27, %v1781_v26  ;;  %v1978_v23 = vld [vmem:[#allocation9 + $0x9d0] sm:$0xff]  ;;  %v1985_v25 = vld [vmem:[#allocation9 + $0xa08] sm:$0xff]  ;;  %v1844_v27 = vld [vmem:[#allocation9 + $0x5a0] sm:$0xff] }
 0x42f   :  { %6927 = vmatprep.subr.bf16.mxu1 %v6926_v40  ;;  %v6942_v40 = vpack.c.bf16 %v2055_v29, %v2048_v28  ;;  %v1837_v26 = vld [vmem:[#allocation9 + $0x568] sm:$0xff]  ;;  %v2104_v28 = vld [vmem:[#allocation9 + $0xdc0] sm:$0xff]  ;;  %v2111_v29 = vld [vmem:[#allocation9 + $0xdf8] sm:$0xff] }
 0x431   :  { %6721 = vmatpush1.bf16.msra.mxu0 %v6720_v47  ;;  %v6736_v47 = vpack.c.bf16 %v1787_v35, %v1780_v34  ;;  %v1836_v34 = vld [vmem:[#allocation9 + $0x560] sm:$0xff]  ;;  %v1843_v35 = vld [vmem:[#allocation9 + $0x598] sm:$0xff] }
 0x432   :  { %6929 = vmatpush3.bf16.msra.mxu1 %v6928_v48  ;;  %6723 = vmatprep.subr.bf16.mxu0 %v6722_v49  ;;  %v6944_v48 = vpack.c.bf16 %v1943_v41, %v1936_v37  ;;  %v6738_v49 = vpack.c.bf16 %v1802_v43, %v1795_v42  ;;  %v1992_v37 = vld [vmem:[#allocation9 + $0xa40] sm:$0xff]  ;;  %v1999_v41 = vld [vmem:[#allocation9 + $0xa78] sm:$0xff]  ;;  %v1858_v43 = vld [vmem:[#allocation9 + $0x610] sm:$0xff] }
 0x433   :  { %6931 = vmatprep.subr.bf16.mxu1 %v6930_v53  ;;  %v1950_v53 = vld [vmem:[#allocation9 + $0x8f0] sm:$0xff]  ;;  %v1851_v42 = vld [vmem:[#allocation9 + $0x5d8] sm:$0xff] }
 0x435   :  { %6725 = vmatpush1.bf16.msra.mxu0 %v6724_v1  ;;  %3308 = vmatmul.mubr.f32.vlgmr.msra.gmra.mrb[10].mxu1 %v8730_v62  ;;  %v6740_v1 = vpack.c.bf16 %v1801_v51, %v1794_v50  ;;  %v1850_v50 = vld [vmem:[#allocation9 + $0x5d0] sm:$0xff]  ;;  %v1857_v51 = vld [vmem:[#allocation9 + $0x608] sm:$0xff] }
 0x436   :  { %6933 = vmatpush3.bf16.msra.mxu1 %v6932_v3  ;;  %3377 = vmatprep.mubr.f32.mxu1 %v8734_v10  ;;  %v6948_v3 = vpack.c.bf16 %v1957_v57, %v1950_v53  ;;  %v6962_v53 = vpack.c.bf16 %v2237_v45, %v2230_v44  ;;  %v2125_v57 = vld [vmem:[#allocation9 + $0xe68] sm:$0xff]  ;;  %v2286_v44 = vld [vmem:[#allocation9 + $0x1370] sm:$0xff] }
 0x437   :  { %6727 = vmatprep.subr.bf16.mxu0 %v6726_v9  ;;  %6935 = vmatprep.subr.bf16.mxu1 %v6934_v11  ;;  %v1964_v9 = vld [vmem:[#allocation9 + $0x960] sm:$0xff]  ;;  %v6950_v11 = vpack.c.bf16 %v2083_v63, %v2076_v60  ;;  %v2251_v63 = vld [vmem:[#allocation9 + $0x1258] sm:$0xff]  ;;  %v2293_v45 = vld [vmem:[#allocation9 + $0x13a8] sm:$0xff] }
 0x438   :  { %v2244_v60 = vld [vmem:[#allocation9 + $0x1220] sm:$0xff] }
 0x439   :  { %6729 = vmatpush1.bf16.msra.mxu0 %v6728_v19  ;;  %v6744_v19 = vpack.c.bf16 %v1815_v8, %v1808_v6  ;;  %v1871_v6 = vld [vmem:[#allocation9 + $0x678] sm:$0xff]  ;;  %v2132_v8 = vld [vmem:[#allocation9 + $0xea0] sm:$0xff] }
 0x43a   :  { %6937 = vmatpush3.bf16.msra.mxu1 %v6936_v56  ;;  %6731 = vmatprep.subr.bf16.mxu0 %v6730_v21  ;;  %v6952_v56 = vpack.c.bf16 %v1971_v14, %v1964_v9  ;;  %v6746_v21 = vpack.c.bf16 %v1830_v7, %v1823_v46  ;;  %v6758_v9 = vpack.c.bf16 %v1872_v58, %v1865_v0  ;;  %v2139_v14 = vld [vmem:[#allocation9 + $0xed8] sm:$0xff]  ;;  %v1886_v7 = vld [vmem:[#allocation9 + $0x6f0] sm:$0xff]  ;;  %v1921_v0 = vld [vmem:[#allocation9 + $0x808] sm:$0xff] }
 0x43b   :  { %6939 = vmatprep.subr.bf16.mxu1 %v6938_v24  ;;  %v6954_v24 = vpack.c.bf16 %v2097_v18, %v2090_v16  ;;  %v1879_v46 = vld [vmem:[#allocation9 + $0x6b8] sm:$0xff]  ;;  %v2258_v16 = vld [vmem:[#allocation9 + $0x1290] sm:$0xff]  ;;  %v2265_v18 = vld [vmem:[#allocation9 + $0x12c8] sm:$0xff] }
 0x43c   :  { %v1928_v58 = vld [vmem:[#allocation9 + $0x840] sm:$0xff] }
 0x43d   :  { %6733 = vmatpush1.bf16.msra.mxu0 %v6732_v38  ;;  %v6748_v38 = vpack.c.bf16 %v1829_v15, %v1822_v22  ;;  %v1878_v22 = vld [vmem:[#allocation9 + $0x6b0] sm:$0xff]  ;;  %v1885_v15 = vld [vmem:[#allocation9 + $0x6e8] sm:$0xff] }
 0x43e   :  { %6941 = vmatpush3.bf16.msra.mxu1 %v6940_v31  ;;  %6735 = vmatprep.subr.bf16.mxu0 %v6734_v32  ;;  %v6956_v31 = vpack.c.bf16 %v1985_v25, %v1978_v23  ;;  %v6750_v32 = vpack.c.bf16 %v1844_v27, %v1837_v26  ;;  %v2146_v23 = vld [vmem:[#allocation9 + $0xf10] sm:$0xff]  ;;  %v2153_v25 = vld [vmem:[#allocation9 + $0xf48] sm:$0xff]  ;;  %v1900_v27 = vld [vmem:[#allocation9 + $0x760] sm:$0xff] }
 0x43f   :  { %6943 = vmatprep.subr.bf16.mxu1 %v6942_v40  ;;  %v6958_v40 = vpack.c.bf16 %v2111_v29, %v2104_v28  ;;  %v1893_v26 = vld [vmem:[#allocation9 + $0x728] sm:$0xff]  ;;  %v2272_v28 = vld [vmem:[#allocation9 + $0x1300] sm:$0xff]  ;;  %v2279_v29 = vld [vmem:[#allocation9 + $0x1338] sm:$0xff] }
 0x441   :  { %6737 = vmatpush1.bf16.msra.mxu0 %v6736_v47  ;;  %v6752_v47 = vpack.c.bf16 %v1843_v35, %v1836_v34  ;;  %v1892_v34 = vld [vmem:[#allocation9 + $0x720] sm:$0xff]  ;;  %v1899_v35 = vld [vmem:[#allocation9 + $0x758] sm:$0xff] }
 0x442   :  { %6945 = vmatpush3.bf16.msra.mxu1 %v6944_v48  ;;  %6739 = vmatprep.subr.bf16.mxu0 %v6738_v49  ;;  %v6960_v48 = vpack.c.bf16 %v1999_v41, %v1992_v37  ;;  %v6754_v49 = vpack.c.bf16 %v1858_v43, %v1851_v42  ;;  %v2160_v37 = vld [vmem:[#allocation9 + $0xf80] sm:$0xff]  ;;  %v2167_v41 = vld [vmem:[#allocation9 + $0xfb8] sm:$0xff]  ;;  %v1914_v43 = vld [vmem:[#allocation9 + $0x7d0] sm:$0xff] }
 0x443   :  { %6947 = vmatprep.subr.bf16.mxu1 %v6946_v55  ;;  %v2118_v55 = vld [vmem:[#allocation9 + $0xe30] sm:$0xff]  ;;  %v1907_v42 = vld [vmem:[#allocation9 + $0x798] sm:$0xff] }
 0x445   :  { %6741 = vmatpush1.bf16.msra.mxu0 %v6740_v1  ;;  %v6756_v1 = vpack.c.bf16 %v1857_v51, %v1850_v50  ;;  %v1906_v50 = vld [vmem:[#allocation9 + $0x790] sm:$0xff]  ;;  %v1913_v51 = vld [vmem:[#allocation9 + $0x7c8] sm:$0xff] }
 0x446   :  { %6949 = vmatpush3.bf16.msra.mxu1 %v6948_v3  ;;  %6743 = vmatprep.subr.bf16.mxu0 %v6742_v5  ;;  %v6964_v3 = vpack.c.bf16 %v2125_v57, %v2118_v55  ;;  %v1864_v5 = vld [vmem:[#allocation9 + $0x640] sm:$0xff]  ;;  %v6978_v55 = vpack.c.bf16 %v2293_v45, %v2286_v44  ;;  %v2181_v57 = vld [vmem:[#allocation9 + $0x1028] sm:$0xff]  ;;  %v1962_v45 = vld [vmem:[#allocation9 + $0x950] sm:$0xff] }
 0x447   :  { %6951 = vmatprep.subr.bf16.mxu1 %v6950_v11  ;;  %v6966_v11 = vpack.c.bf16 %v2251_v63, %v2244_v60  ;;  %v2300_v60 = vld [vmem:[#allocation9 + $0x13e0] sm:$0xff]  ;;  %v2307_v63 = vld [vmem:[#allocation9 + $0x1418] sm:$0xff] }
 0x449   :  { %6745 = vmatpush1.bf16.msra.mxu0 %v6744_v19  ;;  %v6760_v19 = vpack.c.bf16 %v1871_v6, %v1864_v5  ;;  %v6774_v5 = vpack.c.bf16 %v1928_v58, %v1921_v0  ;;  %v1920_v6 = vld [vmem:[#allocation9 + $0x800] sm:$0xff] }
 0x44a   :  { %6953 = vmatpush3.bf16.msra.mxu1 %v6952_v56  ;;  %6747 = vmatprep.subr.bf16.mxu0 %v6746_v21  ;;  %v6968_v56 = vpack.c.bf16 %v2139_v14, %v2132_v8  ;;  %v6762_v21 = vpack.c.bf16 %v1886_v7, %v1879_v46  ;;  %v1927_v8 = vld [vmem:[#allocation9 + $0x838] sm:$0xff]  ;;  %v1942_v7 = vld [vmem:[#allocation9 + $0x8b0] sm:$0xff] }
 0x44b   :  { %6955 = vmatprep.subr.bf16.mxu1 %v6954_v24  ;;  %v6970_v24 = vpack.c.bf16 %v2265_v18, %v2258_v16  ;;  %v2195_v14 = vld [vmem:[#allocation9 + $0x1098] sm:$0xff]  ;;  %v2314_v16 = vld [vmem:[#allocation9 + $0x1450] sm:$0xff]  ;;  %v6776_v18 = vpack.c.bf16 %v1927_v8, %v1920_v6 }
 0x44c   :  { %v1935_v46 = vld [vmem:[#allocation9 + $0x878] sm:$0xff]  ;;  %v3537_v8 = vld [vmem:[#allocation12 + $0x38] sm:$0xff] }
 0x44d   :  { %6749 = vmatpush1.bf16.msra.mxu0 %v6748_v38  ;;  %v6764_v38 = vpack.c.bf16 %v1885_v15, %v1878_v22  ;;  %v2202_v22 = vld [vmem:[#allocation9 + $0x10d0] sm:$0xff]  ;;  %v3530_v6 = vld [vmem:[#allocation12] sm:$0xff] }
 0x44e   :  { %6957 = vmatpush3.bf16.msra.mxu1 %v6956_v31  ;;  %6751 = vmatprep.subr.bf16.mxu0 %v6750_v32  ;;  %v6972_v31 = vpack.c.bf16 %v2153_v25, %v2146_v23  ;;  %v6766_v32 = vpack.c.bf16 %v1900_v27, %v1893_v26  ;;  %v2209_v23 = vld [vmem:[#allocation9 + $0x1108] sm:$0xff]  ;;  %v1956_v25 = vld [vmem:[#allocation9 + $0x920] sm:$0xff]  ;;  %v2335_v27 = vld [vmem:[#allocation9 + $0x14f8] sm:$0xff] }
 0x44f   :  { %6959 = vmatprep.subr.bf16.mxu1 %v6958_v40  ;;  %v6974_v40 = vpack.c.bf16 %v2279_v29, %v2272_v28  ;;  %v2328_v26 = vld [vmem:[#allocation9 + $0x14c0] sm:$0xff]  ;;  %v6988_v29 = vpack.c.bf16 %v2209_v23, %v2202_v22 }
 0x450   :  { %v3559_v22 = vld [vmem:[#allocation12 + $0xe8] sm:$0xff] }
 0x451   :  { %6753 = vmatpush1.bf16.msra.mxu0 %v6752_v47  ;;  %v6768_v47 = vpack.c.bf16 %v1899_v35, %v1892_v34  ;;  %v2216_v34 = vld [vmem:[#allocation9 + $0x1140] sm:$0xff]  ;;  %v6990_v35 = vpack.c.bf16 %v2335_v27, %v2328_v26  ;;  %v2011_v26 = vld [vmem:[#allocation9 + $0xad8] sm:$0xff] }
 0x452   :  { %6961 = vmatpush3.bf16.msra.mxu1 %v6960_v48  ;;  %6755 = vmatprep.subr.bf16.mxu0 %v6754_v49  ;;  %v6976_v48 = vpack.c.bf16 %v2167_v41, %v2160_v37  ;;  %v6770_v49 = vpack.c.bf16 %v1914_v43, %v1907_v42  ;;  %v2223_v37 = vld [vmem:[#allocation9 + $0x1178] sm:$0xff]  ;;  %v1970_v41 = vld [vmem:[#allocation9 + $0x990] sm:$0xff] }
 0x453   :  { %6963 = vmatprep.subr.bf16.mxu1 %v6962_v53  ;;  %v2174_v53 = vld [vmem:[#allocation9 + $0xff0] sm:$0xff]  ;;  %v6992_v43 = vpack.c.bf16 %v2223_v37, %v2216_v34  ;;  %v2019_v27 = vld [vmem:[#allocation9 + $0xb18] sm:$0xff] }
 0x454   :  { %v3573_v34 = vld [vmem:[#allocation12 + $0x158] sm:$0xff] }
 0x455   :  { %6757 = vmatpush1.bf16.msra.mxu0 %v6756_v1  ;;  %3378 = vmatmul.mubr.f32.vlgmr.msra.gmra.mrb[12].mxu1 %v8753_v2  ;;  %v6772_v1 = vpack.c.bf16 %v1913_v51, %v1906_v50  ;;  %v1977_v50 = vld [vmem:[#allocation9 + $0x9c8] sm:$0xff]  ;;  %v1984_v51 = vld [vmem:[#allocation9 + $0xa00] sm:$0xff] }
 0x456   :  { %6965 = vmatpush3.bf16.msra.mxu1 %v6964_v3  ;;  %3447 = vmatprep.mubr.f32.mxu1 %v8761_v30  ;;  %v6980_v3 = vpack.c.bf16 %v2181_v57, %v2174_v53  ;;  %v3531_v53 = vld [vmem:[#allocation12 + $0x8] sm:$0xff]  ;;  %v6790_v58 = vpack.c.bf16 %v1984_v51, %v1977_v50  ;;  %v3594_v51 = vld [vmem:[#allocation12 + $0x200] sm:$0xff] }
 0x457   :  { %6759 = vmatprep.subr.bf16.mxu0 %v6758_v9  ;;  %6967 = vmatprep.subr.bf16.mxu1 %v6966_v11  ;;  %v2188_v9 = vld [vmem:[#allocation9 + $0x1060] sm:$0xff]  ;;  %v6982_v11 = vpack.c.bf16 %v2307_v63, %v2300_v60  ;;  %v1983_v63 = vld [vmem:[#allocation9 + $0x9f8] sm:$0xff] }
 0x458   :  { %v1976_v60 = vld [vmem:[#allocation9 + $0x9c0] sm:$0xff] }
 0x459   :  { %6761 = vmatpush1.bf16.msra.mxu0 %v6760_v19  ;;  %v6778_v19 = vpack.c.bf16 %v1942_v7, %v1935_v46  ;;  %v1990_v7 = vld [vmem:[#allocation9 + $0xa30] sm:$0xff]  ;;  %v3587_v50 = vld [vmem:[#allocation12 + $0x1c8] sm:$0xff] }
 0x45a   :  { %6969 = vmatpush3.bf16.msra.mxu1 %v6968_v56  ;;  %6763 = vmatprep.subr.bf16.mxu0 %v6762_v21  ;;  %v1934_v56 = vld [vmem:[#allocation9 + $0x870] sm:$0xff]  ;;  %v1941_v21 = vld [vmem:[#allocation9 + $0x8a8] sm:$0xff] }
 0x45b   :  { %6971 = vmatprep.subr.bf16.mxu1 %v6970_v24  ;;  %v1949_v24 = vld [vmem:[#allocation9 + $0x8e8] sm:$0xff]  ;;  %v6780_v28 = vpack.c.bf16 %v1941_v21, %v1934_v56  ;;  %v3551_v21 = vld [vmem:[#allocation12 + $0xa8] sm:$0xff] }
 0x45c   :  { %v3544_v56 = vld [vmem:[#allocation12 + $0x70] sm:$0xff] }
 0x45d   :  { %6765 = vmatpush1.bf16.msra.mxu0 %v6764_v38  ;;  %v6782_v38 = vpack.c.bf16 %v1956_v25, %v1949_v24  ;;  %v2004_v25 = vld [vmem:[#allocation9 + $0xaa0] sm:$0xff] }
 0x45e   :  { %6973 = vmatpush3.bf16.msra.mxu1 %v6972_v31  ;;  %6767 = vmatprep.subr.bf16.mxu0 %v6766_v32  ;;  %v1948_v31 = vld [vmem:[#allocation9 + $0x8e0] sm:$0xff]  ;;  %v1955_v32 = vld [vmem:[#allocation9 + $0x918] sm:$0xff]  ;;  %v6800_v37 = vpack.c.bf16 %v2011_v26, %v2004_v25 }
 0x45f   :  { %6975 = vmatprep.subr.bf16.mxu1 %v6974_v40  ;;  %v1963_v40 = vld [vmem:[#allocation9 + $0x958] sm:$0xff]  ;;  %v6784_v42 = vpack.c.bf16 %v1955_v32, %v1948_v31  ;;  %v3565_v32 = vld [vmem:[#allocation12 + $0x118] sm:$0xff] }
 0x460   :  { %3024 = vmatmul.mubr.f32.vlgmr.msra.gmra.mrb[18].mxu0 %v8730_v62  ;;  %v2321_v62 = vld [vmem:[#allocation9 + $0x1488] sm:$0xff]  ;;  %v6786_v44 = vpack.c.bf16 %v1970_v41, %v1963_v40  ;;  %v3558_v31 = vld [vmem:[#allocation12 + $0xe0] sm:$0xff]  ;;  %v2018_v41 = vld [vmem:[#allocation9 + $0xb10] sm:$0xff] }
 0x461   :  { %6769 = vmatpush1.bf16.msra.mxu0 %v6768_v47  ;;  %3094 = vmatprep.mubr.f32.mxu0 %v8734_v10  ;;  %v6984_v10 = vpack.c.bf16 %v2195_v14, %v2188_v9  ;;  %v6986_v15 = vpack.c.bf16 %v2321_v62, %v2314_v16  ;;  %v1969_v47 = vld [vmem:[#allocation9 + $0x988] sm:$0xff]  ;;  %v3545_v9 = vld [vmem:[#allocation12 + $0x78] sm:$0xff]  ;;  %v6792_v14 = vpack.c.bf16 %v1983_v63, %v1976_v60  ;;  %v2075_v25 = vld [vmem:[#allocation9 + $0xcd8] sm:$0xff] }
 0x462   :  { %6977 = vmatpush3.bf16.msra.mxu1 %v6976_v48  ;;  %6771 = vmatprep.subr.bf16.mxu0 %v6770_v49  ;;  %v2342_v48 = vld [vmem:[#allocation9 + $0x1530] sm:$0xff]  ;;  %v2349_v49 = vld [vmem:[#allocation9 + $0x1568] sm:$0xff]  ;;  %v6788_v57 = vpack.c.bf16 %v1969_v47, %v1962_v45  ;;  %v2040_v45 = vld [vmem:[#allocation9 + $0xbc0] sm:$0xff] }
 0x463   :  { %6979 = vmatprep.subr.bf16.mxu1 %v6978_v55  ;;  %v3538_v55 = vld [vmem:[#allocation12 + $0x40] sm:$0xff]  ;;  %v6995_v0 = vpack.c.bf16 %v2349_v49, %v2342_v48  ;;  %v1997_v16 = vld [vmem:[#allocation9 + $0xa68] sm:$0xff]  ;;  %v3579_v49 = vld [vmem:[#allocation12 + $0x188] sm:$0xff] }
 0x464   :  { %v2005_v62 = vld [vmem:[#allocation9 + $0xaa8] sm:$0xff]  ;;  %v6796_v23 = vpack.c.bf16 %v1997_v16, %v1990_v7  ;;  %v2054_v63 = vld [vmem:[#allocation9 + $0xc30] sm:$0xff] }
 0x465   :  { %6773 = vmatpush1.bf16.msra.mxu0 %v6772_v1  ;;  %v1991_v1 = vld [vmem:[#allocation9 + $0xa38] sm:$0xff]  ;;  %v3572_v48 = vld [vmem:[#allocation12 + $0x150] sm:$0xff] }
 0x466   :  { %6981 = vmatpush3.bf16.msra.mxu1 %v6980_v3  ;;  %6775 = vmatprep.subr.bf16.mxu0 %v6774_v5  ;;  %v1998_v3 = vld [vmem:[#allocation9 + $0xa70] sm:$0xff]  ;;  %v6997_v5 = vpack.c.bf16 %v3538_v55, %v3531_v53  ;;  %v7011_v60 = vpack.c.bf16 %v3579_v49, %v3572_v48  ;;  %v2061_v7 = vld [vmem:[#allocation9 + $0xc68] sm:$0xff]  ;;  %v3643_v48 = vld [vmem:[#allocation12 + $0x388] sm:$0xff] }
 0x467   :  { %6983 = vmatprep.subr.bf16.mxu1 %v6982_v11  ;;  %v3552_v11 = vld [vmem:[#allocation12 + $0xb0] sm:$0xff]  ;;  %v6794_v46 = vpack.c.bf16 %v1998_v3, %v1991_v1  ;;  %v7013_v1 = vpack.c.bf16 %v3594_v51, %v3587_v50  ;;  %v3586_v3 = vld [vmem:[#allocation12 + $0x1c0] sm:$0xff] }
 0x468   :  { %v3650_v49 = vld [vmem:[#allocation12 + $0x3c0] sm:$0xff] }
 0x469   :  { %6777 = vmatpush1.bf16.msra.mxu0 %v6776_v18  ;;  %v6999_v18 = vpack.c.bf16 %v3537_v8, %v3530_v6  ;;  %v3601_v6 = vld [vmem:[#allocation12 + $0x238] sm:$0xff]  ;;  %v3608_v8 = vld [vmem:[#allocation12 + $0x270] sm:$0xff] }
 0x46a   :  { %6985 = vmatpush3.bf16.msra.mxu1 %v6984_v10  ;;  %6779 = vmatprep.subr.bf16.mxu0 %v6778_v19  ;;  %v2012_v10 = vld [vmem:[#allocation9 + $0xae0] sm:$0xff]  ;;  %v7001_v19 = vpack.c.bf16 %v3552_v11, %v3545_v9 }
 0x46b   :  { %6987 = vmatprep.subr.bf16.mxu1 %v6986_v15  ;;  %v3566_v15 = vld [vmem:[#allocation12 + $0x120] sm:$0xff]  ;;  %v6798_v24 = vpack.c.bf16 %v2012_v10, %v2005_v62  ;;  %v2068_v62 = vld [vmem:[#allocation9 + $0xca0] sm:$0xff]  ;;  %v3600_v10 = vld [vmem:[#allocation12 + $0x230] sm:$0xff] }
 0x46d   :  { %6781 = vmatpush1.bf16.msra.mxu0 %v6780_v28  ;;  %v7003_v28 = vpack.c.bf16 %v3551_v21, %v3544_v56  ;;  %v3615_v56 = vld [vmem:[#allocation12 + $0x2a8] sm:$0xff]  ;;  %v3622_v21 = vld [vmem:[#allocation12 + $0x2e0] sm:$0xff] }
 0x46e   :  { %6989 = vmatpush3.bf16.msra.mxu1 %v6988_v29  ;;  %6783 = vmatprep.subr.bf16.mxu0 %v6782_v38  ;;  %v2026_v29 = vld [vmem:[#allocation9 + $0xb50] sm:$0xff]  ;;  %v7005_v38 = vpack.c.bf16 %v3566_v15, %v3559_v22  ;;  %v6814_v15 = vpack.c.bf16 %v2068_v62, %v2061_v7  ;;  %v2124_v7 = vld [vmem:[#allocation9 + $0xe60] sm:$0xff]  ;;  %v3656_v62 = vld [vmem:[#allocation12 + $0x3f0] sm:$0xff] }
 0x46f   :  { %6991 = vmatprep.subr.bf16.mxu1 %v6990_v35  ;;  %v3580_v35 = vld [vmem:[#allocation12 + $0x190] sm:$0xff]  ;;  %v6802_v40 = vpack.c.bf16 %v2026_v29, %v2019_v27  ;;  %v2082_v27 = vld [vmem:[#allocation9 + $0xd10] sm:$0xff]  ;;  %v3614_v29 = vld [vmem:[#allocation12 + $0x2a0] sm:$0xff] }
 0x470   :  { %v7009_v47 = vpack.c.bf16 %v3580_v35, %v3573_v34  ;;  %v6818_v35 = vpack.c.bf16 %v2082_v27, %v2075_v25  ;;  %v2138_v25 = vld [vmem:[#allocation9 + $0xed0] sm:$0xff]  ;;  %v3670_v27 = vld [vmem:[#allocation12 + $0x460] sm:$0xff] }
 0x471   :  { %6785 = vmatpush1.bf16.msra.mxu0 %v6784_v42  ;;  %v2025_v42 = vld [vmem:[#allocation9 + $0xb48] sm:$0xff] }
 0x472   :  { %6993 = vmatpush3.bf16.msra.mxu1 %v6992_v43  ;;  %6787 = vmatprep.subr.bf16.mxu0 %v6786_v44  ;;  %v2033_v43 = vld [vmem:[#allocation9 + $0xb88] sm:$0xff]  ;;  %v7007_v44 = vpack.c.bf16 %v3565_v32, %v3558_v31  ;;  %v6804_v53 = vpack.c.bf16 %v2025_v42, %v2018_v41  ;;  %v3629_v31 = vld [vmem:[#allocation12 + $0x318] sm:$0xff] }
 0x473   :  { %6994 = vmatprep.subr.bf16.mxu1 %v7959_v59  ;;  %v6806_v55 = vpack.c.bf16 %v2040_v45, %v2033_v43  ;;  %v3636_v32 = vld [vmem:[#allocation12 + $0x350] sm:$0xff]  ;;  %v2096_v43 = vld [vmem:[#allocation9 + $0xd80] sm:$0xff] }
 0x474   :  { %v2089_v41 = vld [vmem:[#allocation9 + $0xd48] sm:$0xff] }
 0x475   :  { %6789 = vmatpush1.bf16.msra.mxu0 %v6788_v57  ;;  %3448 = vmatmul.mubr.f32.vlgmr.msra.gmra.mrb[14].mxu1 %v8770_v12  ;;  %v2032_v57 = vld [vmem:[#allocation9 + $0xb80] sm:$0xff]  ;;  %v3628_v45 = vld [vmem:[#allocation12 + $0x310] sm:$0xff]  ;;  %v6822_v51 = vpack.c.bf16 %v2096_v43, %v2089_v41 }
 0x476   :  { %6996 = vmatpush3.bf16.msra.mxu1 %v6995_v0  ;;  %6791 = vmatprep.subr.bf16.mxu0 %v6790_v58  ;;  %v2039_v0 = vld [vmem:[#allocation9 + $0xbb8] sm:$0xff]  ;;  %v2152_v41 = vld [vmem:[#allocation9 + $0xf40] sm:$0xff]  ;;  %v3684_v43 = vld [vmem:[#allocation12 + $0x4d0] sm:$0xff] }
 0x477   :  { %5881 = vmatprep.mubr.msk.f32.mxu1 %vm7961_vm3, %v7960_v4  ;;  %6998 = vmatprep.subr.bf16.mxu1 %v6997_v5  ;;  %v2047_v58 = vld [vmem:[#allocation9 + $0xbf8] sm:$0xff]  ;;  %v3593_v5 = vld [vmem:[#allocation12 + $0x1f8] sm:$0xff]  ;;  %v6808_v9 = vpack.c.bf16 %v2039_v0, %v2032_v57 }
 0x478   :  { %v6810_v11 = vpack.c.bf16 %v2054_v63, %v2047_v58  ;;  %v7015_v16 = vpack.c.bf16 %v3593_v5, %v3586_v3  ;;  %v2103_v57 = vld [vmem:[#allocation9 + $0xdb8] sm:$0xff]  ;;  %v2110_v58 = vld [vmem:[#allocation9 + $0xdf0] sm:$0xff]  ;;  %v3664_v5 = vld [vmem:[#allocation12 + $0x430] sm:$0xff] }
 0x479   :  { %6793 = vmatpush1.bf16.msra.mxu0 %v6792_v14  ;;  %5882 = vmatmul.mubr.msk.f32.vlgmr.msra.gmra.mrb[16].mxu1 %vm2387_vm5, %v8745_v17  ;;  %v2046_v14 = vld [vmem:[#allocation9 + $0xbf0] sm:$0xff]  ;;  %v3642_v63 = vld [vmem:[#allocation12 + $0x380] sm:$0xff] }
 0x47a   :  { %6795 = vmatprep.subr.bf16.mxu0 %v6794_v46  ;;  %7000 = vmatpush1.bf16.msra.mxu1 %v6999_v18  ;;  %v2053_v46 = vld [vmem:[#allocation9 + $0xc28] sm:$0xff]  ;;  %v7017_v18 = vpack.c.bf16 %v3608_v8, %v3601_v6  ;;  %v3657_v3 = vld [vmem:[#allocation12 + $0x3f8] sm:$0xff]  ;;  %v6826_v8 = vpack.c.bf16 %v2110_v58, %v2103_v57  ;;  %v3698_v58 = vld [vmem:[#allocation12 + $0x540] sm:$0xff] }
 0x47b   :  { %7002 = vmatprep.subr.bf16.mxu1 %v7001_v19  ;;  %v3607_v19 = vld [vmem:[#allocation12 + $0x268] sm:$0xff]  ;;  %v6812_v22 = vpack.c.bf16 %v2053_v46, %v2046_v14  ;;  %v2117_v14 = vld [vmem:[#allocation9 + $0xe28] sm:$0xff]  ;;  %v2166_v57 = vld [vmem:[#allocation9 + $0xfb0] sm:$0xff] }
 0x47c   :  { %v7019_v26 = vpack.c.bf16 %v3607_v19, %v3600_v10  ;;  %v3671_v10 = vld [vmem:[#allocation12 + $0x468] sm:$0xff]  ;;  %v3678_v19 = vld [vmem:[#allocation12 + $0x4a0] sm:$0xff] }
 0x47d   :  { %6797 = vmatpush1.bf16.msra.mxu0 %v6796_v23  ;;  %v2060_v23 = vld [vmem:[#allocation9 + $0xc60] sm:$0xff] }
 0x47e   :  { %6799 = vmatprep.subr.bf16.mxu0 %v6798_v24  ;;  %7004 = vmatpush1.bf16.msra.mxu1 %v7003_v28  ;;  %v2067_v24 = vld [vmem:[#allocation9 + $0xc98] sm:$0xff]  ;;  %v7021_v28 = vpack.c.bf16 %v3622_v21, %v3615_v56  ;;  %v6830_v21 = vpack.c.bf16 %v2124_v7, %v2117_v14  ;;  %v3712_v14 = vld [vmem:[#allocation12 + $0x5b0] sm:$0xff]  ;;  %v3727_v7 = vld [vmem:[#allocation12 + $0x628] sm:$0xff] }
 0x47f   :  { %7006 = vmatprep.subr.bf16.mxu1 %v7005_v38  ;;  %v3621_v38 = vld [vmem:[#allocation12 + $0x2d8] sm:$0xff]  ;;  %v6816_v34 = vpack.c.bf16 %v2067_v24, %v2060_v23  ;;  %v2131_v23 = vld [vmem:[#allocation9 + $0xe98] sm:$0xff] }
 0x480   :  { %v7023_v42 = vpack.c.bf16 %v3621_v38, %v3614_v29  ;;  %v3685_v29 = vld [vmem:[#allocation12 + $0x4d8] sm:$0xff]  ;;  %v3692_v38 = vld [vmem:[#allocation12 + $0x510] sm:$0xff] }
 0x481   :  { %6801 = vmatpush1.bf16.msra.mxu0 %v6800_v37  ;;  %v2074_v37 = vld [vmem:[#allocation9 + $0xcd0] sm:$0xff] }
 0x482   :  { %6803 = vmatprep.subr.bf16.mxu0 %v6802_v40  ;;  %7008 = vmatpush1.bf16.msra.mxu1 %v7007_v44  ;;  %v2081_v40 = vld [vmem:[#allocation9 + $0xd08] sm:$0xff]  ;;  %v7025_v44 = vpack.c.bf16 %v3636_v32, %v3629_v31  ;;  %v6834_v32 = vpack.c.bf16 %v2138_v25, %v2131_v23  ;;  %v3726_v23 = vld [vmem:[#allocation12 + $0x620] sm:$0xff]  ;;  %v3741_v25 = vld [vmem:[#allocation12 + $0x698] sm:$0xff] }
 0x483   :  { %7010 = vmatprep.subr.bf16.mxu1 %v7009_v47  ;;  %v3635_v47 = vld [vmem:[#allocation12 + $0x348] sm:$0xff]  ;;  %v6820_v50 = vpack.c.bf16 %v2081_v40, %v2074_v37  ;;  %v2145_v37 = vld [vmem:[#allocation9 + $0xf08] sm:$0xff] }
 0x484   :  { %v7027_v0 = vpack.c.bf16 %v3635_v47, %v3628_v45  ;;  %v3699_v45 = vld [vmem:[#allocation12 + $0x548] sm:$0xff]  ;;  %v3706_v47 = vld [vmem:[#allocation12 + $0x580] sm:$0xff] }
 0x485   :  { %6805 = vmatpush1.bf16.msra.mxu0 %v6804_v53  ;;  %v2088_v53 = vld [vmem:[#allocation9 + $0xd40] sm:$0xff] }
 0x486   :  { %6807 = vmatprep.subr.bf16.mxu0 %v6806_v55  ;;  %7012 = vmatpush1.bf16.msra.mxu1 %v7011_v60  ;;  %v2095_v55 = vld [vmem:[#allocation9 + $0xd78] sm:$0xff]  ;;  %v7029_v60 = vpack.c.bf16 %v3650_v49, %v3643_v48  ;;  %v6838_v49 = vpack.c.bf16 %v2152_v41, %v2145_v37  ;;  %v3740_v37 = vld [vmem:[#allocation12 + $0x690] sm:$0xff]  ;;  %v3755_v41 = vld [vmem:[#allocation12 + $0x708] sm:$0xff] }
 0x487   :  { %7014 = vmatprep.subr.bf16.mxu1 %v7013_v1  ;;  %v3649_v1 = vld [vmem:[#allocation12 + $0x3b8] sm:$0xff]  ;;  %v6824_v6 = vpack.c.bf16 %v2095_v55, %v2088_v53  ;;  %v2159_v53 = vld [vmem:[#allocation9 + $0xf78] sm:$0xff] }
 0x488   :  { %v7031_v46 = vpack.c.bf16 %v3649_v1, %v3642_v63  ;;  %v3713_v63 = vld [vmem:[#allocation12 + $0x5b8] sm:$0xff] }
 0x489   :  { %6809 = vmatpush1.bf16.msra.mxu0 %v6808_v9  ;;  %v2102_v9 = vld [vmem:[#allocation9 + $0xdb0] sm:$0xff] }
 0x48a   :  { %6811 = vmatprep.subr.bf16.mxu0 %v6810_v11  ;;  %7016 = vmatpush1.bf16.msra.mxu1 %v7015_v16  ;;  %v2109_v11 = vld [vmem:[#allocation9 + $0xde8] sm:$0xff]  ;;  %v7033_v16 = vpack.c.bf16 %v3664_v5, %v3657_v3  ;;  %v6842_v3 = vpack.c.bf16 %v2166_v57, %v2159_v53  ;;  %v2214_v57 = vld [vmem:[#allocation9 + $0x1130] sm:$0xff] }
 0x48b   :  { %7018 = vmatprep.subr.bf16.mxu1 %v7017_v18  ;;  %v3663_v18 = vld [vmem:[#allocation12 + $0x428] sm:$0xff]  ;;  %v6828_v56 = vpack.c.bf16 %v2109_v11, %v2102_v9  ;;  %v2165_v5 = vld [vmem:[#allocation9 + $0xfa8] sm:$0xff] }
 0x48c   :  { %v7035_v24 = vpack.c.bf16 %v3663_v18, %v3656_v62  ;;  %v2180_v9 = vld [vmem:[#allocation9 + $0x1020] sm:$0xff] }
 0x48d   :  { %6813 = vmatpush1.bf16.msra.mxu0 %v6812_v22  ;;  %v2116_v22 = vld [vmem:[#allocation9 + $0xe20] sm:$0xff] }
 0x48e   :  { %6815 = vmatprep.subr.bf16.mxu0 %v6814_v15  ;;  %7020 = vmatpush1.bf16.msra.mxu1 %v7019_v26  ;;  %v2123_v15 = vld [vmem:[#allocation9 + $0xe58] sm:$0xff]  ;;  %v7037_v26 = vpack.c.bf16 %v3678_v19, %v3671_v10  ;;  %v2172_v10 = vld [vmem:[#allocation9 + $0xfe0] sm:$0xff] }
 0x48f   :  { %7022 = vmatprep.subr.bf16.mxu1 %v7021_v28  ;;  %v3677_v28 = vld [vmem:[#allocation12 + $0x498] sm:$0xff]  ;;  %v6832_v31 = vpack.c.bf16 %v2123_v15, %v2116_v22  ;;  %v2179_v19 = vld [vmem:[#allocation9 + $0x1018] sm:$0xff] }
 0x490   :  { %v7039_v40 = vpack.c.bf16 %v3677_v28, %v3670_v27  ;;  %v2194_v22 = vld [vmem:[#allocation9 + $0x1090] sm:$0xff]  ;;  %v6848_v27 = vpack.c.bf16 %v2179_v19, %v2172_v10  ;;  %v2271_v10 = vld [vmem:[#allocation9 + $0x12f8] sm:$0xff] }
 0x491   :  { %6817 = vmatpush1.bf16.msra.mxu0 %v6816_v34  ;;  %v2130_v34 = vld [vmem:[#allocation9 + $0xe90] sm:$0xff] }
 0x492   :  { %6819 = vmatprep.subr.bf16.mxu0 %v6818_v35  ;;  %7024 = vmatpush1.bf16.msra.mxu1 %v7023_v42  ;;  %v2137_v35 = vld [vmem:[#allocation9 + $0xec8] sm:$0xff]  ;;  %v7041_v42 = vpack.c.bf16 %v3692_v38, %v3685_v29  ;;  %v2186_v29 = vld [vmem:[#allocation9 + $0x1050] sm:$0xff] }
 0x493   :  { %7026 = vmatprep.subr.bf16.mxu1 %v7025_v44  ;;  %v3691_v44 = vld [vmem:[#allocation12 + $0x508] sm:$0xff]  ;;  %v6836_v48 = vpack.c.bf16 %v2137_v35, %v2130_v34  ;;  %v2193_v38 = vld [vmem:[#allocation9 + $0x1088] sm:$0xff]  ;;  %v2278_v19 = vld [vmem:[#allocation9 + $0x1330] sm:$0xff] }
 0x494   :  { %v7043_v55 = vpack.c.bf16 %v3691_v44, %v3684_v43  ;;  %v2208_v34 = vld [vmem:[#allocation9 + $0x1100] sm:$0xff]  ;;  %v6852_v43 = vpack.c.bf16 %v2193_v38, %v2186_v29  ;;  %v2299_v29 = vld [vmem:[#allocation9 + $0x13d8] sm:$0xff]  ;;  %v2306_v38 = vld [vmem:[#allocation9 + $0x1410] sm:$0xff] }
 0x495   :  { %6821 = vmatpush1.bf16.msra.mxu0 %v6820_v50  ;;  %v2144_v50 = vld [vmem:[#allocation9 + $0xf00] sm:$0xff] }
 0x496   :  { %6823 = vmatprep.subr.bf16.mxu0 %v6822_v51  ;;  %7028 = vmatpush1.bf16.msra.mxu1 %v7027_v0  ;;  %v2151_v51 = vld [vmem:[#allocation9 + $0xf38] sm:$0xff]  ;;  %v7045_v0 = vpack.c.bf16 %v3706_v47, %v3699_v45  ;;  %v2200_v45 = vld [vmem:[#allocation9 + $0x10c0] sm:$0xff] }
 0x497   :  { %7030 = vmatprep.subr.bf16.mxu1 %v7029_v60  ;;  %v3705_v60 = vld [vmem:[#allocation12 + $0x578] sm:$0xff]  ;;  %v6840_v1 = vpack.c.bf16 %v2151_v51, %v2144_v50  ;;  %v2207_v47 = vld [vmem:[#allocation9 + $0x10f8] sm:$0xff] }
 0x498   :  { %v2222_v50 = vld [vmem:[#allocation9 + $0x1170] sm:$0xff]  ;;  %v6856_v53 = vpack.c.bf16 %v2207_v47, %v2200_v45  ;;  %v2327_v45 = vld [vmem:[#allocation9 + $0x14b8] sm:$0xff] }
 0x499   :  { %6825 = vmatpush1.bf16.msra.mxu0 %v6824_v6  ;;  %v2173_v6 = vld [vmem:[#allocation9 + $0xfe8] sm:$0xff]  ;;  %v2334_v47 = vld [vmem:[#allocation9 + $0x14f0] sm:$0xff] }
 0x49a   :  { %6827 = vmatprep.subr.bf16.mxu0 %v6826_v8  ;;  %7032 = vmatpush1.bf16.msra.mxu1 %v7031_v46  ;;  %v7047_v8 = vpack.c.bf16 %v3705_v60, %v3698_v58  ;;  %v3719_v46 = vld [vmem:[#allocation12 + $0x5e8] sm:$0xff]  ;;  %v6846_v18 = vpack.c.bf16 %v2180_v9, %v2173_v6  ;;  %v2229_v58 = vld [vmem:[#allocation9 + $0x11a8] sm:$0xff]  ;;  %v2242_v9 = vld [vmem:[#allocation9 + $0x1210] sm:$0xff] }
 0x49b   :  { %7034 = vmatprep.subr.bf16.mxu1 %v7033_v16  ;;  %v3734_v16 = vld [vmem:[#allocation12 + $0x660] sm:$0xff]  ;;  %v2236_v60 = vld [vmem:[#allocation9 + $0x11e0] sm:$0xff] }
 0x49c   :  { %v7053_v15 = vpack.c.bf16 %v3734_v16, %v3727_v7 }
 0x49d   :  { %6829 = vmatpush1.bf16.msra.mxu0 %v6828_v56  ;;  %v2187_v56 = vld [vmem:[#allocation9 + $0x1058] sm:$0xff] }
 0x49e   :  { %6831 = vmatprep.subr.bf16.mxu0 %v6830_v21  ;;  %7036 = vmatpush1.bf16.msra.mxu1 %v7035_v24  ;;  %v7051_v21 = vpack.c.bf16 %v3719_v46, %v3712_v14  ;;  %v3733_v24 = vld [vmem:[#allocation12 + $0x658] sm:$0xff]  ;;  %v6850_v28 = vpack.c.bf16 %v2194_v22, %v2187_v56  ;;  %v2257_v14 = vld [vmem:[#allocation9 + $0x1288] sm:$0xff]  ;;  %v2264_v46 = vld [vmem:[#allocation9 + $0x12c0] sm:$0xff] }
 0x49f   :  { %7038 = vmatprep.subr.bf16.mxu1 %v7037_v26  ;;  %v3748_v26 = vld [vmem:[#allocation12 + $0x6d0] sm:$0xff]  ;;  %v6870_v16 = vpack.c.bf16 %v2264_v46, %v2257_v14  ;;  %v2270_v22 = vld [vmem:[#allocation9 + $0x12f0] sm:$0xff]  ;;  %v3546_v14 = vld [vmem:[#allocation12 + $0x80] sm:$0xff] }
 0x4a0   :  { %3095 = vmatmul.mubr.f32.vlgmr.msra.gmra.mrb[18].mxu0 %v8753_v2  ;;  %v3720_v2 = vld [vmem:[#allocation12 + $0x5f0] sm:$0xff]  ;;  %v7057_v35 = vpack.c.bf16 %v3748_v26, %v3741_v25  ;;  %v3553_v46 = vld [vmem:[#allocation12 + $0xb8] sm:$0xff] }
 0x4a1   :  { %6833 = vmatpush1.bf16.msra.mxu0 %v6832_v31  ;;  %3165 = vmatprep.mubr.f32.mxu0 %v8761_v30  ;;  %v2158_v30 = vld [vmem:[#allocation9 + $0xf70] sm:$0xff]  ;;  %v7049_v11 = vpack.c.bf16 %v3720_v2, %v3713_v63  ;;  %v2201_v31 = vld [vmem:[#allocation9 + $0x10c8] sm:$0xff]  ;;  %v6862_v2 = vpack.c.bf16 %v2236_v60, %v2229_v58  ;;  %v2340_v58 = vld [vmem:[#allocation9 + $0x1520] sm:$0xff] }
 0x4a2   :  { %6835 = vmatprep.subr.bf16.mxu0 %v6834_v32  ;;  %7040 = vmatpush1.bf16.msra.mxu1 %v7039_v40  ;;  %v6844_v62 = vpack.c.bf16 %v2165_v5, %v2158_v30  ;;  %v7055_v32 = vpack.c.bf16 %v3733_v24, %v3726_v23  ;;  %v3747_v40 = vld [vmem:[#allocation12 + $0x6c8] sm:$0xff]  ;;  %v6854_v44 = vpack.c.bf16 %v2208_v34, %v2201_v31  ;;  %v2243_v30 = vld [vmem:[#allocation9 + $0x1218] sm:$0xff]  ;;  %v2250_v5 = vld [vmem:[#allocation9 + $0x1250] sm:$0xff] }
 0x4a3   :  { %7042 = vmatprep.subr.bf16.mxu1 %v7041_v42  ;;  %v3762_v42 = vld [vmem:[#allocation12 + $0x740] sm:$0xff]  ;;  %v2285_v23 = vld [vmem:[#allocation9 + $0x1368] sm:$0xff]  ;;  %v2292_v24 = vld [vmem:[#allocation9 + $0x13a0] sm:$0xff] }
 0x4a4   :  { %v7061_v51 = vpack.c.bf16 %v3762_v42, %v3755_v41  ;;  %v6878_v26 = vpack.c.bf16 %v2292_v24, %v2285_v23  ;;  %v2298_v34 = vld [vmem:[#allocation9 + $0x13d0] sm:$0xff]  ;;  %v2347_v60 = vld [vmem:[#allocation9 + $0x1558] sm:$0xff] }
 0x4a5   :  { %6837 = vmatpush1.bf16.msra.mxu0 %v6836_v48  ;;  %v7059_v48 = vpack.c.bf16 %v3747_v40, %v3740_v37  ;;  %v2313_v37 = vld [vmem:[#allocation9 + $0x1448] sm:$0xff]  ;;  %v2320_v40 = vld [vmem:[#allocation9 + $0x1480] sm:$0xff] }
 0x4a6   :  { %6839 = vmatprep.subr.bf16.mxu0 %v6838_v49  ;;  %7044 = vmatpush1.bf16.msra.mxu1 %v7043_v55  ;;  %v2215_v49 = vld [vmem:[#allocation9 + $0x1138] sm:$0xff]  ;;  %v6886_v42 = vpack.c.bf16 %v2320_v40, %v2313_v37  ;;  %v3589_v37 = vld [vmem:[#allocation12 + $0x1d8] sm:$0xff]  ;;  %v3596_v40 = vld [vmem:[#allocation12 + $0x210] sm:$0xff] }
 0x4a7   :  { %7046 = vmatprep.subr.bf16.mxu1 %v7045_v0  ;;  %v6858_v55 = vpack.c.bf16 %v2222_v50, %v2215_v49  ;;  %v2221_v0 = vld [vmem:[#allocation9 + $0x1168] sm:$0xff]  ;;  %v6890_v49 = vpack.c.bf16 %v2334_v47, %v2327_v45  ;;  %v2326_v50 = vld [vmem:[#allocation9 + $0x14b0] sm:$0xff] }
 0x4a8   :  { %v6860_v63 = vpack.c.bf16 %v2221_v0, %v2214_v57  ;;  %v3588_v47 = vld [vmem:[#allocation12 + $0x1d0] sm:$0xff] }
 0x4a9   :  { %6841 = vmatpush1.bf16.msra.mxu0 %v6840_v1  ;;  %v2228_v1 = vld [vmem:[#allocation9 + $0x11a0] sm:$0xff] }
 0x4aa   :  { %6843 = vmatprep.subr.bf16.mxu0 %v6842_v3  ;;  %7048 = vmatpush1.bf16.msra.mxu1 %v7047_v8  ;;  %v2235_v3 = vld [vmem:[#allocation9 + $0x11d8] sm:$0xff]  ;;  %v6866_v8 = vpack.c.bf16 %v2250_v5, %v2243_v30  ;;  %v3532_v30 = vld [vmem:[#allocation12 + $0x10] sm:$0xff]  ;;  %v3539_v5 = vld [vmem:[#allocation12 + $0x48] sm:$0xff] }
 0x4ab   :  { %7050 = vmatprep.subr.bf16.mxu1 %v7049_v11  ;;  %v6864_v6 = vpack.c.bf16 %v2235_v3, %v2228_v1  ;;  %v2249_v11 = vld [vmem:[#allocation9 + $0x1248] sm:$0xff]  ;;  %v6896_v1 = vpack.c.bf16 %v2347_v60, %v2340_v58 }
 0x4ac   :  { %v6868_v7 = vpack.c.bf16 %v2249_v11, %v2242_v9  ;;  %v7195_v9 = vpack.c.bf16 %v3539_v5, %v3532_v30 }
 0x4ad   :  { %6845 = vmatpush1.bf16.msra.mxu0 %v6844_v62  ;;  %v2256_v62 = vld [vmem:[#allocation9 + $0x1280] sm:$0xff] }
 0x4ae   :  { %6847 = vmatprep.subr.bf16.mxu0 %v6846_v18  ;;  %7052 = vmatpush1.bf16.msra.mxu1 %v7051_v21  ;;  %v2263_v18 = vld [vmem:[#allocation9 + $0x12b8] sm:$0xff]  ;;  %v6874_v21 = vpack.c.bf16 %v2278_v19, %v2271_v10  ;;  %v3560_v19 = vld [vmem:[#allocation12 + $0xf0] sm:$0xff] }
 0x4af   :  { %7054 = vmatprep.subr.bf16.mxu1 %v7053_v15  ;;  %v6872_v56 = vpack.c.bf16 %v2263_v18, %v2256_v62  ;;  %v2277_v15 = vld [vmem:[#allocation9 + $0x1328] sm:$0xff] }
 0x4b0   :  { %v6876_v25 = vpack.c.bf16 %v2277_v15, %v2270_v22  ;;  %v3568_v62 = vld [vmem:[#allocation12 + $0x130] sm:$0xff]  ;;  %v3575_v22 = vld [vmem:[#allocation12 + $0x168] sm:$0xff]  ;;  %v3582_v15 = vld [vmem:[#allocation12 + $0x1a0] sm:$0xff] }
 0x4b1   :  { %6849 = vmatpush1.bf16.msra.mxu0 %v6848_v27  ;;  %v2284_v27 = vld [vmem:[#allocation9 + $0x1360] sm:$0xff] }
 0x4b2   :  { %6851 = vmatprep.subr.bf16.mxu0 %v6850_v28  ;;  %7056 = vmatpush1.bf16.msra.mxu1 %v7055_v32  ;;  %v2291_v28 = vld [vmem:[#allocation9 + $0x1398] sm:$0xff]  ;;  %v6882_v32 = vpack.c.bf16 %v2306_v38, %v2299_v29 }
 0x4b3   :  { %7058 = vmatprep.subr.bf16.mxu1 %v7057_v35  ;;  %v6880_v31 = vpack.c.bf16 %v2291_v28, %v2284_v27  ;;  %v2305_v35 = vld [vmem:[#allocation9 + $0x1408] sm:$0xff]  ;;  %v3574_v27 = vld [vmem:[#allocation12 + $0x160] sm:$0xff]  ;;  %v3581_v28 = vld [vmem:[#allocation12 + $0x198] sm:$0xff] }
 0x4b4   :  { %v6884_v41 = vpack.c.bf16 %v2305_v35, %v2298_v34  ;;  %v3761_v35 = vld [vmem:[#allocation12 + $0x738] sm:$0xff] }
 0x4b5   :  { %6853 = vmatpush1.bf16.msra.mxu0 %v6852_v43  ;;  %v2312_v43 = vld [vmem:[#allocation9 + $0x1440] sm:$0xff] }
 0x4b6   :  { %6855 = vmatprep.subr.bf16.mxu0 %v6854_v44  ;;  %7060 = vmatpush1.bf16.msra.mxu1 %v7059_v48  ;;  %v2319_v44 = vld [vmem:[#allocation9 + $0x1478] sm:$0xff] }
 0x4b7   :  { %7062 = vmatprep.subr.bf16.mxu1 %v7061_v51  ;;  %v6888_v48 = vpack.c.bf16 %v2319_v44, %v2312_v43  ;;  %v2333_v51 = vld [vmem:[#allocation9 + $0x14e8] sm:$0xff]  ;;  %v3769_v43 = vld [vmem:[#allocation12 + $0x778] sm:$0xff] }
 0x4b8   :  { %v6892_v57 = vpack.c.bf16 %v2333_v51, %v2326_v50  ;;  %v3776_v44 = vld [vmem:[#allocation12 + $0x7b0] sm:$0xff] }
 0x4b9   :  { %6857 = vmatpush1.bf16.msra.mxu0 %v6856_v53  ;;  %v2341_v53 = vld [vmem:[#allocation9 + $0x1528] sm:$0xff] }
 0x4ba   :  { %6859 = vmatprep.subr.bf16.mxu0 %v6858_v55  ;;  %v2348_v55 = vld [vmem:[#allocation9 + $0x1560] sm:$0xff] }
 0x4bb   :  { %v6894_v0 = vpack.c.bf16 %v2348_v55, %v2341_v53  ;;  %v7209_v55 = vpack.c.bf16 %v3596_v40, %v3589_v37  ;;  %v3637_v37 = vld [vmem:[#allocation12 + $0x358] sm:$0xff] }
 0x4bd   :  { %6861 = vmatpush1.bf16.msra.mxu0 %v6860_v63  ;;  %v3533_v63 = vld [vmem:[#allocation12 + $0x18] sm:$0xff] }
 0x4be   :  { %6863 = vmatprep.subr.bf16.mxu0 %v6862_v2  ;;  %v3540_v2 = vld [vmem:[#allocation12 + $0x50] sm:$0xff] }
 0x4bf   :  { %v7193_v3 = vpack.c.bf16 %v3540_v2, %v3533_v63  ;;  %v7065_v2 = vpack.c.bf16 %v3776_v44, %v3769_v43  ;;  %v3810_v44 = vld [vmem:[#allocation12 + $0x8c0] sm:$0xff] }
 0x4c1   :  { %6865 = vmatpush1.bf16.msra.mxu0 %v6864_v6  ;;  %v3547_v6 = vld [vmem:[#allocation12 + $0x88] sm:$0xff] }
 0x4c2   :  { %6867 = vmatprep.subr.bf16.mxu0 %v6866_v8  ;;  %v3554_v8 = vld [vmem:[#allocation12 + $0xc0] sm:$0xff] }
 0x4c3   :  { %v7197_v11 = vpack.c.bf16 %v3554_v8, %v3547_v6  ;;  %v3783_v6 = vld [vmem:[#allocation12 + $0x7e8] sm:$0xff]  ;;  %v3790_v8 = vld [vmem:[#allocation12 + $0x820] sm:$0xff] }
 0x4c5   :  { %6869 = vmatpush1.bf16.msra.mxu0 %v6868_v7 }
 0x4c6   :  { %6871 = vmatprep.subr.bf16.mxu0 %v6870_v16  ;;  %v3561_v16 = vld [vmem:[#allocation12 + $0xf8] sm:$0xff] }
 0x4c7   :  { %v7201_v10 = vpack.c.bf16 %v3568_v62, %v3561_v16  ;;  %v3617_v16 = vld [vmem:[#allocation12 + $0x2b8] sm:$0xff]  ;;  %v3624_v62 = vld [vmem:[#allocation12 + $0x2f0] sm:$0xff] }
 0x4c9   :  { %6873 = vmatpush1.bf16.msra.mxu0 %v6872_v56  ;;  %v3567_v56 = vld [vmem:[#allocation12 + $0x128] sm:$0xff] }
 0x4ca   :  { %6875 = vmatprep.subr.bf16.mxu0 %v6874_v21  ;;  %v8800_v21 = vld [vmem:[#allocation10] sm:$0x7f]  ;;  %v7203_v24 = vpack.c.bf16 %v3567_v56, %v3560_v19 }
 0x4cb   :  { %v2355_v23 = vrot.slane %v8800_v21, %v8675_v52  ;;  %v2367_v29 = vrot.slane %v8800_v21, %v8718_v39  ;;  %v3797_v56 = vld [vmem:[#allocation12 + $0x858] sm:$0xff] }
 0x4cd   :  { %6877 = vmatpush1.bf16.msra.mxu0 %v6876_v25  ;;  %v2359_v25 = vrot.slane %v8800_v21, %v8678_v54 }
 0x4ce   :  { %6879 = vmatprep.subr.bf16.mxu0 %v6878_v26  ;;  %v7205_v26 = vpack.c.bf16 %v3582_v15, %v3575_v22  ;;  %v3804_v22 = vld [vmem:[#allocation12 + $0x890] sm:$0xff]  ;;  %v7217_v15 = vpack.c.bf16 %v3624_v62, %v3617_v16 }
 0x4cf   :  { %v3680_v16 = vld [vmem:[#allocation12 + $0x4b0] sm:$0xff] }
 0x4d1   :  { %6881 = vmatpush1.bf16.msra.mxu0 %v6880_v31  ;;  %v3754_v31 = vld [vmem:[#allocation12 + $0x700] sm:$0xff] }
 0x4d2   :  { %6883 = vmatprep.subr.bf16.mxu0 %v6882_v32  ;;  %v7063_v53 = vpack.c.bf16 %v3761_v35, %v3754_v31  ;;  %v3811_v31 = vld [vmem:[#allocation12 + $0x8c8] sm:$0xff]  ;;  %v3630_v35 = vld [vmem:[#allocation12 + $0x320] sm:$0xff] }
 0x4d5   :  { %6885 = vmatpush1.bf16.msra.mxu0 %v6884_v41 }
 0x4d6   :  { %6887 = vmatprep.subr.bf16.mxu0 %v6886_v42  ;;  %v7207_v42 = vpack.c.bf16 %v3581_v28, %v3574_v27  ;;  %v7073_v27 = vpack.c.bf16 %v3804_v22, %v3797_v56  ;;  %v3796_v28 = vld [vmem:[#allocation12 + $0x850] sm:$0xff]  ;;  %v3853_v22 = vld [vmem:[#allocation12 + $0xa18] sm:$0xff] }
 0x4d9   :  { %6889 = vmatpush1.bf16.msra.mxu0 %v6888_v48  ;;  %v3595_v48 = vld [vmem:[#allocation12 + $0x208] sm:$0xff] }
 0x4da   :  { %6891 = vmatprep.subr.bf16.mxu0 %v6890_v49  ;;  %v7211_v5 = vpack.c.bf16 %v3595_v48, %v3588_v47  ;;  %v7223_v47 = vpack.c.bf16 %v3637_v37, %v3630_v35  ;;  %v3825_v48 = vld [vmem:[#allocation12 + $0x938] sm:$0xff]  ;;  %v3874_v35 = vld [vmem:[#allocation12 + $0xac0] sm:$0xff] }
 0x4dd   :  { %6893 = vmatpush1.bf16.msra.mxu0 %v6892_v57  ;;  %v3603_v57 = vld [vmem:[#allocation12 + $0x248] sm:$0xff] }
 0x4de   :  { %6895 = vmatprep.subr.bf16.mxu0 %v6894_v0  ;;  %v3610_v0 = vld [vmem:[#allocation12 + $0x280] sm:$0xff] }
 0x4e0   :  { %3166 = vmatmul.mubr.f32.vlgmr.msra.gmra.mrb[18].mxu0 %v8770_v12  ;;  %v7199_v12 = vpack.c.bf16 %v3553_v46, %v3546_v14  ;;  %v3609_v14 = vld [vmem:[#allocation12 + $0x278] sm:$0xff] }
 0x4e1   :  { %6897 = vmatpush1.bf16.msra.mxu0 %v6896_v1  ;;  %3236 = vmatprep.mubr.f32.mxu0 %v7960_v4  ;;  %v3768_v1 = vld [vmem:[#allocation12 + $0x770] sm:$0xff] }
 0x4e2   :  { %7194 = vmatprep.subr.bf16.mxu0 %v7193_v3  ;;  %v3775_v3 = vld [vmem:[#allocation12 + $0x7a8] sm:$0xff] }
 0x4e7   :  { %v2883_v7 = vpop.f32.mrb[8].mxu1 }
 0x4e8   :  { %5459 = vmatmul.mubr.msk.f32.vlgmr.msra.gmra.mrb[18].mxu0 %vm2387_vm5, %v8745_v17  ;;  %v2885_v18 = vpop.f32.mrb[9].mxu1  ;;  %v2363_v17 = vrot.slane %v8800_v21, %v8693_v20 }
 0x4e9   :  { %7196 = vmatpush1.bf16.msra.mxu0 %v7195_v9  ;;  %v7694_v49 = vadd.f32 %v2885_v18, %v2367_v29  ;;  %v7213_v9 = vpack.c.bf16 %v3610_v0, %v3603_v57  ;;  %v7069_v18 = vpack.c.bf16 %v3790_v8, %v3783_v6  ;;  %v3803_v29 = vld [vmem:[#allocation12 + $0x888] sm:$0xff]  ;;  %v3846_v6 = vld [vmem:[#allocation12 + $0x9e0] sm:$0xff] }
 0x4ea   :  { %7198 = vmatprep.subr.bf16.mxu0 %v7197_v11  ;;  %v7692_v45 = vadd.f32 %v2883_v7, %v2363_v17  ;;  %v3602_v11 = vld [vmem:[#allocation12 + $0x240] sm:$0xff]  ;;  %v7067_v7 = vpack.c.bf16 %v3775_v3, %v3768_v1  ;;  %v3631_v17 = vld [vmem:[#allocation12 + $0x328] sm:$0xff]  ;;  %v7075_v40 = vpack.c.bf16 %v3803_v29, %v3796_v28  ;;  %v3824_v1 = vld [vmem:[#allocation12 + $0x930] sm:$0xff] }
 0x4eb   :  { %v7215_v19 = vpack.c.bf16 %v3609_v14, %v3602_v11  ;;  %v3659_v0 = vld [vmem:[#allocation12 + $0x408] sm:$0xff]  ;;  %v3665_v11 = vld [vmem:[#allocation12 + $0x438] sm:$0xff]  ;;  %v3694_v28 = vld [vmem:[#allocation12 + $0x520] sm:$0xff] }
 0x4ec   :  { %v3831_v3 = vld [vmem:[#allocation12 + $0x968] sm:$0xff] }
 0x4ed   :  { %7200 = vmatpush1.bf16.msra.mxu0 %v7199_v12  ;;  %v3782_v12 = vld [vmem:[#allocation12 + $0x7e0] sm:$0xff]  ;;  %v7083_v14 = vpack.c.bf16 %v3831_v3, %v3824_v1 }
 0x4ee   :  { %7202 = vmatprep.subr.bf16.mxu0 %v7201_v10  ;;  %v3789_v10 = vld [vmem:[#allocation12 + $0x818] sm:$0xff]  ;;  %v3722_v1 = vld [vmem:[#allocation12 + $0x600] sm:$0xff] }
 0x4ef   :  { %v2670_v38 = vpop.f32.mrb[14].mxu0 }
 0x4f0   :  { %v7690_v32 = vadd.f32 %v2670_v38, %v2355_v23  ;;  %v2672_v34 = vpop.f32.mrb[15].mxu0  ;;  %v3616_v23 = vld [vmem:[#allocation12 + $0x2b0] sm:$0xff] }
 0x4f1   :  { %7204 = vmatpush1.bf16.msra.mxu0 %v7203_v24  ;;  %v7691_v41 = vadd.f32 %v2672_v34, %v2359_v25  ;;  %v3623_v24 = vld [vmem:[#allocation12 + $0x2e8] sm:$0xff]  ;;  %v7071_v25 = vpack.c.bf16 %v3789_v10, %v3782_v12  ;;  %v3838_v12 = vld [vmem:[#allocation12 + $0x9a0] sm:$0xff]  ;;  %v3845_v10 = vld [vmem:[#allocation12 + $0x9d8] sm:$0xff] }
 0x4f2   :  { %7206 = vmatprep.subr.bf16.mxu0 %v7205_v26  ;;  %v8812_v58 = vmax.f32 %v7690_v32, 0.0  ;;  %v3638_v26 = vld [vmem:[#allocation12 + $0x360] sm:$0xff]  ;;  %v7219_v38 = vpack.c.bf16 %v3623_v24, %v3616_v23 }
 0x4f3   :  { %v8810_v50 = vmax.f32 %v7691_v41, 0.0  ;;  %v2954_v51 = vpop.f32.mrb[16].mxu0  ;;  %v3818_v32 = vld [vmem:[#allocation12 + $0x900] sm:$0xff]  ;;  %v7221_v34 = vpack.c.bf16 %v3638_v26, %v3631_v17  ;;  %v3645_v41 = vld [vmem:[#allocation12 + $0x398] sm:$0xff]  ;;  %v3679_v17 = vld [vmem:[#allocation12 + $0x4a8] sm:$0xff]  ;;  %v7087_v26 = vpack.c.bf16 %v3845_v10, %v3838_v12 }
 0x4f4   :  { %v8814_v60 = vadd.f32 %v7692_v45, %v2954_v51  ;;  %v2956_v63 = vpop.f32.mrb[17].mxu0  ;;  %v7077_v43 = vpack.c.bf16 %v3818_v32, %v3811_v31  ;;  %v3817_v45 = vld [vmem:[#allocation12 + $0x8f8] sm:$0xff]  ;;  %v3859_v31 = vld [vmem:[#allocation12 + $0xa48] sm:$0xff]  ;;  %v3894_v10 = vld [vmem:[#allocation12 + $0xb60] sm:$0xff] }
 0x4f5   :  { %7208 = vmatpush1.bf16.msra.mxu0 %v7207_v42  ;;  %v7695_v30 = vadd.f32 %v7694_v49, %v2956_v63  ;;  %4320 = vmatprep.mubr.f32.mxu1 %v8810_v50  ;;  %v3652_v42 = vld [vmem:[#allocation12 + $0x3d0] sm:$0xff]  ;;  %v7079_v57 = vpack.c.bf16 %v3817_v45, %v3810_v44  ;;  %v3666_v63 = vld [vmem:[#allocation12 + $0x440] sm:$0xff] }
 0x4f6   :  { %4604 = vmatprep.mubr.f32.mxu0 %v8810_v50  ;;  %4321 = vmatmul.mubr.f32.vlgmr.msra.gmra.mrb[18].mxu1 %v8812_v58  ;;  %v3832_v49 = vld [vmem:[#allocation12 + $0x970] sm:$0xff]  ;;  %v7225_v51 = vpack.c.bf16 %v3652_v42, %v3645_v41  ;;  %v7229_v8 = vpack.c.bf16 %v3666_v63, %v3659_v0  ;;  %v3693_v41 = vld [vmem:[#allocation12 + $0x518] sm:$0xff]  ;;  %v3707_v0 = vld [vmem:[#allocation12 + $0x588] sm:$0xff] }
 0x4f7   :  { %v8819_v46 = vmax.f32 %v7695_v30, 0.0  ;;  %7064 = vmatpush1.bf16.msra.mxu1 %v7063_v53  ;;  %7210 = vmatprep.subr.bf16.mxu0 %v7209_v55  ;;  %v3644_v53 = vld [vmem:[#allocation12 + $0x390] sm:$0xff]  ;;  %v3651_v55 = vld [vmem:[#allocation12 + $0x3c8] sm:$0xff] }
 0x4f8   :  { %7066 = vmatprep.subr.bf16.mxu1 %v7065_v2  ;;  %v7081_v2 = vpack.c.bf16 %v3832_v49, %v3825_v48  ;;  %v7227_v30 = vpack.c.bf16 %v3651_v55, %v3644_v53  ;;  %v3708_v44 = vld [vmem:[#allocation12 + $0x590] sm:$0xff]  ;;  %v3873_v48 = vld [vmem:[#allocation12 + $0xab8] sm:$0xff] }
 0x4f9   :  { %7212 = vmatpush1.bf16.msra.mxu0 %v7211_v5  ;;  %4391 = vmatprep.mubr.f32.mxu1 %v8819_v46  ;;  %v3839_v5 = vld [vmem:[#allocation12 + $0x9a8] sm:$0xff]  ;;  %v3888_v53 = vld [vmem:[#allocation12 + $0xb30] sm:$0xff] }
 0x4fa   :  { %7214 = vmatprep.subr.bf16.mxu0 %v7213_v9  ;;  %v3658_v9 = vld [vmem:[#allocation12 + $0x400] sm:$0xff] }
 0x4fb   :  { %7068 = vmatpush1.bf16.msra.mxu1 %v7067_v7  ;;  %v3673_v7 = vld [vmem:[#allocation12 + $0x478] sm:$0xff]  ;;  %v7231_v56 = vpack.c.bf16 %v3665_v11, %v3658_v9  ;;  %v3902_v9 = vld [vmem:[#allocation12 + $0xba0] sm:$0xff] }
 0x4fc   :  { %7070 = vmatprep.subr.bf16.mxu1 %v7069_v18  ;;  %v7085_v18 = vpack.c.bf16 %v3846_v6, %v3839_v5  ;;  %v7233_v24 = vpack.c.bf16 %v3680_v16, %v3673_v7  ;;  %v3887_v5 = vld [vmem:[#allocation12 + $0xb28] sm:$0xff]  ;;  %v3721_v7 = vld [vmem:[#allocation12 + $0x5f8] sm:$0xff] }
 0x4fd   :  { %7216 = vmatpush1.bf16.msra.mxu0 %v7215_v19 }
 0x4fe   :  { %7218 = vmatprep.subr.bf16.mxu0 %v7217_v15  ;;  %v3860_v15 = vld [vmem:[#allocation12 + $0xa50] sm:$0xff] }
 0x4ff   :  { %7072 = vmatpush1.bf16.msra.mxu1 %v7071_v25  ;;  %v3672_v25 = vld [vmem:[#allocation12 + $0x470] sm:$0xff]  ;;  %v7089_v29 = vpack.c.bf16 %v3860_v15, %v3853_v22  ;;  %v3909_v22 = vld [vmem:[#allocation12 + $0xbd8] sm:$0xff] }
 0x500   :  { %7074 = vmatprep.subr.bf16.mxu1 %v7073_v27  ;;  %v3687_v27 = vld [vmem:[#allocation12 + $0x4e8] sm:$0xff]  ;;  %v7235_v32 = vpack.c.bf16 %v3679_v17, %v3672_v25  ;;  %v3916_v15 = vld [vmem:[#allocation12 + $0xc10] sm:$0xff] }
 0x501   :  { %7220 = vmatpush1.bf16.msra.mxu0 %v7219_v38  ;;  %v3852_v38 = vld [vmem:[#allocation12 + $0xa10] sm:$0xff]  ;;  %v7237_v37 = vpack.c.bf16 %v3694_v28, %v3687_v27  ;;  %v3735_v17 = vld [vmem:[#allocation12 + $0x668] sm:$0xff]  ;;  %v3750_v28 = vld [vmem:[#allocation12 + $0x6e0] sm:$0xff] }
 0x502   :  { %7222 = vmatprep.subr.bf16.mxu0 %v7221_v34  ;;  %v3867_v34 = vld [vmem:[#allocation12 + $0xa88] sm:$0xff]  ;;  %v7091_v42 = vpack.c.bf16 %v3859_v31, %v3852_v38  ;;  %v3728_v25 = vld [vmem:[#allocation12 + $0x630] sm:$0xff] }
 0x503   :  { %7076 = vmatpush1.bf16.msra.mxu1 %v7075_v40  ;;  %v3686_v40 = vld [vmem:[#allocation12 + $0x4e0] sm:$0xff]  ;;  %v7093_v45 = vpack.c.bf16 %v3874_v35, %v3867_v34  ;;  %v3743_v27 = vld [vmem:[#allocation12 + $0x6a8] sm:$0xff]  ;;  %v3908_v38 = vld [vmem:[#allocation12 + $0xbd0] sm:$0xff] }
 0x504   :  { %7078 = vmatprep.subr.bf16.mxu1 %v7077_v43  ;;  %v3701_v43 = vld [vmem:[#allocation12 + $0x558] sm:$0xff]  ;;  %v7239_v49 = vpack.c.bf16 %v3693_v41, %v3686_v40  ;;  %v3915_v31 = vld [vmem:[#allocation12 + $0xc08] sm:$0xff]  ;;  %v3930_v35 = vld [vmem:[#allocation12 + $0xc80] sm:$0xff] }
 0x505   :  { %7224 = vmatpush1.bf16.msra.mxu0 %v7223_v47  ;;  %v3866_v47 = vld [vmem:[#allocation12 + $0xa80] sm:$0xff]  ;;  %v7241_v55 = vpack.c.bf16 %v3708_v44, %v3701_v43  ;;  %v3923_v34 = vld [vmem:[#allocation12 + $0xc48] sm:$0xff]  ;;  %v3749_v41 = vld [vmem:[#allocation12 + $0x6d8] sm:$0xff] }
 0x506   :  { %7226 = vmatprep.subr.bf16.mxu0 %v7225_v51  ;;  %v3881_v51 = vld [vmem:[#allocation12 + $0xaf8] sm:$0xff]  ;;  %v7095_v63 = vpack.c.bf16 %v3873_v48, %v3866_v47  ;;  %v3742_v40 = vld [vmem:[#allocation12 + $0x6a0] sm:$0xff]  ;;  %v3764_v44 = vld [vmem:[#allocation12 + $0x750] sm:$0xff] }
 0x507   :  { %7080 = vmatpush1.bf16.msra.mxu1 %v7079_v57  ;;  %v3700_v57 = vld [vmem:[#allocation12 + $0x550] sm:$0xff]  ;;  %v7097_v3 = vpack.c.bf16 %v3888_v53, %v3881_v51  ;;  %v3757_v43 = vld [vmem:[#allocation12 + $0x718] sm:$0xff]  ;;  %v3922_v47 = vld [vmem:[#allocation12 + $0xc40] sm:$0xff] }
 0x508   :  { %v5655_v62 = vpop.f32.mrb[10].mxu1  ;;  %7082 = vmatprep.subr.bf16.mxu1 %v7081_v2  ;;  %v3715_v2 = vld [vmem:[#allocation12 + $0x5c8] sm:$0xff]  ;;  %v7243_v6 = vpack.c.bf16 %v3707_v0, %v3700_v57  ;;  %v3929_v48 = vld [vmem:[#allocation12 + $0xc78] sm:$0xff]  ;;  %v3944_v53 = vld [vmem:[#allocation12 + $0xcf0] sm:$0xff] }
 0x509   :  { %7228 = vmatpush1.bf16.msra.mxu0 %v7227_v30  ;;  %v5656_v19 = vpop.f32.mrb[11].mxu1  ;;  %v3880_v30 = vld [vmem:[#allocation12 + $0xaf0] sm:$0xff]  ;;  %v7245_v11 = vpack.c.bf16 %v3722_v1, %v3715_v2  ;;  %v3937_v51 = vld [vmem:[#allocation12 + $0xcb8] sm:$0xff]  ;;  %v3763_v0 = vld [vmem:[#allocation12 + $0x748] sm:$0xff] }
 0x50a   :  { %v8822_v23 = vadd.f32 %v5656_v19, %v5655_v62  ;;  %7230 = vmatprep.subr.bf16.mxu0 %v7229_v8  ;;  %v3895_v8 = vld [vmem:[#allocation12 + $0xb68] sm:$0xff]  ;;  %v7099_v16 = vpack.c.bf16 %v3887_v5, %v3880_v30  ;;  %v3729_v62 = vld [vmem:[#allocation12 + $0x638] sm:$0xff]  ;;  %v3756_v57 = vld [vmem:[#allocation12 + $0x710] sm:$0xff] }
 0x50b   :  { %7084 = vmatpush1.bf16.msra.mxu1 %v7083_v14  ;;  %v3714_v14 = vld [vmem:[#allocation12 + $0x5c0] sm:$0xff]  ;;  %v7101_v12 = vpack.c.bf16 %v3902_v9, %v3895_v8  ;;  %v3901_v19 = vld [vmem:[#allocation12 + $0xb98] sm:$0xff]  ;;  %v3771_v2 = vld [vmem:[#allocation12 + $0x788] sm:$0xff] }
 0x50c   :  { %7086 = vmatprep.subr.bf16.mxu1 %v7085_v18  ;;  %v3736_v18 = vld [vmem:[#allocation12 + $0x670] sm:$0xff]  ;;  %v3778_v1 = vld [vmem:[#allocation12 + $0x7c0] sm:$0xff]  ;;  %v3943_v5 = vld [vmem:[#allocation12 + $0xce8] sm:$0xff] }
 0x50d   :  { %7232 = vmatpush1.bf16.msra.mxu0 %v7231_v56  ;;  %v7247_v56 = vpack.c.bf16 %v3721_v7, %v3714_v14  ;;  %v3936_v30 = vld [vmem:[#allocation12 + $0xcb0] sm:$0xff]  ;;  %v3951_v8 = vld [vmem:[#allocation12 + $0xd28] sm:$0xff]  ;;  %v3958_v9 = vld [vmem:[#allocation12 + $0xd60] sm:$0xff]  ;;  %v7261_v14 = vpack.c.bf16 %v3778_v1, %v3771_v2 }
 0x50e   :  { %7234 = vmatprep.subr.bf16.mxu0 %v7233_v24  ;;  %v7249_v24 = vpack.c.bf16 %v3736_v18, %v3729_v62  ;;  %v3770_v7 = vld [vmem:[#allocation12 + $0x780] sm:$0xff]  ;;  %v7115_v62 = vpack.c.bf16 %v3943_v5, %v3936_v30  ;;  %v3785_v18 = vld [vmem:[#allocation12 + $0x7f8] sm:$0xff]  ;;  %v3812_v1 = vld [vmem:[#allocation12 + $0x8d0] sm:$0xff] }
 0x50f   :  { %7088 = vmatpush1.bf16.msra.mxu1 %v7087_v26  ;;  %v7103_v26 = vpack.c.bf16 %v3901_v19, %v3894_v10  ;;  %v7117_v19 = vpack.c.bf16 %v3958_v9, %v3951_v8  ;;  %v3827_v30 = vld [vmem:[#allocation12 + $0x948] sm:$0xff]  ;;  %v3834_v5 = vld [vmem:[#allocation12 + $0x980] sm:$0xff]  ;;  %v8832_v8 = vmax.f32 %v8814_v60, 0.0 }
 0x510   :  { %7090 = vmatprep.subr.bf16.mxu1 %v7089_v29  ;;  %v7105_v29 = vpack.c.bf16 %v3916_v15, %v3909_v22  ;;  %v3957_v22 = vld [vmem:[#allocation12 + $0xd58] sm:$0xff] }
 0x511   :  { %7236 = vmatpush1.bf16.msra.mxu0 %v7235_v32  ;;  %v7251_v32 = vpack.c.bf16 %v3735_v17, %v3728_v25  ;;  %v3972_v25 = vld [vmem:[#allocation12 + $0xdd0] sm:$0xff] }
 0x512   :  { %7238 = vmatprep.subr.bf16.mxu0 %v7237_v37  ;;  %v7253_v37 = vpack.c.bf16 %v3750_v28, %v3743_v27  ;;  %v3784_v28 = vld [vmem:[#allocation12 + $0x7f0] sm:$0xff] }
 0x513   :  { %7092 = vmatpush1.bf16.msra.mxu1 %v7091_v42  ;;  %v7107_v42 = vpack.c.bf16 %v3915_v31, %v3908_v38  ;;  %v3799_v31 = vld [vmem:[#allocation12 + $0x868] sm:$0xff] }
 0x514   :  { %7094 = vmatprep.subr.bf16.mxu1 %v7093_v45  ;;  %v7109_v45 = vpack.c.bf16 %v3930_v35, %v3923_v34 }
 0x515   :  { %7240 = vmatpush1.bf16.msra.mxu0 %v7239_v49  ;;  %v7255_v49 = vpack.c.bf16 %v3749_v41, %v3742_v40  ;;  %v3971_v40 = vld [vmem:[#allocation12 + $0xdc8] sm:$0xff] }
 0x516   :  { %7242 = vmatprep.subr.bf16.mxu0 %v7241_v55  ;;  %v7257_v55 = vpack.c.bf16 %v3764_v44, %v3757_v43  ;;  %v3986_v43 = vld [vmem:[#allocation12 + $0xe40] sm:$0xff] }
 0x517   :  { %7096 = vmatpush1.bf16.msra.mxu1 %v7095_v63  ;;  %v7111_v63 = vpack.c.bf16 %v3929_v48, %v3922_v47  ;;  %v3798_v44 = vld [vmem:[#allocation12 + $0x860] sm:$0xff]  ;;  %v3813_v48 = vld [vmem:[#allocation12 + $0x8d8] sm:$0xff] }
 0x518   :  { %7098 = vmatprep.subr.bf16.mxu1 %v7097_v3  ;;  %v7113_v3 = vpack.c.bf16 %v3944_v53, %v3937_v51  ;;  %v3978_v53 = vld [vmem:[#allocation12 + $0xe00] sm:$0xff] }
 0x519   :  { %7244 = vmatpush1.bf16.msra.mxu0 %v7243_v6  ;;  %v7259_v6 = vpack.c.bf16 %v3763_v0, %v3756_v57  ;;  %v3993_v0 = vld [vmem:[#allocation12 + $0xe78] sm:$0xff] }
 0x51a   :  { %7246 = vmatprep.subr.bf16.mxu0 %v7245_v11  ;;  %v2379_v11 = vrot.slane %v8800_v21, %v8741_v33 }
 0x51b   :  { %7100 = vmatpush1.bf16.msra.mxu1 %v7099_v16  ;;  %v3777_v16 = vld [vmem:[#allocation12 + $0x7b8] sm:$0xff] }
 0x51c   :  { %7102 = vmatprep.subr.bf16.mxu1 %v7101_v12  ;;  %v3792_v12 = vld [vmem:[#allocation12 + $0x830] sm:$0xff]  ;;  %v7263_v21 = vpack.c.bf16 %v3777_v16, %v3770_v7  ;;  %v3310_v17 = vadd.f32 %v8822_v23, %v2379_v11  ;;  %v4007_v16 = vld [vmem:[#allocation12 + $0xee8] sm:$0xff] }
 0x51d   :  { %7248 = vmatpush1.bf16.msra.mxu0 %v7247_v56  ;;  %v3950_v56 = vld [vmem:[#allocation12 + $0xd20] sm:$0xff]  ;;  %v7265_v27 = vpack.c.bf16 %v3792_v12, %v3785_v18  ;;  %v3992_v11 = vld [vmem:[#allocation12 + $0xe70] sm:$0xff]  ;;  %v7277_v18 = vpack.c.bf16 %v3834_v5, %v3827_v30 }
 0x51e   :  { %7250 = vmatprep.subr.bf16.mxu0 %v7249_v24  ;;  %v3965_v24 = vld [vmem:[#allocation12 + $0xd98] sm:$0xff]  ;;  %v7119_v38 = vpack.c.bf16 %v3957_v22, %v3950_v56  ;;  %v3826_v12 = vld [vmem:[#allocation12 + $0x940] sm:$0xff]  ;;  %v3848_v56 = vld [vmem:[#allocation12 + $0x9f0] sm:$0xff] }
 0x51f   :  { %7104 = vmatpush1.bf16.msra.mxu1 %v7103_v26  ;;  %v7121_v35 = vpack.c.bf16 %v3972_v25, %v3965_v24  ;;  %v4021_v25 = vld [vmem:[#allocation12 + $0xf58] sm:$0xff]  ;;  %v3890_v30 = vld [vmem:[#allocation12 + $0xb40] sm:$0xff] }
 0x520   :  { %7106 = vmatprep.subr.bf16.mxu1 %v7105_v29  ;;  %v3791_v29 = vld [vmem:[#allocation12 + $0x828] sm:$0xff] }
 0x521   :  { %7252 = vmatpush1.bf16.msra.mxu0 %v7251_v32  ;;  %v3806_v32 = vld [vmem:[#allocation12 + $0x8a0] sm:$0xff]  ;;  %v7267_v41 = vpack.c.bf16 %v3791_v29, %v3784_v28  ;;  %v3847_v28 = vld [vmem:[#allocation12 + $0x9e8] sm:$0xff] }
 0x522   :  { %7254 = vmatprep.subr.bf16.mxu0 %v7253_v37  ;;  %v3964_v37 = vld [vmem:[#allocation12 + $0xd90] sm:$0xff]  ;;  %v7269_v23 = vpack.c.bf16 %v3806_v32, %v3799_v31  ;;  %v3855_v29 = vld [vmem:[#allocation12 + $0xa28] sm:$0xff] }
 0x523   :  { %7108 = vmatpush1.bf16.msra.mxu1 %v7107_v42  ;;  %v3979_v42 = vld [vmem:[#allocation12 + $0xe08] sm:$0xff]  ;;  %v7123_v47 = vpack.c.bf16 %v3971_v40, %v3964_v37 }
 0x524   :  { %7110 = vmatprep.subr.bf16.mxu1 %v7109_v45  ;;  %v3805_v45 = vld [vmem:[#allocation12 + $0x898] sm:$0xff]  ;;  %v7125_v51 = vpack.c.bf16 %v3986_v43, %v3979_v42  ;;  %v4027_v37 = vld [vmem:[#allocation12 + $0xf88] sm:$0xff]  ;;  %v4042_v42 = vld [vmem:[#allocation12 + $0x1000] sm:$0xff] }
 0x525   :  { %7256 = vmatpush1.bf16.msra.mxu0 %v7255_v49  ;;  %v3820_v49 = vld [vmem:[#allocation12 + $0x910] sm:$0xff]  ;;  %v7271_v57 = vpack.c.bf16 %v3805_v45, %v3798_v44  ;;  %v3861_v44 = vld [vmem:[#allocation12 + $0xa58] sm:$0xff] }
 0x526   :  { %7258 = vmatprep.subr.bf16.mxu0 %v7257_v55  ;;  %v3985_v55 = vld [vmem:[#allocation12 + $0xe38] sm:$0xff]  ;;  %v7273_v2 = vpack.c.bf16 %v3820_v49, %v3813_v48 }
 0x527   :  { %7112 = vmatpush1.bf16.msra.mxu1 %v7111_v63  ;;  %v4000_v63 = vld [vmem:[#allocation12 + $0xeb0] sm:$0xff]  ;;  %v3869_v45 = vld [vmem:[#allocation12 + $0xa98] sm:$0xff] }
 0x528   :  { %4605 = vmatmul.mubr.f32.vlgmr.msra.gmra.mrb[20].mxu0 %v8812_v58  ;;  %v5690_v10 = vpop.f32.mrb[12].mxu1  ;;  %7114 = vmatprep.subr.bf16.mxu1 %v7113_v3  ;;  %v3819_v3 = vld [vmem:[#allocation12 + $0x908] sm:$0xff]  ;;  %v7129_v9 = vpack.c.bf16 %v4000_v63, %v3993_v0  ;;  %v4056_v0 = vld [vmem:[#allocation12 + $0x1070] sm:$0xff] }
 0x529   :  { %7260 = vmatpush1.bf16.msra.mxu0 %v7259_v6  ;;  %4675 = vmatprep.mubr.f32.mxu0 %v8819_v46  ;;  %v5691_v15 = vpop.f32.mrb[13].mxu1  ;;  %v7127_v6 = vpack.c.bf16 %v3985_v55, %v3978_v53  ;;  %v7275_v7 = vpack.c.bf16 %v3819_v3, %v3812_v1  ;;  %v4041_v53 = vld [vmem:[#allocation12 + $0xff8] sm:$0xff]  ;;  %v3875_v1 = vld [vmem:[#allocation12 + $0xac8] sm:$0xff] }
 0x52a   :  { %v5692_v26 = vadd.f32 %v5691_v15, %v5690_v10  ;;  %7262 = vmatprep.subr.bf16.mxu0 %v7261_v14  ;;  %v3999_v14 = vld [vmem:[#allocation12 + $0xea8] sm:$0xff]  ;;  %v3833_v10 = vld [vmem:[#allocation12 + $0x978] sm:$0xff]  ;;  %v4006_v15 = vld [vmem:[#allocation12 + $0xee0] sm:$0xff] }
 0x52b   :  { %7116 = vmatpush1.bf16.msra.mxu1 %v7115_v62  ;;  %v4014_v62 = vld [vmem:[#allocation12 + $0xf20] sm:$0xff]  ;;  %v7131_v22 = vpack.c.bf16 %v3999_v14, %v3992_v11  ;;  %v7279_v24 = vpack.c.bf16 %v3833_v10, %v3826_v12  ;;  %v3883_v3 = vld [vmem:[#allocation12 + $0xb08] sm:$0xff]  ;;  %v3889_v12 = vld [vmem:[#allocation12 + $0xb38] sm:$0xff] }
 0x52c   :  { %v8829_v34 = vadd.f32 %v5692_v26, %v3310_v17  ;;  %7118 = vmatprep.subr.bf16.mxu1 %v7117_v19  ;;  %v3841_v19 = vld [vmem:[#allocation12 + $0x9b8] sm:$0xff]  ;;  %v7133_v60 = vpack.c.bf16 %v4014_v62, %v4007_v16  ;;  %v4028_v17 = vld [vmem:[#allocation12 + $0xf90] sm:$0xff]  ;;  %v4055_v11 = vld [vmem:[#allocation12 + $0x1068] sm:$0xff]  ;;  %v7293_v62 = vpack.c.bf16 %v3890_v30, %v3883_v3 }
 0x52d   :  { %7264 = vmatpush1.bf16.msra.mxu0 %v7263_v21  ;;  %v4013_v21 = vld [vmem:[#allocation12 + $0xf18] sm:$0xff]  ;;  %v7281_v26 = vpack.c.bf16 %v3848_v56, %v3841_v19  ;;  %v7137_v32 = vpack.c.bf16 %v4028_v17, %v4021_v25  ;;  %v4070_v16 = vld [vmem:[#allocation12 + $0x10e0] sm:$0xff]  ;;  %v3904_v19 = vld [vmem:[#allocation12 + $0xbb0] sm:$0xff] }
 0x52e   :  { %7266 = vmatprep.subr.bf16.mxu0 %v7265_v27  ;;  %v3840_v27 = vld [vmem:[#allocation12 + $0x9b0] sm:$0xff]  ;;  %v7135_v31 = vpack.c.bf16 %v4013_v21, %v4006_v15  ;;  %v3897_v10 = vld [vmem:[#allocation12 + $0xb78] sm:$0xff]  ;;  %v4062_v15 = vld [vmem:[#allocation12 + $0x10a0] sm:$0xff] }
 0x52f   :  { %7120 = vmatpush1.bf16.msra.mxu1 %v7119_v38  ;;  %v3862_v38 = vld [vmem:[#allocation12 + $0xa60] sm:$0xff]  ;;  %v7283_v40 = vpack.c.bf16 %v3847_v28, %v3840_v27  ;;  %v4069_v21 = vld [vmem:[#allocation12 + $0x10d8] sm:$0xff]  ;;  %v7297_v28 = vpack.c.bf16 %v3904_v19, %v3897_v10  ;;  %v4112_v30 = vld [vmem:[#allocation12 + $0x1230] sm:$0xff] }
 0x530   :  { %7122 = vmatprep.subr.bf16.mxu1 %v7121_v35  ;;  %v4020_v35 = vld [vmem:[#allocation12 + $0xf50] sm:$0xff]  ;;  %v7285_v43 = vpack.c.bf16 %v3862_v38, %v3855_v29  ;;  %v4077_v17 = vld [vmem:[#allocation12 + $0x1118] sm:$0xff]  ;;  %v3903_v38 = vld [vmem:[#allocation12 + $0xba8] sm:$0xff] }
 0x531   :  { %7268 = vmatpush1.bf16.msra.mxu0 %v7267_v41  ;;  %v4035_v41 = vld [vmem:[#allocation12 + $0xfc8] sm:$0xff]  ;;  %v7139_v48 = vpack.c.bf16 %v4027_v37, %v4020_v35  ;;  %v3896_v29 = vld [vmem:[#allocation12 + $0xb70] sm:$0xff]  ;;  %v7151_v35 = vpack.c.bf16 %v4069_v21, %v4062_v15  ;;  %v4105_v3 = vld [vmem:[#allocation12 + $0x11f8] sm:$0xff] }
 0x532   :  { %7270 = vmatprep.subr.bf16.mxu0 %v7269_v23  ;;  %v3854_v23 = vld [vmem:[#allocation12 + $0xa20] sm:$0xff]  ;;  %v7141_v49 = vpack.c.bf16 %v4042_v42, %v4035_v41  ;;  %v4076_v42 = vld [vmem:[#allocation12 + $0x1110] sm:$0xff]  ;;  %v4119_v10 = vld [vmem:[#allocation12 + $0x1268] sm:$0xff] }
 0x533   :  { %7124 = vmatpush1.bf16.msra.mxu1 %v7123_v47  ;;  %v3876_v47 = vld [vmem:[#allocation12 + $0xad0] sm:$0xff]  ;;  %v7287_v55 = vpack.c.bf16 %v3861_v44, %v3854_v23  ;;  %v7299_v44 = vpack.c.bf16 %v3903_v38, %v3896_v29  ;;  %v4126_v19 = vld [vmem:[#allocation12 + $0x12a0] sm:$0xff]  ;;  %v3953_v15 = vld [vmem:[#allocation12 + $0xd38] sm:$0xff] }
 0x534   :  { %7126 = vmatprep.subr.bf16.mxu1 %v7125_v51  ;;  %v4034_v51 = vld [vmem:[#allocation12 + $0xfc0] sm:$0xff]  ;;  %v7289_v63 = vpack.c.bf16 %v3876_v47, %v3869_v45  ;;  %v4091_v45 = vld [vmem:[#allocation12 + $0x1188] sm:$0xff]  ;;  %v3960_v21 = vld [vmem:[#allocation12 + $0xd70] sm:$0xff] }
 0x535   :  { %7272 = vmatpush1.bf16.msra.mxu0 %v7271_v57  ;;  %v4049_v57 = vld [vmem:[#allocation12 + $0x1038] sm:$0xff]  ;;  %v7143_v5 = vpack.c.bf16 %v4041_v53, %v4034_v51  ;;  %v4098_v47 = vld [vmem:[#allocation12 + $0x11c0] sm:$0xff]  ;;  %v4140_v29 = vld [vmem:[#allocation12 + $0x1310] sm:$0xff]  ;;  %v7313_v38 = vpack.c.bf16 %v3960_v21, %v3953_v15 }
 0x536   :  { %4392 = vmatmul.mubr.f32.vlgmr.msra.gmra.mrb[18].mxu1 %v8832_v8  ;;  %7274 = vmatprep.subr.bf16.mxu0 %v7273_v2  ;;  %v3868_v2 = vld [vmem:[#allocation12 + $0xa90] sm:$0xff]  ;;  %v3910_v51 = vld [vmem:[#allocation12 + $0xbe0] sm:$0xff]  ;;  %v3917_v53 = vld [vmem:[#allocation12 + $0xc18] sm:$0xff] }
 0x537   :  { %7128 = vmatpush1.bf16.msra.mxu1 %v7127_v6  ;;  %v7145_v6 = vpack.c.bf16 %v4056_v0, %v4049_v57  ;;  %v7291_v14 = vpack.c.bf16 %v3875_v1, %v3868_v2  ;;  %v3932_v57 = vld [vmem:[#allocation12 + $0xc90] sm:$0xff]  ;;  %v7157_v0 = vpack.c.bf16 %v4098_v47, %v4091_v45  ;;  %v4097_v2 = vld [vmem:[#allocation12 + $0x11b8] sm:$0xff]  ;;  %v7303_v1 = vpack.c.bf16 %v3917_v53, %v3910_v51  ;;  %v4154_v45 = vld [vmem:[#allocation12 + $0x1380] sm:$0xff] }
 0x538   :  { %7130 = vmatprep.subr.bf16.mxu1 %v7129_v9  ;;  %v4048_v9 = vld [vmem:[#allocation12 + $0x1030] sm:$0xff]  ;;  %v3973_v51 = vld [vmem:[#allocation12 + $0xdd8] sm:$0xff] }
 0x539   :  { %7276 = vmatpush1.bf16.msra.mxu0 %v7275_v7  ;;  %v4063_v7 = vld [vmem:[#allocation12 + $0x10a8] sm:$0xff]  ;;  %v7147_v56 = vpack.c.bf16 %v4055_v11, %v4048_v9  ;;  %v3981_v53 = vld [vmem:[#allocation12 + $0xe18] sm:$0xff]  ;;  %v4016_v15 = vld [vmem:[#allocation12 + $0xf30] sm:$0xff] }
 0x53a   :  { %7278 = vmatprep.subr.bf16.mxu0 %v7277_v18  ;;  %v3882_v18 = vld [vmem:[#allocation12 + $0xb00] sm:$0xff]  ;;  %v3931_v9 = vld [vmem:[#allocation12 + $0xc88] sm:$0xff] }
 0x53b   :  { %7132 = vmatpush1.bf16.msra.mxu1 %v7131_v22  ;;  %v7295_v25 = vpack.c.bf16 %v3889_v12, %v3882_v18  ;;  %v3939_v11 = vld [vmem:[#allocation12 + $0xcc8] sm:$0xff] }
 0x53c   :  { %7134 = vmatprep.subr.bf16.mxu1 %v7133_v60  ;;  %v7149_v60 = vpack.c.bf16 %v4070_v16, %v4063_v7  ;;  %v7161_v16 = vpack.c.bf16 %v4112_v30, %v4105_v3  ;;  %v4111_v18 = vld [vmem:[#allocation12 + $0x1228] sm:$0xff]  ;;  %v4168_v3 = vld [vmem:[#allocation12 + $0x13f0] sm:$0xff] }
 0x53d   :  { %7280 = vmatpush1.bf16.msra.mxu0 %v7279_v24 }
 0x53e   :  { %7282 = vmatprep.subr.bf16.mxu0 %v7281_v26  ;;  %v4084_v26 = vld [vmem:[#allocation12 + $0x1150] sm:$0xff] }
 0x53f   :  { %7136 = vmatpush1.bf16.msra.mxu1 %v7135_v31  ;;  %v3911_v31 = vld [vmem:[#allocation12 + $0xbe8] sm:$0xff]  ;;  %v7153_v41 = vpack.c.bf16 %v4084_v26, %v4077_v17  ;;  %v4118_v17 = vld [vmem:[#allocation12 + $0x1260] sm:$0xff]  ;;  %v4125_v26 = vld [vmem:[#allocation12 + $0x1298] sm:$0xff] }
 0x540   :  { %7138 = vmatprep.subr.bf16.mxu1 %v7137_v32  ;;  %v3918_v32 = vld [vmem:[#allocation12 + $0xc20] sm:$0xff] }
 0x541   :  { %7284 = vmatpush1.bf16.msra.mxu0 %v7283_v40 }
 0x542   :  { %7286 = vmatprep.subr.bf16.mxu0 %v7285_v43  ;;  %v4083_v43 = vld [vmem:[#allocation12 + $0x1148] sm:$0xff] }
 0x543   :  { %7140 = vmatpush1.bf16.msra.mxu1 %v7139_v48 }
 0x544   :  { %7142 = vmatprep.subr.bf16.mxu1 %v7141_v49  ;;  %v7301_v49 = vpack.c.bf16 %v3918_v32, %v3911_v31  ;;  %v3952_v31 = vld [vmem:[#allocation12 + $0xd30] sm:$0xff]  ;;  %v3959_v32 = vld [vmem:[#allocation12 + $0xd68] sm:$0xff] }
 0x545   :  { %7288 = vmatpush1.bf16.msra.mxu0 %v7287_v55  ;;  %v3925_v55 = vld [vmem:[#allocation12 + $0xc58] sm:$0xff] }
 0x546   :  { %7290 = vmatprep.subr.bf16.mxu0 %v7289_v63  ;;  %v4090_v63 = vld [vmem:[#allocation12 + $0x1180] sm:$0xff] }
 0x547   :  { %7144 = vmatpush1.bf16.msra.mxu1 %v7143_v5  ;;  %v7305_v5 = vpack.c.bf16 %v3932_v57, %v3925_v55  ;;  %v7159_v7 = vpack.c.bf16 %v4097_v2, %v4090_v63  ;;  %v3988_v55 = vld [vmem:[#allocation12 + $0xe50] sm:$0xff]  ;;  %v4153_v63 = vld [vmem:[#allocation12 + $0x1378] sm:$0xff] }
 0x548   :  { %v5725_v22 = vpop.f32.mrb[14].mxu1  ;;  %7146 = vmatprep.subr.bf16.mxu1 %v7145_v6  ;;  %v3924_v6 = vld [vmem:[#allocation12 + $0xc50] sm:$0xff]  ;;  %v7321_v30 = vpack.c.bf16 %v3988_v55, %v3981_v53 }
 0x549   :  { %7292 = vmatpush1.bf16.msra.mxu0 %v7291_v14  ;;  %v5726_v24 = vpop.f32.mrb[15].mxu1  ;;  %v3946_v14 = vld [vmem:[#allocation12 + $0xd00] sm:$0xff]  ;;  %v7307_v12 = vpack.c.bf16 %v3931_v9, %v3924_v6  ;;  %v3987_v6 = vld [vmem:[#allocation12 + $0xe48] sm:$0xff]  ;;  %v4044_v53 = vld [vmem:[#allocation12 + $0x1010] sm:$0xff] }
 0x54a   :  { %v5727_v27 = vadd.f32 %v5726_v24, %v5725_v22  ;;  %7294 = vmatprep.subr.bf16.mxu0 %v7293_v62  ;;  %v4104_v62 = vld [vmem:[#allocation12 + $0x11f0] sm:$0xff]  ;;  %v3938_v22 = vld [vmem:[#allocation12 + $0xcc0] sm:$0xff]  ;;  %v3995_v9 = vld [vmem:[#allocation12 + $0xe88] sm:$0xff] }
 0x54b   :  { %7148 = vmatpush1.bf16.msra.mxu1 %v7147_v56  ;;  %v7309_v56 = vpack.c.bf16 %v3946_v14, %v3939_v11  ;;  %v7163_v24 = vpack.c.bf16 %v4111_v18, %v4104_v62  ;;  %v4002_v11 = vld [vmem:[#allocation12 + $0xec0] sm:$0xff]  ;;  %v4167_v62 = vld [vmem:[#allocation12 + $0x13e8] sm:$0xff] }
 0x54c   :  { %v3450_v37 = vadd.f32 %v5727_v27, %v8829_v34  ;;  %v3519_v40 = vpop.f32.mrb[16].mxu1  ;;  %7150 = vmatprep.subr.bf16.mxu1 %v7149_v60  ;;  %v7155_v34 = vpack.c.bf16 %v4083_v43, %v4076_v42  ;;  %v3945_v60 = vld [vmem:[#allocation12 + $0xcf8] sm:$0xff]  ;;  %v4132_v42 = vld [vmem:[#allocation12 + $0x12d0] sm:$0xff]  ;;  %v4139_v43 = vld [vmem:[#allocation12 + $0x1308] sm:$0xff] }
 0x54d   :  { %7296 = vmatpush1.bf16.msra.mxu0 %v7295_v25  ;;  %v5883_v23 = vpop.f32.mrb[17].mxu1  ;;  %v7165_v25 = vpack.c.bf16 %v4126_v19, %v4119_v10  ;;  %v7311_v27 = vpack.c.bf16 %v3945_v60, %v3938_v22  ;;  %v7171_v57 = vpack.c.bf16 %v4139_v43, %v4132_v42  ;;  %v4182_v10 = vld [vmem:[#allocation12 + $0x1460] sm:$0xff]  ;;  %v7325_v19 = vpack.c.bf16 %v4002_v11, %v3995_v9  ;;  %v4001_v22 = vld [vmem:[#allocation12 + $0xeb8] sm:$0xff]  ;;  %v4195_v42 = vld [vmem:[#allocation12 + $0x14c8] sm:$0xff] }
 0x54e   :  { %v8836_v48 = vadd.f32 %v3519_v40, %v3450_v37  ;;  %7298 = vmatprep.subr.bf16.mxu0 %v7297_v28  ;;  %v4133_v28 = vld [vmem:[#allocation12 + $0x12d8] sm:$0xff]  ;;  %v3974_v37 = vld [vmem:[#allocation12 + $0xde0] sm:$0xff]  ;;  %v7167_v40 = vpack.c.bf16 %v4125_v26, %v4118_v17  ;;  %v7315_v23 = vpack.c.bf16 %v3959_v32, %v3952_v31  ;;  %v4015_v31 = vld [vmem:[#allocation12 + $0xf28] sm:$0xff] }
 0x54f   :  { %7152 = vmatpush1.bf16.msra.mxu1 %v7151_v35  ;;  %v3967_v35 = vld [vmem:[#allocation12 + $0xda8] sm:$0xff]  ;;  %v4009_v60 = vld [vmem:[#allocation12 + $0xef8] sm:$0xff] }
 0x550   :  { %7154 = vmatprep.subr.bf16.mxu1 %v7153_v41  ;;  %v7169_v41 = vpack.c.bf16 %v4140_v29, %v4133_v28  ;;  %v7317_v47 = vpack.c.bf16 %v3974_v37, %v3967_v35  ;;  %v4181_v17 = vld [vmem:[#allocation12 + $0x1458] sm:$0xff]  ;;  %v4196_v28 = vld [vmem:[#allocation12 + $0x14d0] sm:$0xff]  ;;  %v7329_v29 = vpack.c.bf16 %v4016_v15, %v4009_v60  ;;  %v4023_v32 = vld [vmem:[#allocation12 + $0xf68] sm:$0xff] }
 0x551   :  { %7300 = vmatpush1.bf16.msra.mxu0 %v7299_v44  ;;  %v4147_v44 = vld [vmem:[#allocation12 + $0x1348] sm:$0xff]  ;;  %v4030_v35 = vld [vmem:[#allocation12 + $0xfa0] sm:$0xff]  ;;  %v4057_v9 = vld [vmem:[#allocation12 + $0x1078] sm:$0xff] }
 0x552   :  { %7302 = vmatprep.subr.bf16.mxu0 %v7301_v49  ;;  %v3966_v49 = vld [vmem:[#allocation12 + $0xda0] sm:$0xff]  ;;  %v4065_v11 = vld [vmem:[#allocation12 + $0x10b8] sm:$0xff] }
 0x553   :  { %7156 = vmatpush1.bf16.msra.mxu1 %v7155_v34  ;;  %v7173_v34 = vpack.c.bf16 %v4154_v45, %v4147_v44  ;;  %v7319_v2 = vpack.c.bf16 %v3973_v51, %v3966_v49  ;;  %v4210_v44 = vld [vmem:[#allocation12 + $0x1540] sm:$0xff]  ;;  %v7333_v45 = vpack.c.bf16 %v4030_v35, %v4023_v32  ;;  %v4029_v49 = vld [vmem:[#allocation12 + $0xf98] sm:$0xff] }
 0x554   :  { %7158 = vmatprep.subr.bf16.mxu1 %v7157_v0  ;;  %v4146_v0 = vld [vmem:[#allocation12 + $0x1340] sm:$0xff]  ;;  %v4037_v51 = vld [vmem:[#allocation12 + $0xfd8] sm:$0xff] }
 0x555   :  { %7304 = vmatpush1.bf16.msra.mxu0 %v7303_v1  ;;  %v4161_v1 = vld [vmem:[#allocation12 + $0x13b8] sm:$0xff]  ;;  %v7175_v14 = vpack.c.bf16 %v4153_v63, %v4146_v0  ;;  %v7337_v0 = vpack.c.bf16 %v4044_v53, %v4037_v51  ;;  %v4036_v63 = vld [vmem:[#allocation12 + $0xfd0] sm:$0xff] }
 0x556   :  { %7306 = vmatprep.subr.bf16.mxu0 %v7305_v5  ;;  %v3980_v5 = vld [vmem:[#allocation12 + $0xe10] sm:$0xff]  ;;  %v4085_v60 = vld [vmem:[#allocation12 + $0x1158] sm:$0xff] }
 0x557   :  { %7160 = vmatpush1.bf16.msra.mxu1 %v7159_v7  ;;  %v7177_v7 = vpack.c.bf16 %v4168_v3, %v4161_v1  ;;  %v7323_v18 = vpack.c.bf16 %v3987_v6, %v3980_v5  ;;  %v4051_v1 = vld [vmem:[#allocation12 + $0x1048] sm:$0xff]  ;;  %v4058_v3 = vld [vmem:[#allocation12 + $0x1080] sm:$0xff]  ;;  %v4093_v15 = vld [vmem:[#allocation12 + $0x1198] sm:$0xff] }
 0x558   :  { %7162 = vmatprep.subr.bf16.mxu1 %v7161_v16  ;;  %v4160_v16 = vld [vmem:[#allocation12 + $0x13b0] sm:$0xff]  ;;  %v7341_v5 = vpack.c.bf16 %v4058_v3, %v4051_v1  ;;  %v4050_v6 = vld [vmem:[#allocation12 + $0x1040] sm:$0xff]  ;;  %v4113_v32 = vld [vmem:[#allocation12 + $0x1238] sm:$0xff] }
 0x559   :  { %7308 = vmatpush1.bf16.msra.mxu0 %v7307_v12  ;;  %v4175_v12 = vld [vmem:[#allocation12 + $0x1428] sm:$0xff]  ;;  %v7179_v21 = vpack.c.bf16 %v4167_v62, %v4160_v16  ;;  %v4064_v62 = vld [vmem:[#allocation12 + $0x10b0] sm:$0xff]  ;;  %v4121_v35 = vld [vmem:[#allocation12 + $0x1278] sm:$0xff] }
 0x55a   :  { %7310 = vmatprep.subr.bf16.mxu0 %v7309_v56  ;;  %v3994_v56 = vld [vmem:[#allocation12 + $0xe80] sm:$0xff]  ;;  %v4141_v51 = vld [vmem:[#allocation12 + $0x1318] sm:$0xff] }
 0x55b   :  { %7164 = vmatpush1.bf16.msra.mxu1 %v7163_v24  ;;  %v7181_v24 = vpack.c.bf16 %v4182_v10, %v4175_v12  ;;  %v7327_v26 = vpack.c.bf16 %v4001_v22, %v3994_v56  ;;  %v4079_v12 = vld [vmem:[#allocation12 + $0x1128] sm:$0xff]  ;;  %v4086_v10 = vld [vmem:[#allocation12 + $0x1160] sm:$0xff]  ;;  %v4149_v53 = vld [vmem:[#allocation12 + $0x1358] sm:$0xff] }
 0x55c   :  { %7166 = vmatprep.subr.bf16.mxu1 %v7165_v25  ;;  %v4174_v25 = vld [vmem:[#allocation12 + $0x1420] sm:$0xff]  ;;  %v7349_v56 = vpack.c.bf16 %v4086_v10, %v4079_v12 }
 0x55d   :  { %7312 = vmatpush1.bf16.msra.mxu0 %v7311_v27  ;;  %v4189_v27 = vld [vmem:[#allocation12 + $0x1498] sm:$0xff]  ;;  %v7183_v37 = vpack.c.bf16 %v4181_v17, %v4174_v25  ;;  %v4078_v22 = vld [vmem:[#allocation12 + $0x1120] sm:$0xff]  ;;  %v4092_v17 = vld [vmem:[#allocation12 + $0x1190] sm:$0xff] }
 0x55e   :  { %7314 = vmatprep.subr.bf16.mxu0 %v7313_v38  ;;  %v4008_v38 = vld [vmem:[#allocation12 + $0xef0] sm:$0xff]  ;;  %v4170_v1 = vld [vmem:[#allocation12 + $0x1400] sm:$0xff] }
 0x55f   :  { %7168 = vmatpush1.bf16.msra.mxu1 %v7167_v40  ;;  %v7185_v40 = vpack.c.bf16 %v4196_v28, %v4189_v27  ;;  %v7331_v43 = vpack.c.bf16 %v4015_v31, %v4008_v38  ;;  %v4107_v27 = vld [vmem:[#allocation12 + $0x1208] sm:$0xff]  ;;  %v4114_v28 = vld [vmem:[#allocation12 + $0x1240] sm:$0xff] }
 0x560   :  { %7170 = vmatprep.subr.bf16.mxu1 %v7169_v41  ;;  %v4188_v41 = vld [vmem:[#allocation12 + $0x1490] sm:$0xff]  ;;  %v7357_v38 = vpack.c.bf16 %v4114_v28, %v4107_v27  ;;  %v4106_v31 = vld [vmem:[#allocation12 + $0x1200] sm:$0xff] }
 0x561   :  { %7316 = vmatpush1.bf16.msra.mxu0 %v7315_v23  ;;  %v4203_v23 = vld [vmem:[#allocation12 + $0x1508] sm:$0xff]  ;;  %v7187_v55 = vpack.c.bf16 %v4195_v42, %v4188_v41  ;;  %v4120_v42 = vld [vmem:[#allocation12 + $0x1270] sm:$0xff]  ;;  %v4198_v12 = vld [vmem:[#allocation12 + $0x14e0] sm:$0xff] }
 0x562   :  { %7318 = vmatprep.subr.bf16.mxu0 %v7317_v47  ;;  %v4022_v47 = vld [vmem:[#allocation12 + $0xf60] sm:$0xff] }
 0x563   :  { %7172 = vmatpush1.bf16.msra.mxu1 %v7171_v57  ;;  %v7189_v57 = vpack.c.bf16 %v4210_v44, %v4203_v23  ;;  %v4135_v23 = vld [vmem:[#allocation12 + $0x12e8] sm:$0xff]  ;;  %v4142_v44 = vld [vmem:[#allocation12 + $0x1320] sm:$0xff] }
 0x564   :  { %7174 = vmatprep.subr.bf16.mxu1 %v7173_v34  ;;  %v7335_v34 = vpack.c.bf16 %v4029_v49, %v4022_v47  ;;  %v7365_v47 = vpack.c.bf16 %v4142_v44, %v4135_v23  ;;  %v4134_v49 = vld [vmem:[#allocation12 + $0x12e0] sm:$0xff] }
 0x565   :  { %7320 = vmatpush1.bf16.msra.mxu0 %v7319_v2  ;;  %v4043_v2 = vld [vmem:[#allocation12 + $0x1008] sm:$0xff]  ;;  %v4202_v28 = vld [vmem:[#allocation12 + $0x1500] sm:$0xff] }
 0x566   :  { %7322 = vmatprep.subr.bf16.mxu0 %v7321_v30  ;;  %v7339_v30 = vpack.c.bf16 %v4043_v2, %v4036_v63  ;;  %v4155_v63 = vld [vmem:[#allocation12 + $0x1388] sm:$0xff] }
 0x567   :  { %7176 = vmatpush1.bf16.msra.mxu1 %v7175_v14  ;;  %v4072_v14 = vld [vmem:[#allocation12 + $0x10f0] sm:$0xff]  ;;  %v4163_v2 = vld [vmem:[#allocation12 + $0x13c8] sm:$0xff] }
 0x568   :  { %4676 = vmatmul.mubr.f32.vlgmr.msra.gmra.mrb[20].mxu0 %v8832_v8  ;;  %7178 = vmatprep.subr.bf16.mxu1 %v7177_v7  ;;  %v7343_v7 = vpack.c.bf16 %v4057_v9, %v4050_v6  ;;  %v7345_v16 = vpack.c.bf16 %v4072_v14, %v4065_v11  ;;  %v4169_v6 = vld [vmem:[#allocation12 + $0x13f8] sm:$0xff]  ;;  %v4184_v11 = vld [vmem:[#allocation12 + $0x1470] sm:$0xff] }
 0x569   :  { %7324 = vmatpush1.bf16.msra.mxu0 %v7323_v18  ;;  %v4071_v18 = vld [vmem:[#allocation12 + $0x10e8] sm:$0xff]  ;;  %v4177_v9 = vld [vmem:[#allocation12 + $0x1438] sm:$0xff] }
 0x56a   :  { %7326 = vmatprep.subr.bf16.mxu0 %v7325_v19  ;;  %v7347_v19 = vpack.c.bf16 %v4071_v18, %v4064_v62  ;;  %v4183_v62 = vld [vmem:[#allocation12 + $0x1468] sm:$0xff] }
 0x56b   :  { %7180 = vmatpush1.bf16.msra.mxu1 %v7179_v21  ;;  %v4100_v21 = vld [vmem:[#allocation12 + $0x11d0] sm:$0xff]  ;;  %v4191_v18 = vld [vmem:[#allocation12 + $0x14a8] sm:$0xff] }
 0x56c   :  { %7182 = vmatprep.subr.bf16.mxu1 %v7181_v24  ;;  %v7351_v24 = vpack.c.bf16 %v4085_v60, %v4078_v22  ;;  %v7353_v25 = vpack.c.bf16 %v4100_v21, %v4093_v15  ;;  %v4197_v22 = vld [vmem:[#allocation12 + $0x14d8] sm:$0xff]  ;;  %v4212_v15 = vld [vmem:[#allocation12 + $0x1550] sm:$0xff] }
 0x56d   :  { %7328 = vmatpush1.bf16.msra.mxu0 %v7327_v26  ;;  %v4099_v26 = vld [vmem:[#allocation12 + $0x11c8] sm:$0xff]  ;;  %v4205_v60 = vld [vmem:[#allocation12 + $0x1518] sm:$0xff] }
 0x56e   :  { %7330 = vmatprep.subr.bf16.mxu0 %v7329_v29  ;;  %v7355_v29 = vpack.c.bf16 %v4099_v26, %v4092_v17 }
 0x56f   :  { %7184 = vmatpush1.bf16.msra.mxu1 %v7183_v37  ;;  %v4128_v37 = vld [vmem:[#allocation12 + $0x12b0] sm:$0xff] }
 0x570   :  { %7186 = vmatprep.subr.bf16.mxu1 %v7185_v40  ;;  %v7359_v40 = vpack.c.bf16 %v4113_v32, %v4106_v31  ;;  %v7361_v41 = vpack.c.bf16 %v4128_v37, %v4121_v35  ;;  %v4209_v31 = vld [vmem:[#allocation12 + $0x1538] sm:$0xff]  ;;  %v4204_v32 = vld [vmem:[#allocation12 + $0x1510] sm:$0xff]  ;;  %v4211_v35 = vld [vmem:[#allocation12 + $0x1548] sm:$0xff] }
 0x571   :  { %7332 = vmatpush1.bf16.msra.mxu0 %v7331_v43  ;;  %v4127_v43 = vld [vmem:[#allocation12 + $0x12a8] sm:$0xff]  ;;  %v7191_v44 = vpack.c.bf16 %v4209_v31, %v4202_v28 }
 0x572   :  { %7334 = vmatprep.subr.bf16.mxu0 %v7333_v45  ;;  %v7363_v45 = vpack.c.bf16 %v4127_v43, %v4120_v42  ;;  %v3648_v42 = vld [vmem:[#allocation12 + $0x3b0] sm:$0xff]  ;;  %v3655_v43 = vld [vmem:[#allocation12 + $0x3e8] sm:$0xff] }
 0x573   :  { %7188 = vmatpush1.bf16.msra.mxu1 %v7187_v55  ;;  %v4156_v55 = vld [vmem:[#allocation12 + $0x1390] sm:$0xff]  ;;  %v3583_v31 = vld [vmem:[#allocation12 + $0x1a8] sm:$0xff] }
 0x574   :  { %7190 = vmatprep.subr.bf16.mxu1 %v7189_v57  ;;  %v7367_v57 = vpack.c.bf16 %v4141_v51, %v4134_v49  ;;  %v7585_v51 = vpack.c.bf16 %v3655_v43, %v3648_v42  ;;  %v3704_v42 = vld [vmem:[#allocation12 + $0x570] sm:$0xff]  ;;  %v3711_v43 = vld [vmem:[#allocation12 + $0x5a8] sm:$0xff] }
 0x575   :  { %7336 = vmatpush1.bf16.msra.mxu0 %v7335_v34  ;;  %v7369_v34 = vpack.c.bf16 %v4156_v55, %v4149_v53  ;;  %v3534_v53 = vld [vmem:[#allocation12 + $0x20] sm:$0xff]  ;;  %v3541_v55 = vld [vmem:[#allocation12 + $0x58] sm:$0xff] }
 0x576   :  { %7338 = vmatprep.subr.bf16.mxu0 %v7337_v0  ;;  %v4148_v0 = vld [vmem:[#allocation12 + $0x1350] sm:$0xff] }
 0x577   :  { %v7371_v3 = vpack.c.bf16 %v4155_v63, %v4148_v0  ;;  %v3549_v0 = vld [vmem:[#allocation12 + $0x98] sm:$0xff]  ;;  %v3556_v63 = vld [vmem:[#allocation12 + $0xd0] sm:$0xff] }
 0x579   :  { %7340 = vmatpush1.bf16.msra.mxu0 %v7339_v30  ;;  %v7373_v30 = vpack.c.bf16 %v4170_v1, %v4163_v2  ;;  %v3662_v2 = vld [vmem:[#allocation12 + $0x420] sm:$0xff]  ;;  %v3669_v1 = vld [vmem:[#allocation12 + $0x458] sm:$0xff] }
 0x57a   :  { %7342 = vmatprep.subr.bf16.mxu0 %v7341_v5  ;;  %v4162_v5 = vld [vmem:[#allocation12 + $0x13c0] sm:$0xff] }
 0x57b   :  { %v7375_v14 = vpack.c.bf16 %v4169_v6, %v4162_v5  ;;  %v3548_v5 = vld [vmem:[#allocation12 + $0x90] sm:$0xff]  ;;  %v3555_v6 = vld [vmem:[#allocation12 + $0xc8] sm:$0xff] }
 0x57d   :  { %7344 = vmatpush1.bf16.msra.mxu0 %v7343_v7  ;;  %v7377_v7 = vpack.c.bf16 %v4184_v11, %v4177_v9  ;;  %v8852_v9 = vmax.f32 %v8836_v48, 0.0  ;;  %v3550_v11 = vld [vmem:[#allocation12 + $0xa0] sm:$0xff] }
 0x57e   :  { %7346 = vmatprep.subr.bf16.mxu0 %v7345_v16  ;;  %v4176_v16 = vld [vmem:[#allocation12 + $0x1430] sm:$0xff]  ;;  %v3562_v48 = vld [vmem:[#allocation12 + $0x100] sm:$0xff] }
 0x57f   :  { %v7379_v10 = vpack.c.bf16 %v4183_v62, %v4176_v16  ;;  %v7393_v16 = vpack.c.bf16 %v3556_v63, %v3549_v0  ;;  %v7589_v62 = vpack.c.bf16 %v3669_v1, %v3662_v2  ;;  %v3605_v0 = vld [vmem:[#allocation12 + $0x258] sm:$0xff]  ;;  %v3612_v63 = vld [vmem:[#allocation12 + $0x290] sm:$0xff]  ;;  %v3718_v2 = vld [vmem:[#allocation12 + $0x5e0] sm:$0xff] }
 0x580   :  { %v3725_v1 = vld [vmem:[#allocation12 + $0x618] sm:$0xff] }
 0x581   :  { %7348 = vmatpush1.bf16.msra.mxu0 %v7347_v19  ;;  %v7381_v19 = vpack.c.bf16 %v4198_v12, %v4191_v18  ;;  %v3570_v18 = vld [vmem:[#allocation12 + $0x140] sm:$0xff]  ;;  %v3676_v12 = vld [vmem:[#allocation12 + $0x490] sm:$0xff] }
 0x582   :  { %7350 = vmatprep.subr.bf16.mxu0 %v7349_v56  ;;  %v4190_v56 = vld [vmem:[#allocation12 + $0x14a0] sm:$0xff] }
 0x583   :  { %v7383_v21 = vpack.c.bf16 %v4197_v22, %v4190_v56  ;;  %v3569_v22 = vld [vmem:[#allocation12 + $0x138] sm:$0xff] }
 0x584   :  { %v7399_v28 = vpack.c.bf16 %v3569_v22, %v3562_v48  ;;  %v3618_v48 = vld [vmem:[#allocation12 + $0x2c0] sm:$0xff]  ;;  %v3625_v22 = vld [vmem:[#allocation12 + $0x2f8] sm:$0xff] }
 0x585   :  { %7352 = vmatpush1.bf16.msra.mxu0 %v7351_v24  ;;  %v7385_v24 = vpack.c.bf16 %v4212_v15, %v4205_v60 }
 0x586   :  { %7354 = vmatprep.subr.bf16.mxu0 %v7353_v25  ;;  %v7761_v25 = vld [vmem:[#allocation10] sm:$0x7f] }
 0x587   :  { %v2371_v17 = vrot.slane %v7761_v25, %v8766_v36  ;;  %v2375_v26 = vrot.slane %v7761_v25, %v8750_v61  ;;  %v3577_v25 = vld [vmem:[#allocation12 + $0x178] sm:$0xff] }
 0x589   :  { %7356 = vmatpush1.bf16.msra.mxu0 %v7355_v29 }
 0x58a   :  { %7358 = vmatprep.subr.bf16.mxu0 %v7357_v38 }
 0x58d   :  { %7360 = vmatpush1.bf16.msra.mxu0 %v7359_v40  ;;  %v3535_v40 = vld [vmem:[#allocation12 + $0x28] sm:$0xff] }
 0x58e   :  { %7362 = vmatprep.subr.bf16.mxu0 %v7361_v41  ;;  %v3542_v41 = vld [vmem:[#allocation12 + $0x60] sm:$0xff] }
 0x58f   :  { %v7389_v49 = vpack.c.bf16 %v3542_v41, %v3535_v40  ;;  %v3591_v40 = vld [vmem:[#allocation12 + $0x1e8] sm:$0xff]  ;;  %v3598_v41 = vld [vmem:[#allocation12 + $0x220] sm:$0xff] }
 0x591   :  { %7364 = vmatpush1.bf16.msra.mxu0 %v7363_v45  ;;  %v7387_v45 = vpack.c.bf16 %v4211_v35, %v4204_v32  ;;  %v3578_v35 = vld [vmem:[#allocation12 + $0x180] sm:$0xff] }
 0x592   :  { %7366 = vmatprep.subr.bf16.mxu0 %v7365_v47 }
 0x595   :  { %7368 = vmatpush1.bf16.msra.mxu0 %v7367_v57  ;;  %v3536_v57 = vld [vmem:[#allocation12 + $0x30] sm:$0xff] }
 0x596   :  { %7370 = vmatprep.subr.bf16.mxu0 %v7369_v34  ;;  %v3543_v34 = vld [vmem:[#allocation12 + $0x68] sm:$0xff] }
 0x599   :  { %7372 = vmatpush1.bf16.msra.mxu0 %v7371_v3  ;;  %v7391_v3 = vpack.c.bf16 %v3541_v55, %v3534_v53  ;;  %v7405_v53 = vpack.c.bf16 %v3598_v41, %v3591_v40  ;;  %v7601_v55 = vpack.c.bf16 %v3711_v43, %v3704_v42  ;;  %v3647_v40 = vld [vmem:[#allocation12 + $0x3a8] sm:$0xff]  ;;  %v3654_v41 = vld [vmem:[#allocation12 + $0x3e0] sm:$0xff]  ;;  %v3872_v42 = vld [vmem:[#allocation12 + $0xab0] sm:$0xff] }
 0x59a   :  { %7374 = vmatprep.subr.bf16.mxu0 %v7373_v30  ;;  %v7587_v30 = vpack.c.bf16 %v3543_v34, %v3536_v57  ;;  %v3592_v57 = vld [vmem:[#allocation12 + $0x1f0] sm:$0xff]  ;;  %v3599_v34 = vld [vmem:[#allocation12 + $0x228] sm:$0xff] }
 0x59b   :  { %v3879_v43 = vld [vmem:[#allocation12 + $0xae8] sm:$0xff] }
 0x59d   :  { %7376 = vmatpush1.bf16.msra.mxu0 %v7375_v14  ;;  %v3557_v14 = vld [vmem:[#allocation12 + $0xd8] sm:$0xff] }
 0x59e   :  { %7378 = vmatprep.subr.bf16.mxu0 %v7377_v7  ;;  %v3563_v7 = vld [vmem:[#allocation12 + $0x108] sm:$0xff]  ;;  %v7591_v56 = vpack.c.bf16 %v3557_v14, %v3550_v11  ;;  %v7409_v11 = vpack.c.bf16 %v3612_v63, %v3605_v0  ;;  %v7605_v14 = vpack.c.bf16 %v3725_v1, %v3718_v2  ;;  %v3661_v0 = vld [vmem:[#allocation12 + $0x418] sm:$0xff]  ;;  %v3668_v63 = vld [vmem:[#allocation12 + $0x450] sm:$0xff] }
 0x59f   :  { %v7397_v60 = vpack.c.bf16 %v3570_v18, %v3563_v7  ;;  %v3606_v7 = vld [vmem:[#allocation12 + $0x260] sm:$0xff]  ;;  %v3893_v1 = vld [vmem:[#allocation12 + $0xb58] sm:$0xff] }
 0x5a0   :  { %v3626_v18 = vld [vmem:[#allocation12 + $0x300] sm:$0xff] }
 0x5a1   :  { %7380 = vmatpush1.bf16.msra.mxu0 %v7379_v10  ;;  %v3683_v10 = vld [vmem:[#allocation12 + $0x4c8] sm:$0xff]  ;;  %v3886_v2 = vld [vmem:[#allocation12 + $0xb20] sm:$0xff] }
 0x5a2   :  { %7382 = vmatprep.subr.bf16.mxu0 %v7381_v19  ;;  %v7395_v19 = vpack.c.bf16 %v3555_v6, %v3548_v5  ;;  %v7593_v15 = vpack.c.bf16 %v3683_v10, %v3676_v12  ;;  %v3604_v5 = vld [vmem:[#allocation12 + $0x250] sm:$0xff]  ;;  %v3611_v6 = vld [vmem:[#allocation12 + $0x288] sm:$0xff] }
 0x5a3   :  { %v3732_v12 = vld [vmem:[#allocation12 + $0x650] sm:$0xff]  ;;  %v3739_v10 = vld [vmem:[#allocation12 + $0x688] sm:$0xff] }
 0x5a5   :  { %7384 = vmatpush1.bf16.msra.mxu0 %v7383_v21  ;;  %v3564_v21 = vld [vmem:[#allocation12 + $0x110] sm:$0xff] }
 0x5a6   :  { %7386 = vmatprep.subr.bf16.mxu0 %v7385_v24  ;;  %v3571_v24 = vld [vmem:[#allocation12 + $0x148] sm:$0xff] }
 0x5bb   :  { %v3238_v27 = vpop.f32.mrb[18].mxu0 }
 0x5bc   :  { %v7696_v29 = vadd.f32 %v3238_v27, %v2371_v17  ;;  %v3240_v38 = vpop.f32.mrb[19].mxu0  ;;  %v3584_v17 = vld [vmem:[#allocation12 + $0x1b0] sm:$0xff]  ;;  %v3697_v27 = vld [vmem:[#allocation12 + $0x538] sm:$0xff] }
 0x5bd   :  { %v7697_v37 = vadd.f32 %v3240_v38, %v2375_v26  ;;  %v3690_v26 = vld [vmem:[#allocation12 + $0x500] sm:$0xff]  ;;  %v3576_v38 = vld [vmem:[#allocation12 + $0x170] sm:$0xff]  ;;  %v7401_v32 = vpack.c.bf16 %v3584_v17, %v3577_v25  ;;  %v3633_v25 = vld [vmem:[#allocation12 + $0x338] sm:$0xff] }
 0x5be   :  { %v8843_v47 = vmax.f32 %v7696_v29, 0.0  ;;  %v7595_v29 = vpack.c.bf16 %v3571_v24, %v3564_v21  ;;  %v3620_v21 = vld [vmem:[#allocation12 + $0x2d0] sm:$0xff]  ;;  %v3627_v24 = vld [vmem:[#allocation12 + $0x308] sm:$0xff] }
 0x5bf   :  { %v8841_v23 = vmax.f32 %v7697_v37, 0.0  ;;  %v3585_v37 = vld [vmem:[#allocation12 + $0x1b8] sm:$0xff]  ;;  %v3640_v17 = vld [vmem:[#allocation12 + $0x370] sm:$0xff] }
 0x5c1   :  { %4462 = vmatprep.mubr.f32.mxu1 %v8841_v23  ;;  %4746 = vmatprep.mubr.f32.mxu0 %v8841_v23 }
 0x5c2   :  { %4463 = vmatmul.mubr.f32.vlgmr.msra.gmra.mrb[18].mxu1 %v8843_v47  ;;  %4747 = vmatmul.mubr.f32.vlgmr.msra.gmra.mrb[20].mxu0 %v8843_v47 }
 0x5c3   :  { %7192 = vmatpush1.bf16.msra.mxu1 %v7191_v44  ;;  %7388 = vmatpush1.bf16.msra.mxu0 %v7387_v45  ;;  %v7403_v44 = vpack.c.bf16 %v3583_v31, %v3576_v38  ;;  %v7599_v45 = vpack.c.bf16 %v3585_v37, %v3578_v35  ;;  %v3632_v38 = vld [vmem:[#allocation12 + $0x330] sm:$0xff]  ;;  %v3639_v31 = vld [vmem:[#allocation12 + $0x368] sm:$0xff]  ;;  %v3634_v35 = vld [vmem:[#allocation12 + $0x340] sm:$0xff] }
 0x5c4   :  { %4533 = vmatprep.mubr.f32.mxu1 %v7960_v4  ;;  %4817 = vmatprep.mubr.f32.mxu0 %v7960_v4  ;;  %v3641_v37 = vld [vmem:[#allocation12 + $0x378] sm:$0xff] }
 0x5c5   :  { %7390 = vmatprep.subr.bf16.mxu1 %v7389_v49  ;;  %7586 = vmatprep.subr.bf16.mxu0 %v7585_v51  ;;  %v3590_v49 = vld [vmem:[#allocation12 + $0x1e0] sm:$0xff]  ;;  %v3597_v51 = vld [vmem:[#allocation12 + $0x218] sm:$0xff] }
 0x5ca   :  { %5461 = vmatmul.mubr.msk.f32.vlgmr.msra.gmra.mrb[18].mxu1 %vm2387_vm5, %v8852_v9  ;;  %5462 = vmatmul.mubr.msk.f32.vlgmr.msra.gmra.mrb[20].mxu0 %vm2387_vm5, %v8852_v9 }
 0x5cb   :  { %7392 = vmatpush1.bf16.msra.mxu1 %v7391_v3  ;;  %7588 = vmatpush3.bf16.msra.mxu0 %v7587_v30  ;;  %v7407_v3 = vpack.c.bf16 %v3597_v51, %v3590_v49  ;;  %v7603_v30 = vpack.c.bf16 %v3599_v34, %v3592_v57  ;;  %v3646_v49 = vld [vmem:[#allocation12 + $0x3a0] sm:$0xff]  ;;  %v7421_v51 = vpack.c.bf16 %v3654_v41, %v3647_v40  ;;  %v3760_v57 = vld [vmem:[#allocation12 + $0x730] sm:$0xff]  ;;  %v3767_v34 = vld [vmem:[#allocation12 + $0x768] sm:$0xff] }
 0x5cc   :  { %4888 = vmatprep.mubr.f32.mxu1 %v8810_v50  ;;  %5172 = vmatprep.mubr.f32.mxu0 %v8810_v50  ;;  %v7597_v50 = vpack.c.bf16 %v3697_v27, %v3690_v26  ;;  %v3746_v26 = vld [vmem:[#allocation12 + $0x6c0] sm:$0xff]  ;;  %v3753_v27 = vld [vmem:[#allocation12 + $0x6f8] sm:$0xff]  ;;  %v3703_v40 = vld [vmem:[#allocation12 + $0x568] sm:$0xff] }
 0x5cd   :  { %7394 = vmatprep.subr.bf16.mxu1 %v7393_v16  ;;  %7590 = vmatprep.subr.bf16.mxu0 %v7589_v62  ;;  %v3613_v16 = vld [vmem:[#allocation12 + $0x298] sm:$0xff]  ;;  %v3619_v62 = vld [vmem:[#allocation12 + $0x2c8] sm:$0xff]  ;;  %v3710_v41 = vld [vmem:[#allocation12 + $0x5a0] sm:$0xff] }
 0x5cf   :  { %7396 = vmatpush1.bf16.msra.mxu1 %v7395_v19  ;;  %7592 = vmatpush3.bf16.msra.mxu0 %v7591_v56  ;;  %v7411_v19 = vpack.c.bf16 %v3611_v6, %v3604_v5  ;;  %v7607_v56 = vpack.c.bf16 %v3613_v16, %v3606_v7  ;;  %v3660_v5 = vld [vmem:[#allocation12 + $0x410] sm:$0xff]  ;;  %v3667_v6 = vld [vmem:[#allocation12 + $0x448] sm:$0xff]  ;;  %v3781_v7 = vld [vmem:[#allocation12 + $0x7d8] sm:$0xff] }
 0x5d0   :  { %7398 = vmatprep.subr.bf16.mxu1 %v7397_v60  ;;  %7594 = vmatprep.subr.bf16.mxu0 %v7593_v15  ;;  %v7413_v60 = vpack.c.bf16 %v3626_v18, %v3619_v62  ;;  %v7609_v15 = vpack.c.bf16 %v3739_v10, %v3732_v12  ;;  %v3675_v16 = vld [vmem:[#allocation12 + $0x488] sm:$0xff]  ;;  %v7621_v62 = vpack.c.bf16 %v3893_v1, %v3886_v2  ;;  %v3682_v18 = vld [vmem:[#allocation12 + $0x4c0] sm:$0xff]  ;;  %v3900_v12 = vld [vmem:[#allocation12 + $0xb90] sm:$0xff] }
 0x5d1   :  { %v3907_v10 = vld [vmem:[#allocation12 + $0xbc8] sm:$0xff]  ;;  %v3942_v2 = vld [vmem:[#allocation12 + $0xce0] sm:$0xff]  ;;  %v3949_v1 = vld [vmem:[#allocation12 + $0xd18] sm:$0xff] }
 0x5d3   :  { %7400 = vmatpush1.bf16.msra.mxu1 %v7399_v28  ;;  %7596 = vmatpush3.bf16.msra.mxu0 %v7595_v29  ;;  %v7415_v28 = vpack.c.bf16 %v3625_v22, %v3618_v48  ;;  %v7611_v29 = vpack.c.bf16 %v3627_v24, %v3620_v21  ;;  %v3674_v48 = vld [vmem:[#allocation12 + $0x480] sm:$0xff]  ;;  %v3681_v22 = vld [vmem:[#allocation12 + $0x4b8] sm:$0xff]  ;;  %v3788_v21 = vld [vmem:[#allocation12 + $0x810] sm:$0xff] }
 0x5d4   :  { %7402 = vmatprep.subr.bf16.mxu1 %v7401_v32  ;;  %7598 = vmatprep.subr.bf16.mxu0 %v7597_v50  ;;  %v7417_v32 = vpack.c.bf16 %v3640_v17, %v3633_v25  ;;  %v7613_v50 = vpack.c.bf16 %v3753_v27, %v3746_v26  ;;  %v3795_v24 = vld [vmem:[#allocation12 + $0x848] sm:$0xff]  ;;  %v3689_v25 = vld [vmem:[#allocation12 + $0x4f8] sm:$0xff]  ;;  %v3696_v17 = vld [vmem:[#allocation12 + $0x530] sm:$0xff] }
 0x5d5   :  { %v3914_v26 = vld [vmem:[#allocation12 + $0xc00] sm:$0xff]  ;;  %v3921_v27 = vld [vmem:[#allocation12 + $0xc38] sm:$0xff] }
 0x5d7   :  { %7404 = vmatpush1.bf16.msra.mxu1 %v7403_v44  ;;  %7600 = vmatpush3.bf16.msra.mxu0 %v7599_v45  ;;  %v7419_v44 = vpack.c.bf16 %v3639_v31, %v3632_v38  ;;  %v7615_v45 = vpack.c.bf16 %v3641_v37, %v3634_v35  ;;  %v3688_v38 = vld [vmem:[#allocation12 + $0x4f0] sm:$0xff]  ;;  %v3695_v31 = vld [vmem:[#allocation12 + $0x528] sm:$0xff]  ;;  %v3802_v35 = vld [vmem:[#allocation12 + $0x880] sm:$0xff] }
 0x5d8   :  { %7406 = vmatprep.subr.bf16.mxu1 %v7405_v53  ;;  %7602 = vmatprep.subr.bf16.mxu0 %v7601_v55  ;;  %v7617_v53 = vpack.c.bf16 %v3879_v43, %v3872_v42  ;;  %v3653_v55 = vld [vmem:[#allocation12 + $0x3d8] sm:$0xff]  ;;  %v3928_v42 = vld [vmem:[#allocation12 + $0xc70] sm:$0xff]  ;;  %v3935_v43 = vld [vmem:[#allocation12 + $0xca8] sm:$0xff] }
 0x5d9   :  { %v3809_v37 = vld [vmem:[#allocation12 + $0x8b8] sm:$0xff] }
 0x5db   :  { %7408 = vmatpush1.bf16.msra.mxu1 %v7407_v3  ;;  %7604 = vmatpush3.bf16.msra.mxu0 %v7603_v30  ;;  %v7423_v3 = vpack.c.bf16 %v3653_v55, %v3646_v49  ;;  %v7619_v30 = vpack.c.bf16 %v3767_v34, %v3760_v57  ;;  %v3702_v49 = vld [vmem:[#allocation12 + $0x560] sm:$0xff]  ;;  %v7633_v55 = vpack.c.bf16 %v3935_v43, %v3928_v42  ;;  %v3816_v57 = vld [vmem:[#allocation12 + $0x8f0] sm:$0xff]  ;;  %v3823_v34 = vld [vmem:[#allocation12 + $0x928] sm:$0xff] }
 0x5dc   :  { %7410 = vmatprep.subr.bf16.mxu1 %v7409_v11  ;;  %7606 = vmatprep.subr.bf16.mxu0 %v7605_v14  ;;  %v7425_v11 = vpack.c.bf16 %v3668_v63, %v3661_v0  ;;  %v3774_v14 = vld [vmem:[#allocation12 + $0x7a0] sm:$0xff]  ;;  %v3717_v0 = vld [vmem:[#allocation12 + $0x5d8] sm:$0xff]  ;;  %v3724_v63 = vld [vmem:[#allocation12 + $0x610] sm:$0xff] }
 0x5dd   :  { %v4096_v42 = vld [vmem:[#allocation12 + $0x11b0] sm:$0xff]  ;;  %v4103_v43 = vld [vmem:[#allocation12 + $0x11e8] sm:$0xff] }
 0x5df   :  { %7412 = vmatpush1.bf16.msra.mxu1 %v7411_v19  ;;  %7608 = vmatpush3.bf16.msra.mxu0 %v7607_v56  ;;  %v7427_v19 = vpack.c.bf16 %v3667_v6, %v3660_v5  ;;  %v7623_v56 = vpack.c.bf16 %v3781_v7, %v3774_v14  ;;  %v3716_v5 = vld [vmem:[#allocation12 + $0x5d0] sm:$0xff]  ;;  %v3723_v6 = vld [vmem:[#allocation12 + $0x608] sm:$0xff]  ;;  %v7637_v14 = vpack.c.bf16 %v3949_v1, %v3942_v2  ;;  %v3830_v7 = vld [vmem:[#allocation12 + $0x960] sm:$0xff] }
 0x5e0   :  { %7414 = vmatprep.subr.bf16.mxu1 %v7413_v60  ;;  %7610 = vmatprep.subr.bf16.mxu0 %v7609_v15  ;;  %v7429_v60 = vpack.c.bf16 %v3682_v18, %v3675_v16  ;;  %v7625_v15 = vpack.c.bf16 %v3907_v10, %v3900_v12  ;;  %v3837_v16 = vld [vmem:[#allocation12 + $0x998] sm:$0xff]  ;;  %v3738_v18 = vld [vmem:[#allocation12 + $0x680] sm:$0xff]  ;;  %v3956_v12 = vld [vmem:[#allocation12 + $0xd50] sm:$0xff] }
 0x5e1   :  { %v3963_v10 = vld [vmem:[#allocation12 + $0xd88] sm:$0xff]  ;;  %v4110_v2 = vld [vmem:[#allocation12 + $0x1220] sm:$0xff]  ;;  %v4117_v1 = vld [vmem:[#allocation12 + $0x1258] sm:$0xff] }
 0x5e3   :  { %7416 = vmatpush1.bf16.msra.mxu1 %v7415_v28  ;;  %7612 = vmatpush3.bf16.msra.mxu0 %v7611_v29  ;;  %v7431_v28 = vpack.c.bf16 %v3681_v22, %v3674_v48  ;;  %v7627_v29 = vpack.c.bf16 %v3795_v24, %v3788_v21  ;;  %v3730_v48 = vld [vmem:[#allocation12 + $0x640] sm:$0xff]  ;;  %v3737_v22 = vld [vmem:[#allocation12 + $0x678] sm:$0xff]  ;;  %v3844_v21 = vld [vmem:[#allocation12 + $0x9d0] sm:$0xff] }
 0x5e4   :  { %7418 = vmatprep.subr.bf16.mxu1 %v7417_v32  ;;  %7614 = vmatprep.subr.bf16.mxu0 %v7613_v50  ;;  %v7433_v32 = vpack.c.bf16 %v3696_v17, %v3689_v25  ;;  %v7629_v50 = vpack.c.bf16 %v3921_v27, %v3914_v26  ;;  %v3851_v24 = vld [vmem:[#allocation12 + $0xa08] sm:$0xff]  ;;  %v3745_v25 = vld [vmem:[#allocation12 + $0x6b8] sm:$0xff]  ;;  %v3752_v17 = vld [vmem:[#allocation12 + $0x6f0] sm:$0xff] }
 0x5e5   :  { %v3970_v26 = vld [vmem:[#allocation12 + $0xdc0] sm:$0xff]  ;;  %v3977_v27 = vld [vmem:[#allocation12 + $0xdf8] sm:$0xff] }
 0x5e7   :  { %7420 = vmatpush1.bf16.msra.mxu1 %v7419_v44  ;;  %7616 = vmatpush3.bf16.msra.mxu0 %v7615_v45  ;;  %v7435_v44 = vpack.c.bf16 %v3695_v31, %v3688_v38  ;;  %v7631_v45 = vpack.c.bf16 %v3809_v37, %v3802_v35  ;;  %v3744_v38 = vld [vmem:[#allocation12 + $0x6b0] sm:$0xff]  ;;  %v3751_v31 = vld [vmem:[#allocation12 + $0x6e8] sm:$0xff]  ;;  %v3858_v35 = vld [vmem:[#allocation12 + $0xa40] sm:$0xff] }
 0x5e8   :  { %7422 = vmatprep.subr.bf16.mxu1 %v7421_v51  ;;  %7618 = vmatprep.subr.bf16.mxu0 %v7617_v53  ;;  %v3709_v51 = vld [vmem:[#allocation12 + $0x598] sm:$0xff]  ;;  %v7437_v53 = vpack.c.bf16 %v3710_v41, %v3703_v40  ;;  %v3759_v40 = vld [vmem:[#allocation12 + $0x728] sm:$0xff]  ;;  %v3766_v41 = vld [vmem:[#allocation12 + $0x760] sm:$0xff] }
 0x5e9   :  { %v3865_v37 = vld [vmem:[#allocation12 + $0xa78] sm:$0xff] }
 0x5ea   :  { %5173 = vmatmul.mubr.f32.vlgmr.msra.gmra.mrb[22].mxu0 %v8812_v58 }
 0x5eb   :  { %7424 = vmatpush1.bf16.msra.mxu1 %v7423_v3  ;;  %7620 = vmatpush3.bf16.msra.mxu0 %v7619_v30  ;;  %v7439_v3 = vpack.c.bf16 %v3709_v51, %v3702_v49  ;;  %v7635_v30 = vpack.c.bf16 %v3823_v34, %v3816_v57  ;;  %v7453_v49 = vpack.c.bf16 %v3766_v41, %v3759_v40  ;;  %v3984_v57 = vld [vmem:[#allocation12 + $0xe30] sm:$0xff]  ;;  %v3991_v34 = vld [vmem:[#allocation12 + $0xe68] sm:$0xff] }
 0x5ec   :  { %5242 = vmatprep.mubr.f32.mxu0 %v8819_v46  ;;  %7426 = vmatprep.subr.bf16.mxu1 %v7425_v11  ;;  %v7441_v11 = vpack.c.bf16 %v3724_v63, %v3717_v0  ;;  %v7649_v51 = vpack.c.bf16 %v4103_v43, %v4096_v42  ;;  %v3773_v0 = vld [vmem:[#allocation12 + $0x798] sm:$0xff]  ;;  %v3780_v63 = vld [vmem:[#allocation12 + $0x7d0] sm:$0xff]  ;;  %v4159_v41 = vld [vmem:[#allocation12 + $0x13a8] sm:$0xff] }
 0x5ed   :  { %7622 = vmatprep.subr.bf16.mxu0 %v7621_v62  ;;  %v3731_v62 = vld [vmem:[#allocation12 + $0x648] sm:$0xff]  ;;  %v4152_v40 = vld [vmem:[#allocation12 + $0x1370] sm:$0xff] }
 0x5ef   :  { %7428 = vmatpush1.bf16.msra.mxu1 %v7427_v19  ;;  %7624 = vmatpush3.bf16.msra.mxu0 %v7623_v56  ;;  %v7443_v19 = vpack.c.bf16 %v3723_v6, %v3716_v5  ;;  %v7639_v56 = vpack.c.bf16 %v3837_v16, %v3830_v7  ;;  %v3772_v5 = vld [vmem:[#allocation12 + $0x790] sm:$0xff]  ;;  %v3779_v6 = vld [vmem:[#allocation12 + $0x7c8] sm:$0xff]  ;;  %v7653_v7 = vpack.c.bf16 %v4117_v1, %v4110_v2  ;;  %v4005_v16 = vld [vmem:[#allocation12 + $0xed8] sm:$0xff] }
 0x5f0   :  { %7430 = vmatprep.subr.bf16.mxu1 %v7429_v60  ;;  %7626 = vmatprep.subr.bf16.mxu0 %v7625_v15  ;;  %v7445_v60 = vpack.c.bf16 %v3738_v18, %v3731_v62  ;;  %v7641_v15 = vpack.c.bf16 %v3963_v10, %v3956_v12  ;;  %v3787_v62 = vld [vmem:[#allocation12 + $0x808] sm:$0xff]  ;;  %v3794_v18 = vld [vmem:[#allocation12 + $0x840] sm:$0xff]  ;;  %v4124_v12 = vld [vmem:[#allocation12 + $0x1290] sm:$0xff] }
 0x5f1   :  { %v4131_v10 = vld [vmem:[#allocation12 + $0x12c8] sm:$0xff] }
 0x5f3   :  { %7432 = vmatpush1.bf16.msra.mxu1 %v7431_v28  ;;  %7628 = vmatpush3.bf16.msra.mxu0 %v7627_v29  ;;  %v7447_v28 = vpack.c.bf16 %v3737_v22, %v3730_v48  ;;  %v7643_v29 = vpack.c.bf16 %v3851_v24, %v3844_v21  ;;  %v7461_v48 = vpack.c.bf16 %v3794_v18, %v3787_v62  ;;  %v3786_v22 = vld [vmem:[#allocation12 + $0x800] sm:$0xff]  ;;  %v3801_v24 = vld [vmem:[#allocation12 + $0x878] sm:$0xff]  ;;  %v4180_v62 = vld [vmem:[#allocation12 + $0x1450] sm:$0xff] }
 0x5f4   :  { %7434 = vmatprep.subr.bf16.mxu1 %v7433_v32  ;;  %7630 = vmatprep.subr.bf16.mxu0 %v7629_v50  ;;  %v7449_v32 = vpack.c.bf16 %v3752_v17, %v3745_v25  ;;  %v7645_v50 = vpack.c.bf16 %v3977_v27, %v3970_v26  ;;  %v7657_v21 = vpack.c.bf16 %v4131_v10, %v4124_v12  ;;  %v3808_v25 = vld [vmem:[#allocation12 + $0x8b0] sm:$0xff]  ;;  %v4138_v17 = vld [vmem:[#allocation12 + $0x1300] sm:$0xff]  ;;  %v4145_v26 = vld [vmem:[#allocation12 + $0x1338] sm:$0xff] }
 0x5f5   :  { %v4187_v18 = vld [vmem:[#allocation12 + $0x1488] sm:$0xff] }
 0x5f7   :  { %7436 = vmatpush1.bf16.msra.mxu1 %v7435_v44  ;;  %7632 = vmatpush3.bf16.msra.mxu0 %v7631_v45  ;;  %v7451_v44 = vpack.c.bf16 %v3751_v31, %v3744_v38  ;;  %v7647_v45 = vpack.c.bf16 %v3865_v37, %v3858_v35  ;;  %v3807_v38 = vld [vmem:[#allocation12 + $0x8a8] sm:$0xff]  ;;  %v4026_v31 = vld [vmem:[#allocation12 + $0xf80] sm:$0xff] }
 0x5f8   :  { %7438 = vmatprep.subr.bf16.mxu1 %v7437_v53  ;;  %7634 = vmatprep.subr.bf16.mxu0 %v7633_v55  ;;  %v3758_v53 = vld [vmem:[#allocation12 + $0x720] sm:$0xff]  ;;  %v3765_v55 = vld [vmem:[#allocation12 + $0x758] sm:$0xff]  ;;  %v3815_v35 = vld [vmem:[#allocation12 + $0x8e8] sm:$0xff] }
 0x5f9   :  { %v3822_v37 = vld [vmem:[#allocation12 + $0x920] sm:$0xff] }
 0x5fb   :  { %7440 = vmatpush1.bf16.msra.mxu1 %v7439_v3  ;;  %7636 = vmatpush3.bf16.msra.mxu0 %v7635_v30  ;;  %v7455_v3 = vpack.c.bf16 %v3765_v55, %v3758_v53  ;;  %v7651_v30 = vpack.c.bf16 %v3991_v34, %v3984_v57  ;;  %v7665_v53 = vpack.c.bf16 %v4159_v41, %v4152_v40  ;;  %v4047_v55 = vld [vmem:[#allocation12 + $0x1028] sm:$0xff]  ;;  %v3829_v57 = vld [vmem:[#allocation12 + $0x958] sm:$0xff]  ;;  %v3836_v34 = vld [vmem:[#allocation12 + $0x990] sm:$0xff] }
 0x5fc   :  { %7442 = vmatprep.subr.bf16.mxu1 %v7441_v11  ;;  %7638 = vmatprep.subr.bf16.mxu0 %v7637_v14  ;;  %v3998_v11 = vld [vmem:[#allocation12 + $0xea0] sm:$0xff]  ;;  %v7457_v14 = vpack.c.bf16 %v3780_v63, %v3773_v0  ;;  %v4173_v63 = vld [vmem:[#allocation12 + $0x1418] sm:$0xff] }
 0x5fd   :  { %v4166_v0 = vld [vmem:[#allocation12 + $0x13e0] sm:$0xff] }
 0x5fe   :  { %v3870_v41 = vld [vmem:[#allocation12 + $0xaa0] sm:$0xff] }
 0x5ff   :  { %7444 = vmatpush1.bf16.msra.mxu1 %v7443_v19  ;;  %7640 = vmatpush3.bf16.msra.mxu0 %v7639_v56  ;;  %v7459_v19 = vpack.c.bf16 %v3779_v6, %v3772_v5  ;;  %v7655_v56 = vpack.c.bf16 %v4005_v16, %v3998_v11  ;;  %v3835_v5 = vld [vmem:[#allocation12 + $0x988] sm:$0xff]  ;;  %v4054_v6 = vld [vmem:[#allocation12 + $0x1060] sm:$0xff]  ;;  %v7669_v11 = vpack.c.bf16 %v4173_v63, %v4166_v0 }
 0x600   :  { %7446 = vmatprep.subr.bf16.mxu1 %v7445_v60  ;;  %7642 = vmatprep.subr.bf16.mxu0 %v7641_v15  ;;  %v3793_v60 = vld [vmem:[#allocation12 + $0x838] sm:$0xff]  ;;  %v4012_v15 = vld [vmem:[#allocation12 + $0xf10] sm:$0xff]  ;;  %v3850_v16 = vld [vmem:[#allocation12 + $0xa00] sm:$0xff] }
 0x601   :  { %v7463_v27 = vpack.c.bf16 %v3793_v60, %v3786_v22  ;;  %v4068_v22 = vld [vmem:[#allocation12 + $0x10d0] sm:$0xff]  ;;  %v7673_v60 = vpack.c.bf16 %v4187_v18, %v4180_v62  ;;  %v3899_v0 = vld [vmem:[#allocation12 + $0xb88] sm:$0xff]  ;;  %v3906_v63 = vld [vmem:[#allocation12 + $0xbc0] sm:$0xff] }
 0x602   :  { %v3934_v62 = vld [vmem:[#allocation12 + $0xca0] sm:$0xff] }
 0x603   :  { %7448 = vmatpush1.bf16.msra.mxu1 %v7447_v28  ;;  %7644 = vmatpush3.bf16.msra.mxu0 %v7643_v29  ;;  %v7465_v28 = vpack.c.bf16 %v3808_v25, %v3801_v24  ;;  %v3800_v29 = vld [vmem:[#allocation12 + $0x870] sm:$0xff]  ;;  %v4194_v24 = vld [vmem:[#allocation12 + $0x14c0] sm:$0xff]  ;;  %v4201_v25 = vld [vmem:[#allocation12 + $0x14f8] sm:$0xff] }
 0x604   :  { %7450 = vmatprep.subr.bf16.mxu1 %v7449_v32  ;;  %7646 = vmatprep.subr.bf16.mxu0 %v7645_v50  ;;  %v7661_v32 = vpack.c.bf16 %v4145_v26, %v4138_v17  ;;  %v4033_v50 = vld [vmem:[#allocation12 + $0xfb8] sm:$0xff]  ;;  %v7467_v42 = vpack.c.bf16 %v3807_v38, %v3800_v29  ;;  %v4082_v29 = vld [vmem:[#allocation12 + $0x1140] sm:$0xff]  ;;  %v7677_v38 = vpack.c.bf16 %v4201_v25, %v4194_v24 }
 0x605   :  { %v7663_v43 = vpack.c.bf16 %v4033_v50, %v4026_v31  ;;  %v4089_v31 = vld [vmem:[#allocation12 + $0x1178] sm:$0xff]  ;;  %v3878_v50 = vld [vmem:[#allocation12 + $0xae0] sm:$0xff] }
 0x606   :  { %v3962_v24 = vld [vmem:[#allocation12 + $0xd80] sm:$0xff] }
 0x607   :  { %7452 = vmatpush1.bf16.msra.mxu1 %v7451_v44  ;;  %7648 = vmatpush3.bf16.msra.mxu0 %v7647_v45  ;;  %v7469_v44 = vpack.c.bf16 %v3822_v37, %v3815_v35  ;;  %v3814_v45 = vld [vmem:[#allocation12 + $0x8e0] sm:$0xff]  ;;  %v7679_v37 = vpack.c.bf16 %v4089_v31, %v4082_v29  ;;  %v3968_v31 = vld [vmem:[#allocation12 + $0xdb0] sm:$0xff] }
 0x608   :  { %7454 = vmatprep.subr.bf16.mxu1 %v7453_v49  ;;  %7650 = vmatprep.subr.bf16.mxu0 %v7649_v51  ;;  %v3821_v49 = vld [vmem:[#allocation12 + $0x918] sm:$0xff]  ;;  %v4040_v51 = vld [vmem:[#allocation12 + $0xff0] sm:$0xff] }
 0x609   :  { %v7471_v2 = vpack.c.bf16 %v3821_v49, %v3814_v45  ;;  %v7667_v1 = vpack.c.bf16 %v4047_v55, %v4040_v51  ;;  %v3885_v45 = vld [vmem:[#allocation12 + $0xb18] sm:$0xff]  ;;  %v3892_v49 = vld [vmem:[#allocation12 + $0xb50] sm:$0xff] }
 0x60a   :  { %4889 = vmatmul.mubr.f32.vlgmr.msra.gmra.mrb[20].mxu1 %v8812_v58  ;;  %5243 = vmatmul.mubr.f32.vlgmr.msra.gmra.mrb[24].mxu0 %v8832_v8  ;;  %v4019_v58 = vld [vmem:[#allocation12 + $0xf48] sm:$0xff]  ;;  %v3884_v55 = vld [vmem:[#allocation12 + $0xb10] sm:$0xff] }
 0x60b   :  { %7456 = vmatpush1.bf16.msra.mxu1 %v7455_v3  ;;  %4959 = vmatprep.mubr.f32.mxu1 %v8819_v46  ;;  %v7659_v46 = vpack.c.bf16 %v4019_v58, %v4012_v15  ;;  %v7473_v3 = vpack.c.bf16 %v3836_v34, %v3829_v57  ;;  %v4075_v15 = vld [vmem:[#allocation12 + $0x1108] sm:$0xff]  ;;  %v3864_v58 = vld [vmem:[#allocation12 + $0xa70] sm:$0xff]  ;;  %v7489_v34 = vpack.c.bf16 %v3892_v49, %v3885_v45 }
 0x60c   :  { %7652 = vmatpush3.bf16.msra.mxu0 %v7651_v30  ;;  %5312 = vmatprep.mubr.f32.mxu0 %v8841_v23  ;;  %v3828_v30 = vld [vmem:[#allocation12 + $0x950] sm:$0xff]  ;;  %v7675_v26 = vpack.c.bf16 %v4075_v15, %v4068_v22  ;;  %v3891_v57 = vld [vmem:[#allocation12 + $0xb48] sm:$0xff] }
 0x60d   :  { %7458 = vmatprep.subr.bf16.mxu1 %v7457_v14  ;;  %7654 = vmatprep.subr.bf16.mxu0 %v7653_v7  ;;  %v4061_v14 = vld [vmem:[#allocation12 + $0x1098] sm:$0xff]  ;;  %v3843_v7 = vld [vmem:[#allocation12 + $0x9c8] sm:$0xff]  ;;  %v7475_v12 = vpack.c.bf16 %v3835_v5, %v3828_v30  ;;  %v3940_v15 = vld [vmem:[#allocation12 + $0xcd0] sm:$0xff] }
 0x60e   :  { %v7671_v10 = vpack.c.bf16 %v4061_v14, %v4054_v6  ;;  %v3905_v30 = vld [vmem:[#allocation12 + $0xbb8] sm:$0xff]  ;;  %v3920_v6 = vld [vmem:[#allocation12 + $0xc30] sm:$0xff] }
 0x60f   :  { %7460 = vmatpush1.bf16.msra.mxu1 %v7459_v19  ;;  %v7477_v19 = vpack.c.bf16 %v3850_v16, %v3843_v7  ;;  %v3913_v5 = vld [vmem:[#allocation12 + $0xbf8] sm:$0xff]  ;;  %v3912_v14 = vld [vmem:[#allocation12 + $0xbf0] sm:$0xff]  ;;  %v3919_v7 = vld [vmem:[#allocation12 + $0xc28] sm:$0xff] }
 0x610   :  { %7656 = vmatpush3.bf16.msra.mxu0 %v7655_v56  ;;  %7462 = vmatprep.subr.bf16.mxu1 %v7461_v48  ;;  %v3842_v56 = vld [vmem:[#allocation12 + $0x9c0] sm:$0xff]  ;;  %v3849_v48 = vld [vmem:[#allocation12 + $0x9f8] sm:$0xff]  ;;  %v3927_v16 = vld [vmem:[#allocation12 + $0xc68] sm:$0xff]  ;;  %v7499_v18 = vpack.c.bf16 %v3919_v7, %v3912_v14 }
 0x611   :  { %7658 = vmatprep.subr.bf16.mxu0 %v7657_v21  ;;  %v3857_v21 = vld [vmem:[#allocation12 + $0xa38] sm:$0xff]  ;;  %v7479_v17 = vpack.c.bf16 %v3849_v48, %v3842_v56  ;;  %v3948_v48 = vld [vmem:[#allocation12 + $0xd10] sm:$0xff]  ;;  %v4046_v14 = vld [vmem:[#allocation12 + $0x1020] sm:$0xff] }
 0x612   :  { %v3941_v56 = vld [vmem:[#allocation12 + $0xcd8] sm:$0xff] }
 0x613   :  { %7464 = vmatpush1.bf16.msra.mxu1 %v7463_v27  ;;  %v7481_v27 = vpack.c.bf16 %v3864_v58, %v3857_v21  ;;  %v3947_v21 = vld [vmem:[#allocation12 + $0xd08] sm:$0xff] }
 0x614   :  { %7660 = vmatpush3.bf16.msra.mxu0 %v7659_v46  ;;  %7466 = vmatprep.subr.bf16.mxu1 %v7465_v28  ;;  %v3856_v46 = vld [vmem:[#allocation12 + $0xa30] sm:$0xff]  ;;  %v3863_v28 = vld [vmem:[#allocation12 + $0xa68] sm:$0xff]  ;;  %v7507_v25 = vpack.c.bf16 %v3947_v21, %v3940_v15  ;;  %v4066_v21 = vld [vmem:[#allocation12 + $0x10c0] sm:$0xff] }
 0x615   :  { %7662 = vmatprep.subr.bf16.mxu0 %v7661_v32  ;;  %v3871_v32 = vld [vmem:[#allocation12 + $0xaa8] sm:$0xff]  ;;  %v7483_v35 = vpack.c.bf16 %v3863_v28, %v3856_v46  ;;  %v3969_v46 = vld [vmem:[#allocation12 + $0xdb8] sm:$0xff]  ;;  %v3976_v28 = vld [vmem:[#allocation12 + $0xdf0] sm:$0xff] }
 0x616   :  { %v7485_v40 = vpack.c.bf16 %v3878_v50, %v3871_v32  ;;  %v3955_v58 = vld [vmem:[#allocation12 + $0xd48] sm:$0xff] }
 0x617   :  { %7468 = vmatpush1.bf16.msra.mxu1 %v7467_v42  ;;  %v3877_v42 = vld [vmem:[#allocation12 + $0xad8] sm:$0xff]  ;;  %v3975_v32 = vld [vmem:[#allocation12 + $0xde8] sm:$0xff] }
 0x618   :  { %7664 = vmatpush3.bf16.msra.mxu0 %v7663_v43  ;;  %7470 = vmatprep.subr.bf16.mxu1 %v7469_v44  ;;  %v4208_v43 = vld [vmem:[#allocation12 + $0x1530] sm:$0xff]  ;;  %v4215_v44 = vld [vmem:[#allocation12 + $0x1568] sm:$0xff]  ;;  %v7487_v51 = vpack.c.bf16 %v3877_v42, %v3870_v41  ;;  %v3982_v41 = vld [vmem:[#allocation12 + $0xe20] sm:$0xff] }
 0x619   :  { %7666 = vmatprep.subr.bf16.mxu0 %v7665_v53  ;;  %v7682_v53 = vpack.c.bf16 %v4215_v44, %v4208_v43  ;;  %v3983_v50 = vld [vmem:[#allocation12 + $0xe28] sm:$0xff]  ;;  %v3989_v42 = vld [vmem:[#allocation12 + $0xe58] sm:$0xff]  ;;  %v4004_v44 = vld [vmem:[#allocation12 + $0xed0] sm:$0xff] }
 0x61a   :  { %v3997_v43 = vld [vmem:[#allocation12 + $0xe98] sm:$0xff]  ;;  %v7519_v45 = vpack.c.bf16 %v3989_v42, %v3982_v41  ;;  %v4108_v42 = vld [vmem:[#allocation12 + $0x1210] sm:$0xff] }
 0x61b   :  { %7472 = vmatpush1.bf16.msra.mxu1 %v7471_v2  ;;  %v7491_v2 = vpack.c.bf16 %v3891_v57, %v3884_v55  ;;  %v7521_v49 = vpack.c.bf16 %v4004_v44, %v3997_v43  ;;  %v4011_v55 = vld [vmem:[#allocation12 + $0xf08] sm:$0xff]  ;;  %v4018_v57 = vld [vmem:[#allocation12 + $0xf40] sm:$0xff] }
 0x61c   :  { %7668 = vmatpush3.bf16.msra.mxu0 %v7667_v1  ;;  %7474 = vmatprep.subr.bf16.mxu1 %v7473_v3  ;;  %v7493_v1 = vpack.c.bf16 %v3906_v63, %v3899_v0  ;;  %v3898_v3 = vld [vmem:[#allocation12 + $0xb80] sm:$0xff]  ;;  %v7525_v0 = vpack.c.bf16 %v4018_v57, %v4011_v55  ;;  %v4115_v43 = vld [vmem:[#allocation12 + $0x1248] sm:$0xff]  ;;  %v4129_v55 = vld [vmem:[#allocation12 + $0x12b8] sm:$0xff] }
 0x61d   :  { %7670 = vmatprep.subr.bf16.mxu0 %v7669_v11  ;;  %v7497_v11 = vpack.c.bf16 %v3920_v6, %v3913_v5  ;;  %v4010_v63 = vld [vmem:[#allocation12 + $0xf00] sm:$0xff]  ;;  %v4024_v6 = vld [vmem:[#allocation12 + $0xf70] sm:$0xff]  ;;  %v4123_v44 = vld [vmem:[#allocation12 + $0x1288] sm:$0xff] }
 0x61e   :  { %v4137_v57 = vld [vmem:[#allocation12 + $0x12f8] sm:$0xff] }
 0x61f   :  { %7476 = vmatpush1.bf16.msra.mxu1 %v7475_v12  ;;  %v7501_v12 = vpack.c.bf16 %v3934_v62, %v3927_v16  ;;  %v4045_v16 = vld [vmem:[#allocation12 + $0x1018] sm:$0xff] }
 0x620   :  { %7672 = vmatpush3.bf16.msra.mxu0 %v7671_v10  ;;  %7478 = vmatprep.subr.bf16.mxu1 %v7477_v19  ;;  %v3926_v10 = vld [vmem:[#allocation12 + $0xc60] sm:$0xff]  ;;  %v3933_v19 = vld [vmem:[#allocation12 + $0xc98] sm:$0xff] }
 0x621   :  { %7674 = vmatprep.subr.bf16.mxu0 %v7673_v60  ;;  %v7503_v22 = vpack.c.bf16 %v3933_v19, %v3926_v10  ;;  %v7505_v60 = vpack.c.bf16 %v3948_v48, %v3941_v56  ;;  %v4053_v62 = vld [vmem:[#allocation12 + $0x1058] sm:$0xff]  ;;  %v4052_v19 = vld [vmem:[#allocation12 + $0x1050] sm:$0xff]  ;;  %v4059_v56 = vld [vmem:[#allocation12 + $0x1088] sm:$0xff] }
 0x622   :  { %v4067_v48 = vld [vmem:[#allocation12 + $0x10c8] sm:$0xff] }
 0x623   :  { %7480 = vmatpush1.bf16.msra.mxu1 %v7479_v17  ;;  %v7509_v17 = vpack.c.bf16 %v3962_v24, %v3955_v58  ;;  %v4073_v58 = vld [vmem:[#allocation12 + $0x10f8] sm:$0xff] }
 0x624   :  { %7676 = vmatpush3.bf16.msra.mxu0 %v7675_v26  ;;  %7482 = vmatprep.subr.bf16.mxu1 %v7481_v27  ;;  %v3954_v26 = vld [vmem:[#allocation12 + $0xd40] sm:$0xff]  ;;  %v3961_v27 = vld [vmem:[#allocation12 + $0xd78] sm:$0xff] }
 0x625   :  { %7678 = vmatprep.subr.bf16.mxu0 %v7677_v38  ;;  %v7511_v29 = vpack.c.bf16 %v3961_v27, %v3954_v26  ;;  %v7513_v38 = vpack.c.bf16 %v3976_v28, %v3969_v46  ;;  %v4081_v24 = vld [vmem:[#allocation12 + $0x1138] sm:$0xff]  ;;  %v4080_v27 = vld [vmem:[#allocation12 + $0x1130] sm:$0xff]  ;;  %v4087_v46 = vld [vmem:[#allocation12 + $0x1168] sm:$0xff] }
 0x626   :  { %v4095_v28 = vld [vmem:[#allocation12 + $0x11a8] sm:$0xff] }
 0x627   :  { %7484 = vmatpush1.bf16.msra.mxu1 %v7483_v35  ;;  %v3990_v35 = vld [vmem:[#allocation12 + $0xe60] sm:$0xff] }
 0x628   :  { %7680 = vmatpush3.bf16.msra.mxu0 %v7679_v37  ;;  %7486 = vmatprep.subr.bf16.mxu1 %v7485_v40  ;;  %v7515_v37 = vpack.c.bf16 %v3975_v32, %v3968_v31  ;;  %v7517_v40 = vpack.c.bf16 %v3990_v35, %v3983_v50  ;;  %v4094_v32 = vld [vmem:[#allocation12 + $0x11a0] sm:$0xff]  ;;  %v4101_v50 = vld [vmem:[#allocation12 + $0x11d8] sm:$0xff] }
 0x629   :  { %7681 = vmatprep.subr.bf16.mxu0 %v7959_v59  ;;  %v7495_v59 = vpack.c.bf16 %v3905_v30, %v3898_v3  ;;  %v4032_v3 = vld [vmem:[#allocation12 + $0xfb0] sm:$0xff]  ;;  %v4109_v35 = vld [vmem:[#allocation12 + $0x1218] sm:$0xff] }
 0x62b   :  { %5313 = vmatmul.mubr.f32.vlgmr.msra.gmra.mrb[26].mxu0 %v8843_v47  ;;  %7488 = vmatpush1.bf16.msra.mxu1 %v7487_v51  ;;  %v3996_v51 = vld [vmem:[#allocation12 + $0xe90] sm:$0xff] }
 0x62c   :  { %7683 = vmatpush3.bf16.msra.mxu0 %v7682_v53  ;;  %5888 = vmatprep.mubr.msk.f32.mxu0 %vm7961_vm3, %v7960_v4  ;;  %v4003_v53 = vld [vmem:[#allocation12 + $0xec8] sm:$0xff] }
 0x62d   :  { %7490 = vmatprep.subr.bf16.mxu1 %v7489_v34  ;;  %v7523_v34 = vpack.c.bf16 %v4003_v53, %v3996_v51  ;;  %v4122_v53 = vld [vmem:[#allocation12 + $0x1280] sm:$0xff] }
 0x62f   :  { %5889 = vmatmul.mubr.msk.f32.vlgmr.msra.gmra.mrb[28].mxu0 %vm2387_vm5, %v8852_v9  ;;  %7492 = vmatpush1.bf16.msra.mxu1 %v7491_v2  ;;  %v4017_v2 = vld [vmem:[#allocation12 + $0xf38] sm:$0xff] }
 0x630   :  { %7494 = vmatprep.subr.bf16.mxu1 %v7493_v1  ;;  %v4025_v1 = vld [vmem:[#allocation12 + $0xf78] sm:$0xff]  ;;  %v7527_v30 = vpack.c.bf16 %v4017_v2, %v4010_v63  ;;  %v4136_v2 = vld [vmem:[#allocation12 + $0x12f0] sm:$0xff] }
 0x631   :  { %v7529_v5 = vpack.c.bf16 %v4032_v3, %v4025_v1  ;;  %v4143_v1 = vld [vmem:[#allocation12 + $0x1328] sm:$0xff] }
 0x632   :  { %v4151_v3 = vld [vmem:[#allocation12 + $0x1368] sm:$0xff] }
 0x633   :  { %7496 = vmatpush1.bf16.msra.mxu1 %v7495_v59  ;;  %v4031_v59 = vld [vmem:[#allocation12 + $0xfa8] sm:$0xff] }
 0x634   :  { %7498 = vmatprep.subr.bf16.mxu1 %v7497_v11  ;;  %v4039_v11 = vld [vmem:[#allocation12 + $0xfe8] sm:$0xff] }
 0x635   :  { %v7533_v7 = vpack.c.bf16 %v4046_v14, %v4039_v11  ;;  %v4157_v11 = vld [vmem:[#allocation12 + $0x1398] sm:$0xff] }
 0x636   :  { %v4165_v14 = vld [vmem:[#allocation12 + $0x13d8] sm:$0xff] }
 0x637   :  { %7500 = vmatpush1.bf16.msra.mxu1 %v7499_v18  ;;  %v4060_v18 = vld [vmem:[#allocation12 + $0x1090] sm:$0xff] }
 0x638   :  { %7502 = vmatprep.subr.bf16.mxu1 %v7501_v12  ;;  %v7537_v10 = vpack.c.bf16 %v4060_v18, %v4053_v62  ;;  %v4171_v62 = vld [vmem:[#allocation12 + $0x1408] sm:$0xff] }
 0x639   :  { %v4179_v18 = vld [vmem:[#allocation12 + $0x1448] sm:$0xff] }
 0x63b   :  { %7504 = vmatpush1.bf16.msra.mxu1 %v7503_v22  ;;  %v4074_v22 = vld [vmem:[#allocation12 + $0x1100] sm:$0xff] }
 0x63c   :  { %7506 = vmatprep.subr.bf16.mxu1 %v7505_v60  ;;  %v7539_v60 = vpack.c.bf16 %v4059_v56, %v4052_v19  ;;  %v7541_v15 = vpack.c.bf16 %v4074_v22, %v4067_v48  ;;  %v4178_v56 = vld [vmem:[#allocation12 + $0x1440] sm:$0xff]  ;;  %v4185_v48 = vld [vmem:[#allocation12 + $0x1478] sm:$0xff] }
 0x63d   :  { %v4193_v22 = vld [vmem:[#allocation12 + $0x14b8] sm:$0xff] }
 0x63f   :  { %7508 = vmatpush1.bf16.msra.mxu1 %v7507_v25  ;;  %v4088_v25 = vld [vmem:[#allocation12 + $0x1170] sm:$0xff] }
 0x640   :  { %7510 = vmatprep.subr.bf16.mxu1 %v7509_v17  ;;  %v7543_v17 = vpack.c.bf16 %v4073_v58, %v4066_v21  ;;  %v7545_v26 = vpack.c.bf16 %v4088_v25, %v4081_v24  ;;  %v4192_v58 = vld [vmem:[#allocation12 + $0x14b0] sm:$0xff]  ;;  %v4199_v24 = vld [vmem:[#allocation12 + $0x14e8] sm:$0xff] }
 0x641   :  { %v4207_v25 = vld [vmem:[#allocation12 + $0x1528] sm:$0xff] }
 0x643   :  { %7512 = vmatpush1.bf16.msra.mxu1 %v7511_v29  ;;  %v4102_v29 = vld [vmem:[#allocation12 + $0x11e0] sm:$0xff] }
 0x644   :  { %7514 = vmatprep.subr.bf16.mxu1 %v7513_v38  ;;  %v7547_v38 = vpack.c.bf16 %v4087_v46, %v4080_v27  ;;  %v7549_v31 = vpack.c.bf16 %v4102_v29, %v4095_v28  ;;  %v4206_v46 = vld [vmem:[#allocation12 + $0x1520] sm:$0xff]  ;;  %v4213_v28 = vld [vmem:[#allocation12 + $0x1558] sm:$0xff] }
 0x645   :  { %v7583_v29 = vpack.c.bf16 %v4213_v28, %v4206_v46 }
 0x647   :  { %7516 = vmatpush1.bf16.msra.mxu1 %v7515_v37  ;;  %v4116_v37 = vld [vmem:[#allocation12 + $0x1250] sm:$0xff] }
 0x648   :  { %7518 = vmatprep.subr.bf16.mxu1 %v7517_v40  ;;  %v7551_v40 = vpack.c.bf16 %v4101_v50, %v4094_v32  ;;  %v7553_v41 = vpack.c.bf16 %v4116_v37, %v4109_v35 }
 0x64a   :  { %4960 = vmatmul.mubr.f32.vlgmr.msra.gmra.mrb[20].mxu1 %v8832_v8  ;;  %v7531_v8 = vpack.c.bf16 %v4031_v59, %v4024_v6  ;;  %v4150_v59 = vld [vmem:[#allocation12 + $0x1360] sm:$0xff] }
 0x64b   :  { %7520 = vmatpush1.bf16.msra.mxu1 %v7519_v45  ;;  %5030 = vmatprep.mubr.f32.mxu1 %v8841_v23  ;;  %v4038_v23 = vld [vmem:[#allocation12 + $0xfe0] sm:$0xff] }
 0x64c   :  { %7522 = vmatprep.subr.bf16.mxu1 %v7521_v49  ;;  %v7535_v12 = vpack.c.bf16 %v4045_v16, %v4038_v23  ;;  %v4130_v45 = vld [vmem:[#allocation12 + $0x12c0] sm:$0xff]  ;;  %v7555_v49 = vpack.c.bf16 %v4115_v43, %v4108_v42  ;;  %v4164_v16 = vld [vmem:[#allocation12 + $0x13d0] sm:$0xff] }
 0x64d   :  { %v7557_v51 = vpack.c.bf16 %v4130_v45, %v4123_v44 }
 0x64f   :  { %7524 = vmatpush1.bf16.msra.mxu1 %v7523_v34  ;;  %v4144_v34 = vld [vmem:[#allocation12 + $0x1330] sm:$0xff] }
 0x650   :  { %7526 = vmatprep.subr.bf16.mxu1 %v7525_v0  ;;  %v7559_v0 = vpack.c.bf16 %v4129_v55, %v4122_v53  ;;  %v7561_v63 = vpack.c.bf16 %v4144_v34, %v4137_v57 }
 0x653   :  { %7528 = vmatpush1.bf16.msra.mxu1 %v7527_v30  ;;  %v4158_v30 = vld [vmem:[#allocation12 + $0x13a0] sm:$0xff] }
 0x654   :  { %7530 = vmatprep.subr.bf16.mxu1 %v7529_v5  ;;  %v7563_v5 = vpack.c.bf16 %v4143_v1, %v4136_v2  ;;  %v7565_v6 = vpack.c.bf16 %v4158_v30, %v4151_v3 }
 0x657   :  { %7532 = vmatpush1.bf16.msra.mxu1 %v7531_v8  ;;  %v4172_v8 = vld [vmem:[#allocation12 + $0x1410] sm:$0xff] }
 0x658   :  { %7534 = vmatprep.subr.bf16.mxu1 %v7533_v7  ;;  %v7567_v7 = vpack.c.bf16 %v4157_v11, %v4150_v59  ;;  %v7569_v23 = vpack.c.bf16 %v4172_v8, %v4165_v14 }
 0x65b   :  { %7536 = vmatpush1.bf16.msra.mxu1 %v7535_v12  ;;  %v4186_v12 = vld [vmem:[#allocation12 + $0x1480] sm:$0xff] }
 0x65c   :  { %7538 = vmatprep.subr.bf16.mxu1 %v7537_v10  ;;  %v7571_v10 = vpack.c.bf16 %v4171_v62, %v4164_v16  ;;  %v7573_v19 = vpack.c.bf16 %v4186_v12, %v4179_v18 }
 0x65f   :  { %7540 = vmatpush1.bf16.msra.mxu1 %v7539_v60  ;;  %v4200_v60 = vld [vmem:[#allocation12 + $0x14f0] sm:$0xff] }
 0x660   :  { %7542 = vmatprep.subr.bf16.mxu1 %v7541_v15  ;;  %v7575_v15 = vpack.c.bf16 %v4185_v48, %v4178_v56  ;;  %v7577_v21 = vpack.c.bf16 %v4200_v60, %v4193_v22 }
 0x663   :  { %7544 = vmatpush1.bf16.msra.mxu1 %v7543_v17  ;;  %v4214_v17 = vld [vmem:[#allocation12 + $0x1560] sm:$0xff] }
 0x664   :  { %7546 = vmatprep.subr.bf16.mxu1 %v7545_v26  ;;  %v7579_v26 = vpack.c.bf16 %v4199_v24, %v4192_v58  ;;  %v7581_v27 = vpack.c.bf16 %v4214_v17, %v4207_v25 }
 0x667   :  { %7548 = vmatpush1.bf16.msra.mxu1 %v7547_v38  ;;  %v4216_v38 = vld [vmem:[#allocation13] sm:$0x7f] }
 0x668   :  { %7550 = vmatprep.subr.bf16.mxu1 %v7549_v31  ;;  %v4221_v31 = vrot.slane %v4216_v38, %v8675_v52  ;;  %v4229_v32 = vrot.slane %v4216_v38, %v8693_v20  ;;  %v4225_v50 = vrot.slane %v4216_v38, %v8678_v54  ;;  %v4233_v35 = vrot.slane %v4216_v38, %v8718_v39 }
 0x669   :  { %v4245_v53 = vrot.slane %v4216_v38, %v8741_v33  ;;  %v4237_v11 = vrot.slane %v4216_v38, %v8766_v36  ;;  %v4241_v14 = vrot.slane %v4216_v38, %v8750_v61 }
 0x66b   :  { %7552 = vmatpush1.bf16.msra.mxu1 %v7551_v40 }
 0x66c   :  { %7554 = vmatprep.subr.bf16.mxu1 %v7553_v41 }
 0x66f   :  { %7556 = vmatpush1.bf16.msra.mxu1 %v7555_v49 }
 0x670   :  { %7558 = vmatprep.subr.bf16.mxu1 %v7557_v51 }
 0x673   :  { %7560 = vmatpush1.bf16.msra.mxu1 %v7559_v0 }
 0x674   :  { %7562 = vmatprep.subr.bf16.mxu1 %v7561_v63 }
 0x677   :  { %7564 = vmatpush1.bf16.msra.mxu1 %v7563_v5 }
 0x678   :  { %7566 = vmatprep.subr.bf16.mxu1 %v7565_v6 }
 0x67b   :  { %7568 = vmatpush1.bf16.msra.mxu1 %v7567_v7 }
 0x67c   :  { %7570 = vmatprep.subr.bf16.mxu1 %v7569_v23 }
 0x67f   :  { %7572 = vmatpush1.bf16.msra.mxu1 %v7571_v10 }
 0x680   :  { %7574 = vmatprep.subr.bf16.mxu1 %v7573_v19 }
 0x683   :  { %7576 = vmatpush1.bf16.msra.mxu1 %v7575_v15 }
 0x684   :  { %7578 = vmatprep.subr.bf16.mxu1 %v7577_v21 }
 0x687   :  { %7580 = vmatpush1.bf16.msra.mxu1 %v7579_v26 }
 0x688   :  { %7582 = vmatprep.subr.bf16.mxu1 %v7581_v27 }
 0x68a   :  { %5031 = vmatmul.mubr.f32.vlgmr.msra.gmra.mrb[20].mxu1 %v8843_v47 }
 0x68b   :  { %7584 = vmatpush1.bf16.msra.mxu1 %v7583_v29  ;;  %5101 = vmatprep.mubr.f32.mxu1 %v7960_v4 }
 0x692   :  { %5463 = vmatmul.mubr.msk.f32.vlgmr.msra.gmra.mrb[20].mxu1 %vm2387_vm5, %v8852_v9 }
 0x69d   :  { %v4535_v37 = vpop.f32.mrb[18].mxu1  ;;  %v4819_v40 = vpop.f32.mrb[20].mxu0 }
 0x69e   :  { %v7698_v41 = vadd.f32 %v4535_v37, %v4221_v31  ;;  %v7700_v42 = vadd.f32 %v4819_v40, %v4229_v32  ;;  %v4537_v47 = vpop.f32.mrb[19].mxu1  ;;  %v4821_v43 = vpop.f32.mrb[21].mxu0 }
 0x69f   :  { %v7699_v44 = vadd.f32 %v4537_v47, %v4225_v50  ;;  %v7701_v4 = vadd.f32 %v4821_v43, %v4233_v35 }
 0x6a1   :  { %v5395_v45 = vcombine.low %v7698_v41, %v7699_v44  ;;  %v5396_v49 = vcombine.low %v7700_v42, %v7701_v4 }
 0x6a3   :  { %v5403_v9 = vrot.slane %v5395_v45, %v8280_v13  ;;  %v5410_v52 = vrot.slane %v5396_v49, %v8280_v13 }
 0x6a5   :  { %v5411_v51 = vcombine.low %v5403_v9, %v5410_v52 }
 0x6a7   :  { %5430 = vst [vmem:[%s8906_s11] sm:$0xff] %v5411_v51 }
 0x6bd   :  { %v5763_v54 = vpop.f32.mrb[22].mxu0 }
 0x6be   :  { %v5764_v20 = vpop.f32.mrb[23].mxu0 }
 0x6bf   :  { %v5765_v39 = vadd.f32 %v5764_v20, %v5763_v54 }
 0x6c1   :  { %v5175_v34 = vadd.f32 %v5765_v39, %v4245_v53 }
 0x6dd   :  { %v5798_v55 = vpop.f32.mrb[24].mxu0 }
 0x6de   :  { %v5799_v57 = vpop.f32.mrb[25].mxu0 }
 0x6df   :  { %v5800_v0 = vadd.f32 %v5799_v57, %v5798_v55 }
 0x6e1   :  { %v5245_v63 = vadd.f32 %v5800_v0, %v5175_v34 }
 0x6fe   :  { %v5833_v2 = vpop.f32.mrb[26].mxu0 }
 0x6ff   :  { %v5834_v1 = vpop.f32.mrb[27].mxu0 }
 0x700   :  { %v5835_v3 = vadd.f32 %v5834_v1, %v5833_v2 }
 0x702   :  { %v5315_v30 = vadd.f32 %v5835_v3, %v5245_v63  ;;  %v5384_v5 = vpop.f32.mrb[28].mxu0 }
 0x703   :  { %v5890_v6 = vpop.f32.mrb[29].mxu0 }
 0x704   :  { %v5385_v59 = vadd.f32 %v5384_v5, %v5315_v30 }
 0x706   :  { %v5426_v62 = vrot.slane %v5385_v59, %v8280_v13 }
 0x765   :  { %v5103_v8 = vpop.f32.mrb[20].mxu1 }
 0x766   :  { %v7702_v7 = vadd.f32 %v5103_v8, %v4237_v11  ;;  %v5105_v23 = vpop.f32.mrb[21].mxu1 }
 0x767   :  { %v7703_v33 = vadd.f32 %v5105_v23, %v4241_v14 }
 0x769   :  { %v5412_v16 = vcombine.low %v7702_v7, %v7703_v33 }
 0x76b   :  { %v5419_v18 = vrot.slane %v5412_v16, %v8280_v13 }
 0x76d   :  { %v5427_v12 = vcombine.low %v5419_v18, %v5426_v62 }
 0x76f   :  { %5436 = vst.msk [vmem:[%s8906_s11 + $0x8] sm:$0x3f] %vm5435_vm10, %v5427_v12 }
 0x770   :  { %5441 = vsyncpa [#allocation3], 1 }
 0x771   :  { %5442 = vsyncpa [#allocation5], 1 }
 0x772   :  { %5443 = vsyncpa [#allocation8], 1 }
 0x773   :  { %5444 = vsyncpa [#allocation11], 1 }
 0x774   :  { %5445 = vsyncpa [#allocation14], 1 }

</bundles_post_ra>
